<compile_context>
chip_gen: v7x
topology: tpu7x:2x2x1
jax: 0.10.0
libtpu: 0.0.40
codegen_flags: <defaults>
</compile_context>

<pallas_src>
import functools

import jax
import jax.numpy as jnp
import numpy as np
from jax.experimental import pallas as pl
from jax.experimental.pallas import tpu as pltpu

BN_EPS = 1e-5
LANE = 128


def _round_up(x, m):
    return (x + m - 1) // m * m


def _pad_cout(c):
    # Fill the 256-wide MXU (v6e/v7x) when the layer is wide enough.
    return 128 if c <= 128 else _round_up(c, 256)


def _vmem_limit_bytes():
    """Generation-aware scoped-VMEM budget (headroom for compiler scratch)."""
    cap = 64 * 1024 * 1024
    try:
        cap = int(getattr(pltpu.get_tpu_info(), "vmem_capacity_bytes", cap))
    except Exception:
        pass
    return max(32 * 1024 * 1024, min(cap - 12 * 1024 * 1024, 112 * 1024 * 1024))


def _compiler_params():
    return pltpu.CompilerParams(
        dimension_semantics=("parallel", "parallel"),
        vmem_limit_bytes=_vmem_limit_bytes())


def _pick_row_tile(h, w):
    """Largest divisor of H keeping M = TH*W a healthy MXU size within VMEM."""
    cap = max(1, min(64, 16384 // max(w, 1)))
    th = 1
    for cand in range(1, min(h, cap) + 1):
        if h % cand == 0:
            th = cand
    return th


# ---------------------------------------------------------------------------
# Kernel helpers
# ---------------------------------------------------------------------------
def _fill_pad(pad_ref, center, top_row, bot_row, r, ht, th, wd):
    """Fill the (TH+2, W+2, Cp) padded scratch: halo ring + interior only."""
    cp = pad_ref.shape[-1]
    dt = pad_ref.dtype
    zcol = jnp.zeros((th + 2, 1, cp), dt)
    pad_ref[:, 0:1, :] = zcol                       # left border column
    pad_ref[:, wd + 1:wd + 2, :] = zcol             # right border column
    pad_ref[1:th + 1, 1:wd + 1, :] = center         # interior rows

    zrow = jnp.zeros((1, wd, cp), dt)

    @pl.when(r == 0)
    def _():
        pad_ref[0:1, 1:wd + 1, :] = zrow            # image top -> zero pad

    @pl.when(r > 0)
    def _():
        pad_ref[0:1, 1:wd + 1, :] = top_row         # previous tile's last row

    @pl.when(r == ht - 1)
    def _():
        pad_ref[th + 1:th + 2, 1:wd + 1, :] = zrow  # image bottom -> zero pad

    @pl.when(r < ht - 1)
    def _():
        pad_ref[th + 1:th + 2, 1:wd + 1, :] = bot_row


def _conv3x3_acc(pad_ref, w_ref, th, wd, cout_p):
    """3x3 conv as 9 per-tap MXU matmuls accumulated in f32 (no im2col buffer)."""
    cin_p = pad_ref.shape[-1]
    acc = jnp.zeros((th * wd, cout_p), jnp.float32)
    for ky in range(3):
        for kx in range(3):
            tap = pad_ref[ky:ky + th, kx:kx + wd, :].reshape(th * wd, cin_p)
            acc = acc + jnp.dot(tap, w_ref[ky * 3 + kx],
                                preferred_element_type=jnp.float32)
    return acc


def _store_conv_and_stats(acc, y_ref, st_ref, th, wd, cout_p):
    y_bf = acc.astype(y_ref.dtype)
    y_ref[0] = y_bf.reshape(th, wd, cout_p)
    # Stats from the same rounded values that will be normalized later.
    yf = y_bf.astype(jnp.float32)
    s = jnp.sum(yf, axis=0, keepdims=True)
    ss = jnp.sum(yf * yf, axis=0, keepdims=True)
    st_ref[0, 0] = jnp.concatenate([s, ss], axis=0)


# ---------------------------------------------------------------------------
# Kernel bodies
# ---------------------------------------------------------------------------
def _conv_stats_kernel(x_ref, xt_ref, xb_ref, w_ref, y_ref, st_ref, xpad_ref,
                       *, th, ht):
    """Conv3x3 (pad 1, no bias) + per-tile BN partial stats."""
    r = pl.program_id(1)
    wd = x_ref.shape[2]
    cout_p = y_ref.shape[3]
    _fill_pad(xpad_ref, x_ref[0], xt_ref[0], xb_ref[0], r, ht, th, wd)
    acc = _conv3x3_acc(xpad_ref, w_ref, th, wd, cout_p)
    _store_conv_and_stats(acc, y_ref, st_ref, th, wd, cout_p)


def _bn_relu_conv_stats_kernel(y1_ref, yt_ref, yb_ref, sc_ref, sh_ref, w_ref,
                               y2_ref, st_ref, apad_ref, *, th, ht):
    """BN1(scale/shift)+ReLU1 applied per tile, fused with conv2 + its stats."""
    r = pl.program_id(1)
    wd = y1_ref.shape[2]
    cout_p = y2_ref.shape[3]
    sc = sc_ref[...].reshape(1, 1, -1)
    sh = sh_ref[...].reshape(1, 1, -1)

    def bn_relu(v):
        return jnp.maximum(v.astype(jnp.float32) * sc + sh, 0.0).astype(apad_ref.dtype)

    _fill_pad(apad_ref, bn_relu(y1_ref[0]), bn_relu(yt_ref[0]), bn_relu(yb_ref[0]),
              r, ht, th, wd)
    acc = _conv3x3_acc(apad_ref, w_ref, th, wd, cout_p)
    _store_conv_and_stats(acc, y2_ref, st_ref, th, wd, cout_p)


def _bn_relu_kernel(y_ref, sc_ref, sh_ref, o_ref):
    """Final BN(scale/shift)+ReLU with the channel slice fused (no pad lanes out)."""
    c = o_ref.shape[-1]
    sc = sc_ref[...].reshape(1, 1, -1)
    sh = sh_ref[...].reshape(1, 1, -1)
    a = jnp.maximum(y_ref[0].astype(jnp.float32) * sc + sh, 0.0)
    o_ref[0] = a[:, :, :c]


# ---------------------------------------------------------------------------
# pallas_call wrappers
# ---------------------------------------------------------------------------
def _conv_stats(x, w, th):
    n, h, wd, cin_p = x.shape
    ht = h // th
    cout_p = w.shape[-1]
    grid_spec = pltpu.PrefetchScalarGridSpec(
        num_scalar_prefetch=0,
        grid=(n, ht),
        in_specs=[
            pl.BlockSpec((1, th, wd, cin_p), lambda i, r: (i, r, 0, 0)),
            # 1-row top/bottom halo blocks of the same array (clamped at edges).
            pl.BlockSpec((1, 1, wd, cin_p),
                         lambda i, r: (i, jnp.maximum(r * th - 1, 0), 0, 0)),
            pl.BlockSpec((1, 1, wd, cin_p),
                         lambda i, r: (i, jnp.minimum((r + 1) * th, h - 1), 0, 0)),
            pl.BlockSpec((9, cin_p, cout_p), lambda i, r: (0, 0, 0)),
        ],
        out_specs=(
            pl.BlockSpec((1, th, wd, cout_p), lambda i, r: (i, r, 0, 0)),
            pl.BlockSpec((1, 1, 2, cout_p), lambda i, r: (i, r, 0, 0)),
        ),
        scratch_shapes=[pltpu.VMEM((th + 2, wd + 2, cin_p), jnp.bfloat16)],
    )
    return pl.pallas_call(
        functools.partial(_conv_stats_kernel, th=th, ht=ht),
        out_shape=(
            jax.ShapeDtypeStruct((n, h, wd, cout_p), jnp.bfloat16),
            jax.ShapeDtypeStruct((n, ht, 2, cout_p), jnp.float32),
        ),
        grid_spec=grid_spec,
        compiler_params=_compiler_params(),
    )(x, x, x, w)


def _bn_relu_conv_stats(y1, scale, shift, w, th):
    n, h, wd, cp = y1.shape
    ht = h // th
    cout_p = w.shape[-1]
    grid_spec = pltpu.PrefetchScalarGridSpec(
        num_scalar_prefetch=0,
        grid=(n, ht),
        in_specs=[
            pl.BlockSpec((1, th, wd, cp), lambda i, r: (i, r, 0, 0)),
            pl.BlockSpec((1, 1, wd, cp),
                         lambda i, r: (i, jnp.maximum(r * th - 1, 0), 0, 0)),
            pl.BlockSpec((1, 1, wd, cp),
                         lambda i, r: (i, jnp.minimum((r + 1) * th, h - 1), 0, 0)),
            pl.BlockSpec((1, cp), lambda i, r: (0, 0)),
            pl.BlockSpec((1, cp), lambda i, r: (0, 0)),
            pl.BlockSpec((9, cp, cout_p), lambda i, r: (0, 0, 0)),
        ],
        out_specs=(
            pl.BlockSpec((1, th, wd, cout_p), lambda i, r: (i, r, 0, 0)),
            pl.BlockSpec((1, 1, 2, cout_p), lambda i, r: (i, r, 0, 0)),
        ),
        scratch_shapes=[pltpu.VMEM((th + 2, wd + 2, cp), jnp.bfloat16)],
    )
    return pl.pallas_call(
        functools.partial(_bn_relu_conv_stats_kernel, th=th, ht=ht),
        out_shape=(
            jax.ShapeDtypeStruct((n, h, wd, cout_p), jnp.bfloat16),
            jax.ShapeDtypeStruct((n, ht, 2, cout_p), jnp.float32),
        ),
        grid_spec=grid_spec,
        compiler_params=_compiler_params(),
    )(y1, y1, y1, scale, shift, w)


def _bn_relu(y, scale, shift, c_out, th):
    n, h, wd, cp = y.shape
    ht = h // th
    grid_spec = pltpu.PrefetchScalarGridSpec(
        num_scalar_prefetch=0,
        grid=(n, ht),
        in_specs=[
            pl.BlockSpec((1, th, wd, cp), lambda i, r: (i, r, 0, 0)),
            pl.BlockSpec((1, cp), lambda i, r: (0, 0)),
            pl.BlockSpec((1, cp), lambda i, r: (0, 0)),
        ],
        out_specs=pl.BlockSpec((1, th, wd, c_out), lambda i, r: (i, r, 0, 0)),
    )
    return pl.pallas_call(
        _bn_relu_kernel,
        out_shape=jax.ShapeDtypeStruct((n, h, wd, c_out), jnp.float32),
        grid_spec=grid_spec,
        compiler_params=_compiler_params(),
    )(y, scale, shift)


def _bn_scale_shift(stats, gamma_p, beta_p, count):
    """Fold per-tile [sum, sum_sq] partials into per-channel scale/shift.

    Tiny (N, HT, 2, Cp) reduction -> plain-JAX glue; the per-element normalize
    runs inside the Pallas kernels as one fused multiply-add + ReLU.
    Note: E[x^2]-E[x]^2 in f32 (single pass); fine at the test tolerance.
    """
    s = jnp.sum(stats[:, :, 0, :], axis=(0, 1))
    ss = jnp.sum(stats[:, :, 1, :], axis=(0, 1))
    mean = s / count
    var = jnp.maximum(ss / count - mean * mean, 0.0)   # biased (training) var
    scale = gamma_p * jax.lax.rsqrt(var + BN_EPS)
    shift = beta_p - mean * scale
    return (scale.reshape(1, -1).astype(jnp.float32),
            shift.reshape(1, -1).astype(jnp.float32))


@functools.partial(jax.jit, static_argnames=("out_channels", "row_tile"))
def double_conv(x_nchw, w1, g1, b1, w2, g2, b2, *, out_channels, row_tile=None):
    """DoubleConv forward. x_nchw: (N, Cin, H, W) f32; params pre-packed."""
    n, cin, h, w = x_nchw.shape
    cin_p, cout_p = w1.shape[1], w1.shape[2]
    th = row_tile if row_tile is not None else _pick_row_tile(h, w)
    assert h % th == 0, "row_tile must divide H"
    count = n * h * w

    # NCHW -> NHWC, channel-pad to the lane width, bf16 (smallest tensor).
    x = jnp.transpose(x_nchw, (0, 2, 3, 1))
    x = jnp.pad(x, ((0, 0), (0, 0), (0, 0), (0, cin_p - cin))).astype(jnp.bfloat16)

    y1, st1 = _conv_stats(x, w1, th)                          # conv1 + stats
    s1, sh1 = _bn_scale_shift(st1, g1, b1, count)
    y2, st2 = _bn_relu_conv_stats(y1, s1, sh1, w2, th)        # bn1+relu1+conv2+stats
    s2, sh2 = _bn_scale_shift(st2, g2, b2, count)
    out = _bn_relu(y2, s2, sh2, out_channels, th)             # bn2+relu2 (+slice)

    return jnp.transpose(out, (0, 3, 1, 2))                   # NHWC -> NCHW


# ---------------------------------------------------------------------------
# Parameter construction / packing
# ---------------------------------------------------------------------------
def make_params(key, in_channels, out_channels):
    """PyTorch-layout parameters (conv weights random, BN gamma=1, beta=0)."""
    k1, k2 = jax.random.split(key)
    w1 = jax.random.normal(k1, (out_channels, in_channels, 3, 3), jnp.float32) * 0.1
    w2 = jax.random.normal(k2, (out_channels, out_channels, 3, 3), jnp.float32) * 0.1
    g = jnp.ones((out_channels,), jnp.float32)
    b = jnp.zeros((out_channels,), jnp.float32)
    return w1, g, b, w2, g, b


def _pack_conv_weight(w_pt, cin_p, cout_p):
    """(Cout, Cin, 3, 3) -> tap-major, channel-padded (9, Cin_p, Cout_p) bf16."""
    cout, cin = w_pt.shape[0], w_pt.shape[1]
    w = jnp.transpose(w_pt, (2, 3, 1, 0))                     # (3, 3, Cin, Cout)
    w = jnp.pad(w, ((0, 0), (0, 0), (0, cin_p - cin), (0, cout_p - cout)))
    return w.reshape(9, cin_p, cout_p).astype(jnp.bfloat16)


def pack_params(params):
    """Pad channels to lane/MXU-friendly widths and pre-pack the weights."""
    w1_pt, g1, b1, w2_pt, g2, b2 = params
    cout, cin = w1_pt.shape[0], w1_pt.shape[1]
    cin_p, cout_p = _round_up(cin, LANE), _pad_cout(cout)
    # Padded BN gamma/beta stay 0 so padded channels remain exactly zero.
    pad_c = lambda v: jnp.pad(v, (0, cout_p - cout))
    return (_pack_conv_weight(w1_pt, cin_p, cout_p), pad_c(g1), pad_c(b1),
            _pack_conv_weight(w2_pt, cout_p, cout_p), pad_c(g2), pad_c(b2))


# ---------------------------------------------------------------------------
# Pure-JAX reference (f32) for correctness checking
# ---------------------------------------------------------------------------
def _ref_block(x_nhwc, w_pt, gamma, beta):
    w_hwio = jnp.transpose(w_pt, (2, 3, 1, 0))
    y = jax.lax.conv_general_dilated(
        x_nhwc, w_hwio, window_strides=(1, 1), padding="SAME",
        dimension_numbers=("NHWC", "HWIO", "NHWC"))
    mean = jnp.mean(y, axis=(0, 1, 2), keepdims=True)
    var = jnp.mean(jnp.square(y - mean), axis=(0, 1, 2), keepdims=True)
    y = (y - mean) * jax.lax.rsqrt(var + BN_EPS)
    y = y * gamma.reshape(1, 1, 1, -1) + beta.reshape(1, 1, 1, -1)
    return jnp.maximum(y, 0.0)


def _ref_double_conv(x_nchw, w1, g1, b1, w2, g2, b2):
    x = jnp.transpose(x_nchw, (0, 2, 3, 1))
    y = _ref_block(x, w1, g1, b1)
    y = _ref_block(y, w2, g2, b2)
    return jnp.transpose(y, (0, 3, 1, 2))


if __name__ == "__main__":
    N, Cin, H, W = 2, 4, 16, 16
    Cout = 8

    key = jax.random.PRNGKey(0)
    kx, kp = jax.random.split(key)
    x = jax.random.normal(kx, (N, Cin, H, W), jnp.float32)    # NCHW, like PyTorch

    raw_params = make_params(kp, Cin, Cout)
    packed = pack_params(raw_params)
    ref = _ref_double_conv(x, *raw_params)

    # Default (auto) row tiling.
    out = jax.block_until_ready(double_conv(x, *packed, out_channels=Cout))
    assert out.shape == (N, Cout, H, W), out.shape
    np.testing.assert_allclose(np.asarray(out), np.asarray(ref),
                               atol=5e-2, rtol=5e-2)

    # Force multiple row tiles to exercise the halo / grid-tiling path.
    out_t = jax.block_until_ready(
        double_conv(x, *packed, out_channels=Cout, row_tile=4))
    np.testing.assert_allclose(np.asarray(out_t), np.asarray(ref),
                               atol=5e-2, rtol=5e-2)

    print("KERNEL_OK")
</pallas_src>

<mosaic_0001>
module attributes {stable_mosaic.version = 11 : i64} {
  func.func @_conv_stats_kernel(%arg0: i32, %arg1: i32, %arg2: memref<1x16x16x128xbf16, #tpu.memory_space<vmem>>, %arg3: memref<1x1x16x128xbf16, #tpu.memory_space<vmem>>, %arg4: memref<1x1x16x128xbf16, #tpu.memory_space<vmem>>, %arg5: memref<9x128x128xbf16, #tpu.memory_space<vmem>>, %arg6: memref<1x16x16x128xbf16, #tpu.memory_space<vmem>>, %arg7: memref<1x1x2x128xf32, #tpu.memory_space<vmem>>, %arg8: memref<18x18x128xbf16, #tpu.memory_space<vmem>>) attributes {dimension_semantics = [#tpu.dimension_semantics<parallel>, #tpu.dimension_semantics<parallel>], iteration_bounds = array<i64: 2, 1>, scalar_prefetch = 0 : i64, scratch_operands = 1 : i64, tpu.core_type = #tpu.core_type<tc>, window_params = [{transform_indices = @transform_0, window_bounds = array<i64: 1, 16, 16, 128>}, {transform_indices = @transform_1, window_bounds = array<i64: 1, 1, 16, 128>}, {transform_indices = @transform_2, window_bounds = array<i64: 1, 1, 16, 128>}, {pipeline_mode = #tpu.pipeline_mode<synchronous>, transform_indices = @transform_3, window_bounds = array<i64: 9, 128, 128>}, {transform_indices = @transform_4, window_bounds = array<i64: 1, 16, 16, 128>}, {transform_indices = @transform_5, window_bounds = array<i64: 1, 1, 2, 128>}]} {
    %c0 = arith.constant 0 : index
    %c0_0 = arith.constant 0 : index
    %c0_1 = arith.constant 0 : index
    %c0_2 = arith.constant 0 : index
    %0 = vector.load %arg2[%c0, %c0_0, %c0_1, %c0_2] : memref<1x16x16x128xbf16, #tpu.memory_space<vmem>>, vector<1x16x16x128xbf16>
    %1 = vector.shape_cast %0 : vector<1x16x16x128xbf16> to vector<16x16x128xbf16>
    %c0_3 = arith.constant 0 : index
    %c0_4 = arith.constant 0 : index
    %c0_5 = arith.constant 0 : index
    %c0_6 = arith.constant 0 : index
    %2 = vector.load %arg3[%c0_3, %c0_4, %c0_5, %c0_6] : memref<1x1x16x128xbf16, #tpu.memory_space<vmem>>, vector<1x1x16x128xbf16>
    %3 = vector.shape_cast %2 : vector<1x1x16x128xbf16> to vector<1x16x128xbf16>
    %c0_7 = arith.constant 0 : index
    %c0_8 = arith.constant 0 : index
    %c0_9 = arith.constant 0 : index
    %c0_10 = arith.constant 0 : index
    %4 = vector.load %arg4[%c0_7, %c0_8, %c0_9, %c0_10] : memref<1x1x16x128xbf16, #tpu.memory_space<vmem>>, vector<1x1x16x128xbf16>
    %5 = vector.shape_cast %4 : vector<1x1x16x128xbf16> to vector<1x16x128xbf16>
    %cst = arith.constant 0.000000e+00 : bf16
    %6 = vector.broadcast %cst : bf16 to vector<18x1x128xbf16>
    %c0_11 = arith.constant 0 : index
    %c0_12 = arith.constant 0 : index
    %c0_13 = arith.constant 0 : index
    %7 = vector.load %arg8[%c0_11, %c0_12, %c0_13] : memref<18x18x128xbf16, #tpu.memory_space<vmem>>, vector<18x1x128xbf16>
    tpu.vector_store %arg8[%c0_11, %c0_12, %c0_13], %6 {strides = array<i32>} : memref<18x18x128xbf16, #tpu.memory_space<vmem>>, vector<18x1x128xbf16>,
    %c0_14 = arith.constant 0 : index
    %c17 = arith.constant 17 : index
    %c0_15 = arith.constant 0 : index
    %8 = vector.load %arg8[%c0_14, %c17, %c0_15] : memref<18x18x128xbf16, #tpu.memory_space<vmem>>, vector<18x1x128xbf16>
    tpu.vector_store %arg8[%c0_14, %c17, %c0_15], %6 {strides = array<i32>} : memref<18x18x128xbf16, #tpu.memory_space<vmem>>, vector<18x1x128xbf16>,
    %c1 = arith.constant 1 : index
    %c1_16 = arith.constant 1 : index
    %c0_17 = arith.constant 0 : index
    %9 = vector.load %arg8[%c1, %c1_16, %c0_17] : memref<18x18x128xbf16, #tpu.memory_space<vmem>>, vector<16x16x128xbf16>
    tpu.vector_store %arg8[%c1, %c1_16, %c0_17], %1 {strides = array<i32>} : memref<18x18x128xbf16, #tpu.memory_space<vmem>>, vector<16x16x128xbf16>,
    %cst_18 = arith.constant 0.000000e+00 : bf16
    %10 = vector.broadcast %cst_18 : bf16 to vector<1x16x128xbf16>
    %c0_i32 = arith.constant 0 : i32
    %11 = arith.cmpi eq, %arg1, %c0_i32 : i32
    %12 = arith.extui %11 : i1 to i32
    %c0_i32_19 = arith.constant 0 : i32
    %13 = arith.cmpi ne, %12, %c0_i32_19 : i32
    scf.if %13 {
      %c0_93 = arith.constant 0 : index
      %c1_94 = arith.constant 1 : index
      %c0_95 = arith.constant 0 : index
      %93 = vector.load %arg8[%c0_93, %c1_94, %c0_95] : memref<18x18x128xbf16, #tpu.memory_space<vmem>>, vector<1x16x128xbf16>
      tpu.vector_store %arg8[%c0_93, %c1_94, %c0_95], %10 {strides = array<i32>} : memref<18x18x128xbf16, #tpu.memory_space<vmem>>, vector<1x16x128xbf16>,
    } else {
    }
    %c0_i32_20 = arith.constant 0 : i32
    %14 = arith.cmpi sgt, %arg1, %c0_i32_20 : i32
    %15 = arith.extui %14 : i1 to i32
    %c0_i32_21 = arith.constant 0 : i32
    %16 = arith.cmpi ne, %15, %c0_i32_21 : i32
    scf.if %16 {
      %c0_93 = arith.constant 0 : index
      %c1_94 = arith.constant 1 : index
      %c0_95 = arith.constant 0 : index
      %93 = vector.load %arg8[%c0_93, %c1_94, %c0_95] : memref<18x18x128xbf16, #tpu.memory_space<vmem>>, vector<1x16x128xbf16>
      tpu.vector_store %arg8[%c0_93, %c1_94, %c0_95], %3 {strides = array<i32>} : memref<18x18x128xbf16, #tpu.memory_space<vmem>>, vector<1x16x128xbf16>,
    } else {
    }
    %c0_i32_22 = arith.constant 0 : i32
    %17 = arith.cmpi eq, %arg1, %c0_i32_22 : i32
    %18 = arith.extui %17 : i1 to i32
    %c0_i32_23 = arith.constant 0 : i32
    %19 = arith.cmpi ne, %18, %c0_i32_23 : i32
    scf.if %19 {
      %c17_93 = arith.constant 17 : index
      %c1_94 = arith.constant 1 : index
      %c0_95 = arith.constant 0 : index
      %93 = vector.load %arg8[%c17_93, %c1_94, %c0_95] : memref<18x18x128xbf16, #tpu.memory_space<vmem>>, vector<1x16x128xbf16>
      tpu.vector_store %arg8[%c17_93, %c1_94, %c0_95], %10 {strides = array<i32>} : memref<18x18x128xbf16, #tpu.memory_space<vmem>>, vector<1x16x128xbf16>,
    } else {
    }
    %c0_i32_24 = arith.constant 0 : i32
    %20 = arith.cmpi slt, %arg1, %c0_i32_24 : i32
    %21 = arith.extui %20 : i1 to i32
    %c0_i32_25 = arith.constant 0 : i32
    %22 = arith.cmpi ne, %21, %c0_i32_25 : i32
    scf.if %22 {
      %c17_93 = arith.constant 17 : index
      %c1_94 = arith.constant 1 : index
      %c0_95 = arith.constant 0 : index
      %93 = vector.load %arg8[%c17_93, %c1_94, %c0_95] : memref<18x18x128xbf16, #tpu.memory_space<vmem>>, vector<1x16x128xbf16>
      tpu.vector_store %arg8[%c17_93, %c1_94, %c0_95], %5 {strides = array<i32>} : memref<18x18x128xbf16, #tpu.memory_space<vmem>>, vector<1x16x128xbf16>,
    } else {
    }
    %cst_26 = arith.constant 0.000000e+00 : f32
    %23 = vector.broadcast %cst_26 : f32 to vector<256x128xf32>
    %c0_27 = arith.constant 0 : index
    %c0_28 = arith.constant 0 : index
    %c0_29 = arith.constant 0 : index
    %24 = vector.load %arg8[%c0_27, %c0_28, %c0_29] : memref<18x18x128xbf16, #tpu.memory_space<vmem>>, vector<16x16x128xbf16>
    %25 = vector.shape_cast %24 : vector<16x16x128xbf16> to vector<256x128xbf16>
    %c0_30 = arith.constant 0 : index
    %c0_31 = arith.constant 0 : index
    %c0_32 = arith.constant 0 : index
    %26 = vector.load %arg5[%c0_30, %c0_31, %c0_32] : memref<9x128x128xbf16, #tpu.memory_space<vmem>>, vector<1x128x128xbf16>
    %27 = vector.shape_cast %26 : vector<1x128x128xbf16> to vector<128x128xbf16>
    %cst_33 = arith.constant dense<0.000000e+00> : vector<256x128xf32>
    %28 = tpu.matmul %25, %27, %cst_33 {dimension_numbers = #tpu.dot_dimension_numbers<[1], [0], [0], [1], [0, 0, 1, 1], [], []>} : vector<256x128xbf16>, vector<128x128xbf16>, vector<256x128xf32> -> vector<256x128xf32>
    %29 = arith.addf %23, %28 : vector<256x128xf32>
    %c0_34 = arith.constant 0 : index
    %c1_35 = arith.constant 1 : index
    %c0_36 = arith.constant 0 : index
    %30 = vector.load %arg8[%c0_34, %c1_35, %c0_36] : memref<18x18x128xbf16, #tpu.memory_space<vmem>>, vector<16x16x128xbf16>
    %31 = vector.shape_cast %30 : vector<16x16x128xbf16> to vector<256x128xbf16>
    %c1_37 = arith.constant 1 : index
    %c0_38 = arith.constant 0 : index
    %c0_39 = arith.constant 0 : index
    %32 = vector.load %arg5[%c1_37, %c0_38, %c0_39] : memref<9x128x128xbf16, #tpu.memory_space<vmem>>, vector<1x128x128xbf16>
    %33 = vector.shape_cast %32 : vector<1x128x128xbf16> to vector<128x128xbf16>
    %cst_40 = arith.constant dense<0.000000e+00> : vector<256x128xf32>
    %34 = tpu.matmul %31, %33, %cst_40 {dimension_numbers = #tpu.dot_dimension_numbers<[1], [0], [0], [1], [0, 0, 1, 1], [], []>} : vector<256x128xbf16>, vector<128x128xbf16>, vector<256x128xf32> -> vector<256x128xf32>
    %35 = arith.addf %29, %34 : vector<256x128xf32>
    %c0_41 = arith.constant 0 : index
    %c2 = arith.constant 2 : index
    %c0_42 = arith.constant 0 : index
    %36 = vector.load %arg8[%c0_41, %c2, %c0_42] : memref<18x18x128xbf16, #tpu.memory_space<vmem>>, vector<16x16x128xbf16>
    %37 = vector.shape_cast %36 : vector<16x16x128xbf16> to vector<256x128xbf16>
    %c2_43 = arith.constant 2 : index
    %c0_44 = arith.constant 0 : index
    %c0_45 = arith.constant 0 : index
    %38 = vector.load %arg5[%c2_43, %c0_44, %c0_45] : memref<9x128x128xbf16, #tpu.memory_space<vmem>>, vector<1x128x128xbf16>
    %39 = vector.shape_cast %38 : vector<1x128x128xbf16> to vector<128x128xbf16>
    %cst_46 = arith.constant dense<0.000000e+00> : vector<256x128xf32>
    %40 = tpu.matmul %37, %39, %cst_46 {dimension_numbers = #tpu.dot_dimension_numbers<[1], [0], [0], [1], [0, 0, 1, 1], [], []>} : vector<256x128xbf16>, vector<128x128xbf16>, vector<256x128xf32> -> vector<256x128xf32>
    %41 = arith.addf %35, %40 : vector<256x128xf32>
    %c1_47 = arith.constant 1 : index
    %c0_48 = arith.constant 0 : index
    %c0_49 = arith.constant 0 : index
    %42 = vector.load %arg8[%c1_47, %c0_48, %c0_49] : memref<18x18x128xbf16, #tpu.memory_space<vmem>>, vector<16x16x128xbf16>
    %43 = vector.shape_cast %42 : vector<16x16x128xbf16> to vector<256x128xbf16>
    %c3 = arith.constant 3 : index
    %c0_50 = arith.constant 0 : index
    %c0_51 = arith.constant 0 : index
    %44 = vector.load %arg5[%c3, %c0_50, %c0_51] : memref<9x128x128xbf16, #tpu.memory_space<vmem>>, vector<1x128x128xbf16>
    %45 = vector.shape_cast %44 : vector<1x128x128xbf16> to vector<128x128xbf16>
    %cst_52 = arith.constant dense<0.000000e+00> : vector<256x128xf32>
    %46 = tpu.matmul %43, %45, %cst_52 {dimension_numbers = #tpu.dot_dimension_numbers<[1], [0], [0], [1], [0, 0, 1, 1], [], []>} : vector<256x128xbf16>, vector<128x128xbf16>, vector<256x128xf32> -> vector<256x128xf32>
    %47 = arith.addf %41, %46 : vector<256x128xf32>
    %c1_53 = arith.constant 1 : index
    %c1_54 = arith.constant 1 : index
    %c0_55 = arith.constant 0 : index
    %48 = vector.load %arg8[%c1_53, %c1_54, %c0_55] : memref<18x18x128xbf16, #tpu.memory_space<vmem>>, vector<16x16x128xbf16>
    %49 = vector.shape_cast %48 : vector<16x16x128xbf16> to vector<256x128xbf16>
    %c4 = arith.constant 4 : index
    %c0_56 = arith.constant 0 : index
    %c0_57 = arith.constant 0 : index
    %50 = vector.load %arg5[%c4, %c0_56, %c0_57] : memref<9x128x128xbf16, #tpu.memory_space<vmem>>, vector<1x128x128xbf16>
    %51 = vector.shape_cast %50 : vector<1x128x128xbf16> to vector<128x128xbf16>
    %cst_58 = arith.constant dense<0.000000e+00> : vector<256x128xf32>
    %52 = tpu.matmul %49, %51, %cst_58 {dimension_numbers = #tpu.dot_dimension_numbers<[1], [0], [0], [1], [0, 0, 1, 1], [], []>} : vector<256x128xbf16>, vector<128x128xbf16>, vector<256x128xf32> -> vector<256x128xf32>
    %53 = arith.addf %47, %52 : vector<256x128xf32>
    %c1_59 = arith.constant 1 : index
    %c2_60 = arith.constant 2 : index
    %c0_61 = arith.constant 0 : index
    %54 = vector.load %arg8[%c1_59, %c2_60, %c0_61] : memref<18x18x128xbf16, #tpu.memory_space<vmem>>, vector<16x16x128xbf16>
    %55 = vector.shape_cast %54 : vector<16x16x128xbf16> to vector<256x128xbf16>
    %c5 = arith.constant 5 : index
    %c0_62 = arith.constant 0 : index
    %c0_63 = arith.constant 0 : index
    %56 = vector.load %arg5[%c5, %c0_62, %c0_63] : memref<9x128x128xbf16, #tpu.memory_space<vmem>>, vector<1x128x128xbf16>
    %57 = vector.shape_cast %56 : vector<1x128x128xbf16> to vector<128x128xbf16>
    %cst_64 = arith.constant dense<0.000000e+00> : vector<256x128xf32>
    %58 = tpu.matmul %55, %57, %cst_64 {dimension_numbers = #tpu.dot_dimension_numbers<[1], [0], [0], [1], [0, 0, 1, 1], [], []>} : vector<256x128xbf16>, vector<128x128xbf16>, vector<256x128xf32> -> vector<256x128xf32>
    %59 = arith.addf %53, %58 : vector<256x128xf32>
    %c2_65 = arith.constant 2 : index
    %c0_66 = arith.constant 0 : index
    %c0_67 = arith.constant 0 : index
    %60 = vector.load %arg8[%c2_65, %c0_66, %c0_67] : memref<18x18x128xbf16, #tpu.memory_space<vmem>>, vector<16x16x128xbf16>
    %61 = vector.shape_cast %60 : vector<16x16x128xbf16> to vector<256x128xbf16>
    %c6 = arith.constant 6 : index
    %c0_68 = arith.constant 0 : index
    %c0_69 = arith.constant 0 : index
    %62 = vector.load %arg5[%c6, %c0_68, %c0_69] : memref<9x128x128xbf16, #tpu.memory_space<vmem>>, vector<1x128x128xbf16>
    %63 = vector.shape_cast %62 : vector<1x128x128xbf16> to vector<128x128xbf16>
    %cst_70 = arith.constant dense<0.000000e+00> : vector<256x128xf32>
    %64 = tpu.matmul %61, %63, %cst_70 {dimension_numbers = #tpu.dot_dimension_numbers<[1], [0], [0], [1], [0, 0, 1, 1], [], []>} : vector<256x128xbf16>, vector<128x128xbf16>, vector<256x128xf32> -> vector<256x128xf32>
    %65 = arith.addf %59, %64 : vector<256x128xf32>
    %c2_71 = arith.constant 2 : index
    %c1_72 = arith.constant 1 : index
    %c0_73 = arith.constant 0 : index
    %66 = vector.load %arg8[%c2_71, %c1_72, %c0_73] : memref<18x18x128xbf16, #tpu.memory_space<vmem>>, vector<16x16x128xbf16>
    %67 = vector.shape_cast %66 : vector<16x16x128xbf16> to vector<256x128xbf16>
    %c7 = arith.constant 7 : index
    %c0_74 = arith.constant 0 : index
    %c0_75 = arith.constant 0 : index
    %68 = vector.load %arg5[%c7, %c0_74, %c0_75] : memref<9x128x128xbf16, #tpu.memory_space<vmem>>, vector<1x128x128xbf16>
    %69 = vector.shape_cast %68 : vector<1x128x128xbf16> to vector<128x128xbf16>
    %cst_76 = arith.constant dense<0.000000e+00> : vector<256x128xf32>
    %70 = tpu.matmul %67, %69, %cst_76 {dimension_numbers = #tpu.dot_dimension_numbers<[1], [0], [0], [1], [0, 0, 1, 1], [], []>} : vector<256x128xbf16>, vector<128x128xbf16>, vector<256x128xf32> -> vector<256x128xf32>
    %71 = arith.addf %65, %70 : vector<256x128xf32>
    %c2_77 = arith.constant 2 : index
    %c2_78 = arith.constant 2 : index
    %c0_79 = arith.constant 0 : index
    %72 = vector.load %arg8[%c2_77, %c2_78, %c0_79] : memref<18x18x128xbf16, #tpu.memory_space<vmem>>, vector<16x16x128xbf16>
    %73 = vector.shape_cast %72 : vector<16x16x128xbf16> to vector<256x128xbf16>
    %c8 = arith.constant 8 : index
    %c0_80 = arith.constant 0 : index
    %c0_81 = arith.constant 0 : index
    %74 = vector.load %arg5[%c8, %c0_80, %c0_81] : memref<9x128x128xbf16, #tpu.memory_space<vmem>>, vector<1x128x128xbf16>
    %75 = vector.shape_cast %74 : vector<1x128x128xbf16> to vector<128x128xbf16>
    %cst_82 = arith.constant dense<0.000000e+00> : vector<256x128xf32>
    %76 = tpu.matmul %73, %75, %cst_82 {dimension_numbers = #tpu.dot_dimension_numbers<[1], [0], [0], [1], [0, 0, 1, 1], [], []>} : vector<256x128xbf16>, vector<128x128xbf16>, vector<256x128xf32> -> vector<256x128xf32>
    %77 = arith.addf %71, %76 : vector<256x128xf32>
    %78 = arith.truncf %77 : vector<256x128xf32> to vector<256x128xbf16>
    %79 = vector.shape_cast %78 : vector<256x128xbf16> to vector<16x16x128xbf16>
    %c0_83 = arith.constant 0 : index
    %c0_84 = arith.constant 0 : index
    %c0_85 = arith.constant 0 : index
    %c0_86 = arith.constant 0 : index
    %80 = vector.load %arg6[%c0_83, %c0_84, %c0_85, %c0_86] : memref<1x16x16x128xbf16, #tpu.memory_space<vmem>>, vector<1x16x16x128xbf16>
    %81 = vector.shape_cast %80 : vector<1x16x16x128xbf16> to vector<16x16x128xbf16>
    %82 = vector.shape_cast %79 : vector<16x16x128xbf16> to vector<1x16x16x128xbf16>
    tpu.vector_store %arg6[%c0_83, %c0_84, %c0_85, %c0_86], %82 {strides = array<i32>} : memref<1x16x16x128xbf16, #tpu.memory_space<vmem>>, vector<1x16x16x128xbf16>,
    %83 = arith.extf %78 : vector<256x128xbf16> to vector<256x128xf32>
    %cst_87 = arith.constant dense<0.000000e+00> : vector<128xf32>
    %84 = vector.multi_reduction <add>, %83, %cst_87 [0] : vector<256x128xf32> to vector<128xf32>
    %85 = vector.shape_cast %84 : vector<128xf32> to vector<1x128xf32>
    %86 = arith.mulf %83, %83 : vector<256x128xf32>
    %cst_88 = arith.constant dense<0.000000e+00> : vector<128xf32>
    %87 = vector.multi_reduction <add>, %86, %cst_88 [0] : vector<256x128xf32> to vector<128xf32>
    %88 = vector.shape_cast %87 : vector<128xf32> to vector<1x128xf32>
    %89 = tpu.concatenate %85, %88 in 0 : vector<1x128xf32>, vector<1x128xf32> -> vector<2x128xf32>
    %c0_89 = arith.constant 0 : index
    %c0_90 = arith.constant 0 : index
    %c0_91 = arith.constant 0 : index
    %c0_92 = arith.constant 0 : index
    %90 = vector.load %arg7[%c0_89, %c0_90, %c0_91, %c0_92] : memref<1x1x2x128xf32, #tpu.memory_space<vmem>>, vector<1x1x2x128xf32>
    %91 = vector.shape_cast %90 : vector<1x1x2x128xf32> to vector<2x128xf32>
    %92 = vector.shape_cast %89 : vector<2x128xf32> to vector<1x1x2x128xf32>
    tpu.vector_store %arg7[%c0_89, %c0_90, %c0_91, %c0_92], %92 {strides = array<i32>} : memref<1x1x2x128xf32, #tpu.memory_space<vmem>>, vector<1x1x2x128xf32>,
    return
  }
  func.func @transform_0(%arg0: i32, %arg1: i32) -> (i32, i32, i32, i32) {
    %c0_i32 = arith.constant 0 : i32
    %c0_i32_0 = arith.constant 0 : i32
    %c0_i32_1 = arith.constant 0 : i32
    return %arg0, %arg1, %c0_i32, %c0_i32_0 : i32, i32, i32, i32
  }
  func.func @transform_1(%arg0: i32, %arg1: i32) -> (i32, i32, i32, i32) {
    %c16_i32 = arith.constant 16 : i32
    %0 = arith.muli %arg1, %c16_i32 : i32
    %c1_i32 = arith.constant 1 : i32
    %1 = arith.subi %0, %c1_i32 : i32
    %c0_i32 = arith.constant 0 : i32
    %2 = arith.maxsi %1, %c0_i32 : i32
    %c0_i32_0 = arith.constant 0 : i32
    %c0_i32_1 = arith.constant 0 : i32
    %c0_i32_2 = arith.constant 0 : i32
    return %arg0, %2, %c0_i32_0, %c0_i32_1 : i32, i32, i32, i32
  }
  func.func @transform_2(%arg0: i32, %arg1: i32) -> (i32, i32, i32, i32) {
    %c1_i32 = arith.constant 1 : i32
    %0 = arith.addi %arg1, %c1_i32 : i32
    %c16_i32 = arith.constant 16 : i32
    %1 = arith.muli %0, %c16_i32 : i32
    %c15_i32 = arith.constant 15 : i32
    %2 = arith.minsi %1, %c15_i32 : i32
    %c0_i32 = arith.constant 0 : i32
    %c0_i32_0 = arith.constant 0 : i32
    %c0_i32_1 = arith.constant 0 : i32
    return %arg0, %2, %c0_i32, %c0_i32_0 : i32, i32, i32, i32
  }
  func.func @transform_3(%arg0: i32, %arg1: i32) -> (i32, i32, i32) {
    %c0_i32 = arith.constant 0 : i32
    %c0_i32_0 = arith.constant 0 : i32
    %c0_i32_1 = arith.constant 0 : i32
    %c0_i32_2 = arith.constant 0 : i32
    return %c0_i32, %c0_i32_0, %c0_i32_1 : i32, i32, i32
  }
  func.func @transform_4(%arg0: i32, %arg1: i32) -> (i32, i32, i32, i32) {
    %c0_i32 = arith.constant 0 : i32
    %c0_i32_0 = arith.constant 0 : i32
    %c0_i32_1 = arith.constant 0 : i32
    return %arg0, %arg1, %c0_i32, %c0_i32_0 : i32, i32, i32, i32
  }
  func.func @transform_5(%arg0: i32, %arg1: i32) -> (i32, i32, i32, i32) {
    %c0_i32 = arith.constant 0 : i32
    %c0_i32_0 = arith.constant 0 : i32
    %c0_i32_1 = arith.constant 0 : i32
    return %arg0, %arg1, %c0_i32, %c0_i32_0 : i32, i32, i32, i32
  }
}

module attributes {stable_mosaic.version = 11 : i64} {
  func.func @_bn_relu_kernel(%arg0: i32, %arg1: i32, %arg2: memref<1x16x16x128xbf16, #tpu.memory_space<vmem>>, %arg3: memref<1x128xf32, #tpu.memory_space<vmem>>, %arg4: memref<1x128xf32, #tpu.memory_space<vmem>>, %arg5: memref<1x16x16x8xf32, #tpu.memory_space<vmem>>) attributes {dimension_semantics = [#tpu.dimension_semantics<parallel>, #tpu.dimension_semantics<parallel>], iteration_bounds = array<i64: 2, 1>, scalar_prefetch = 0 : i64, scratch_operands = 0 : i64, tpu.core_type = #tpu.core_type<tc>, window_params = [{transform_indices = @transform_0, window_bounds = array<i64: 1, 16, 16, 128>}, {pipeline_mode = #tpu.pipeline_mode<synchronous>, transform_indices = @transform_1, window_bounds = array<i64: 1, 128>}, {pipeline_mode = #tpu.pipeline_mode<synchronous>, transform_indices = @transform_2, window_bounds = array<i64: 1, 128>}, {transform_indices = @transform_3, window_bounds = array<i64: 1, 16, 16, 8>}]} {
    %c0 = arith.constant 0 : index
    %c0_0 = arith.constant 0 : index
    %0 = vector.load %arg3[%c0, %c0_0] : memref<1x128xf32, #tpu.memory_space<vmem>>, vector<1x128xf32>
    %1 = vector.shape_cast %0 : vector<1x128xf32> to vector<1x1x128xf32>
    %c0_1 = arith.constant 0 : index
    %c0_2 = arith.constant 0 : index
    %2 = vector.load %arg4[%c0_1, %c0_2] : memref<1x128xf32, #tpu.memory_space<vmem>>, vector<1x128xf32>
    %3 = vector.shape_cast %2 : vector<1x128xf32> to vector<1x1x128xf32>
    %c0_3 = arith.constant 0 : index
    %c0_4 = arith.constant 0 : index
    %c0_5 = arith.constant 0 : index
    %c0_6 = arith.constant 0 : index
    %4 = vector.load %arg2[%c0_3, %c0_4, %c0_5, %c0_6] : memref<1x16x16x128xbf16, #tpu.memory_space<vmem>>, vector<1x16x16x128xbf16>
    %5 = vector.shape_cast %4 : vector<1x16x16x128xbf16> to vector<16x16x128xbf16>
    %6 = arith.extf %5 : vector<16x16x128xbf16> to vector<16x16x128xf32>
    %7 = vector.broadcast %1 : vector<1x1x128xf32> to vector<16x16x128xf32>
    %8 = arith.mulf %6, %7 : vector<16x16x128xf32>
    %9 = vector.broadcast %3 : vector<1x1x128xf32> to vector<16x16x128xf32>
    %10 = arith.addf %8, %9 : vector<16x16x128xf32>
    %cst = arith.constant 0.000000e+00 : f32
    %11 = vector.broadcast %cst : f32 to vector<16x16x128xf32>
    %12 = arith.maximumf %10, %11 : vector<16x16x128xf32>
    %13 = vector.extract_strided_slice %12 {offsets = [0, 0, 0], sizes = [16, 16, 8], strides = [1, 1, 1]} : vector<16x16x128xf32> to vector<16x16x8xf32>
    %c0_7 = arith.constant 0 : index
    %c0_8 = arith.constant 0 : index
    %c0_9 = arith.constant 0 : index
    %c0_10 = arith.constant 0 : index
    %14 = vector.load %arg5[%c0_7, %c0_8, %c0_9, %c0_10] : memref<1x16x16x8xf32, #tpu.memory_space<vmem>>, vector<1x16x16x8xf32>
    %15 = vector.shape_cast %14 : vector<1x16x16x8xf32> to vector<16x16x8xf32>
    %16 = vector.shape_cast %13 : vector<16x16x8xf32> to vector<1x16x16x8xf32>
    tpu.vector_store %arg5[%c0_7, %c0_8, %c0_9, %c0_10], %16 {strides = array<i32>} : memref<1x16x16x8xf32, #tpu.memory_space<vmem>>, vector<1x16x16x8xf32>,
    return
  }
  func.func @transform_0(%arg0: i32, %arg1: i32) -> (i32, i32, i32, i32) {
    %c0_i32 = arith.constant 0 : i32
    %c0_i32_0 = arith.constant 0 : i32
    %c0_i32_1 = arith.constant 0 : i32
    return %arg0, %arg1, %c0_i32, %c0_i32_0 : i32, i32, i32, i32
  }
  func.func @transform_1(%arg0: i32, %arg1: i32) -> (i32, i32) {
    %c0_i32 = arith.constant 0 : i32
    %c0_i32_0 = arith.constant 0 : i32
    %c0_i32_1 = arith.constant 0 : i32
    return %c0_i32, %c0_i32_0 : i32, i32
  }
  func.func @transform_2(%arg0: i32, %arg1: i32) -> (i32, i32) {
    %c0_i32 = arith.constant 0 : i32
    %c0_i32_0 = arith.constant 0 : i32
    %c0_i32_1 = arith.constant 0 : i32
    return %c0_i32, %c0_i32_0 : i32, i32
  }
  func.func @transform_3(%arg0: i32, %arg1: i32) -> (i32, i32, i32, i32) {
    %c0_i32 = arith.constant 0 : i32
    %c0_i32_0 = arith.constant 0 : i32
    %c0_i32_1 = arith.constant 0 : i32
    return %arg0, %arg1, %c0_i32, %c0_i32_0 : i32, i32, i32, i32
  }
}

module attributes {stable_mosaic.version = 11 : i64} {
  func.func @_bn_relu_conv_stats_kernel(%arg0: i32, %arg1: i32, %arg2: memref<1x16x16x128xbf16, #tpu.memory_space<vmem>>, %arg3: memref<1x1x16x128xbf16, #tpu.memory_space<vmem>>, %arg4: memref<1x1x16x128xbf16, #tpu.memory_space<vmem>>, %arg5: memref<1x128xf32, #tpu.memory_space<vmem>>, %arg6: memref<1x128xf32, #tpu.memory_space<vmem>>, %arg7: memref<9x128x128xbf16, #tpu.memory_space<vmem>>, %arg8: memref<1x16x16x128xbf16, #tpu.memory_space<vmem>>, %arg9: memref<1x1x2x128xf32, #tpu.memory_space<vmem>>, %arg10: memref<18x18x128xbf16, #tpu.memory_space<vmem>>) attributes {dimension_semantics = [#tpu.dimension_semantics<parallel>, #tpu.dimension_semantics<parallel>], iteration_bounds = array<i64: 2, 1>, scalar_prefetch = 0 : i64, scratch_operands = 1 : i64, tpu.core_type = #tpu.core_type<tc>, window_params = [{transform_indices = @transform_0, window_bounds = array<i64: 1, 16, 16, 128>}, {transform_indices = @transform_1, window_bounds = array<i64: 1, 1, 16, 128>}, {transform_indices = @transform_2, window_bounds = array<i64: 1, 1, 16, 128>}, {pipeline_mode = #tpu.pipeline_mode<synchronous>, transform_indices = @transform_3, window_bounds = array<i64: 1, 128>}, {pipeline_mode = #tpu.pipeline_mode<synchronous>, transform_indices = @transform_4, window_bounds = array<i64: 1, 128>}, {pipeline_mode = #tpu.pipeline_mode<synchronous>, transform_indices = @transform_5, window_bounds = array<i64: 9, 128, 128>}, {transform_indices = @transform_6, window_bounds = array<i64: 1, 16, 16, 128>}, {transform_indices = @transform_7, window_bounds = array<i64: 1, 1, 2, 128>}]} {
    %c0 = arith.constant 0 : index
    %c0_0 = arith.constant 0 : index
    %0 = vector.load %arg5[%c0, %c0_0] : memref<1x128xf32, #tpu.memory_space<vmem>>, vector<1x128xf32>
    %1 = vector.shape_cast %0 : vector<1x128xf32> to vector<1x1x128xf32>
    %c0_1 = arith.constant 0 : index
    %c0_2 = arith.constant 0 : index
    %2 = vector.load %arg6[%c0_1, %c0_2] : memref<1x128xf32, #tpu.memory_space<vmem>>, vector<1x128xf32>
    %3 = vector.shape_cast %2 : vector<1x128xf32> to vector<1x1x128xf32>
    %c0_3 = arith.constant 0 : index
    %c0_4 = arith.constant 0 : index
    %c0_5 = arith.constant 0 : index
    %c0_6 = arith.constant 0 : index
    %4 = vector.load %arg2[%c0_3, %c0_4, %c0_5, %c0_6] : memref<1x16x16x128xbf16, #tpu.memory_space<vmem>>, vector<1x16x16x128xbf16>
    %5 = vector.shape_cast %4 : vector<1x16x16x128xbf16> to vector<16x16x128xbf16>
    %6 = arith.extf %5 : vector<16x16x128xbf16> to vector<16x16x128xf32>
    %7 = vector.broadcast %1 : vector<1x1x128xf32> to vector<16x16x128xf32>
    %8 = arith.mulf %6, %7 : vector<16x16x128xf32>
    %9 = vector.broadcast %3 : vector<1x1x128xf32> to vector<16x16x128xf32>
    %10 = arith.addf %8, %9 : vector<16x16x128xf32>
    %cst = arith.constant 0.000000e+00 : f32
    %11 = vector.broadcast %cst : f32 to vector<16x16x128xf32>
    %12 = arith.maximumf %10, %11 : vector<16x16x128xf32>
    %13 = arith.truncf %12 : vector<16x16x128xf32> to vector<16x16x128xbf16>
    %c0_7 = arith.constant 0 : index
    %c0_8 = arith.constant 0 : index
    %c0_9 = arith.constant 0 : index
    %c0_10 = arith.constant 0 : index
    %14 = vector.load %arg3[%c0_7, %c0_8, %c0_9, %c0_10] : memref<1x1x16x128xbf16, #tpu.memory_space<vmem>>, vector<1x1x16x128xbf16>
    %15 = vector.shape_cast %14 : vector<1x1x16x128xbf16> to vector<1x16x128xbf16>
    %16 = arith.extf %15 : vector<1x16x128xbf16> to vector<1x16x128xf32>
    %17 = vector.broadcast %1 : vector<1x1x128xf32> to vector<1x16x128xf32>
    %18 = arith.mulf %16, %17 : vector<1x16x128xf32>
    %19 = vector.broadcast %3 : vector<1x1x128xf32> to vector<1x16x128xf32>
    %20 = arith.addf %18, %19 : vector<1x16x128xf32>
    %cst_11 = arith.constant 0.000000e+00 : f32
    %21 = vector.broadcast %cst_11 : f32 to vector<1x16x128xf32>
    %22 = arith.maximumf %20, %21 : vector<1x16x128xf32>
    %23 = arith.truncf %22 : vector<1x16x128xf32> to vector<1x16x128xbf16>
    %c0_12 = arith.constant 0 : index
    %c0_13 = arith.constant 0 : index
    %c0_14 = arith.constant 0 : index
    %c0_15 = arith.constant 0 : index
    %24 = vector.load %arg4[%c0_12, %c0_13, %c0_14, %c0_15] : memref<1x1x16x128xbf16, #tpu.memory_space<vmem>>, vector<1x1x16x128xbf16>
    %25 = vector.shape_cast %24 : vector<1x1x16x128xbf16> to vector<1x16x128xbf16>
    %26 = arith.extf %25 : vector<1x16x128xbf16> to vector<1x16x128xf32>
    %27 = vector.broadcast %1 : vector<1x1x128xf32> to vector<1x16x128xf32>
    %28 = arith.mulf %26, %27 : vector<1x16x128xf32>
    %29 = vector.broadcast %3 : vector<1x1x128xf32> to vector<1x16x128xf32>
    %30 = arith.addf %28, %29 : vector<1x16x128xf32>
    %cst_16 = arith.constant 0.000000e+00 : f32
    %31 = vector.broadcast %cst_16 : f32 to vector<1x16x128xf32>
    %32 = arith.maximumf %30, %31 : vector<1x16x128xf32>
    %33 = arith.truncf %32 : vector<1x16x128xf32> to vector<1x16x128xbf16>
    %cst_17 = arith.constant 0.000000e+00 : bf16
    %34 = vector.broadcast %cst_17 : bf16 to vector<18x1x128xbf16>
    %c0_18 = arith.constant 0 : index
    %c0_19 = arith.constant 0 : index
    %c0_20 = arith.constant 0 : index
    %35 = vector.load %arg10[%c0_18, %c0_19, %c0_20] : memref<18x18x128xbf16, #tpu.memory_space<vmem>>, vector<18x1x128xbf16>
    tpu.vector_store %arg10[%c0_18, %c0_19, %c0_20], %34 {strides = array<i32>} : memref<18x18x128xbf16, #tpu.memory_space<vmem>>, vector<18x1x128xbf16>,
    %c0_21 = arith.constant 0 : index
    %c17 = arith.constant 17 : index
    %c0_22 = arith.constant 0 : index
    %36 = vector.load %arg10[%c0_21, %c17, %c0_22] : memref<18x18x128xbf16, #tpu.memory_space<vmem>>, vector<18x1x128xbf16>
    tpu.vector_store %arg10[%c0_21, %c17, %c0_22], %34 {strides = array<i32>} : memref<18x18x128xbf16, #tpu.memory_space<vmem>>, vector<18x1x128xbf16>,
    %c1 = arith.constant 1 : index
    %c1_23 = arith.constant 1 : index
    %c0_24 = arith.constant 0 : index
    %37 = vector.load %arg10[%c1, %c1_23, %c0_24] : memref<18x18x128xbf16, #tpu.memory_space<vmem>>, vector<16x16x128xbf16>
    tpu.vector_store %arg10[%c1, %c1_23, %c0_24], %13 {strides = array<i32>} : memref<18x18x128xbf16, #tpu.memory_space<vmem>>, vector<16x16x128xbf16>,
    %cst_25 = arith.constant 0.000000e+00 : bf16
    %38 = vector.broadcast %cst_25 : bf16 to vector<1x16x128xbf16>
    %c0_i32 = arith.constant 0 : i32
    %39 = arith.cmpi eq, %arg1, %c0_i32 : i32
    %40 = arith.extui %39 : i1 to i32
    %c0_i32_26 = arith.constant 0 : i32
    %41 = arith.cmpi ne, %40, %c0_i32_26 : i32
    scf.if %41 {
      %c0_100 = arith.constant 0 : index
      %c1_101 = arith.constant 1 : index
      %c0_102 = arith.constant 0 : index
      %121 = vector.load %arg10[%c0_100, %c1_101, %c0_102] : memref<18x18x128xbf16, #tpu.memory_space<vmem>>, vector<1x16x128xbf16>
      tpu.vector_store %arg10[%c0_100, %c1_101, %c0_102], %38 {strides = array<i32>} : memref<18x18x128xbf16, #tpu.memory_space<vmem>>, vector<1x16x128xbf16>,
    } else {
    }
    %c0_i32_27 = arith.constant 0 : i32
    %42 = arith.cmpi sgt, %arg1, %c0_i32_27 : i32
    %43 = arith.extui %42 : i1 to i32
    %c0_i32_28 = arith.constant 0 : i32
    %44 = arith.cmpi ne, %43, %c0_i32_28 : i32
    scf.if %44 {
      %c0_100 = arith.constant 0 : index
      %c1_101 = arith.constant 1 : index
      %c0_102 = arith.constant 0 : index
      %121 = vector.load %arg10[%c0_100, %c1_101, %c0_102] : memref<18x18x128xbf16, #tpu.memory_space<vmem>>, vector<1x16x128xbf16>
      tpu.vector_store %arg10[%c0_100, %c1_101, %c0_102], %23 {strides = array<i32>} : memref<18x18x128xbf16, #tpu.memory_space<vmem>>, vector<1x16x128xbf16>,
    } else {
    }
    %c0_i32_29 = arith.constant 0 : i32
    %45 = arith.cmpi eq, %arg1, %c0_i32_29 : i32
    %46 = arith.extui %45 : i1 to i32
    %c0_i32_30 = arith.constant 0 : i32
    %47 = arith.cmpi ne, %46, %c0_i32_30 : i32
    scf.if %47 {
      %c17_100 = arith.constant 17 : index
      %c1_101 = arith.constant 1 : index
      %c0_102 = arith.constant 0 : index
      %121 = vector.load %arg10[%c17_100, %c1_101, %c0_102] : memref<18x18x128xbf16, #tpu.memory_space<vmem>>, vector<1x16x128xbf16>
      tpu.vector_store %arg10[%c17_100, %c1_101, %c0_102], %38 {strides = array<i32>} : memref<18x18x128xbf16, #tpu.memory_space<vmem>>, vector<1x16x128xbf16>,
    } else {
    }
    %c0_i32_31 = arith.constant 0 : i32
    %48 = arith.cmpi slt, %arg1, %c0_i32_31 : i32
    %49 = arith.extui %48 : i1 to i32
    %c0_i32_32 = arith.constant 0 : i32
    %50 = arith.cmpi ne, %49, %c0_i32_32 : i32
    scf.if %50 {
      %c17_100 = arith.constant 17 : index
      %c1_101 = arith.constant 1 : index
      %c0_102 = arith.constant 0 : index
      %121 = vector.load %arg10[%c17_100, %c1_101, %c0_102] : memref<18x18x128xbf16, #tpu.memory_space<vmem>>, vector<1x16x128xbf16>
      tpu.vector_store %arg10[%c17_100, %c1_101, %c0_102], %33 {strides = array<i32>} : memref<18x18x128xbf16, #tpu.memory_space<vmem>>, vector<1x16x128xbf16>,
    } else {
    }
    %cst_33 = arith.constant 0.000000e+00 : f32
    %51 = vector.broadcast %cst_33 : f32 to vector<256x128xf32>
    %c0_34 = arith.constant 0 : index
    %c0_35 = arith.constant 0 : index
    %c0_36 = arith.constant 0 : index
    %52 = vector.load %arg10[%c0_34, %c0_35, %c0_36] : memref<18x18x128xbf16, #tpu.memory_space<vmem>>, vector<16x16x128xbf16>
    %53 = vector.shape_cast %52 : vector<16x16x128xbf16> to vector<256x128xbf16>
    %c0_37 = arith.constant 0 : index
    %c0_38 = arith.constant 0 : index
    %c0_39 = arith.constant 0 : index
    %54 = vector.load %arg7[%c0_37, %c0_38, %c0_39] : memref<9x128x128xbf16, #tpu.memory_space<vmem>>, vector<1x128x128xbf16>
    %55 = vector.shape_cast %54 : vector<1x128x128xbf16> to vector<128x128xbf16>
    %cst_40 = arith.constant dense<0.000000e+00> : vector<256x128xf32>
    %56 = tpu.matmul %53, %55, %cst_40 {dimension_numbers = #tpu.dot_dimension_numbers<[1], [0], [0], [1], [0, 0, 1, 1], [], []>} : vector<256x128xbf16>, vector<128x128xbf16>, vector<256x128xf32> -> vector<256x128xf32>
    %57 = arith.addf %51, %56 : vector<256x128xf32>
    %c0_41 = arith.constant 0 : index
    %c1_42 = arith.constant 1 : index
    %c0_43 = arith.constant 0 : index
    %58 = vector.load %arg10[%c0_41, %c1_42, %c0_43] : memref<18x18x128xbf16, #tpu.memory_space<vmem>>, vector<16x16x128xbf16>
    %59 = vector.shape_cast %58 : vector<16x16x128xbf16> to vector<256x128xbf16>
    %c1_44 = arith.constant 1 : index
    %c0_45 = arith.constant 0 : index
    %c0_46 = arith.constant 0 : index
    %60 = vector.load %arg7[%c1_44, %c0_45, %c0_46] : memref<9x128x128xbf16, #tpu.memory_space<vmem>>, vector<1x128x128xbf16>
    %61 = vector.shape_cast %60 : vector<1x128x128xbf16> to vector<128x128xbf16>
    %cst_47 = arith.constant dense<0.000000e+00> : vector<256x128xf32>
    %62 = tpu.matmul %59, %61, %cst_47 {dimension_numbers = #tpu.dot_dimension_numbers<[1], [0], [0], [1], [0, 0, 1, 1], [], []>} : vector<256x128xbf16>, vector<128x128xbf16>, vector<256x128xf32> -> vector<256x128xf32>
    %63 = arith.addf %57, %62 : vector<256x128xf32>
    %c0_48 = arith.constant 0 : index
    %c2 = arith.constant 2 : index
    %c0_49 = arith.constant 0 : index
    %64 = vector.load %arg10[%c0_48, %c2, %c0_49] : memref<18x18x128xbf16, #tpu.memory_space<vmem>>, vector<16x16x128xbf16>
    %65 = vector.shape_cast %64 : vector<16x16x128xbf16> to vector<256x128xbf16>
    %c2_50 = arith.constant 2 : index
    %c0_51 = arith.constant 0 : index
    %c0_52 = arith.constant 0 : index
    %66 = vector.load %arg7[%c2_50, %c0_51, %c0_52] : memref<9x128x128xbf16, #tpu.memory_space<vmem>>, vector<1x128x128xbf16>
    %67 = vector.shape_cast %66 : vector<1x128x128xbf16> to vector<128x128xbf16>
    %cst_53 = arith.constant dense<0.000000e+00> : vector<256x128xf32>
    %68 = tpu.matmul %65, %67, %cst_53 {dimension_numbers = #tpu.dot_dimension_numbers<[1], [0], [0], [1], [0, 0, 1, 1], [], []>} : vector<256x128xbf16>, vector<128x128xbf16>, vector<256x128xf32> -> vector<256x128xf32>
    %69 = arith.addf %63, %68 : vector<256x128xf32>
    %c1_54 = arith.constant 1 : index
    %c0_55 = arith.constant 0 : index
    %c0_56 = arith.constant 0 : index
    %70 = vector.load %arg10[%c1_54, %c0_55, %c0_56] : memref<18x18x128xbf16, #tpu.memory_space<vmem>>, vector<16x16x128xbf16>
    %71 = vector.shape_cast %70 : vector<16x16x128xbf16> to vector<256x128xbf16>
    %c3 = arith.constant 3 : index
    %c0_57 = arith.constant 0 : index
    %c0_58 = arith.constant 0 : index
    %72 = vector.load %arg7[%c3, %c0_57, %c0_58] : memref<9x128x128xbf16, #tpu.memory_space<vmem>>, vector<1x128x128xbf16>
    %73 = vector.shape_cast %72 : vector<1x128x128xbf16> to vector<128x128xbf16>
    %cst_59 = arith.constant dense<0.000000e+00> : vector<256x128xf32>
    %74 = tpu.matmul %71, %73, %cst_59 {dimension_numbers = #tpu.dot_dimension_numbers<[1], [0], [0], [1], [0, 0, 1, 1], [], []>} : vector<256x128xbf16>, vector<128x128xbf16>, vector<256x128xf32> -> vector<256x128xf32>
    %75 = arith.addf %69, %74 : vector<256x128xf32>
    %c1_60 = arith.constant 1 : index
    %c1_61 = arith.constant 1 : index
    %c0_62 = arith.constant 0 : index
    %76 = vector.load %arg10[%c1_60, %c1_61, %c0_62] : memref<18x18x128xbf16, #tpu.memory_space<vmem>>, vector<16x16x128xbf16>
    %77 = vector.shape_cast %76 : vector<16x16x128xbf16> to vector<256x128xbf16>
    %c4 = arith.constant 4 : index
    %c0_63 = arith.constant 0 : index
    %c0_64 = arith.constant 0 : index
    %78 = vector.load %arg7[%c4, %c0_63, %c0_64] : memref<9x128x128xbf16, #tpu.memory_space<vmem>>, vector<1x128x128xbf16>
    %79 = vector.shape_cast %78 : vector<1x128x128xbf16> to vector<128x128xbf16>
    %cst_65 = arith.constant dense<0.000000e+00> : vector<256x128xf32>
    %80 = tpu.matmul %77, %79, %cst_65 {dimension_numbers = #tpu.dot_dimension_numbers<[1], [0], [0], [1], [0, 0, 1, 1], [], []>} : vector<256x128xbf16>, vector<128x128xbf16>, vector<256x128xf32> -> vector<256x128xf32>
    %81 = arith.addf %75, %80 : vector<256x128xf32>
    %c1_66 = arith.constant 1 : index
    %c2_67 = arith.constant 2 : index
    %c0_68 = arith.constant 0 : index
    %82 = vector.load %arg10[%c1_66, %c2_67, %c0_68] : memref<18x18x128xbf16, #tpu.memory_space<vmem>>, vector<16x16x128xbf16>
    %83 = vector.shape_cast %82 : vector<16x16x128xbf16> to vector<256x128xbf16>
    %c5 = arith.constant 5 : index
    %c0_69 = arith.constant 0 : index
    %c0_70 = arith.constant 0 : index
    %84 = vector.load %arg7[%c5, %c0_69, %c0_70] : memref<9x128x128xbf16, #tpu.memory_space<vmem>>, vector<1x128x128xbf16>
    %85 = vector.shape_cast %84 : vector<1x128x128xbf16> to vector<128x128xbf16>
    %cst_71 = arith.constant dense<0.000000e+00> : vector<256x128xf32>
    %86 = tpu.matmul %83, %85, %cst_71 {dimension_numbers = #tpu.dot_dimension_numbers<[1], [0], [0], [1], [0, 0, 1, 1], [], []>} : vector<256x128xbf16>, vector<128x128xbf16>, vector<256x128xf32> -> vector<256x128xf32>
    %87 = arith.addf %81, %86 : vector<256x128xf32>
    %c2_72 = arith.constant 2 : index
    %c0_73 = arith.constant 0 : index
    %c0_74 = arith.constant 0 : index
    %88 = vector.load %arg10[%c2_72, %c0_73, %c0_74] : memref<18x18x128xbf16, #tpu.memory_space<vmem>>, vector<16x16x128xbf16>
    %89 = vector.shape_cast %88 : vector<16x16x128xbf16> to vector<256x128xbf16>
    %c6 = arith.constant 6 : index
    %c0_75 = arith.constant 0 : index
    %c0_76 = arith.constant 0 : index
    %90 = vector.load %arg7[%c6, %c0_75, %c0_76] : memref<9x128x128xbf16, #tpu.memory_space<vmem>>, vector<1x128x128xbf16>
    %91 = vector.shape_cast %90 : vector<1x128x128xbf16> to vector<128x128xbf16>
    %cst_77 = arith.constant dense<0.000000e+00> : vector<256x128xf32>
    %92 = tpu.matmul %89, %91, %cst_77 {dimension_numbers = #tpu.dot_dimension_numbers<[1], [0], [0], [1], [0, 0, 1, 1], [], []>} : vector<256x128xbf16>, vector<128x128xbf16>, vector<256x128xf32> -> vector<256x128xf32>
    %93 = arith.addf %87, %92 : vector<256x128xf32>
    %c2_78 = arith.constant 2 : index
    %c1_79 = arith.constant 1 : index
    %c0_80 = arith.constant 0 : index
    %94 = vector.load %arg10[%c2_78, %c1_79, %c0_80] : memref<18x18x128xbf16, #tpu.memory_space<vmem>>, vector<16x16x128xbf16>
    %95 = vector.shape_cast %94 : vector<16x16x128xbf16> to vector<256x128xbf16>
    %c7 = arith.constant 7 : index
    %c0_81 = arith.constant 0 : index
    %c0_82 = arith.constant 0 : index
    %96 = vector.load %arg7[%c7, %c0_81, %c0_82] : memref<9x128x128xbf16, #tpu.memory_space<vmem>>, vector<1x128x128xbf16>
    %97 = vector.shape_cast %96 : vector<1x128x128xbf16> to vector<128x128xbf16>
    %cst_83 = arith.constant dense<0.000000e+00> : vector<256x128xf32>
    %98 = tpu.matmul %95, %97, %cst_83 {dimension_numbers = #tpu.dot_dimension_numbers<[1], [0], [0], [1], [0, 0, 1, 1], [], []>} : vector<256x128xbf16>, vector<128x128xbf16>, vector<256x128xf32> -> vector<256x128xf32>
    %99 = arith.addf %93, %98 : vector<256x128xf32>
    %c2_84 = arith.constant 2 : index
    %c2_85 = arith.constant 2 : index
    %c0_86 = arith.constant 0 : index
    %100 = vector.load %arg10[%c2_84, %c2_85, %c0_86] : memref<18x18x128xbf16, #tpu.memory_space<vmem>>, vector<16x16x128xbf16>
    %101 = vector.shape_cast %100 : vector<16x16x128xbf16> to vector<256x128xbf16>
    %c8 = arith.constant 8 : index
    %c0_87 = arith.constant 0 : index
    %c0_88 = arith.constant 0 : index
    %102 = vector.load %arg7[%c8, %c0_87, %c0_88] : memref<9x128x128xbf16, #tpu.memory_space<vmem>>, vector<1x128x128xbf16>
    %103 = vector.shape_cast %102 : vector<1x128x128xbf16> to vector<128x128xbf16>
    %cst_89 = arith.constant dense<0.000000e+00> : vector<256x128xf32>
    %104 = tpu.matmul %101, %103, %cst_89 {dimension_numbers = #tpu.dot_dimension_numbers<[1], [0], [0], [1], [0, 0, 1, 1], [], []>} : vector<256x128xbf16>, vector<128x128xbf16>, vector<256x128xf32> -> vector<256x128xf32>
    %105 = arith.addf %99, %104 : vector<256x128xf32>
    %106 = arith.truncf %105 : vector<256x128xf32> to vector<256x128xbf16>
    %107 = vector.shape_cast %106 : vector<256x128xbf16> to vector<16x16x128xbf16>
    %c0_90 = arith.constant 0 : index
    %c0_91 = arith.constant 0 : index
    %c0_92 = arith.constant 0 : index
    %c0_93 = arith.constant 0 : index
    %108 = vector.load %arg8[%c0_90, %c0_91, %c0_92, %c0_93] : memref<1x16x16x128xbf16, #tpu.memory_space<vmem>>, vector<1x16x16x128xbf16>
    %109 = vector.shape_cast %108 : vector<1x16x16x128xbf16> to vector<16x16x128xbf16>
    %110 = vector.shape_cast %107 : vector<16x16x128xbf16> to vector<1x16x16x128xbf16>
    tpu.vector_store %arg8[%c0_90, %c0_91, %c0_92, %c0_93], %110 {strides = array<i32>} : memref<1x16x16x128xbf16, #tpu.memory_space<vmem>>, vector<1x16x16x128xbf16>,
    %111 = arith.extf %106 : vector<256x128xbf16> to vector<256x128xf32>
    %cst_94 = arith.constant dense<0.000000e+00> : vector<128xf32>
    %112 = vector.multi_reduction <add>, %111, %cst_94 [0] : vector<256x128xf32> to vector<128xf32>
    %113 = vector.shape_cast %112 : vector<128xf32> to vector<1x128xf32>
    %114 = arith.mulf %111, %111 : vector<256x128xf32>
    %cst_95 = arith.constant dense<0.000000e+00> : vector<128xf32>
    %115 = vector.multi_reduction <add>, %114, %cst_95 [0] : vector<256x128xf32> to vector<128xf32>
    %116 = vector.shape_cast %115 : vector<128xf32> to vector<1x128xf32>
    %117 = tpu.concatenate %113, %116 in 0 : vector<1x128xf32>, vector<1x128xf32> -> vector<2x128xf32>
    %c0_96 = arith.constant 0 : index
    %c0_97 = arith.constant 0 : index
    %c0_98 = arith.constant 0 : index
    %c0_99 = arith.constant 0 : index
    %118 = vector.load %arg9[%c0_96, %c0_97, %c0_98, %c0_99] : memref<1x1x2x128xf32, #tpu.memory_space<vmem>>, vector<1x1x2x128xf32>
    %119 = vector.shape_cast %118 : vector<1x1x2x128xf32> to vector<2x128xf32>
    %120 = vector.shape_cast %117 : vector<2x128xf32> to vector<1x1x2x128xf32>
    tpu.vector_store %arg9[%c0_96, %c0_97, %c0_98, %c0_99], %120 {strides = array<i32>} : memref<1x1x2x128xf32, #tpu.memory_space<vmem>>, vector<1x1x2x128xf32>,
    return
  }
  func.func @transform_0(%arg0: i32, %arg1: i32) -> (i32, i32, i32, i32) {
    %c0_i32 = arith.constant 0 : i32
    %c0_i32_0 = arith.constant 0 : i32
    %c0_i32_1 = arith.constant 0 : i32
    return %arg0, %arg1, %c0_i32, %c0_i32_0 : i32, i32, i32, i32
  }
  func.func @transform_1(%arg0: i32, %arg1: i32) -> (i32, i32, i32, i32) {
    %c16_i32 = arith.constant 16 : i32
    %0 = arith.muli %arg1, %c16_i32 : i32
    %c1_i32 = arith.constant 1 : i32
    %1 = arith.subi %0, %c1_i32 : i32
    %c0_i32 = arith.constant 0 : i32
    %2 = arith.maxsi %1, %c0_i32 : i32
    %c0_i32_0 = arith.constant 0 : i32
    %c0_i32_1 = arith.constant 0 : i32
    %c0_i32_2 = arith.constant 0 : i32
    return %arg0, %2, %c0_i32_0, %c0_i32_1 : i32, i32, i32, i32
  }
  func.func @transform_2(%arg0: i32, %arg1: i32) -> (i32, i32, i32, i32) {
    %c1_i32 = arith.constant 1 : i32
    %0 = arith.addi %arg1, %c1_i32 : i32
    %c16_i32 = arith.constant 16 : i32
    %1 = arith.muli %0, %c16_i32 : i32
    %c15_i32 = arith.constant 15 : i32
    %2 = arith.minsi %1, %c15_i32 : i32
    %c0_i32 = arith.constant 0 : i32
    %c0_i32_0 = arith.constant 0 : i32
    %c0_i32_1 = arith.constant 0 : i32
    return %arg0, %2, %c0_i32, %c0_i32_0 : i32, i32, i32, i32
  }
  func.func @transform_3(%arg0: i32, %arg1: i32) -> (i32, i32) {
    %c0_i32 = arith.constant 0 : i32
    %c0_i32_0 = arith.constant 0 : i32
    %c0_i32_1 = arith.constant 0 : i32
    return %c0_i32, %c0_i32_0 : i32, i32
  }
  func.func @transform_4(%arg0: i32, %arg1: i32) -> (i32, i32) {
    %c0_i32 = arith.constant 0 : i32
    %c0_i32_0 = arith.constant 0 : i32
    %c0_i32_1 = arith.constant 0 : i32
    return %c0_i32, %c0_i32_0 : i32, i32
  }
  func.func @transform_5(%arg0: i32, %arg1: i32) -> (i32, i32, i32) {
    %c0_i32 = arith.constant 0 : i32
    %c0_i32_0 = arith.constant 0 : i32
    %c0_i32_1 = arith.constant 0 : i32
    %c0_i32_2 = arith.constant 0 : i32
    return %c0_i32, %c0_i32_0, %c0_i32_1 : i32, i32, i32
  }
  func.func @transform_6(%arg0: i32, %arg1: i32) -> (i32, i32, i32, i32) {
    %c0_i32 = arith.constant 0 : i32
    %c0_i32_0 = arith.constant 0 : i32
    %c0_i32_1 = arith.constant 0 : i32
    return %arg0, %arg1, %c0_i32, %c0_i32_0 : i32, i32, i32, i32
  }
  func.func @transform_7(%arg0: i32, %arg1: i32) -> (i32, i32, i32, i32) {
    %c0_i32 = arith.constant 0 : i32
    %c0_i32_0 = arith.constant 0 : i32
    %c0_i32_1 = arith.constant 0 : i32
    return %arg0, %arg1, %c0_i32, %c0_i32_0 : i32, i32, i32, i32
  }
}

</mosaic_0001>

<bundles_post_ra>
// kernel: double_conv.5
= control target key start
LH: loop header
LB: loop body
LE: loop exit
PB: predicated region body
PF: predicated region fallthrough
CT: control target
= control target key end

     0   :  { %s680_s12 = smov 0   ;;  %s682_s13 = smov 0   ;;  %s875_s0 = inlined_call_operand.vmem [shape: bf16[2,16,16,128], index: 0, kind: input, shape index: {}]   ;;  %s876_s1 = inlined_call_operand.vmem [shape: f32[1,128], index: 1, kind: input, shape index: {}]   ;;  %s877_s2 = inlined_call_operand.vmem [shape: f32[1,128], index: 2, kind: input, shape index: {}]   ;;  %s878_s3 = inlined_call_operand.vmem [shape: f32[2,16,16,8], index: 3, kind: output, shape index: {}]  }
   0x1   :  { %s684_s14 = smov 0  }
   0x2 LB: > { %s25_s15 = sadd.s32 1, %s654_s13  ;;  %p522_p0 = scmp.ge.s32.totalorder %s658_s14, 1  ;;  %s658_s14 = sphi %s684_s14, %s13_s14   ;;  %s654_s13 = sphi %s682_s13, %s880_s13   ;;  %s650_s12 = sphi %s680_s12, %s879_s12  }
   0x3   : > { %p27_p1 = scmp.ge.s32.totalorder %s25_s15, 2  ;;  %p159_p2 = scmp.lt.s32.totalorder %s658_s14, 3 }
   0x5   : > { %s882_s15 = smov (%p27_p1, %s25_s15), 0  ;;  %p160_p3 = pnand %p522_p0, %p159_p2 }
   0x6   : > { %p194_p4 = scmp.lt.s32.totalorder (!%p160_p3), %s650_s12, 1  ;;  %v709_v0 = vld [vmem:[%s876_s1] ss:$0 sm:$0xff] (!%p160_p3)  ;;  %vm389_vm0 = vcmask (!%p160_p3), 64512  }
   0x7   : > { %163 = sbr.rel (%p160_p3) target bundleno = 54 (0x36), region = 32  ;;  %v718_v9 = vld [vmem:[%s877_s2] ss:$0 sm:$0xff] (!%p160_p3) }
   0xe   : > { %s884_s12 = smov (!%p194_p4, %s650_s12), 1 }
   0xf   : > { %s531_s16 = sshll.u32 %s884_s12, 7  ;;  %s532_s24 = sshll.u32 %s884_s12, 8 }
  0x10   : > { %s704_s19 = scalar_lea.vmem %s875_s0, %s531_s16  ;;  %s736_s27 = scalar_lea.vmem %s878_s3, %s532_s24 }
  0x11   : > { %v534_v1 = vld [vmem:[%s704_s19] sm:$0xff]   ;;  %v597_v2 = vld [vmem:[%s704_s19 + $0x8] sm:$0xff]   ;;  %v598_v3 = vld [vmem:[%s704_s19 + $0x10] sm:$0xff]  }
  0x12   : > { %v535_v4 = vunpack.c.l.bf16 %v534_v1  ;;  %v536_v5 = vunpack.c.h.bf16 %v534_v1  ;;  %v539_v6 = vunpack.c.l.bf16 %v597_v2  ;;  %v540_v7 = vunpack.c.h.bf16 %v597_v2  ;;  %v599_v8 = vld [vmem:[%s704_s19 + $0x18] sm:$0xff]   ;;  %v600_v30 = vld [vmem:[%s704_s19 + $0x20] sm:$0xff]   ;;  %v601_v31 = vld [vmem:[%s704_s19 + $0x28] sm:$0xff]  }
  0x13   : > { %v543_v10 = vunpack.c.l.bf16 %v598_v3  ;;  %v544_v11 = vunpack.c.h.bf16 %v598_v3  ;;  %v547_v12 = vunpack.c.l.bf16 %v599_v8  ;;  %v548_v13 = vunpack.c.h.bf16 %v599_v8  ;;  %v602_v36 = vld [vmem:[%s704_s19 + $0x30] sm:$0xff]   ;;  %v603_v37 = vld [vmem:[%s704_s19 + $0x38] sm:$0xff]   ;;  %v604_v3 = vld [vmem:[%s704_s19 + $0x40] sm:$0xff]  }
  0x14   : > { %v287_v14 = vmul.f32 %v535_v4, %v709_v0  ;;  %v288_v15 = vmul.f32 %v536_v5, %v709_v0  ;;  %v289_v16 = vmul.f32 %v539_v6, %v709_v0  ;;  %v290_v17 = vmul.f32 %v540_v7, %v709_v0  ;;  %v605_v4 = vld [vmem:[%s704_s19 + $0x48] sm:$0xff]  }
  0x15   : > { %v291_v18 = vmul.f32 %v543_v10, %v709_v0  ;;  %v292_v19 = vmul.f32 %v544_v11, %v709_v0  ;;  %v293_v20 = vmul.f32 %v547_v12, %v709_v0  ;;  %v294_v21 = vmul.f32 %v548_v13, %v709_v0  ;;  %v606_v10 = vld [vmem:[%s704_s19 + $0x50] sm:$0xff]   ;;  %v607_v11 = vld [vmem:[%s704_s19 + $0x58] sm:$0xff]  }
  0x16   : > { %v325_v22 = vadd.f32 %v718_v9, %v287_v14  ;;  %v326_v23 = vadd.f32 %v718_v9, %v288_v15  ;;  %v327_v24 = vadd.f32 %v718_v9, %v289_v16  ;;  %v328_v25 = vadd.f32 %v718_v9, %v290_v17 }
  0x17   : > { %v329_v26 = vadd.f32 %v718_v9, %v291_v18  ;;  %v330_v27 = vadd.f32 %v718_v9, %v292_v19  ;;  %v331_v28 = vadd.f32 %v718_v9, %v293_v20  ;;  %v332_v29 = vadd.f32 %v718_v9, %v294_v21 }
  0x18   : > { %v357_v32 = vmax.f32 %v325_v22, 0.0  ;;  %v358_v33 = vmax.f32 %v326_v23, 0.0  ;;  %v359_v34 = vmax.f32 %v327_v24, 0.0  ;;  %v360_v35 = vmax.f32 %v328_v25, 0.0 }
  0x19   : > { %v361_v38 = vmax.f32 %v329_v26, 0.0  ;;  %v362_v39 = vmax.f32 %v330_v27, 0.0  ;;  %v363_v40 = vmax.f32 %v331_v28, 0.0  ;;  %v364_v41 = vmax.f32 %v332_v29, 0.0 }
  0x1a   : > { %390 = vst.msk [vmem:[%s736_s27] sm:$0xff] %vm389_vm0, %v357_v32  ;;  %391 = vst.msk [vmem:[%s736_s27 + $0x8] sm:$0xff] %vm389_vm0, %v358_v33  ;;  %v551_v42 = vunpack.c.l.bf16 %v600_v30  ;;  %v552_v43 = vunpack.c.h.bf16 %v600_v30  ;;  %v555_v44 = vunpack.c.l.bf16 %v601_v31  ;;  %v556_v45 = vunpack.c.h.bf16 %v601_v31 }
  0x1b   : > { %392 = vst.msk [vmem:[%s736_s27 + $0x10] sm:$0xff] %vm389_vm0, %v359_v34  ;;  %393 = vst.msk [vmem:[%s736_s27 + $0x18] sm:$0xff] %vm389_vm0, %v360_v35  ;;  %v559_v46 = vunpack.c.l.bf16 %v602_v36  ;;  %v560_v47 = vunpack.c.h.bf16 %v602_v36  ;;  %v563_v48 = vunpack.c.l.bf16 %v603_v37  ;;  %v564_v49 = vunpack.c.h.bf16 %v603_v37 }
  0x1c   : > { %394 = vst.msk [vmem:[%s736_s27 + $0x20] sm:$0xff] %vm389_vm0, %v361_v38  ;;  %395 = vst.msk [vmem:[%s736_s27 + $0x28] sm:$0xff] %vm389_vm0, %v362_v39  ;;  %v295_v50 = vmul.f32 %v551_v42, %v709_v0  ;;  %v296_v51 = vmul.f32 %v552_v43, %v709_v0  ;;  %v297_v52 = vmul.f32 %v555_v44, %v709_v0  ;;  %v567_v16 = vunpack.c.l.bf16 %v604_v3 }
  0x1d   : > { %396 = vst.msk [vmem:[%s736_s27 + $0x30] sm:$0xff] %vm389_vm0, %v363_v40  ;;  %397 = vst.msk [vmem:[%s736_s27 + $0x38] sm:$0xff] %vm389_vm0, %v364_v41  ;;  %v298_v53 = vmul.f32 %v556_v45, %v709_v0  ;;  %v299_v54 = vmul.f32 %v559_v46, %v709_v0  ;;  %v300_v55 = vmul.f32 %v560_v47, %v709_v0  ;;  %v568_v17 = vunpack.c.h.bf16 %v604_v3  ;;  %v608_v40 = vld [vmem:[%s704_s19 + $0x60] sm:$0xff]   ;;  %v609_v41 = vld [vmem:[%s704_s19 + $0x68] sm:$0xff]  }
  0x1e   : > { %v301_v56 = vmul.f32 %v563_v48, %v709_v0  ;;  %v302_v57 = vmul.f32 %v564_v49, %v709_v0  ;;  %v333_v58 = vadd.f32 %v718_v9, %v295_v50  ;;  %v334_v59 = vadd.f32 %v718_v9, %v296_v51  ;;  %v610_v46 = vld [vmem:[%s704_s19 + $0x70] sm:$0xff]   ;;  %v611_v47 = vld [vmem:[%s704_s19 + $0x78] sm:$0xff]  }
  0x1f   : > { %v335_v60 = vadd.f32 %v718_v9, %v297_v52  ;;  %v336_v61 = vadd.f32 %v718_v9, %v298_v53  ;;  %v337_v62 = vadd.f32 %v718_v9, %v299_v54  ;;  %v338_v63 = vadd.f32 %v718_v9, %v300_v55 }
  0x20   : > { %v339_v1 = vadd.f32 %v718_v9, %v301_v56  ;;  %v340_v2 = vadd.f32 %v718_v9, %v302_v57  ;;  %v365_v5 = vmax.f32 %v333_v58, 0.0  ;;  %v366_v6 = vmax.f32 %v334_v59, 0.0 }
  0x21   : > { %v367_v7 = vmax.f32 %v335_v60, 0.0  ;;  %v368_v8 = vmax.f32 %v336_v61, 0.0  ;;  %v369_v12 = vmax.f32 %v337_v62, 0.0  ;;  %v370_v13 = vmax.f32 %v338_v63, 0.0 }
  0x22   : > { %v371_v14 = vmax.f32 %v339_v1, 0.0  ;;  %v372_v15 = vmax.f32 %v340_v2, 0.0  ;;  %398 = vst.msk [vmem:[%s736_s27 + $0x40] sm:$0xff] %vm389_vm0, %v365_v5  ;;  %399 = vst.msk [vmem:[%s736_s27 + $0x48] sm:$0xff] %vm389_vm0, %v366_v6  ;;  %v571_v18 = vunpack.c.l.bf16 %v605_v4  ;;  %v572_v19 = vunpack.c.h.bf16 %v605_v4 }
  0x23   : > { %400 = vst.msk [vmem:[%s736_s27 + $0x50] sm:$0xff] %vm389_vm0, %v367_v7  ;;  %401 = vst.msk [vmem:[%s736_s27 + $0x58] sm:$0xff] %vm389_vm0, %v368_v8  ;;  %v575_v20 = vunpack.c.l.bf16 %v606_v10  ;;  %v576_v21 = vunpack.c.h.bf16 %v606_v10  ;;  %v579_v22 = vunpack.c.l.bf16 %v607_v11  ;;  %v580_v23 = vunpack.c.h.bf16 %v607_v11 }
  0x24   : > { %402 = vst.msk [vmem:[%s736_s27 + $0x60] sm:$0xff] %vm389_vm0, %v369_v12  ;;  %403 = vst.msk [vmem:[%s736_s27 + $0x68] sm:$0xff] %vm389_vm0, %v370_v13  ;;  %v303_v24 = vmul.f32 %v567_v16, %v709_v0  ;;  %v304_v25 = vmul.f32 %v568_v17, %v709_v0  ;;  %v305_v26 = vmul.f32 %v571_v18, %v709_v0  ;;  %v583_v52 = vunpack.c.l.bf16 %v608_v40 }
  0x25   : > { %404 = vst.msk [vmem:[%s736_s27 + $0x70] sm:$0xff] %vm389_vm0, %v371_v14  ;;  %405 = vst.msk [vmem:[%s736_s27 + $0x78] sm:$0xff] %vm389_vm0, %v372_v15  ;;  %v306_v27 = vmul.f32 %v572_v19, %v709_v0  ;;  %v307_v28 = vmul.f32 %v575_v20, %v709_v0  ;;  %v308_v29 = vmul.f32 %v576_v21, %v709_v0  ;;  %v584_v53 = vunpack.c.h.bf16 %v608_v40 }
  0x26   : > { %v309_v30 = vmul.f32 %v579_v22, %v709_v0  ;;  %v310_v31 = vmul.f32 %v580_v23, %v709_v0  ;;  %v341_v32 = vadd.f32 %v718_v9, %v303_v24  ;;  %v342_v33 = vadd.f32 %v718_v9, %v304_v25 }
  0x27   : > { %v343_v34 = vadd.f32 %v718_v9, %v305_v26  ;;  %v344_v35 = vadd.f32 %v718_v9, %v306_v27  ;;  %v345_v36 = vadd.f32 %v718_v9, %v307_v28  ;;  %v346_v37 = vadd.f32 %v718_v9, %v308_v29 }
  0x28   : > { %v347_v38 = vadd.f32 %v718_v9, %v309_v30  ;;  %v348_v39 = vadd.f32 %v718_v9, %v310_v31  ;;  %v373_v42 = vmax.f32 %v341_v32, 0.0  ;;  %v374_v43 = vmax.f32 %v342_v33, 0.0 }
  0x29   : > { %v375_v44 = vmax.f32 %v343_v34, 0.0  ;;  %v376_v45 = vmax.f32 %v344_v35, 0.0  ;;  %v377_v48 = vmax.f32 %v345_v36, 0.0  ;;  %v378_v49 = vmax.f32 %v346_v37, 0.0 }
  0x2a   : > { %v379_v50 = vmax.f32 %v347_v38, 0.0  ;;  %v380_v51 = vmax.f32 %v348_v39, 0.0  ;;  %406 = vst.msk [vmem:[%s736_s27 + $0x80] sm:$0xff] %vm389_vm0, %v373_v42  ;;  %407 = vst.msk [vmem:[%s736_s27 + $0x88] sm:$0xff] %vm389_vm0, %v374_v43  ;;  %v587_v54 = vunpack.c.l.bf16 %v609_v41  ;;  %v588_v55 = vunpack.c.h.bf16 %v609_v41 }
  0x2b   : > { %408 = vst.msk [vmem:[%s736_s27 + $0x90] sm:$0xff] %vm389_vm0, %v375_v44  ;;  %409 = vst.msk [vmem:[%s736_s27 + $0x98] sm:$0xff] %vm389_vm0, %v376_v45  ;;  %v591_v56 = vunpack.c.l.bf16 %v610_v46  ;;  %v592_v57 = vunpack.c.h.bf16 %v610_v46  ;;  %v595_v58 = vunpack.c.l.bf16 %v611_v47  ;;  %v596_v59 = vunpack.c.h.bf16 %v611_v47 }
  0x2c   : > { %410 = vst.msk [vmem:[%s736_s27 + $0xa0] sm:$0xff] %vm389_vm0, %v377_v48  ;;  %411 = vst.msk [vmem:[%s736_s27 + $0xa8] sm:$0xff] %vm389_vm0, %v378_v49  ;;  %v311_v60 = vmul.f32 %v583_v52, %v709_v0  ;;  %v312_v61 = vmul.f32 %v584_v53, %v709_v0  ;;  %v313_v62 = vmul.f32 %v587_v54, %v709_v0 }
  0x2d   : > { %412 = vst.msk [vmem:[%s736_s27 + $0xb0] sm:$0xff] %vm389_vm0, %v379_v50  ;;  %413 = vst.msk [vmem:[%s736_s27 + $0xb8] sm:$0xff] %vm389_vm0, %v380_v51  ;;  %v314_v63 = vmul.f32 %v588_v55, %v709_v0  ;;  %v315_v1 = vmul.f32 %v591_v56, %v709_v0  ;;  %v316_v2 = vmul.f32 %v592_v57, %v709_v0 }
  0x2e   : > { %v317_v3 = vmul.f32 %v595_v58, %v709_v0  ;;  %v318_v4 = vmul.f32 %v596_v59, %v709_v0  ;;  %v349_v5 = vadd.f32 %v718_v9, %v311_v60  ;;  %v350_v6 = vadd.f32 %v718_v9, %v312_v61 }
  0x2f   : > { %v351_v7 = vadd.f32 %v718_v9, %v313_v62  ;;  %v352_v8 = vadd.f32 %v718_v9, %v314_v63  ;;  %v353_v10 = vadd.f32 %v718_v9, %v315_v1  ;;  %v354_v11 = vadd.f32 %v718_v9, %v316_v2 }
  0x30   : > { %v355_v0 = vadd.f32 %v718_v9, %v317_v3  ;;  %v356_v12 = vadd.f32 %v718_v9, %v318_v4  ;;  %v381_v13 = vmax.f32 %v349_v5, 0.0  ;;  %v382_v14 = vmax.f32 %v350_v6, 0.0 }
  0x31   : > { %v383_v15 = vmax.f32 %v351_v7, 0.0  ;;  %v384_v16 = vmax.f32 %v352_v8, 0.0  ;;  %v385_v17 = vmax.f32 %v353_v10, 0.0  ;;  %v386_v18 = vmax.f32 %v354_v11, 0.0 }
  0x32   : > { %v387_v19 = vmax.f32 %v355_v0, 0.0  ;;  %v388_v20 = vmax.f32 %v356_v12, 0.0  ;;  %414 = vst.msk [vmem:[%s736_s27 + $0xc0] sm:$0xff] %vm389_vm0, %v381_v13  ;;  %415 = vst.msk [vmem:[%s736_s27 + $0xc8] sm:$0xff] %vm389_vm0, %v382_v14 }
  0x33   : > { %416 = vst.msk [vmem:[%s736_s27 + $0xd0] sm:$0xff] %vm389_vm0, %v383_v15  ;;  %417 = vst.msk [vmem:[%s736_s27 + $0xd8] sm:$0xff] %vm389_vm0, %v384_v16 }
  0x34   : > { %418 = vst.msk [vmem:[%s736_s27 + $0xe0] sm:$0xff] %vm389_vm0, %v385_v17  ;;  %419 = vst.msk [vmem:[%s736_s27 + $0xe8] sm:$0xff] %vm389_vm0, %v386_v18 }
  0x35   : > { %420 = vst.msk [vmem:[%s736_s27 + $0xf0] sm:$0xff] %vm389_vm0, %v387_v19  ;;  %421 = vst.msk [vmem:[%s736_s27 + $0xf8] sm:$0xff] %vm389_vm0, %v388_v20 }
  0x36 PF: > { %s13_s14 = sadd.s32 1, %s658_s14   ;;  %s879_s12 = smov %s654_s13 }
  0x37   : > { %p10_p5 = scmp.ge.s32.totalorder %s13_s14, 4   ;;  %s880_s13 = smov %s882_s15 }
  0x39   :  { %12 = sbr.rel (!%p10_p5) target bundleno = 2 (0x2), region = 62 }

// kernel: double_conv.3
= control target key start
LH: loop header
LB: loop body
LE: loop exit
PB: predicated region body
PF: predicated region fallthrough
CT: control target
= control target key end

     0   :  { %s8139_s18 = smov 0   ;;  %s8141_s19 = smov 0   ;;  %s10037_s0 = inlined_call_operand.vmem [shape: bf16[2,16,16,128], index: 0, kind: input, shape index: {}, may-alias: {0,1,2}]   ;;  %s10038_s1 = inlined_call_operand.vmem [shape: bf16[2,16,16,128], index: 1, kind: input, shape index: {}, may-alias: {0,1,2}]   ;;  %s10039_s2 = inlined_call_operand.vmem [shape: bf16[2,16,16,128], index: 2, kind: input, shape index: {}, may-alias: {0,1,2}]   ;;  %s10040_s3 = inlined_call_operand.vmem [shape: bf16[9,128,128], index: 3, kind: input, shape index: {}]   ;;  %s10041_s4 = inlined_call_operand.vmem [shape: bf16[2,16,16,128], index: 4, kind: output, shape index: {0}]   ;;  %s10042_s5 = inlined_call_operand.vmem [shape: f32[2,1,2,128], index: 5, kind: output, shape index: {1}]  }
   0x1   :  { %s8143_s20 = smov 0  }
   0x2 LB: > { %s28_s1 = sadd.s32 1, %s8102_s19  ;;  %p6376_p0 = scmp.ge.s32.totalorder %s8106_s20, 1  ;;  %s8106_s20 = sphi %s8143_s20, %s16_s20   ;;  %s8102_s19 = sphi %s8141_s19, %s10161_s19   ;;  %s8098_s18 = sphi %s8139_s18, %s10160_s18  }
   0x3   : > { %p30_p1 = scmp.ge.s32.totalorder %s28_s1, 2  ;;  %p278_p2 = scmp.lt.s32.totalorder %s8106_s20, 3 }
   0x5   : > { %s10163_s1 = smov (%p30_p1, %s28_s1), 0  ;;  %p279_p3 = pnand %p6376_p0, %p278_p2 }
   0x7   : > { %282 = sbr.rel (%p279_p3) target bundleno = 691 (0x2b3), region = 36 }
   0xe   : > { %v7889_v0 = vld [vmem:[%s10040_s3 + $0x40] sm:$0xff]   ;;  %v7891_v2 = vld [vmem:[%s10040_s3 + $0x48] sm:$0xff]   ;;  %v8108_v4 = vmov 0   ;;  %v7893_v5 = vld [vmem:[%s10040_s3 + $0x50] sm:$0xff]   ;;  %p350_p4 = scmp.lt.s32.totalorder %s8098_s18, 1  ;;  %vm449_vm0 = vcmask 1040384  }
   0xf   : > { %v7890_v1 = vld [vmem:[%s10040_s3 + $0x100] sm:$0xff]   ;;  %7160 = vmatprep.subr.bf16.mxu1 %v7889_v0  ;;  %v7892_v3 = vld [vmem:[%s10040_s3 + $0x108] sm:$0xff]   ;;  %1006 = vst [vmem:[#allocation2 + $0x4] sm:$0xf] %v8108_v4  ;;  %1048 = vst [vmem:[#allocation2 + $0xd0] sm:$0xf] %v8108_v4 }
  0x10   : > { %7352 = vmatprep.subr.bf16.mxu0 %v7890_v1  ;;  %7161 = vmatpush3.bf16.msra.mxu1 %v7889_v0  ;;  %v7894_v6 = vld [vmem:[%s10040_s3 + $0x110] sm:$0xff]   ;;  %v7895_v7 = vld [vmem:[%s10040_s3 + $0x58] sm:$0xff]   ;;  %s10165_s18 = smov (!%p350_p4, %s8098_s18), 1  ;;  %v7897_v9 = vld [vmem:[%s10040_s3 + $0x60] sm:$0xff]   ;;  %vm450_vm1 = vsmask.f32 256 }
  0x11   : > { %7353 = vmatpush3.bf16.msra.mxu0 %v7890_v1  ;;  %7162 = vmatprep.subr.bf16.mxu1 %v7891_v2  ;;  %v7896_v8 = vld [vmem:[%s10040_s3 + $0x118] sm:$0xff]   ;;  %v7898_v10 = vld [vmem:[%s10040_s3 + $0x120] sm:$0xff]   ;;  %s6812_s15 = sshll.u32 %s10165_s18, 7  ;;  %v7899_v11 = vld [vmem:[%s10040_s3 + $0x68] sm:$0xff]   ;;  %vm506_vm2 = vsmask.f32 7938 }
  0x12   : > { %7354 = vmatprep.subr.bf16.mxu0 %v7892_v3  ;;  %v7900_v12 = vld [vmem:[%s10040_s3 + $0x128] sm:$0xff]   ;;  %v452_v13 = vld [vmem:[#allocation2] sm:$0x1]  ;;  %s8205_s24 = scalar_lea.vmem %s10037_s0, %s6812_s15  ;;  %vm8209_vm3 = vmand %vm449_vm0, %vm450_vm1  ;;  %v10070_v14 = vmov 0  ;;  %v10073_v18 = vmov 0  ;;  %vm885_vm5 = vcmask 1043456   ;;  %s10001_s10 = scalar_lea.vmem %s10041_s4, %s6812_s15 }
  0x13   : > { %v10071_v14 = vsel %vm8209_vm3, 4294967295, %v10070_v14  ;;  %v508_v15 = vld [vmem:[#allocation2 + $0x8] sm:$0x1]  ;;  %v453_v17 = vsel %vm8209_vm3, 0, %v452_v13  ;;  %vm8217_vm4 = vmand %vm449_vm0, %vm506_vm2  ;;  %v413_v21 = vld [vmem:[%s8205_s24] sm:$0xf] }
  0x14   : > { %7163 = vmatpush3.bf16.msra.mxu1 %v7891_v2  ;;  %10072 = vst [vmem:[#allocation3_spill] sm:$0xff] %v10071_v14  ;;  %v10074_v18 = vsel %vm8217_vm4, 4294967295, %v10073_v18  ;;  %454 = vst [vmem:[#allocation2] sm:$0x1] %v453_v17  ;;  %v509_v19 = vsel %vm8217_vm4, 0, %v508_v15  ;;  %v7901_v23 = vld [vmem:[%s10040_s3 + $0x70] sm:$0xff]  }
  0x15   : > { %7355 = vmatpush3.bf16.msra.mxu0 %v7892_v3  ;;  %7164 = vmatprep.subr.bf16.mxu1 %v7893_v5  ;;  %10075 = vst [vmem:[#allocation4_spill] sm:$0xff] %v10074_v18  ;;  %v414_v22 = vld [vmem:[%s8205_s24 + $0x4] sm:$0xf]  ;;  %510 = vst [vmem:[#allocation2 + $0x8] sm:$0x1] %v509_v19  ;;  %v7902_v27 = vld [vmem:[%s10040_s3 + $0x130] sm:$0xff]  }
  0x16   : > { %7356 = vmatprep.subr.bf16.mxu0 %v7894_v6  ;;  %v1085_v16 = vld [vmem:[#allocation2 + $0x4] sm:$0xf]  ;;  %v455_v25 = vld [vmem:[#allocation2 + $0xc] sm:$0x1]  ;;  %v511_v26 = vld [vmem:[#allocation2 + $0x14] sm:$0x1] }
  0x17   : > { %v1161_v20 = vshll.u32 %v1085_v16, 16  ;;  %v1165_v24 = vshrl.u32 %v1085_v16, 16  ;;  %v456_v28 = vsel %vm8209_vm3, 0, %v455_v25  ;;  %v512_v29 = vsel %vm8217_vm4, 0, %v511_v26  ;;  %v7903_v31 = vld [vmem:[%s10040_s3 + $0x78] sm:$0xff]   ;;  %vm8243_vm7 = vmand %vm885_vm5, %vm506_vm2  ;;  %v8264_v53 = vld [vmem:[%s10040_s3] sm:$0xff]  }
  0x18   : > { %7165 = vmatpush3.bf16.msra.mxu1 %v7893_v5  ;;  %vm562_vm6 = vsmask.f32 4368  ;;  %v565_v30 = vshrl.u32 %v413_v21, 16  ;;  %457 = vst [vmem:[#allocation2 + $0xc] sm:$0x1] %v456_v28  ;;  %v568_v32 = vshll.u32 %v413_v21, 16 }
  0x19   : > { %7357 = vmatpush3.bf16.msra.mxu0 %v7894_v6  ;;  %7166 = vmatprep.subr.bf16.mxu1 %v7895_v7  ;;  %513 = vst [vmem:[#allocation2 + $0x14] sm:$0x1] %v512_v29  ;;  %v573_v33 = vshrl.u32 %v414_v22, 16  ;;  %v576_v34 = vshll.u32 %v414_v22, 16  ;;  %v8238_v35 = vrot.slane %v1161_v20, 5  ;;  %v8247_v39 = vrot.slane %v1165_v24, 4  ;;  %vm8255_vm8 = vmor %vm450_vm1, %vm562_vm6 }
  0x1a   : > { %7358 = vmatprep.subr.bf16.mxu0 %v7896_v8  ;;  %v567_v36 = vrot.slane %v565_v30, 7  ;;  %v415_v37 = vld [vmem:[%s8205_s24 + $0x8] sm:$0xf]  ;;  %v416_v41 = vld [vmem:[%s8205_s24 + $0xc] sm:$0xf]  ;;  %v7904_v43 = vld [vmem:[%s10040_s3 + $0x138] sm:$0xff]  }
  0x1b   : > { %v575_v40 = vrot.slane %v573_v33, 7  ;;  %v458_v42 = vld [vmem:[#allocation2 + $0x18] sm:$0x1]  ;;  %v514_v48 = vld [vmem:[#allocation2 + $0x20] sm:$0x1]  ;;  %v582_v49 = vshrl.u32 %v415_v37, 16  ;;  %v1168_v19 = vor.u32 %v8247_v39, %v8238_v35 }
  0x1c   : > { %7167 = vmatpush3.bf16.msra.mxu1 %v7895_v7  ;;  %v570_v45 = vor.u32 %v568_v32, %v567_v36  ;;  %v571_v46 = vrot.slane %v567_v36, 4  ;;  %v459_v47 = vsel %vm8209_vm3, 0, %v458_v42  ;;  %v1003_v50 = vld [vmem:[#allocation2] sm:$0xf]  ;;  %v515_v54 = vsel %vm8217_vm4, 0, %v514_v48  ;;  %v7935_v44 = vld [vmem:[%s10040_s3 + $0x90] sm:$0xff]  }
  0x1d   : > { %7359 = vmatpush3.bf16.msra.mxu0 %v7896_v8  ;;  %7168 = vmatprep.subr.bf16.mxu1 %v7897_v9  ;;  %v578_v51 = vor.u32 %v576_v34, %v575_v40  ;;  %v580_v52 = vrot.slane %v575_v40, 4  ;;  %460 = vst [vmem:[#allocation2 + $0x18] sm:$0x1] %v459_v47  ;;  %v585_v55 = vshll.u32 %v415_v37, 16  ;;  %v1004_v56 = vsel %vm8243_vm7, 0, %v1003_v50  ;;  %v8277_v63 = vld [vmem:[%s10040_s3 + $0x140] sm:$0xff]  }
  0x1e   : > { %7360 = vmatprep.subr.bf16.mxu0 %v7898_v10  ;;  %v1007_v57 = vld [vmem:[#allocation2 + $0x8] sm:$0x1]  ;;  %vm1148_vm9 = vsmask.f32 3328  ;;  %516 = vst [vmem:[#allocation2 + $0x20] sm:$0x1] %v515_v54 }
  0x1f   : > { %v584_v58 = vrot.slane %v582_v49, 7  ;;  %v590_v59 = vshrl.u32 %v416_v41, 16  ;;  %v593_v60 = vshll.u32 %v416_v41, 16  ;;  %1005 = vst [vmem:[#allocation2] sm:$0xf] %v1004_v56  ;;  %v1008_v61 = vsel %vm8209_vm3, 0, %v1007_v57 }
  0x20   : > { %7169 = vmatpush3.bf16.msra.mxu1 %v7897_v9  ;;  %v579_v62 = vsel %vm8255_vm8, %v571_v46, %v578_v51  ;;  %1009 = vst [vmem:[#allocation2 + $0x8] sm:$0x1] %v1008_v61  ;;  %v887_v0 = vld [vmem:[#allocation2 + $0xc] sm:$0xf]  ;;  %v891_v1 = vld [vmem:[#allocation2 + $0x14] sm:$0x1] }
  0x21   : > { %7361 = vmatpush3.bf16.msra.mxu0 %v7898_v10  ;;  %7170 = vmatprep.subr.bf16.mxu1 %v7899_v11  ;;  %890 = vst [vmem:[#allocation2 + $0x10] sm:$0xf] %v579_v62  ;;  %v588_v2 = vrot.slane %v584_v58, 4  ;;  %v592_v3 = vrot.slane %v590_v59, 7  ;;  %v888_v4 = vsel %vm8243_vm7, %v570_v45, %v887_v0  ;;  %v892_v5 = vsel %vm8209_vm3, %v580_v52, %v891_v1  ;;  %v8284_v7 = vld [vmem:[%s8205_s24 + $0x10] sm:$0xf] }
  0x22   : > { %7362 = vmatprep.subr.bf16.mxu0 %v7900_v12  ;;  %v587_v6 = vor.u32 %v585_v55, %v584_v58  ;;  %889 = vst [vmem:[#allocation2 + $0xc] sm:$0xf] %v888_v4  ;;  %893 = vst [vmem:[#allocation2 + $0x14] sm:$0x1] %v892_v5  ;;  %v418_v10 = vld [vmem:[%s8205_s24 + $0x14] sm:$0xf] }
  0x23   : > { %v595_v8 = vor.u32 %v593_v60, %v592_v3  ;;  %v597_v9 = vrot.slane %v592_v3, 4  ;;  %v517_v15 = vld [vmem:[#allocation2 + $0x2c] sm:$0x1]  ;;  %v607_v16 = vshrl.u32 %v418_v10, 16  ;;  %v610_v17 = vshll.u32 %v418_v10, 16  ;;  %s6385_s15 = sshll.u32 %s10165_s18, 1 }
  0x24   : > { %7171 = vmatpush3.bf16.msra.mxu1 %v7899_v11  ;;  %v461_v11 = vld [vmem:[#allocation2 + $0x24] sm:$0x1]  ;;  %v894_v21 = vld [vmem:[#allocation2 + $0x18] sm:$0xf]  ;;  %v518_v22 = vsel %vm8217_vm4, 0, %v517_v15  ;;  %v1169_v36 = vrot.slane %v1168_v19, 4  ;;  %s411_s13 = scalar_lea.vmem %s10042_s5, %s6385_s15 }
  0x25   : > { %7363 = vmatpush3.bf16.msra.mxu0 %v7900_v12  ;;  %7172 = vmatprep.subr.bf16.mxu1 %v7901_v23  ;;  %v599_v12 = vshrl.u32 %v8284_v7, 16  ;;  %v462_v13 = vsel %vm8209_vm3, 0, %v461_v11  ;;  %v596_v20 = vsel %vm8255_vm8, %v588_v2, %v595_v8  ;;  %v895_v24 = vsel %vm8243_vm7, %v587_v6, %v894_v21  ;;  %v898_v25 = vld [vmem:[#allocation2 + $0x20] sm:$0x1]  ;;  %519 = vst [vmem:[#allocation2 + $0x2c] sm:$0x1] %v518_v22 }
  0x26   : > { %7364 = vmatprep.subr.bf16.mxu0 %v7902_v27  ;;  %463 = vst [vmem:[#allocation2 + $0x24] sm:$0x1] %v462_v13  ;;  %897 = vst [vmem:[#allocation2 + $0x1c] sm:$0xf] %v596_v20  ;;  %v8302_v26 = vrot.slane %v607_v16, 7  ;;  %v899_v28 = vsel %vm8209_vm3, %v597_v9, %v898_v25  ;;  %v602_v58 = vshll.u32 %v8284_v7, 16 }
  0x27   : > { %vm1149_vm10 = vsmask.f32 7440  ;;  %896 = vst [vmem:[#allocation2 + $0x18] sm:$0xf] %v895_v24  ;;  %v1132_v30 = vld [vmem:[#allocation2 + $0x8] sm:$0x1] }
  0x28   : > { %7173 = vmatpush3.bf16.msra.mxu1 %v7901_v23  ;;  %v8298_v23 = vrot.slane %v599_v12, 7  ;;  %v8307_v33 = vld [vmem:[#allocation2 + $0x10] sm:$0xf]  ;;  %900 = vst [vmem:[#allocation2 + $0x20] sm:$0x1] %v899_v28  ;;  %v612_v34 = vor.u32 %v610_v17, %v8302_v26  ;;  %v1171_v37 = vshll.u32 %v1132_v30, 16  ;;  %vm8313_vm11 = vmor %vm1148_vm9, %vm1149_vm10 }
  0x29   : > { %7365 = vmatpush3.bf16.msra.mxu0 %v7902_v27  ;;  %7174 = vmatprep.subr.bf16.mxu1 %v7903_v31  ;;  %v1084_v27 = vld [vmem:[#allocation2] sm:$0xf]  ;;  %v3059_v39 = vshll.u32 %v8307_v33, 16  ;;  %v3063_v40 = vshrl.u32 %v8307_v33, 16  ;;  %v3001_v45 = vld [vmem:[#allocation2 + $0xc] sm:$0xf] }
  0x2a   : > { %7366 = vmatprep.subr.bf16.mxu0 %v7904_v43  ;;  %v605_v29 = vrot.slane %v8298_v23, 4  ;;  %v1155_v32 = vshll.u32 %v1084_v27, 16  ;;  %v8317_v46 = vld [vmem:[#allocation2 + $0x14] sm:$0x1]  ;;  %v1173_v48 = vrot.slane %v1171_v37, 5  ;;  %v3050_v49 = vshrl.u32 %v3001_v45, 16 }
  0x2b   : > { %v3053_v50 = vshll.u32 %v3001_v45, 16  ;;  %v3061_v51 = vrot.slane %v3059_v39, 5  ;;  %v1086_v52 = vld [vmem:[#allocation2 + $0xc] sm:$0xf]  ;;  %v3065_v55 = vrot.slane %v3063_v40, 4  ;;  %v3069_v56 = vshll.u32 %v8317_v46, 16 }
  0x2c   : > { %7175 = vmatpush3.bf16.msra.mxu1 %v7903_v31  ;;  %v1152_v31 = vshrl.u32 %v1084_v27, 16  ;;  %v613_v47 = vsel %vm8255_vm8, %v605_v29, %v612_v34  ;;  %v1087_v57 = vld [vmem:[#allocation2 + $0x10] sm:$0xf]  ;;  %v1174_v59 = vsel %vm8313_vm11, %v1169_v36, %v1173_v48  ;;  %v3052_v60 = vrot.slane %v3050_v49, 4  ;;  %v1133_v62 = vld [vmem:[#allocation2 + $0x14] sm:$0x1] }
  0x2d   : > { %7367 = vmatpush3.bf16.msra.mxu0 %v7904_v43  ;;  %7208 = vmatprep.subr.bf16.mxu1 %v8264_v53  ;;  %v1157_v43 = vrot.slane %v1155_v32, 5  ;;  %904 = vst [vmem:[#allocation2 + $0x28] sm:$0xf] %v613_v47  ;;  %v3055_v61 = vrot.slane %v3053_v50, 5  ;;  %v1176_v0 = vshrl.u32 %v1086_v52, 16  ;;  %v3066_v2 = vor.u32 %v3065_v55, %v3061_v51 }
  0x2e   : > { %7400 = vmatprep.subr.bf16.mxu0 %v8277_v63  ;;  %v1154_v42 = vrot.slane %v1152_v31, 4  ;;  %v3071_v3 = vrot.slane %v3069_v56, 5  ;;  %v1179_v4 = vshll.u32 %v1086_v52, 16  ;;  %v1185_v8 = vshll.u32 %v1087_v57, 16  ;;  %v3004_v13 = vld [vmem:[#allocation2 + $0x18] sm:$0xf] }
  0x2f   : > { %v3056_v5 = vor.u32 %v3055_v61, %v3052_v60  ;;  %v1178_v6 = vrot.slane %v1176_v0, 4  ;;  %v1189_v9 = vshrl.u32 %v1087_v57, 16  ;;  %v3067_v7 = vrot.slane %v3066_v2, 4  ;;  %v8328_v20 = vld [vmem:[#allocation2 + $0x1c] sm:$0xf] }
  0x30   : > { %v1158_v54 = vor.u32 %v1157_v43, %v1154_v42  ;;  %v1181_v11 = vrot.slane %v1179_v4, 5  ;;  %v1195_v12 = vshll.u32 %v1133_v62, 16  ;;  %v1187_v17 = vrot.slane %v1185_v8, 5  ;;  %v8332_v25 = vld [vmem:[#allocation2 + $0x20] sm:$0x1] }
  0x31   : > { %v3057_v16 = vrot.slane %v3056_v5, 4  ;;  %v1191_v19 = vrot.slane %v1189_v9, 4  ;;  %v3072_v21 = vsel %vm8313_vm11, %v3067_v7, %v3071_v3  ;;  %v8335_v27 = vor.u32 %v602_v58, %v8298_v23  ;;  %v1088_v37 = vld [vmem:[#allocation2 + $0x18] sm:$0xf]  ;;  %v1089_v43 = vld [vmem:[#allocation2 + $0x1c] sm:$0xf] }
  0x32   : > { %v1159_v1 = vrot.slane %v1158_v54, 4  ;;  %v1182_v22 = vor.u32 %v1181_v11, %v1178_v6  ;;  %v1197_v24 = vrot.slane %v1195_v12, 5  ;;  %v3074_v29 = vshrl.u32 %v3004_v13, 16  ;;  %v1134_v50 = vld [vmem:[#allocation2 + $0x20] sm:$0x1] }
  0x33   : > { %v1192_v28 = vor.u32 %v1191_v19, %v1187_v17  ;;  %v3077_v30 = vshll.u32 %v3004_v13, 16  ;;  %v3083_v34 = vshll.u32 %v8328_v20, 16  ;;  %v3087_v36 = vshrl.u32 %v8328_v20, 16  ;;  %v901_v57 = vld [vmem:[#allocation2 + $0x24] sm:$0xf] }
  0x34   : > { %v1164_v10 = vsel %vm8313_vm11, %v1159_v1, %v8238_v35  ;;  %v3062_v35 = vsel %vm8313_vm11, %v3057_v16, %v3061_v51  ;;  %v1183_v32 = vrot.slane %v1182_v22, 4  ;;  %v3076_v40 = vrot.slane %v3074_v29, 4  ;;  %v7908_v51 = vld [vmem:[%s10040_s3 + $0x8] sm:$0xff]   ;;  %v520_v22 = vld [vmem:[#allocation2 + $0x38] sm:$0x1] }
  0x35   : > { %v6402_v15 = vcombine.low %v1164_v10, %v1174_v59  ;;  %v6562_v31 = vcombine.low %v3062_v35, %v3072_v21  ;;  %v1193_v39 = vrot.slane %v1192_v28, 4  ;;  %v3079_v42 = vrot.slane %v3077_v30, 5  ;;  %v905_v58 = vld [vmem:[#allocation2 + $0x2c] sm:$0x1]  ;;  %v3008_v0 = vld [vmem:[#allocation2 + $0x28] sm:$0xf] }
  0x36   : > { %v3093_v23 = vshll.u32 %v8332_v25, 16  ;;  %vm2178_vm12 = vcmask 1042432   ;;  %vm2179_vm13 = vcmask 1046532   ;;  %v1188_v45 = vsel %vm8313_vm11, %v1183_v32, %v1187_v17  ;;  %v1091_v10 = vld [vmem:[#allocation2 + $0x28] sm:$0xf] }
  0x37   : > { %7176 = vmatprep.mubr.bf16.mxu1 %v6402_v15  ;;  %7368 = vmatprep.mubr.bf16.mxu0 %v6562_v31  ;;  %v3085_v47 = vrot.slane %v3083_v34, 5  ;;  %v3089_v48 = vrot.slane %v3087_v36, 4  ;;  %v3828_v49 = vrot.slane %v8328_v20, 5  ;;  %v1198_v52 = vsel %vm8313_vm11, %v1193_v39, %v1197_v24  ;;  %v464_v15 = vld [vmem:[#allocation2 + $0x30] sm:$0x1]  ;;  %v7907_v35 = vld [vmem:[%s10040_s3 + $0x148] sm:$0xff]   ;;  %vm8385_vm14 = vmor %vm2178_vm12, %vm2179_vm13 }
  0x38   : > { %v3080_v54 = vor.u32 %v3079_v42, %v3076_v40  ;;  %v3095_v55 = vrot.slane %v3093_v23, 5  ;;  %v3831_v56 = vrot.slane %v8332_v25, 5  ;;  %v6403_v59 = vcombine.low %v1188_v45, %v1198_v52  ;;  %v419_v21 = vld [vmem:[%s8205_s24 + $0x18] sm:$0xf]  ;;  %v420_v34 = vld [vmem:[%s8205_s24 + $0x1c] sm:$0xf] }
  0x39   : > { %v3090_v60 = vor.u32 %v3089_v48, %v3085_v47  ;;  %v8353_v61 = vrot.slane %v3828_v49, 4  ;;  %v1200_v62 = vshrl.u32 %v1088_v37, 16  ;;  %v1203_v2 = vshll.u32 %v1088_v37, 16  ;;  %v467_v23 = vld [vmem:[#allocation2 + $0x3c] sm:$0x1] }
  0x3a   : > { %v3081_v1 = vrot.slane %v3080_v54, 4  ;;  %v1209_v3 = vshll.u32 %v1089_v43, 16  ;;  %v1213_v4 = vshrl.u32 %v1089_v43, 16  ;;  %7177 = vmatmul.mubr.bf16.vlgmr.msra.gmra.mrb[0].mxu1 %v6403_v59  ;;  %v1219_v8 = vshll.u32 %v1134_v50, 16  ;;  %v523_v50 = vld [vmem:[#allocation2 + $0x44] sm:$0x1] }
  0x3b   : > { %v3091_v5 = vrot.slane %v3090_v60, 4  ;;  %v1202_v6 = vrot.slane %v1200_v62, 4  ;;  %v614_v9 = vrot.slane %v8302_v26, 4  ;;  %7209 = vmatpush3.bf16.msra.mxu1 %v8264_v53  ;;  %v1205_v11 = vrot.slane %v1203_v2, 5  ;;  %v7911_v53 = vld [vmem:[%s10040_s3 + $0x10] sm:$0xff]  }
  0x3c   : > { %v3086_v7 = vsel %vm8313_vm11, %v3081_v1, %v3085_v47  ;;  %v1211_v12 = vrot.slane %v1209_v3, 5  ;;  %v1215_v13 = vrot.slane %v1213_v4, 4  ;;  %v1221_v17 = vrot.slane %v1219_v8, 5  ;;  %7210 = vmatprep.subr.bf16.mxu1 %v7908_v51  ;;  %v8404_v1 = vld [vmem:[%s10040_s3 + $0x20] sm:$0xff]   ;;  %v8409_v4 = vld [vmem:[%s10040_s3 + $0x158] sm:$0xff]  }
  0x3d   : > { %v3096_v16 = vsel %vm8313_vm11, %v3091_v5, %v3095_v55  ;;  %v902_v19 = vsel %vm8243_vm7, %v8335_v27, %v901_v57  ;;  %v906_v26 = vsel %vm8209_vm3, %v614_v9, %v905_v58  ;;  %v1206_v28 = vor.u32 %v1205_v11, %v1202_v6  ;;  %v7909_v57 = vld [vmem:[%s10040_s3 + $0x150] sm:$0xff]   ;;  %v7914_v58 = vld [vmem:[%s10040_s3 + $0x18] sm:$0xff]   ;;  %v4642_v38 = vld [vmem:[#allocation2 + $0x20] sm:$0x1] }
  0x3e   : > { %v6563_v24 = vcombine.low %v3086_v7, %v3096_v16  ;;  %v1216_v29 = vor.u32 %v1215_v13, %v1211_v12  ;;  %903 = vst [vmem:[#allocation2 + $0x24] sm:$0xf] %v902_v19  ;;  %907 = vst [vmem:[#allocation2 + $0x2c] sm:$0x1] %v906_v26  ;;  %v3107_v27 = vshll.u32 %v3008_v0, 16  ;;  %v3111_v30 = vshrl.u32 %v3008_v0, 16 }
  0x3f   : > { %v1233_v31 = vshll.u32 %v1091_v10, 16  ;;  %v1237_v32 = vshrl.u32 %v1091_v10, 16  ;;  %v465_v36 = vsel %vm8209_vm3, 0, %v464_v15  ;;  %v1207_v37 = vrot.slane %v1206_v28, 4  ;;  %7211 = vmatpush3.bf16.msra.mxu1 %v7908_v51  ;;  %v421_v26 = vld [vmem:[%s8205_s24 + $0x20] sm:$0xf] }
  0x40   : > { %7369 = vmatmul.mubr.bf16.vlgmr.msra.gmra.mrb[0].mxu0 %v6563_v24  ;;  %v1217_v39 = vrot.slane %v1216_v29, 4  ;;  %v8376_v40 = vrot.slane %v3107_v27, 5  ;;  %466 = vst [vmem:[#allocation2 + $0x30] sm:$0x1] %v465_v36  ;;  %v521_v42 = vsel %vm8217_vm4, 0, %v520_v22  ;;  %v3113_v43 = vrot.slane %v3111_v30, 4  ;;  %7212 = vmatprep.subr.bf16.mxu1 %v7911_v53 }
  0x41   : > { %7401 = vmatpush3.bf16.msra.mxu0 %v8277_v63  ;;  %v8381_v45 = vrot.slane %v1233_v31, 5  ;;  %v1239_v47 = vrot.slane %v1237_v32, 4  ;;  %522 = vst [vmem:[#allocation2 + $0x38] sm:$0x1] %v521_v42  ;;  %v616_v48 = vshrl.u32 %v419_v21, 16  ;;  %v10082_v52 = vmov 0 }
  0x42   : > { %v10083_v52 = vsel %vm8385_vm14, 4294967295, %v10082_v52  ;;  %7402 = vmatprep.subr.bf16.mxu0 %v7907_v35  ;;  %v1212_v51 = vsel %vm8313_vm11, %v1207_v37, %v1211_v12  ;;  %v1222_v63 = vsel %vm8313_vm11, %v1217_v39, %v1221_v17  ;;  %v619_v54 = vshll.u32 %v419_v21, 16  ;;  %v8431_v21 = vld [vmem:[%s8205_s24 + $0x24] sm:$0xf]  ;;  %v7919_v37 = vld [vmem:[%s10040_s3 + $0x28] sm:$0xff]  }
  0x43   : > { %10084 = vst [vmem:[#allocation5_spill] sm:$0xff] %v10083_v52  ;;  %v624_v55 = vshrl.u32 %v420_v34, 16  ;;  %v6404_v59 = vcombine.low %v1212_v51, %v1222_v63  ;;  %v3114_v60 = vor.u32 %v3113_v43, %v8376_v40  ;;  %v1240_v62 = vor.u32 %v1239_v47, %v8381_v45  ;;  %7213 = vmatpush3.bf16.msra.mxu1 %v7911_v53  ;;  %v8445_v43 = vld [vmem:[%s8205_s24 + $0x28] sm:$0xf] }
  0x44   : > { %v618_v0 = vrot.slane %v616_v48, 7  ;;  %v627_v3 = vshll.u32 %v420_v34, 16  ;;  %v468_v5 = vsel %vm8209_vm3, 0, %v467_v23  ;;  %v524_v6 = vsel %vm8217_vm4, 0, %v523_v50  ;;  %7214 = vmatprep.subr.bf16.mxu1 %v7914_v58  ;;  %v470_v47 = vld [vmem:[#allocation2 + $0x48] sm:$0x1] }
  0x45   : > { %v626_v2 = vrot.slane %v624_v55, 7  ;;  %7403 = vmatpush3.bf16.msra.mxu0 %v7907_v35  ;;  %7180 = vmatprep.mubr.bf16.mxu1 %v6404_v59  ;;  %v3007_v8 = vld [vmem:[#allocation2 + $0x24] sm:$0xf]  ;;  %v8415_v9 = vld [vmem:[#allocation2 + $0x2c] sm:$0x1]  ;;  %v8417_v10 = vrot.slane %v3114_v60, 4  ;;  %v8426_v12 = vsel %vm8385_vm14, %v8353_v61, %v3831_v56 }
  0x46   : > { %v8419_v7 = vrot.slane %v1240_v62, 4  ;;  %v621_v11 = vor.u32 %v619_v54, %v618_v0  ;;  %469 = vst [vmem:[#allocation2 + $0x3c] sm:$0x1] %v468_v5  ;;  %525 = vst [vmem:[#allocation2 + $0x44] sm:$0x1] %v524_v6  ;;  %v3098_v13 = vshrl.u32 %v3007_v8, 16  ;;  %7404 = vmatprep.subr.bf16.mxu0 %v7909_v57 }
  0x47   : > { %v3101_v15 = vshll.u32 %v3007_v8, 16  ;;  %v3117_v16 = vshll.u32 %v8415_v9, 16  ;;  %v1090_v17 = vld [vmem:[#allocation2 + $0x24] sm:$0xf]  ;;  %v622_v19 = vrot.slane %v618_v0, 4  ;;  %v629_v25 = vor.u32 %v627_v3, %v626_v2  ;;  %7215 = vmatpush3.bf16.msra.mxu1 %v7914_v58 }
  0x48   : > { %v1135_v22 = vld [vmem:[#allocation2 + $0x2c] sm:$0x1]  ;;  %v1224_v53 = vshrl.u32 %v1090_v17, 16  ;;  %v1227_v24 = vshll.u32 %v1090_v17, 16  ;;  %v631_v35 = vrot.slane %v626_v2, 4  ;;  %v3100_v28 = vrot.slane %v3098_v13, 4  ;;  %7216 = vmatprep.subr.bf16.mxu1 %v8404_v1 }
  0x49   : > { %v3103_v29 = vrot.slane %v3101_v15, 5  ;;  %v3119_v56 = vrot.slane %v3117_v16, 5  ;;  %v1243_v61 = vshll.u32 %v1135_v22, 16  ;;  %v908_v27 = vld [vmem:[#allocation2 + $0x30] sm:$0xf]  ;;  %v630_v32 = vsel %vm8255_vm8, %v622_v19, %v629_v25  ;;  %7405 = vmatpush3.bf16.msra.mxu0 %v7909_v57  ;;  %v7912_v48 = vld [vmem:[%s10040_s3 + $0x160] sm:$0xff]  }
  0x4a   : > { %v1226_v30 = vrot.slane %v1224_v53, 4  ;;  %v1229_v31 = vrot.slane %v1227_v24, 5  ;;  %v909_v34 = vsel %vm8243_vm7, %v621_v11, %v908_v27  ;;  %v912_v36 = vld [vmem:[#allocation2 + $0x38] sm:$0x1]  ;;  %911 = vst [vmem:[#allocation2 + $0x34] sm:$0xf] %v630_v32  ;;  %7406 = vmatprep.subr.bf16.mxu0 %v8409_v4 }
  0x4b   : > { %v3104_v39 = vor.u32 %v3103_v29, %v3100_v28  ;;  %v1245_v42 = vrot.slane %v1243_v61, 5  ;;  %910 = vst [vmem:[#allocation2 + $0x30] sm:$0xf] %v909_v34  ;;  %v913_v23 = vsel %vm8209_vm3, %v631_v35, %v912_v36  ;;  %v633_v51 = vshrl.u32 %v421_v26, 16  ;;  %v526_v55 = vld [vmem:[#allocation2 + $0x50] sm:$0x1]  ;;  %7217 = vmatpush3.bf16.msra.mxu1 %v8404_v1 }
  0x4c   : > { %v1230_v50 = vor.u32 %v1229_v31, %v1226_v30  ;;  %914 = vst [vmem:[#allocation2 + $0x38] sm:$0x1] %v913_v23  ;;  %v636_v63 = vshll.u32 %v421_v26, 16  ;;  %v641_v54 = vshrl.u32 %v8431_v21, 16  ;;  %v3120_v58 = vsel %vm8313_vm11, %v8417_v10, %v3119_v56  ;;  %7218 = vmatprep.subr.bf16.mxu1 %v7919_v37  ;;  %v7921_v15 = vld [vmem:[%s10040_s3 + $0x30] sm:$0xff]  }
  0x4d   : > { %v3105_v57 = vrot.slane %v3104_v39, 4  ;;  %v1246_v59 = vsel %vm8313_vm11, %v8419_v7, %v1245_v42  ;;  %v644_v60 = vshll.u32 %v8431_v21, 16  ;;  %v915_v62 = vld [vmem:[#allocation2 + $0x3c] sm:$0xf]  ;;  %7407 = vmatpush3.bf16.msra.mxu0 %v8409_v4  ;;  %v635_v2 = vrot.slane %v633_v51, 7  ;;  %v7913_v4 = vld [vmem:[%s10040_s3 + $0x168] sm:$0xff]  }
  0x4e   : > { %v1231_v0 = vrot.slane %v1230_v50, 4  ;;  %v643_v3 = vrot.slane %v641_v54, 7  ;;  %v471_v5 = vsel %vm8209_vm3, 0, %v470_v47  ;;  %v527_v8 = vsel %vm8217_vm4, 0, %v526_v55  ;;  %7408 = vmatprep.subr.bf16.mxu0 %v7912_v48  ;;  %v919_v26 = vld [vmem:[#allocation2 + $0x44] sm:$0x1] }
  0x4f   : > { %v3110_v6 = vsel %vm8313_vm11, %v3105_v57, %v8376_v40  ;;  %472 = vst [vmem:[#allocation2 + $0x48] sm:$0x1] %v471_v5  ;;  %v650_v10 = vshrl.u32 %v8445_v43, 16  ;;  %v653_v1 = vshll.u32 %v8445_v43, 16  ;;  %v638_v13 = vor.u32 %v636_v63, %v635_v2  ;;  %528 = vst [vmem:[#allocation2 + $0x50] sm:$0x1] %v527_v8  ;;  %7219 = vmatpush3.bf16.msra.mxu1 %v7919_v37 }
  0x50   : > { %v6564_v7 = vcombine.low %v3110_v6, %v3120_v58  ;;  %v1236_v11 = vsel %vm8313_vm11, %v1231_v0, %v8381_v45  ;;  %v639_v40 = vrot.slane %v635_v2, 4  ;;  %v646_v17 = vor.u32 %v644_v60, %v643_v3  ;;  %v7915_v22 = vld [vmem:[%s10040_s3 + $0x170] sm:$0xff]   ;;  %7220 = vmatprep.subr.bf16.mxu1 %v7921_v15  ;;  %v7916_v43 = vld [vmem:[%s10040_s3 + $0x178] sm:$0xff]   ;;  %v8500_v63 = vld [vmem:[%s8205_s24 + $0x2c] sm:$0xf] }
  0x51   : > { %v6405_v16 = vcombine.low %v1236_v11, %v1246_v59  ;;  %v648_v19 = vrot.slane %v643_v3, 4  ;;  %v8478_v21 = vrot.slane %v650_v10, 7  ;;  %v8483_v53 = vld [vmem:[#allocation2 + $0x34] sm:$0xf]  ;;  %v916_v25 = vsel %vm8243_vm7, %v638_v13, %v915_v62  ;;  %7409 = vmatpush3.bf16.msra.mxu0 %v7912_v48 }
  0x52   : > { %7372 = vmatprep.mubr.bf16.mxu0 %v6564_v7  ;;  %v3010_v45 = vld [vmem:[#allocation2 + $0x30] sm:$0xf]  ;;  %v3131_v56 = vshll.u32 %v8483_v53, 16  ;;  %v3135_v61 = vshrl.u32 %v8483_v53, 16  ;;  %917 = vst [vmem:[#allocation2 + $0x3c] sm:$0xf] %v916_v25  ;;  %7410 = vmatprep.subr.bf16.mxu0 %v7913_v4  ;;  %v647_v34 = vsel %vm8255_vm8, %v639_v40, %v646_v17 }
  0x53   : > { %v1092_v24 = vld [vmem:[#allocation2 + $0x30] sm:$0xf]  ;;  %7181 = vmatmul.mubr.bf16.gmra.mrb[4].mxu1 %v6405_v16  ;;  %v8487_v35 = vld [vmem:[#allocation2 + $0x38] sm:$0x1]  ;;  %v3122_v28 = vshrl.u32 %v3010_v45, 16  ;;  %v3125_v29 = vshll.u32 %v3010_v45, 16  ;;  %v920_v36 = vsel %vm8209_vm3, %v648_v19, %v919_v26  ;;  %v655_v0 = vor.u32 %v653_v1, %v8478_v21 }
  0x54   : > { %v3141_v27 = vshll.u32 %v8487_v35, 16  ;;  %v1093_v30 = vld [vmem:[#allocation2 + $0x34] sm:$0xf]  ;;  %v1136_v31 = vld [vmem:[#allocation2 + $0x38] sm:$0x1]  ;;  %v1248_v32 = vshrl.u32 %v1092_v24, 16  ;;  %7221 = vmatpush3.bf16.msra.mxu1 %v7921_v15 }
  0x55   : > { %v3124_v37 = vrot.slane %v3122_v28, 4  ;;  %v3127_v39 = vrot.slane %v3125_v29, 5  ;;  %v3133_v42 = vrot.slane %v3131_v56, 5  ;;  %v3137_v23 = vrot.slane %v3135_v61, 4  ;;  %918 = vst [vmem:[#allocation2 + $0x40] sm:$0xf] %v647_v34  ;;  %7411 = vmatpush3.bf16.msra.mxu0 %v7913_v4 }
  0x56   : > { %921 = vst [vmem:[#allocation2 + $0x44] sm:$0x1] %v920_v36  ;;  %v3143_v47 = vrot.slane %v3141_v27, 5  ;;  %v1250_v48 = vrot.slane %v1248_v32, 4  ;;  %v1251_v50 = vshll.u32 %v1092_v24, 16  ;;  %v1257_v51 = vshll.u32 %v1093_v30, 16  ;;  %7412 = vmatprep.subr.bf16.mxu0 %v7915_v22 }
  0x57   : > { %v3128_v54 = vor.u32 %v3127_v39, %v3124_v37  ;;  %v3138_v55 = vor.u32 %v3137_v23, %v3133_v42  ;;  %v1261_v57 = vshrl.u32 %v1093_v30, 16  ;;  %v1267_v58 = vshll.u32 %v1136_v31, 16  ;;  %v922_v59 = vld [vmem:[#allocation2 + $0x48] sm:$0xf]  ;;  %v8515_v19 = vld [vmem:[%s10040_s3 + $0x180] sm:$0xff]   ;;  %v7923_v37 = vld [vmem:[%s10040_s3 + $0x38] sm:$0xff]  }
  0x58   : > { %v1253_v60 = vrot.slane %v1251_v50, 5  ;;  %v1259_v62 = vrot.slane %v1257_v51, 5  ;;  %v656_v2 = vrot.slane %v8478_v21, 4  ;;  %v658_v4 = vshrl.u32 %v8500_v63, 16  ;;  %v473_v27 = vld [vmem:[#allocation2 + $0x54] sm:$0x1]  ;;  %7222 = vmatprep.subr.bf16.mxu1 %v7923_v37 }
  0x59   : > { %v3129_v3 = vrot.slane %v3128_v54, 4  ;;  %v3139_v5 = vrot.slane %v3138_v55, 4  ;;  %v1263_v6 = vrot.slane %v1261_v57, 4  ;;  %v1269_v8 = vrot.slane %v1267_v58, 5  ;;  %v3013_v7 = vld [vmem:[#allocation2 + $0x3c] sm:$0xf]  ;;  %7413 = vmatpush3.bf16.msra.mxu0 %v7915_v22  ;;  %7223 = vmatpush3.bf16.msra.mxu1 %v7923_v37 }
  0x5a   : > { %v1254_v10 = vor.u32 %v1253_v60, %v1250_v48  ;;  %v661_v11 = vshll.u32 %v8500_v63, 16  ;;  %v923_v13 = vsel %vm8243_vm7, %v655_v0, %v922_v59  ;;  %v3146_v16 = vshrl.u32 %v3013_v7, 16  ;;  %v1094_v17 = vld [vmem:[#allocation2 + $0x3c] sm:$0xf]  ;;  %7414 = vmatprep.subr.bf16.mxu0 %v7916_v43 }
  0x5b   : > { %v3134_v40 = vsel %vm8313_vm11, %v3129_v3, %v3133_v42  ;;  %v3144_v1 = vsel %vm8313_vm11, %v3139_v5, %v3143_v47  ;;  %v1264_v15 = vor.u32 %v1263_v6, %v1259_v62  ;;  %924 = vst [vmem:[#allocation2 + $0x48] sm:$0xf] %v923_v13  ;;  %v3149_v25 = vshll.u32 %v3013_v7, 16  ;;  %v926_v7 = vld [vmem:[#allocation2 + $0x50] sm:$0x1] }
  0x5c   : > { %v6565_v26 = vcombine.low %v3134_v40, %v3144_v1  ;;  %v1255_v45 = vrot.slane %v1254_v10, 4  ;;  %v8517_v24 = vld [vmem:[#allocation2 + $0x40] sm:$0xf]  ;;  %v3148_v29 = vrot.slane %v3146_v16, 4  ;;  %v1272_v36 = vshrl.u32 %v1094_v17, 16 }
  0x5d   : > { %v8519_v22 = vld [vmem:[#allocation2 + $0x44] sm:$0x1]  ;;  %v1265_v28 = vrot.slane %v1264_v15, 4  ;;  %v3155_v56 = vshll.u32 %v8517_v24, 16  ;;  %v3159_v61 = vshrl.u32 %v8517_v24, 16  ;;  %v3151_v31 = vrot.slane %v3149_v25, 5  ;;  %7415 = vmatpush3.bf16.msra.mxu0 %v7916_v43 }
  0x5e   : > { %7373 = vmatmul.mubr.bf16.gmra.mrb[4].mxu0 %v6565_v26  ;;  %v1260_v30 = vsel %vm8313_vm11, %v1255_v45, %v1259_v62  ;;  %v3165_v32 = vshll.u32 %v8519_v22, 16  ;;  %v1095_v34 = vld [vmem:[#allocation2 + $0x40] sm:$0xf]  ;;  %v1137_v47 = vld [vmem:[#allocation2 + $0x44] sm:$0x1]  ;;  %v1275_v48 = vshll.u32 %v1094_v17, 16  ;;  %7448 = vmatprep.subr.bf16.mxu0 %v8515_v19 }
  0x5f   : > { %v1270_v39 = vsel %vm8313_vm11, %v1265_v28, %v1269_v8  ;;  %v3157_v42 = vrot.slane %v3155_v56, 5  ;;  %v3161_v23 = vrot.slane %v3159_v61, 4  ;;  %v3152_v51 = vor.u32 %v3151_v31, %v3148_v29  ;;  %v425_v13 = vld [vmem:[%s8205_s24 + $0x30] sm:$0xf]  ;;  %v529_v40 = vld [vmem:[#allocation2 + $0x5c] sm:$0x1] }
  0x60   : > { %v6406_v50 = vcombine.low %v1260_v30, %v1270_v39  ;;  %v3167_v63 = vrot.slane %v3165_v32, 5  ;;  %v1274_v54 = vrot.slane %v1272_v36, 4  ;;  %v1277_v57 = vrot.slane %v1275_v48, 5  ;;  %v426_v30 = vld [vmem:[%s8205_s24 + $0x34] sm:$0xf] }
  0x61   : > { %v3162_v55 = vor.u32 %v3161_v23, %v3157_v42  ;;  %v1281_v58 = vshll.u32 %v1095_v34, 16  ;;  %v1285_v59 = vshrl.u32 %v1095_v34, 16  ;;  %v3153_v60 = vrot.slane %v3152_v51, 4  ;;  %v476_v36 = vld [vmem:[#allocation2 + $0x60] sm:$0x1] }
  0x62   : > { %7184 = vmatprep.mubr.bf16.mxu1 %v6406_v50  ;;  %v1291_v62 = vshll.u32 %v1137_v47, 16  ;;  %v660_v0 = vrot.slane %v658_v4, 7  ;;  %v3016_v3 = vld [vmem:[#allocation2 + $0x48] sm:$0xf]  ;;  %v474_v43 = vsel %vm8209_vm3, 0, %v473_v27  ;;  %v1278_v6 = vor.u32 %v1277_v57, %v1274_v54 }
  0x63   : > { %v3163_v5 = vrot.slane %v3162_v55, 4  ;;  %v1283_v8 = vrot.slane %v1281_v58, 5  ;;  %v1287_v10 = vrot.slane %v1285_v59, 4  ;;  %475 = vst [vmem:[#allocation2 + $0x54] sm:$0x1] %v474_v43  ;;  %v3158_v1 = vsel %vm8313_vm11, %v3153_v60, %v3157_v42 }
  0x64   : > { %v1293_v15 = vrot.slane %v1291_v62, 5  ;;  %v663_v16 = vor.u32 %v661_v11, %v660_v0  ;;  %v665_v17 = vrot.slane %v660_v0, 4  ;;  %v1096_v4 = vld [vmem:[#allocation2 + $0x48] sm:$0xf]  ;;  %v1279_v45 = vrot.slane %v1278_v6, 4  ;;  %v7927_v11 = vld [vmem:[%s10040_s3 + $0x80] sm:$0xff]  }
  0x65   : > { %v3168_v26 = vsel %vm8313_vm11, %v3163_v5, %v3167_v63  ;;  %v1288_v25 = vor.u32 %v1287_v10, %v1283_v8  ;;  %v3170_v28 = vshrl.u32 %v3016_v3, 16  ;;  %v3173_v27 = vshll.u32 %v3016_v3, 16  ;;  %v532_v23 = vld [vmem:[#allocation2 + $0x68] sm:$0x1]  ;;  %7256 = vmatprep.subr.bf16.mxu1 %v7927_v11  ;;  %v427_v58 = vld [vmem:[%s8205_s24 + $0x38] sm:$0xf] }
  0x66   : > { %v6566_v29 = vcombine.low %v3158_v1, %v3168_v26  ;;  %v664_v56 = vsel %vm8255_vm8, %v656_v2, %v663_v16  ;;  %v927_v61 = vsel %vm8209_vm3, %v665_v17, %v926_v7  ;;  %v1284_v31 = vsel %vm8313_vm11, %v1279_v45, %v1283_v8 }
  0x67   : > { %v1289_v32 = vrot.slane %v1288_v25, 4  ;;  %925 = vst [vmem:[#allocation2 + $0x4c] sm:$0xf] %v664_v56  ;;  %928 = vst [vmem:[#allocation2 + $0x50] sm:$0x1] %v927_v61  ;;  %v3172_v34 = vrot.slane %v3170_v28, 4 }
  0x68   : > { %v1296_v21 = vshrl.u32 %v1096_v4, 16  ;;  %7376 = vmatprep.mubr.bf16.mxu0 %v6566_v29  ;;  %v3175_v2 = vrot.slane %v3173_v27, 5  ;;  %v1299_v37 = vshll.u32 %v1096_v4, 16  ;;  %v530_v39 = vsel %vm8217_vm4, 0, %v529_v40  ;;  %v428_v4 = vld [vmem:[%s8205_s24 + $0x3c] sm:$0xf] }
  0x69   : > { %v667_v42 = vshrl.u32 %v425_v13, 16  ;;  %v1294_v47 = vsel %vm8313_vm11, %v1289_v32, %v1293_v15  ;;  %531 = vst [vmem:[#allocation2 + $0x5c] sm:$0x1] %v530_v39  ;;  %v670_v50 = vshll.u32 %v425_v13, 16  ;;  %v675_v51 = vshrl.u32 %v426_v30, 16 }
  0x6a   : > { %v1298_v48 = vrot.slane %v1296_v21, 4  ;;  %v6407_v63 = vcombine.low %v1284_v31, %v1294_v47  ;;  %v3176_v54 = vor.u32 %v3175_v2, %v3172_v34  ;;  %v1301_v55 = vrot.slane %v1299_v37, 5  ;;  %v929_v62 = vld [vmem:[#allocation2 + $0x54] sm:$0xf] }
  0x6b   : > { %v669_v57 = vrot.slane %v667_v42, 7  ;;  %v677_v59 = vrot.slane %v675_v51, 7  ;;  %v678_v60 = vshll.u32 %v426_v30, 16  ;;  %v477_v0 = vsel %vm8209_vm3, 0, %v476_v36  ;;  %v8577_v42 = vld [vmem:[#allocation2 + $0xc] sm:$0xe] }
  0x6c   : > { %v533_v3 = vsel %vm8217_vm4, 0, %v532_v23  ;;  %v3824_v43 = vrot.slane %v8317_v46, 5  ;;  %7185 = vmatmul.mubr.bf16.gmra.mrb[8].mxu1 %v6407_v63  ;;  %v8561_v5 = vrot.slane %v3176_v54, 4  ;;  %478 = vst [vmem:[#allocation2 + $0x60] sm:$0x1] %v477_v0  ;;  %v1302_v10 = vor.u32 %v1301_v55, %v1298_v48 }
  0x6d   : > { %v672_v6 = vor.u32 %v670_v50, %v669_v57  ;;  %v673_v8 = vrot.slane %v669_v57, 4  ;;  %534 = vst [vmem:[#allocation2 + $0x68] sm:$0x1] %v533_v3  ;;  %v680_v7 = vor.u32 %v678_v60, %v677_v59  ;;  %v682_v13 = vrot.slane %v677_v59, 4  ;;  %v479_v63 = vld [vmem:[#allocation2 + $0x6c] sm:$0x1] }
  0x6e   : > { %v684_v40 = vshrl.u32 %v427_v58, 16  ;;  %v8563_v1 = vld [vmem:[#allocation2 + $0x4c] sm:$0xf]  ;;  %v8565_v15 = vld [vmem:[#allocation2 + $0x50] sm:$0x1]  ;;  %v687_v29 = vshll.u32 %v427_v58, 16 }
  0x6f   : > { %v1097_v16 = vld [vmem:[#allocation2 + $0x4c] sm:$0xf]  ;;  %v930_v17 = vsel %vm8243_vm7, %v672_v6, %v929_v62  ;;  %v3179_v26 = vshll.u32 %v8563_v1, 16  ;;  %v3183_v45 = vshrl.u32 %v8563_v1, 16  ;;  %v3189_v25 = vshll.u32 %v8565_v15, 16 }
  0x70   : > { %v1138_v28 = vld [vmem:[#allocation2 + $0x50] sm:$0x1]  ;;  %931 = vst [vmem:[#allocation2 + $0x54] sm:$0xf] %v930_v17  ;;  %v1305_v56 = vshll.u32 %v1097_v16, 16  ;;  %v1309_v61 = vshrl.u32 %v1097_v16, 16  ;;  %v681_v30 = vsel %vm8255_vm8, %v673_v8, %v680_v7 }
  0x71   : > { %v1315_v27 = vshll.u32 %v1138_v28, 16  ;;  %v933_v11 = vld [vmem:[#allocation2 + $0x5c] sm:$0x1]  ;;  %v3181_v31 = vrot.slane %v3179_v26, 5  ;;  %v3185_v32 = vrot.slane %v3183_v45, 4  ;;  %v1303_v34 = vrot.slane %v1302_v10, 4 }
  0x72   : > { %932 = vst [vmem:[#allocation2 + $0x58] sm:$0xf] %v681_v30  ;;  %v934_v21 = vsel %vm8209_vm3, %v682_v13, %v933_v11  ;;  %v3191_v36 = vrot.slane %v3189_v25, 5  ;;  %v1307_v2 = vrot.slane %v1305_v56, 5  ;;  %v1311_v37 = vrot.slane %v1309_v61, 4 }
  0x73   : > { %935 = vst [vmem:[#allocation2 + $0x5c] sm:$0x1] %v934_v21  ;;  %v686_v39 = vrot.slane %v684_v40, 7  ;;  %v3182_v23 = vsel %vm8313_vm11, %v8561_v5, %v3181_v31  ;;  %v3186_v47 = vor.u32 %v3185_v32, %v3181_v31  ;;  %v1317_v48 = vrot.slane %v1315_v27, 5  ;;  %v936_v51 = vld [vmem:[#allocation2 + $0x60] sm:$0xf] }
  0x74   : > { %v692_v50 = vshrl.u32 %v428_v4, 16  ;;  %v1312_v54 = vor.u32 %v1311_v37, %v1307_v2  ;;  %v695_v58 = vshll.u32 %v428_v4, 16  ;;  %v6586_v62 = vrot.slane %v8577_v42, 9 }
  0x75   : > { %v689_v55 = vor.u32 %v687_v29, %v686_v39  ;;  %v690_v57 = vrot.slane %v686_v39, 4  ;;  %v3187_v59 = vrot.slane %v3186_v47, 4  ;;  %v3821_v0 = vrot.slane %v8307_v33, 5 }
  0x76   : > { %v694_v60 = vrot.slane %v692_v50, 7  ;;  %v1308_v3 = vsel %vm8313_vm11, %v1303_v34, %v1307_v2  ;;  %v1313_v6 = vrot.slane %v1312_v54, 4  ;;  %v480_v7 = vsel %vm8209_vm3, 0, %v479_v63 }
  0x77   : > { %v3019_v5 = vld [vmem:[#allocation2 + $0x54] sm:$0xf]  ;;  %v937_v10 = vsel %vm8243_vm7, %v689_v55, %v936_v51  ;;  %v3192_v13 = vsel %vm8313_vm11, %v3187_v59, %v3191_v36  ;;  %481 = vst [vmem:[#allocation2 + $0x6c] sm:$0x1] %v480_v7  ;;  %v940_v59 = vld [vmem:[#allocation2 + $0x68] sm:$0x1] }
  0x78   : > { %v1098_v8 = vld [vmem:[#allocation2 + $0x54] sm:$0xf]  ;;  %v3194_v40 = vshrl.u32 %v3019_v5, 16  ;;  %v3197_v16 = vshll.u32 %v3019_v5, 16  ;;  %938 = vst [vmem:[#allocation2 + $0x60] sm:$0xf] %v937_v10  ;;  %v6567_v4 = vcombine.low %v3182_v23, %v3192_v13  ;;  %v1318_v26 = vsel %vm8313_vm11, %v1313_v6, %v1317_v48 }
  0x79   : > { %v1320_v17 = vshrl.u32 %v1098_v8, 16  ;;  %v8594_v45 = vld [vmem:[#allocation2 + $0x58] sm:$0xf]  ;;  %v1323_v28 = vshll.u32 %v1098_v8, 16  ;;  %v697_v29 = vor.u32 %v695_v58, %v694_v60  ;;  %v6408_v56 = vcombine.low %v1308_v3, %v1318_v26 }
  0x7a   : > { %v1099_v25 = vld [vmem:[#allocation2 + $0x58] sm:$0xf]  ;;  %v8596_v61 = vld [vmem:[#allocation2 + $0x5c] sm:$0x1]  ;;  %v3196_v27 = vrot.slane %v3194_v40, 4  ;;  %v3199_v30 = vrot.slane %v3197_v16, 5  ;;  %7377 = vmatmul.mubr.bf16.gmra.mrb[8].mxu0 %v6567_v4 }
  0x7b   : > { %v3203_v11 = vshll.u32 %v8594_v45, 16  ;;  %v3207_v31 = vshrl.u32 %v8594_v45, 16  ;;  %v3213_v32 = vshll.u32 %v8596_v61, 16  ;;  %v1139_v34 = vld [vmem:[#allocation2 + $0x5c] sm:$0x1]  ;;  %v1322_v21 = vrot.slane %v1320_v17, 4  ;;  %7188 = vmatprep.mubr.bf16.mxu1 %v6408_v56 }
  0x7c   : > { %v1325_v36 = vrot.slane %v1323_v28, 5  ;;  %v3200_v2 = vor.u32 %v3199_v30, %v3196_v27  ;;  %v1329_v39 = vshll.u32 %v1099_v25, 16  ;;  %v1333_v23 = vshrl.u32 %v1099_v25, 16  ;;  %v429_v28 = vld [vmem:[%s8205_s24 + $0x40] sm:$0xf] }
  0x7d   : > { %v3205_v37 = vrot.slane %v3203_v11, 5  ;;  %v3209_v47 = vrot.slane %v3207_v31, 4  ;;  %v3215_v48 = vrot.slane %v3213_v32, 5  ;;  %v1339_v51 = vshll.u32 %v1139_v34, 16  ;;  %v535_v30 = vld [vmem:[#allocation2 + $0x74] sm:$0x1] }
  0x7e   : > { %v1326_v50 = vor.u32 %v1325_v36, %v1322_v21  ;;  %v3201_v63 = vrot.slane %v3200_v2, 4  ;;  %v1331_v54 = vrot.slane %v1329_v39, 5  ;;  %v1335_v55 = vrot.slane %v1333_v23, 4 }
  0x7f   : > { %v698_v58 = vsel %vm8255_vm8, %v690_v57, %v697_v29  ;;  %v3210_v3 = vor.u32 %v3209_v47, %v3205_v37  ;;  %v1341_v5 = vrot.slane %v1339_v51, 5  ;;  %v699_v8 = vrot.slane %v694_v60, 4  ;;  %v3022_v10 = vld [vmem:[#allocation2 + $0x60] sm:$0xf] }
  0x80   : > { %v1327_v6 = vrot.slane %v1326_v50, 4  ;;  %939 = vst [vmem:[#allocation2 + $0x64] sm:$0xf] %v698_v58  ;;  %v3206_v7 = vsel %vm8313_vm11, %v3201_v63, %v3205_v37  ;;  %v1336_v13 = vor.u32 %v1335_v55, %v1331_v54  ;;  %v3218_v40 = vshrl.u32 %v3022_v10, 16  ;;  %v1100_v17 = vld [vmem:[#allocation2 + $0x60] sm:$0xf] }
  0x81   : > { %v3221_v16 = vshll.u32 %v3022_v10, 16  ;;  %v3211_v4 = vrot.slane %v3210_v3, 4  ;;  %v941_v57 = vsel %vm8209_vm3, %v699_v8, %v940_v59  ;;  %v1344_v25 = vshrl.u32 %v1100_v17, 16  ;;  %v430_v37 = vld [vmem:[%s8205_s24 + $0x44] sm:$0xf] }
  0x82   : > { %v1332_v26 = vsel %vm8313_vm11, %v1327_v6, %v1331_v54  ;;  %v1337_v60 = vrot.slane %v1336_v13, 4  ;;  %942 = vst [vmem:[#allocation2 + $0x68] sm:$0x1] %v941_v57  ;;  %v3220_v29 = vrot.slane %v3218_v40, 4  ;;  %v1347_v27 = vshll.u32 %v1100_v17, 16 }
  0x83   : > { %v3223_v56 = vrot.slane %v3221_v16, 5  ;;  %v3216_v11 = vsel %vm8313_vm11, %v3211_v4, %v3215_v48  ;;  %v1346_v31 = vrot.slane %v1344_v25, 4  ;;  %v3823_v32 = vrot.slane %v3821_v0, 4  ;;  %v3756_v8 = vld [vmem:[#allocation2 + $0x18] sm:$0xe] }
  0x84   : > { %v6568_v34 = vcombine.low %v3206_v7, %v3216_v11  ;;  %v1342_v21 = vsel %vm8313_vm11, %v1337_v60, %v1341_v5  ;;  %v1349_v2 = vrot.slane %v1347_v27, 5  ;;  %v8623_v23 = vsel %vm8385_vm14, %v6586_v62, %v3821_v0  ;;  %v431_v40 = vld [vmem:[%s8205_s24 + $0x48] sm:$0xf]  ;;  %v943_v57 = vld [vmem:[#allocation2 + $0x6c] sm:$0xf] }
  0x85   : > { %v3224_v36 = vor.u32 %v3223_v56, %v3220_v29  ;;  %v6409_v39 = vcombine.low %v1332_v26, %v1342_v21  ;;  %v536_v47 = vsel %vm8217_vm4, 0, %v535_v30  ;;  %v701_v48 = vshrl.u32 %v429_v28, 16  ;;  %v482_v56 = vld [vmem:[#allocation2 + $0x78] sm:$0x1]  ;;  %v538_v27 = vld [vmem:[#allocation2 + $0x80] sm:$0x1] }
  0x86   : > { %7380 = vmatprep.mubr.bf16.mxu0 %v6568_v34  ;;  %v1350_v54 = vor.u32 %v1349_v2, %v1346_v31  ;;  %v8633_v33 = vsel %vm8385_vm14, %v3823_v32, %v3824_v43  ;;  %537 = vst [vmem:[#allocation2 + $0x74] sm:$0x1] %v536_v47  ;;  %v704_v42 = vshll.u32 %v429_v28, 16  ;;  %v709_v6 = vshrl.u32 %v430_v37, 16 }
  0x87   : > { %v8627_v50 = vld [vmem:[#allocation2 + $0x64] sm:$0xf]  ;;  %v3225_v51 = vrot.slane %v3224_v36, 4  ;;  %7189 = vmatmul.mubr.bf16.gmra.mrb[12].mxu1 %v6409_v39  ;;  %v703_v3 = vrot.slane %v701_v48, 7  ;;  %v712_v5 = vshll.u32 %v430_v37, 16  ;;  %v6618_v13 = vcombine.low %v8623_v23, %v8633_v33 }
  0x88   : > { %v1101_v63 = vld [vmem:[#allocation2 + $0x64] sm:$0xf]  ;;  %v3227_v62 = vshll.u32 %v8627_v50, 16  ;;  %v3231_v0 = vshrl.u32 %v8627_v50, 16  ;;  %v1351_v59 = vrot.slane %v1350_v54, 4  ;;  %v711_v21 = vrot.slane %v709_v6, 7 }
  0x89   : > { %v1353_v55 = vshll.u32 %v1101_v63, 16  ;;  %v1357_v58 = vshrl.u32 %v1101_v63, 16  ;;  %v8637_v46 = vld [vmem:[#allocation2 + $0x68] sm:$0x1]  ;;  %v706_v60 = vor.u32 %v704_v42, %v703_v3  ;;  %v707_v29 = vrot.slane %v703_v3, 4  ;;  %v7960_v14 = vld [vmem:[#allocation2 + $0x60] sm:$0xff]  }
  0x8a   : > { %v3229_v10 = vrot.slane %v3227_v62, 5  ;;  %v3233_v43 = vrot.slane %v3231_v0, 4  ;;  %v1140_v7 = vld [vmem:[#allocation2 + $0x68] sm:$0x1]  ;;  %v3237_v16 = vshll.u32 %v8637_v46, 16  ;;  %v6587_v2 = vrot.slane %v3756_v8, 9 }
  0x8b   : > { %v1355_v17 = vrot.slane %v1353_v55, 5  ;;  %v1359_v4 = vrot.slane %v1357_v58, 4  ;;  %v1363_v26 = vshll.u32 %v1140_v7, 16  ;;  %v944_v36 = vsel %vm8243_vm7, %v706_v60, %v943_v57  ;;  %v432_v37 = vld [vmem:[%s8205_s24 + $0x4c] sm:$0xf] }
  0x8c   : > { %v3230_v25 = vsel %vm8313_vm11, %v3225_v51, %v3229_v10  ;;  %v3234_v28 = vor.u32 %v3233_v43, %v3229_v10  ;;  %v3239_v30 = vrot.slane %v3237_v16, 5  ;;  %v3757_v39 = vld [vmem:[#allocation2 + $0x24] sm:$0xe]  ;;  %945 = vst [vmem:[#allocation2 + $0x6c] sm:$0xf] %v944_v36  ;;  %v483_v48 = vsel %vm8209_vm3, 0, %v482_v56 }
  0x8d   : > { %v1356_v11 = vsel %vm8313_vm11, %v1351_v59, %v1355_v17  ;;  %v1360_v31 = vor.u32 %v1359_v4, %v1355_v17  ;;  %v1365_v32 = vrot.slane %v1363_v26, 5  ;;  %v947_v47 = vld [vmem:[#allocation2 + $0x74] sm:$0x1]  ;;  %v539_v51 = vsel %vm8217_vm4, 0, %v538_v27  ;;  %484 = vst [vmem:[#allocation2 + $0x78] sm:$0x1] %v483_v48 }
  0x8e   : > { %v3235_v34 = vrot.slane %v3234_v28, 4  ;;  %v718_v63 = vshrl.u32 %v431_v40, 16  ;;  %v714_v33 = vor.u32 %v712_v5, %v711_v21  ;;  %v716_v42 = vrot.slane %v711_v21, 4  ;;  %540 = vst [vmem:[#allocation2 + $0x80] sm:$0x1] %v539_v51 }
  0x8f   : > { %v1361_v23 = vrot.slane %v1360_v31, 4  ;;  %v8660_v62 = vsel %vm8385_vm14, %v6587_v2, %v3828_v49  ;;  %v433_v0 = vld [vmem:[%s8205_s24 + $0x50] sm:$0xf]  ;;  %v485_v55 = vld [vmem:[#allocation2 + $0x84] sm:$0x1]  ;;  %v721_v43 = vshll.u32 %v431_v40, 16 }
  0x90   : > { %v3240_v54 = vsel %vm8313_vm11, %v3235_v34, %v3239_v30  ;;  %v6619_v3 = vcombine.low %v8660_v62, %v8426_v12  ;;  %v720_v6 = vrot.slane %v718_v63, 7  ;;  %v434_v5 = vld [vmem:[%s8205_s24 + $0x54] sm:$0xf]  ;;  %v541_v8 = vld [vmem:[#allocation2 + $0x8c] sm:$0x1]  ;;  %v715_v20 = vsel %vm8255_vm8, %v707_v29, %v714_v33 }
  0x91   : > { %v6569_v58 = vcombine.low %v3230_v25, %v3240_v54  ;;  %v1366_v59 = vsel %vm8313_vm11, %v1361_v23, %v1365_v32  ;;  %v948_v49 = vsel %vm8209_vm3, %v716_v42, %v947_v47  ;;  %946 = vst [vmem:[#allocation2 + $0x70] sm:$0xf] %v715_v20  ;;  %v726_v16 = vshrl.u32 %v432_v37, 16  ;;  %v8009_v26 = vld [vmem:[#allocation2 + $0x28] sm:$0xf] }
  0x92   : > { %v6410_v10 = vcombine.low %v1356_v11, %v1366_v59  ;;  %949 = vst [vmem:[#allocation2 + $0x74] sm:$0x1] %v948_v49  ;;  %v724_v7 = vrot.slane %v720_v6, 4  ;;  %v729_v17 = vshll.u32 %v432_v37, 16  ;;  %v6588_v4 = vrot.slane %v3757_v39, 9  ;;  %v7920_v2 = vld [vmem:[%s10040_s3 + $0x188] sm:$0xff]  }
  0x93   : > { %7381 = vmatmul.mubr.bf16.gmra.mrb[12].mxu0 %v6569_v58  ;;  %v723_v12 = vor.u32 %v721_v43, %v720_v6  ;;  %v3835_v57 = vrot.slane %v8009_v26, 5  ;;  %v3838_v25 = vrot.slane %v8415_v9, 5  ;;  %v486_v28 = vsel %vm8209_vm3, 0, %v485_v55  ;;  %v1102_v27 = vld [vmem:[#allocation2 + $0x6c] sm:$0xf] }
  0x94   : > { %7192 = vmatprep.mubr.bf16.mxu1 %v6410_v10  ;;  %7416 = vmatprep.mubr.bf16.mxu0 %v6618_v13  ;;  %v728_v60 = vrot.slane %v726_v16, 7  ;;  %487 = vst [vmem:[#allocation2 + $0x84] sm:$0x1] %v486_v28  ;;  %v542_v40 = vsel %vm8217_vm4, 0, %v541_v8  ;;  %v735_v29 = vshrl.u32 %v433_v0, 16  ;;  %v738_v56 = vshll.u32 %v433_v0, 16 }
  0x95   : > { %v3836_v30 = vsel %vm8385_vm14, %v6588_v4, %v3835_v57  ;;  %v3837_v13 = vrot.slane %v3835_v57, 4  ;;  %543 = vst [vmem:[#allocation2 + $0x8c] sm:$0x1] %v542_v40  ;;  %v743_v11 = vshrl.u32 %v434_v5, 16  ;;  %v746_v31 = vshll.u32 %v434_v5, 16  ;;  %v7922_v40 = vld [vmem:[%s10040_s3 + $0x190] sm:$0xff]  }
  0x96   : > { %v1368_v32 = vshrl.u32 %v1102_v27, 16  ;;  %v1371_v9 = vshll.u32 %v1102_v27, 16  ;;  %v731_v34 = vor.u32 %v729_v17, %v728_v60  ;;  %v733_v21 = vrot.slane %v728_v60, 4  ;;  %v950_v36 = vld [vmem:[#allocation2 + $0x78] sm:$0xf] }
  0x97   : > { %v951_v37 = vsel %vm8243_vm7, %v723_v12, %v950_v36  ;;  %v954_v39 = vld [vmem:[#allocation2 + $0x80] sm:$0x1]  ;;  %v3839_v23 = vsel %vm8385_vm14, %v3837_v13, %v3838_v25  ;;  %v737_v47 = vrot.slane %v735_v29, 7  ;;  %v745_v48 = vrot.slane %v743_v11, 7  ;;  %v3758_v51 = vld [vmem:[#allocation2 + $0x30] sm:$0xe] }
  0x98   : > { %v1370_v63 = vrot.slane %v1368_v32, 4  ;;  %v1373_v54 = vrot.slane %v1371_v9, 5  ;;  %v732_v33 = vsel %vm8255_vm8, %v724_v7, %v731_v34  ;;  %952 = vst [vmem:[#allocation2 + $0x78] sm:$0xf] %v951_v37  ;;  %v955_v42 = vsel %vm8209_vm3, %v733_v21, %v954_v39  ;;  %v1103_v62 = vld [vmem:[#allocation2 + $0x70] sm:$0xf] }
  0x99   : > { %v1141_v0 = vld [vmem:[#allocation2 + $0x74] sm:$0x1]  ;;  %953 = vst [vmem:[#allocation2 + $0x7c] sm:$0xf] %v732_v33  ;;  %956 = vst [vmem:[#allocation2 + $0x80] sm:$0x1] %v955_v42  ;;  %v6620_v55 = vcombine.low %v3836_v30, %v3839_v23  ;;  %v740_v58 = vor.u32 %v738_v56, %v737_v47  ;;  %v748_v6 = vor.u32 %v746_v31, %v745_v48 }
  0x9a   : > { %v741_v59 = vrot.slane %v737_v47, 4  ;;  %v488_v5 = vld [vmem:[#allocation2 + $0x90] sm:$0x1]  ;;  %v1374_v8 = vor.u32 %v1373_v54, %v1370_v63  ;;  %v1377_v10 = vshll.u32 %v1103_v62, 16  ;;  %v1381_v20 = vshrl.u32 %v1103_v62, 16  ;;  %v7924_v31 = vld [vmem:[%s10040_s3 + $0x198] sm:$0xff]  }
  0x9b   : > { %v1387_v49 = vshll.u32 %v1141_v0, 16  ;;  %7417 = vmatmul.mubr.bf16.vlgmr.msra.gmra.mrb[0].mxu0 %v6619_v3  ;;  %v435_v43 = vld [vmem:[%s8205_s24 + $0x58] sm:$0xf]  ;;  %v8692_v7 = vld [vmem:[%s8205_s24 + $0x5c] sm:$0xf]  ;;  %v750_v4 = vrot.slane %v745_v48, 4 }
  0x9c   : > { %v544_v16 = vld [vmem:[#allocation2 + $0x98] sm:$0x1]  ;;  %7449 = vmatpush3.bf16.msra.mxu0 %v8515_v19  ;;  %7420 = vmatprep.mubr.bf16.mxu0 %v6620_v55  ;;  %v749_v17 = vsel %vm8255_vm8, %v741_v59, %v748_v6  ;;  %v957_v12 = vld [vmem:[#allocation2 + $0x84] sm:$0xf]  ;;  %v6589_v26 = vrot.slane %v3758_v51, 9  ;;  %v3842_v57 = vrot.slane %v8483_v53, 5 }
  0x9d   : > { %v1375_v25 = vrot.slane %v1374_v8, 4  ;;  %v1379_v28 = vrot.slane %v1377_v10, 5  ;;  %v1383_v60 = vrot.slane %v1381_v20, 4  ;;  %960 = vst [vmem:[#allocation2 + $0x88] sm:$0xf] %v749_v17  ;;  %7450 = vmatprep.subr.bf16.mxu0 %v7920_v2  ;;  %v1389_v19 = vrot.slane %v1387_v49, 5 }
  0x9e   : > { %v961_v3 = vld [vmem:[#allocation2 + $0x8c] sm:$0x1]  ;;  %v958_v29 = vsel %vm8243_vm7, %v740_v58, %v957_v12  ;;  %v3844_v27 = vrot.slane %v3842_v57, 4  ;;  %v3843_v53 = vsel %vm8385_vm14, %v6589_v26, %v3842_v57  ;;  %v3845_v13 = vrot.slane %v8487_v35, 5 }
  0x9f   : > { %v962_v56 = vsel %vm8209_vm3, %v750_v4, %v961_v3  ;;  %v1384_v30 = vor.u32 %v1383_v60, %v1379_v28  ;;  %959 = vst [vmem:[#allocation2 + $0x84] sm:$0xf] %v958_v29  ;;  %v489_v11 = vsel %vm8209_vm3, 0, %v488_v5  ;;  %v1104_v32 = vld [vmem:[#allocation2 + $0x78] sm:$0xf]  ;;  %v545_v9 = vsel %vm8217_vm4, 0, %v544_v16 }
  0xa0   : > { %963 = vst [vmem:[#allocation2 + $0x8c] sm:$0x1] %v962_v56  ;;  %7451 = vmatpush3.bf16.msra.mxu0 %v7920_v2  ;;  %490 = vst [vmem:[#allocation2 + $0x90] sm:$0x1] %v489_v11  ;;  %v752_v34 = vshrl.u32 %v435_v43, 16  ;;  %v755_v21 = vshll.u32 %v435_v43, 16  ;;  %v1380_v35 = vsel %vm8313_vm11, %v1375_v25, %v1379_v28  ;;  %v3846_v48 = vsel %vm8385_vm14, %v3844_v27, %v3845_v13 }
  0xa1   : > { %v760_v36 = vshrl.u32 %v8692_v7, 16  ;;  %v1385_v37 = vrot.slane %v1384_v30, 4  ;;  %v1105_v39 = vld [vmem:[#allocation2 + $0x7c] sm:$0xf]  ;;  %v1142_v23 = vld [vmem:[#allocation2 + $0x80] sm:$0x1]  ;;  %7452 = vmatprep.subr.bf16.mxu0 %v7922_v40  ;;  %v6621_v62 = vcombine.low %v3843_v53, %v3846_v48 }
  0xa2   : > { %v1392_v47 = vshrl.u32 %v1104_v32, 16  ;;  %546 = vst [vmem:[#allocation2 + $0x98] sm:$0x1] %v545_v9  ;;  %v1395_v2 = vshll.u32 %v1104_v32, 16  ;;  %v1401_v51 = vshll.u32 %v1105_v39, 16  ;;  %v1405_v63 = vshrl.u32 %v1105_v39, 16 }
  0xa3   : > { %v1411_v54 = vshll.u32 %v1142_v23, 16  ;;  %v1390_v33 = vsel %vm8313_vm11, %v1385_v37, %v1389_v19  ;;  %v754_v0 = vrot.slane %v752_v34, 7  ;;  %7421 = vmatmul.mubr.bf16.gmra.mrb[4].mxu0 %v6621_v62  ;;  %v7928_v43 = vld [vmem:[%s10040_s3 + $0x1a0] sm:$0xff]   ;;  %v762_v57 = vrot.slane %v760_v36, 7  ;;  %v491_v53 = vld [vmem:[#allocation2 + $0x9c] sm:$0x1] }
  0xa4   : > { %v1394_v42 = vrot.slane %v1392_v47, 4  ;;  %v6411_v55 = vcombine.low %v1380_v35, %v1390_v33  ;;  %v1397_v58 = vrot.slane %v1395_v2, 5  ;;  %v1403_v59 = vrot.slane %v1401_v51, 5  ;;  %v8722_v5 = vld [vmem:[#allocation2 + $0x88] sm:$0xf]  ;;  %7453 = vmatpush3.bf16.msra.mxu0 %v7922_v40 }
  0xa5   : > { %v1407_v6 = vrot.slane %v1405_v63, 4  ;;  %v1413_v8 = vrot.slane %v1411_v54, 5  ;;  %v1425_v10 = vshll.u32 %v8722_v5, 16  ;;  %v1429_v20 = vshrl.u32 %v8722_v5, 16  ;;  %7454 = vmatprep.subr.bf16.mxu0 %v7924_v31  ;;  %v3759_v40 = vld [vmem:[#allocation2 + $0x3c] sm:$0xe] }
  0xa6   : > { %v757_v49 = vor.u32 %v755_v21, %v754_v0  ;;  %7193 = vmatmul.mubr.bf16.gmra.mrb[16].mxu1 %v6411_v55  ;;  %v1398_v16 = vor.u32 %v1397_v58, %v1394_v42  ;;  %v8729_v4 = vld [vmem:[#allocation2 + $0x84] sm:$0xf]  ;;  %v758_v26 = vrot.slane %v754_v0, 4  ;;  %v763_v27 = vshll.u32 %v8692_v7, 16  ;;  %v437_v21 = vld [vmem:[%s8205_s24 + $0x60] sm:$0xf] }
  0xa7   : > { %v1408_v17 = vor.u32 %v1407_v6, %v1403_v59  ;;  %v1143_v12 = vld [vmem:[#allocation2 + $0x8c] sm:$0x1]  ;;  %v1416_v25 = vshrl.u32 %v8729_v4, 16  ;;  %v1419_v28 = vshll.u32 %v8729_v4, 16  ;;  %v1427_v60 = vrot.slane %v1425_v10, 5  ;;  %v7936_v6 = vld [vmem:[%s10040_s3 + $0x1b0] sm:$0xff]  }
  0xa8   : > { %v1431_v3 = vrot.slane %v1429_v20, 4  ;;  %v1399_v19 = vrot.slane %v1398_v16, 4  ;;  %v1435_v56 = vshll.u32 %v1143_v12, 16  ;;  %v964_v30 = vld [vmem:[#allocation2 + $0x90] sm:$0xf]  ;;  %7455 = vmatpush3.bf16.msra.mxu0 %v7924_v31  ;;  %v767_v9 = vrot.slane %v762_v57, 4 }
  0xa9   : > { %v1409_v29 = vrot.slane %v1408_v17, 4  ;;  %v1418_v13 = vrot.slane %v1416_v25, 4  ;;  %v1421_v11 = vrot.slane %v1419_v28, 5  ;;  %v968_v34 = vld [vmem:[#allocation2 + $0x98] sm:$0x1]  ;;  %7456 = vmatprep.subr.bf16.mxu0 %v7928_v43  ;;  %v7932_v36 = vld [vmem:[%s10040_s3 + $0x1a8] sm:$0xff]   ;;  %v765_v39 = vor.u32 %v763_v27, %v762_v57 }
  0xaa   : > { %v1432_v32 = vor.u32 %v1431_v3, %v1427_v60  ;;  %v1404_v35 = vsel %vm8313_vm11, %v1399_v19, %v1403_v59  ;;  %v1437_v37 = vrot.slane %v1435_v56, 5  ;;  %v438_v31 = vld [vmem:[%s8205_s24 + $0x64] sm:$0xf]  ;;  %v965_v51 = vsel %vm8243_vm7, %v757_v49, %v964_v30  ;;  %v3760_v63 = vld [vmem:[#allocation2 + $0x48] sm:$0xe] }
  0xab   : > { %v1414_v7 = vsel %vm8313_vm11, %v1409_v29, %v1413_v8  ;;  %v547_v23 = vld [vmem:[#allocation2 + $0xa4] sm:$0x1]  ;;  %v1422_v48 = vor.u32 %v1421_v11, %v1418_v13  ;;  %v766_v54 = vsel %vm8255_vm8, %v758_v26, %v765_v39  ;;  %966 = vst [vmem:[#allocation2 + $0x90] sm:$0xf] %v965_v51  ;;  %v969_v33 = vsel %vm8209_vm3, %v767_v9, %v968_v34  ;;  %v494_v49 = vld [vmem:[#allocation2 + $0xa8] sm:$0x1] }
  0xac   : > { %v6412_v47 = vcombine.low %v1404_v35, %v1414_v7  ;;  %v1433_v2 = vrot.slane %v1432_v32, 4  ;;  %v6590_v42 = vrot.slane %v3759_v40, 9  ;;  %v3849_v62 = vrot.slane %v8517_v24, 5  ;;  %7457 = vmatpush3.bf16.msra.mxu0 %v7928_v43  ;;  %967 = vst [vmem:[#allocation2 + $0x94] sm:$0xf] %v766_v54 }
  0xad   : > { %v1423_v0 = vrot.slane %v1422_v48, 4  ;;  %970 = vst [vmem:[#allocation2 + $0x98] sm:$0x1] %v969_v33  ;;  %v3852_v58 = vrot.slane %v8519_v22, 5  ;;  %v492_v59 = vsel %vm8209_vm3, 0, %v491_v53  ;;  %7458 = vmatprep.subr.bf16.mxu0 %v7932_v36  ;;  %v548_v10 = vsel %vm8217_vm4, 0, %v547_v23 }
  0xae   : > { %7196 = vmatprep.mubr.bf16.mxu1 %v6412_v47  ;;  %v1438_v55 = vsel %vm8313_vm11, %v1433_v2, %v1437_v37  ;;  %v3850_v24 = vsel %vm8385_vm14, %v6590_v42, %v3849_v62  ;;  %v3851_v8 = vrot.slane %v3849_v62, 4  ;;  %493 = vst [vmem:[#allocation2 + $0x9c] sm:$0x1] %v492_v59  ;;  %v769_v20 = vshrl.u32 %v437_v21, 16  ;;  %549 = vst [vmem:[#allocation2 + $0xa4] sm:$0x1] %v548_v10 }
  0xaf   : > { %v1428_v22 = vsel %vm8313_vm11, %v1423_v0, %v1427_v60  ;;  %v772_v43 = vshll.u32 %v437_v21, 16  ;;  %v777_v16 = vshrl.u32 %v438_v31, 16  ;;  %v780_v17 = vshll.u32 %v438_v31, 16  ;;  %v550_v12 = vld [vmem:[#allocation2 + $0xb0] sm:$0x1]  ;;  %v7940_v60 = vld [vmem:[%s10040_s3 + $0x1b8] sm:$0xff]  }
  0xb0   : > { %v6413_v26 = vcombine.low %v1428_v22, %v1438_v55  ;;  %v3853_v57 = vsel %vm8385_vm14, %v3851_v8, %v3852_v58  ;;  %v771_v25 = vrot.slane %v769_v20, 7  ;;  %v6591_v28 = vrot.slane %v3760_v63, 9  ;;  %7459 = vmatpush3.bf16.msra.mxu0 %v7932_v36  ;;  %v439_v32 = vld [vmem:[%s8205_s24 + $0x68] sm:$0xf]  ;;  %v440_v7 = vld [vmem:[%s8205_s24 + $0x6c] sm:$0xf] }
  0xb1   : > { %v6622_v3 = vcombine.low %v3850_v24, %v3853_v57  ;;  %v779_v40 = vrot.slane %v777_v16, 7  ;;  %v3856_v19 = vrot.slane %v8563_v1, 5  ;;  %v3859_v29 = vrot.slane %v8565_v15, 5  ;;  %7460 = vmatprep.subr.bf16.mxu0 %v7936_v6  ;;  %v8792_v48 = vld [vmem:[%s10040_s3 + $0x1c0] sm:$0xff]   ;;  %v3761_v42 = vld [vmem:[#allocation2 + $0x54] sm:$0xe] }
  0xb2   : > { %7197 = vmatmul.mubr.bf16.gmra.mrb[20].mxu1 %v6413_v26  ;;  %v774_v56 = vor.u32 %v772_v43, %v771_v25  ;;  %v775_v27 = vrot.slane %v771_v25, 4  ;;  %v495_v30 = vsel %vm8209_vm3, 0, %v494_v49  ;;  %v551_v53 = vsel %vm8217_vm4, 0, %v550_v12  ;;  %v8775_v13 = vld [vmem:[#allocation2 + $0x90] sm:$0xf] }
  0xb3   : > { %7424 = vmatprep.mubr.bf16.mxu0 %v6622_v3  ;;  %v782_v1 = vor.u32 %v780_v17, %v779_v40  ;;  %v784_v15 = vrot.slane %v779_v40, 4  ;;  %v3858_v11 = vrot.slane %v3856_v19, 4  ;;  %496 = vst [vmem:[#allocation2 + $0xa8] sm:$0x1] %v495_v30  ;;  %552 = vst [vmem:[#allocation2 + $0xb0] sm:$0x1] %v551_v53  ;;  %v3857_v35 = vsel %vm8385_vm14, %v6591_v28, %v3856_v19 }
  0xb4   : > { %v8778_v9 = vld [vmem:[#allocation2 + $0x94] sm:$0xf]  ;;  %v1144_v34 = vld [vmem:[#allocation2 + $0x98] sm:$0x1]  ;;  %v1440_v21 = vshrl.u32 %v8775_v13, 16  ;;  %v1443_v36 = vshll.u32 %v8775_v13, 16  ;;  %7461 = vmatpush3.bf16.msra.mxu0 %v7936_v6 }
  0xb5   : > { %v1449_v37 = vshll.u32 %v8778_v9, 16  ;;  %v1453_v39 = vshrl.u32 %v8778_v9, 16  ;;  %v1459_v31 = vshll.u32 %v1144_v34, 16  ;;  %v783_v23 = vsel %vm8255_vm8, %v775_v27, %v782_v1  ;;  %v971_v47 = vld [vmem:[#allocation2 + $0x9c] sm:$0xf]  ;;  %7462 = vmatprep.subr.bf16.mxu0 %v7940_v60 }
  0xb6   : > { %v1442_v2 = vrot.slane %v1440_v21, 4  ;;  %v1445_v51 = vrot.slane %v1443_v36, 5  ;;  %v972_v63 = vsel %vm8243_vm7, %v774_v56, %v971_v47  ;;  %974 = vst [vmem:[#allocation2 + $0xa0] sm:$0xf] %v783_v23  ;;  %v975_v54 = vld [vmem:[#allocation2 + $0xa4] sm:$0x1]  ;;  %v3860_v33 = vsel %vm8385_vm14, %v3858_v11, %v3859_v29 }
  0xb7   : > { %v1451_v62 = vrot.slane %v1449_v37, 5  ;;  %v1455_v0 = vrot.slane %v1453_v39, 4  ;;  %v1461_v55 = vrot.slane %v1459_v31, 5  ;;  %973 = vst [vmem:[#allocation2 + $0x9c] sm:$0xf] %v972_v63  ;;  %v976_v58 = vsel %vm8209_vm3, %v784_v15, %v975_v54 }
  0xb8   : > { %v497_v59 = vld [vmem:[#allocation2 + $0xb4] sm:$0x1]  ;;  %v1446_v6 = vor.u32 %v1445_v51, %v1442_v2  ;;  %977 = vst [vmem:[#allocation2 + $0xa4] sm:$0x1] %v976_v58  ;;  %v6623_v24 = vcombine.low %v3857_v35, %v3860_v33  ;;  %v786_v8 = vshrl.u32 %v439_v32, 16  ;;  %v789_v10 = vshll.u32 %v439_v32, 16  ;;  %7463 = vmatpush3.bf16.msra.mxu0 %v7940_v60 }
  0xb9   : > { %v1456_v20 = vor.u32 %v1455_v0, %v1451_v62  ;;  %v794_v49 = vshrl.u32 %v440_v7, 16  ;;  %v797_v22 = vshll.u32 %v440_v7, 16  ;;  %v6592_v43 = vrot.slane %v3761_v42, 9  ;;  %7496 = vmatprep.subr.bf16.mxu0 %v8792_v48  ;;  %v442_v21 = vld [vmem:[%s8205_s24 + $0x74] sm:$0xf] }
  0xba   : > { %v1447_v16 = vrot.slane %v1446_v6, 4  ;;  %7425 = vmatmul.mubr.bf16.gmra.mrb[8].mxu0 %v6623_v24  ;;  %v788_v17 = vrot.slane %v786_v8, 7  ;;  %v978_v12 = vld [vmem:[#allocation2 + $0xa8] sm:$0xf]  ;;  %v982_v26 = vld [vmem:[#allocation2 + $0xb0] sm:$0x1] }
  0xbb   : > { %v1457_v57 = vrot.slane %v1456_v20, 4  ;;  %v796_v25 = vrot.slane %v794_v49, 7  ;;  %v3863_v28 = vrot.slane %v8594_v45, 5  ;;  %v3866_v3 = vrot.slane %v8596_v61, 5  ;;  %v441_v61 = vld [vmem:[%s8205_s24 + $0x70] sm:$0xf] }
  0xbc   : > { %v1452_v40 = vsel %vm8313_vm11, %v1447_v16, %v1451_v62  ;;  %v791_v19 = vor.u32 %v789_v10, %v788_v17  ;;  %v792_v29 = vrot.slane %v788_v17, 4  ;;  %v498_v60 = vsel %vm8209_vm3, 0, %v497_v59  ;;  %v553_v36 = vld [vmem:[#allocation2 + $0xbc] sm:$0x1]  ;;  %v3762_v23 = vld [vmem:[#allocation2 + $0x60] sm:$0xe] }
  0xbd   : > { %v1462_v56 = vsel %vm8313_vm11, %v1457_v57, %v1461_v55  ;;  %v8809_v27 = vld [vmem:[#allocation2 + $0xa0] sm:$0xf]  ;;  %v799_v30 = vor.u32 %v797_v22, %v796_v25  ;;  %v801_v53 = vrot.slane %v796_v25, 4  ;;  %v3864_v45 = vsel %vm8385_vm14, %v6592_v43, %v3863_v28  ;;  %499 = vst [vmem:[#allocation2 + $0xb4] sm:$0x1] %v498_v60 }
  0xbe   : > { %v6414_v1 = vcombine.low %v1452_v40, %v1462_v56  ;;  %v8814_v15 = vld [vmem:[#allocation2 + $0x9c] sm:$0xf]  ;;  %v1473_v11 = vshll.u32 %v8809_v27, 16  ;;  %v1477_v32 = vshrl.u32 %v8809_v27, 16  ;;  %v979_v34 = vsel %vm8243_vm7, %v791_v19, %v978_v12 }
  0xbf   : > { %v1145_v35 = vld [vmem:[#allocation2 + $0xa4] sm:$0x1]  ;;  %v1464_v7 = vshrl.u32 %v8814_v15, 16  ;;  %v1467_v37 = vshll.u32 %v8814_v15, 16  ;;  %v800_v39 = vsel %vm8255_vm8, %v792_v29, %v799_v30  ;;  %980 = vst [vmem:[#allocation2 + $0xa8] sm:$0xf] %v979_v34  ;;  %v983_v31 = vsel %vm8209_vm3, %v801_v53, %v982_v26 }
  0xc0   : > { %7200 = vmatprep.mubr.bf16.mxu1 %v6414_v1  ;;  %v1475_v47 = vrot.slane %v1473_v11, 5  ;;  %v1479_v2 = vrot.slane %v1477_v32, 4  ;;  %v1483_v51 = vshll.u32 %v1145_v35, 16  ;;  %981 = vst [vmem:[#allocation2 + $0xac] sm:$0xf] %v800_v39  ;;  %v3865_v63 = vrot.slane %v3863_v28, 4 }
  0xc1   : > { %984 = vst [vmem:[#allocation2 + $0xb0] sm:$0x1] %v983_v31  ;;  %v1466_v54 = vrot.slane %v1464_v7, 4  ;;  %v1469_v33 = vrot.slane %v1467_v37, 5  ;;  %v554_v42 = vsel %vm8217_vm4, 0, %v553_v36  ;;  %v803_v62 = vshrl.u32 %v441_v61, 16 }
  0xc2   : > { %v1480_v0 = vor.u32 %v1479_v2, %v1475_v47  ;;  %v1485_v55 = vrot.slane %v1483_v51, 5  ;;  %v3867_v58 = vsel %vm8385_vm14, %v3865_v63, %v3866_v3  ;;  %555 = vst [vmem:[#allocation2 + $0xbc] sm:$0x1] %v554_v42  ;;  %v806_v59 = vshll.u32 %v441_v61, 16  ;;  %v3763_v29 = vld [vmem:[#allocation2 + $0x6c] sm:$0xe] }
  0xc3   : > { %v1470_v6 = vor.u32 %v1469_v33, %v1466_v54  ;;  %v6624_v24 = vcombine.low %v3864_v45, %v3867_v58  ;;  %v805_v8 = vrot.slane %v803_v62, 7  ;;  %v811_v10 = vshrl.u32 %v442_v21, 16  ;;  %v3026_v61 = vld [vmem:[#allocation2 + $0x70] sm:$0xf]  ;;  %v3764_v2 = vld [vmem:[#allocation2 + $0x78] sm:$0xe] }
  0xc4   : > { %v1481_v20 = vrot.slane %v1480_v0, 4  ;;  %v814_v49 = vshll.u32 %v442_v21, 16  ;;  %v6593_v22 = vrot.slane %v3762_v23, 9  ;;  %v3870_v43 = vrot.slane %v8627_v50, 5  ;;  %v985_v28 = vld [vmem:[#allocation2 + $0xb4] sm:$0xf] }
  0xc5   : > { %v1471_v16 = vrot.slane %v1470_v6, 4  ;;  %7428 = vmatprep.mubr.bf16.mxu0 %v6624_v24  ;;  %v808_v17 = vor.u32 %v806_v59, %v805_v8  ;;  %v809_v12 = vrot.slane %v805_v8, 4  ;;  %v813_v26 = vrot.slane %v811_v10, 7  ;;  %v8855_v42 = vld [vmem:[#allocation2 + $0x7c] sm:$0xf] }
  0xc6   : > { %v1486_v57 = vsel %vm8313_vm11, %v1481_v20, %v1485_v55  ;;  %v8834_v25 = vld [vmem:[#allocation2 + $0xa8] sm:$0xf]  ;;  %v3871_v3 = vsel %vm8385_vm14, %v6593_v22, %v3870_v43  ;;  %v3872_v40 = vrot.slane %v3870_v43, 4  ;;  %v3873_v19 = vrot.slane %v8637_v46, 5  ;;  %v3027_v46 = vld [vmem:[#allocation2 + $0x74] sm:$0x1] }
  0xc7   : > { %v1476_v50 = vsel %vm8313_vm11, %v1471_v16, %v1475_v47  ;;  %v8841_v60 = vld [vmem:[#allocation2 + $0xac] sm:$0xf]  ;;  %v1488_v30 = vshrl.u32 %v8834_v25, 16  ;;  %v1491_v53 = vshll.u32 %v8834_v25, 16  ;;  %v816_v45 = vor.u32 %v814_v49, %v813_v26  ;;  %v8857_v62 = vld [vmem:[#allocation2 + $0x80] sm:$0x1] }
  0xc8   : > { %v1146_v56 = vld [vmem:[#allocation2 + $0xb0] sm:$0x1]  ;;  %v6415_v1 = vcombine.low %v1476_v50, %v1486_v57  ;;  %v1497_v11 = vshll.u32 %v8841_v60, 16  ;;  %v1501_v32 = vshrl.u32 %v8841_v60, 16  ;;  %v818_v7 = vrot.slane %v813_v26, 4  ;;  %10085 = vst [vmem:[#allocation6_spill] sm:$0xff] %v8857_v62 }
  0xc9   : > { %v1507_v34 = vshll.u32 %v1146_v56, 16  ;;  %v1490_v21 = vrot.slane %v1488_v30, 4  ;;  %v1493_v36 = vrot.slane %v1491_v53, 5  ;;  %v817_v35 = vsel %vm8255_vm8, %v809_v12, %v816_v45  ;;  %v989_v37 = vld [vmem:[#allocation2 + $0xbc] sm:$0x1] }
  0xca   : > { %7201 = vmatmul.mubr.bf16.gmra.mrb[24].mxu1 %v6415_v1  ;;  %v1499_v39 = vrot.slane %v1497_v11, 5  ;;  %v1503_v31 = vrot.slane %v1501_v32, 4  ;;  %v986_v47 = vsel %vm8243_vm7, %v808_v17, %v985_v28  ;;  %988 = vst [vmem:[#allocation2 + $0xb8] sm:$0xf] %v817_v35  ;;  %v990_v63 = vsel %vm8209_vm3, %v818_v7, %v989_v37  ;;  %v3765_v24 = vld [vmem:[#allocation2 + $0x84] sm:$0xe] }
  0xcb   : > { %v1509_v23 = vrot.slane %v1507_v34, 5  ;;  %v1494_v51 = vor.u32 %v1493_v36, %v1490_v21  ;;  %987 = vst [vmem:[#allocation2 + $0xb4] sm:$0xf] %v986_v47  ;;  %v3874_v54 = vsel %vm8385_vm14, %v3872_v40, %v3873_v19  ;;  %v6594_v33 = vrot.slane %v3763_v29, 9  ;;  %991 = vst [vmem:[#allocation2 + $0xbc] sm:$0x1] %v990_v63 }
  0xcc   : > { %v1504_v0 = vor.u32 %v1503_v31, %v1499_v39  ;;  %v6625_v55 = vcombine.low %v3871_v3, %v3874_v54  ;;  %v3877_v58 = vrot.slane %v3026_v61, 5  ;;  %v3880_v59 = vrot.slane %v3027_v46, 5  ;;  %v3032_v43 = vld [vmem:[#allocation2 + $0x88] sm:$0xf]  ;;  %v3033_v40 = vld [vmem:[#allocation2 + $0x8c] sm:$0x1] }
  0xcd   : > { %v1495_v6 = vrot.slane %v1494_v51, 4  ;;  %v6595_v49 = vrot.slane %v3764_v2, 9  ;;  %v3884_v12 = vrot.slane %v8855_v42, 5  ;;  %v3887_v26 = vrot.slane %v8857_v62, 5  ;;  %v3035_v45 = vld [vmem:[#allocation2 + $0x94] sm:$0xf] }
  0xce   : > { %v1505_v8 = vrot.slane %v1504_v0, 4  ;;  %7429 = vmatmul.mubr.bf16.gmra.mrb[12].mxu0 %v6625_v55  ;;  %v3878_v10 = vsel %vm8385_vm14, %v6594_v33, %v3877_v58  ;;  %v3879_v20 = vrot.slane %v3877_v58, 4  ;;  %v6596_v19 = vrot.slane %v3765_v24, 9  ;;  %v3036_v61 = vld [vmem:[#allocation2 + $0x98] sm:$0x1] }
  0xcf   : > { %v1500_v22 = vsel %vm8313_vm11, %v1495_v6, %v1499_v39  ;;  %v3885_v30 = vsel %vm8385_vm14, %v6595_v49, %v3884_v12  ;;  %v3886_v53 = vrot.slane %v3884_v12, 4  ;;  %v3766_v1 = vld [vmem:[#allocation2 + $0x90] sm:$0xe]  ;;  %v3891_v46 = vrot.slane %v3032_v43, 5  ;;  %v3038_v21 = vld [vmem:[#allocation2 + $0xa0] sm:$0xf] }
  0xd0   : > { %v1510_v16 = vsel %vm8313_vm11, %v1505_v8, %v1509_v23  ;;  %v3881_v17 = vsel %vm8385_vm14, %v3879_v20, %v3880_v59  ;;  %v3767_v39 = vld [vmem:[#allocation2 + $0x9c] sm:$0xe]  ;;  %v3039_v51 = vld [vmem:[#allocation2 + $0xa4] sm:$0x1]  ;;  %v3894_v0 = vrot.slane %v3033_v40, 5  ;;  %v6597_v59 = vrot.slane %v3766_v1, 9 }
  0xd1   : > { %v6416_v57 = vcombine.low %v1500_v22, %v1510_v16  ;;  %v8869_v28 = vld [vmem:[#allocation2 + $0xb8] sm:$0xf]  ;;  %v6626_v3 = vcombine.low %v3878_v10, %v3881_v17  ;;  %v3888_v37 = vsel %vm8385_vm14, %v3886_v53, %v3887_v26  ;;  %v3892_v2 = vsel %vm8385_vm14, %v6596_v19, %v3891_v46  ;;  %v3041_v55 = vld [vmem:[#allocation2 + $0xac] sm:$0xf]  ;;  %v3768_v8 = vld [vmem:[#allocation2 + $0xa8] sm:$0xe] }
  0xd2   : > { %v8871_v29 = vld [vmem:[#allocation2 + $0xb4] sm:$0xf]  ;;  %v1521_v50 = vshll.u32 %v8869_v28, 16  ;;  %v1525_v56 = vshrl.u32 %v8869_v28, 16  ;;  %v1147_v11 = vld [vmem:[#allocation2 + $0xbc] sm:$0x1]  ;;  %v6627_v47 = vcombine.low %v3885_v30, %v3888_v37 }
  0xd3   : > { %7204 = vmatprep.mubr.bf16.mxu1 %v6416_v57  ;;  %v1512_v32 = vshrl.u32 %v8871_v29, 16  ;;  %v1515_v34 = vshll.u32 %v8871_v29, 16  ;;  %7432 = vmatprep.mubr.bf16.mxu0 %v6626_v3  ;;  %v1531_v7 = vshll.u32 %v1147_v11, 16  ;;  %v3893_v33 = vrot.slane %v3891_v46, 4  ;;  %v3042_v43 = vld [vmem:[#allocation2 + $0xb0] sm:$0x1] }
  0xd4   : > { %v1523_v36 = vrot.slane %v1521_v50, 5  ;;  %v1527_v35 = vrot.slane %v1525_v56, 4  ;;  %v3898_v6 = vrot.slane %v3035_v45, 5  ;;  %v3901_v24 = vrot.slane %v3036_v61, 5  ;;  %v3769_v16 = vld [vmem:[#allocation2 + $0xb4] sm:$0xe] }
  0xd5   : > { %v1514_v31 = vrot.slane %v1512_v32, 4  ;;  %v1517_v23 = vrot.slane %v1515_v34, 5  ;;  %v1533_v54 = vrot.slane %v1531_v7, 5  ;;  %v3895_v20 = vsel %vm8385_vm14, %v3893_v33, %v3894_v0  ;;  %v3044_v3 = vld [vmem:[#allocation2 + $0xb8] sm:$0xf] }
  0xd6   : > { %v1528_v63 = vor.u32 %v1527_v35, %v1523_v36  ;;  %7433 = vmatmul.mubr.bf16.gmra.mrb[16].mxu0 %v6627_v47  ;;  %v6598_v49 = vrot.slane %v3767_v39, 9  ;;  %v3905_v22 = vrot.slane %v3038_v21, 5  ;;  %v6628_v12 = vcombine.low %v3892_v2, %v3895_v20  ;;  %v3045_v40 = vld [vmem:[#allocation2 + $0xbc] sm:$0x1]  ;;  %v500_v19 = vld [vmem:[#allocation2 + $0xc0] sm:$0x1] }
  0xd7   : > { %v1518_v58 = vor.u32 %v1517_v23, %v1514_v31  ;;  %v3899_v26 = vsel %vm8385_vm14, %v6597_v59, %v3898_v6  ;;  %v3900_v57 = vrot.slane %v3898_v6, 4  ;;  %v556_v50 = vld [vmem:[#allocation2 + $0xc8] sm:$0x1]  ;;  %v3908_v45 = vrot.slane %v3039_v51, 5  ;;  %v443_v61 = vld [vmem:[%s8205_s24 + $0x78] sm:$0xf] }
  0xd8   : > { %v1529_v10 = vrot.slane %v1528_v63, 4  ;;  %v3906_v30 = vsel %vm8385_vm14, %v6598_v49, %v3905_v22  ;;  %v3907_v53 = vrot.slane %v3905_v22, 4  ;;  %v8894_v11 = vld [vmem:[#allocation2 + $0x4] sm:$0xf]  ;;  %v8011_v32 = vld [vmem:[#allocation2] sm:$0xf]  ;;  %7436 = vmatprep.mubr.bf16.mxu0 %v6628_v12 }
  0xd9   : > { %v1519_v17 = vrot.slane %v1518_v58, 4  ;;  %v6426_v34 = vcombine.low %v8011_v32, %v8894_v11  ;;  %v3902_v46 = vsel %vm8385_vm14, %v3900_v57, %v3901_v24  ;;  %v3912_v21 = vrot.slane %v3041_v55, 5  ;;  %v444_v31 = vld [vmem:[%s8205_s24 + $0x7c] sm:$0xf]  ;;  %v8012_v49 = vld [vmem:[#allocation2 + $0xc] sm:$0xf] }
  0xda   : > { %v1534_v56 = vsel %vm8313_vm11, %v1529_v10, %v1533_v54  ;;  %v6629_v7 = vcombine.low %v3899_v26, %v3902_v46  ;;  %v3909_v37 = vsel %vm8385_vm14, %v3907_v53, %v3908_v45  ;;  %v6599_v39 = vrot.slane %v3768_v8, 9  ;;  %v8910_v22 = vld [vmem:[#allocation2 + $0x10] sm:$0xf]  ;;  %v8014_v12 = vld [vmem:[#allocation2 + $0x18] sm:$0xf]  ;;  %v8016_v32 = vld [vmem:[%s10040_s3 + $0x80] sm:$0xff]  }
  0xdb   : > { %v1524_v1 = vsel %vm8313_vm11, %v1519_v17, %v1523_v36  ;;  %v6630_v23 = vcombine.low %v3906_v30, %v3909_v37  ;;  %v3914_v47 = vrot.slane %v3912_v21, 4  ;;  %v3915_v36 = vrot.slane %v3042_v43, 5  ;;  %v8917_v26 = vld [vmem:[#allocation2 + $0x1c] sm:$0xf]  ;;  %v8019_v37 = vld [vmem:[#allocation2 + $0x30] sm:$0xf] }
  0xdc   : > { %v6417_v35 = vcombine.low %v1524_v1, %v1534_v56  ;;  %v6600_v2 = vrot.slane %v3769_v16, 9  ;;  %v3919_v51 = vrot.slane %v3044_v3, 5  ;;  %v3922_v63 = vrot.slane %v3045_v40, 5  ;;  %v9478_v52 = vld [vmem:[#allocation2 + $0xa4] sm:$0x1] }
  0xdd   : > { %v501_v54 = vsel %vm8209_vm3, 0, %v500_v19  ;;  %v557_v33 = vsel %vm8217_vm4, 0, %v556_v50  ;;  %v820_v0 = vshrl.u32 %v443_v61, 16  ;;  %v823_v55 = vshll.u32 %v443_v61, 16  ;;  %v7931_v50 = vld [vmem:[%s10040_s3 + $0x88] sm:$0xff]  }
  0xde   : > { %7205 = vmatmul.mubr.bf16.gmra.mrb[28].mxu1 %v6417_v35  ;;  %7437 = vmatmul.mubr.bf16.gmra.mrb[20].mxu0 %v6629_v7  ;;  %502 = vst [vmem:[#allocation2 + $0xc0] sm:$0x1] %v501_v54  ;;  %558 = vst [vmem:[#allocation2 + $0xc8] sm:$0x1] %v557_v33  ;;  %v828_v58 = vshrl.u32 %v444_v31, 16  ;;  %v3921_v59 = vrot.slane %v3919_v51, 4  ;;  %v3913_v24 = vsel %vm8385_vm14, %v6599_v39, %v3912_v21 }
  0xdf   : > { %7224 = vmatprep.mubr.bf16.mxu1 %v6426_v34  ;;  %7440 = vmatprep.mubr.bf16.mxu0 %v6630_v23  ;;  %v831_v6 = vshll.u32 %v444_v31, 16  ;;  %v3916_v8 = vsel %vm8385_vm14, %v3914_v47, %v3915_v36  ;;  %v822_v10 = vrot.slane %v820_v0, 7  ;;  %v6427_v43 = vcombine.low %v8012_v49, %v8910_v22  ;;  %v8935_v21 = vld [vmem:[#allocation2 + $0x28] sm:$0xf]  ;;  %v8018_v35 = vld [vmem:[#allocation2 + $0x24] sm:$0xf] }
  0xe0   : > { %v830_v20 = vrot.slane %v828_v58, 7  ;;  %v3920_v16 = vsel %vm8385_vm14, %v6600_v2, %v3919_v51  ;;  %v3923_v17 = vsel %vm8385_vm14, %v3921_v59, %v3922_v63  ;;  %v6428_v57 = vcombine.low %v8014_v12, %v8917_v26  ;;  %v8938_v39 = vld [vmem:[#allocation2 + $0x34] sm:$0xf]  ;;  %v7939_v23 = vld [vmem:[%s10040_s3 + $0x98] sm:$0xff]   ;;  %v7944_v54 = vld [vmem:[%s10040_s3 + $0xa0] sm:$0xff]  }
  0xe1   : > { %v825_v3 = vor.u32 %v823_v55, %v822_v10  ;;  %v826_v40 = vrot.slane %v822_v10, 4  ;;  %v6631_v56 = vcombine.low %v3913_v24, %v3916_v8  ;;  %v6632_v53 = vcombine.low %v3920_v16, %v3923_v17  ;;  %v8021_v59 = vld [vmem:[#allocation2 + $0x3c] sm:$0xf]  ;;  %v8023_v49 = vld [vmem:[#allocation2 + $0x48] sm:$0xf] }
  0xe2   : > { %v833_v19 = vor.u32 %v831_v6, %v830_v20  ;;  %v835_v30 = vrot.slane %v830_v20, 4  ;;  %v6429_v7 = vcombine.low %v8018_v35, %v8935_v21  ;;  %v6430_v31 = vcombine.low %v8019_v37, %v8938_v39  ;;  %v8949_v6 = vld [vmem:[#allocation2 + $0x40] sm:$0xf]  ;;  %v7942_v20 = vld [vmem:[#allocation2 + $0x18] sm:$0xff]   ;;  %v503_v17 = vld [vmem:[#allocation2 + $0xcc] sm:$0x1] }
  0xe3   : > { %v3275_v2 = vshll.u32 %v8855_v42, 16  ;;  %v3279_v33 = vshrl.u32 %v8855_v42, 16  ;;  %v6431_v24 = vcombine.low %v8021_v59, %v8949_v6  ;;  %v8981_v35 = vld [vmem:[#allocation2 + $0x6c] sm:$0xf] }
  0xe4   : > { %v834_v45 = vsel %vm8255_vm8, %v826_v40, %v833_v19  ;;  %v504_v40 = vsel %vm8209_vm3, 0, %v503_v17  ;;  %v8968_v19 = vld [vmem:[#allocation2 + $0x8] sm:$0x1] }
  0xe5   : > { %v992_v61 = vld [vmem:[#allocation2 + $0xc0] sm:$0xf]  ;;  %995 = vst [vmem:[#allocation2 + $0xc4] sm:$0xf] %v834_v45  ;;  %v996_v1 = vld [vmem:[#allocation2 + $0xc8] sm:$0x1] }
  0xe6   : > { %7225 = vmatmul.mubr.bf16.vlgmr.msra.gmra.mrb[0].mxu1 %v6427_v43  ;;  %v993_v34 = vsel %vm8243_vm7, %v825_v3, %v992_v61  ;;  %v997_v46 = vsel %vm8209_vm3, %v835_v30, %v996_v1  ;;  %7441 = vmatmul.mubr.bf16.gmra.mrb[24].mxu0 %v6631_v56  ;;  %v8956_v43 = vld [vmem:[#allocation2 + $0x4c] sm:$0xf]  ;;  %v8959_v12 = vrot.slane %v3275_v2, 5  ;;  %505 = vst [vmem:[#allocation2 + $0xcc] sm:$0x1] %v504_v40  ;;  %v7945_v2 = vld [vmem:[#allocation2 + $0x24] sm:$0xff]  }
  0xe7   : > { %7257 = vmatpush3.bf16.msra.mxu1 %v8016_v32  ;;  %7228 = vmatprep.mubr.bf16.mxu1 %v6428_v57  ;;  %994 = vst [vmem:[#allocation2 + $0xc0] sm:$0xf] %v993_v34  ;;  %998 = vst [vmem:[#allocation2 + $0xc8] sm:$0x1] %v997_v46  ;;  %v6432_v42 = vcombine.low %v8023_v49, %v8956_v43  ;;  %v8961_v57 = vrot.slane %v3279_v33, 4  ;;  %v7950_v3 = vld [vmem:[%s10040_s3 + $0xa8] sm:$0xff]  }
  0xe8   : > { %7258 = vmatprep.subr.bf16.mxu1 %v7931_v50  ;;  %7444 = vmatprep.mubr.bf16.mxu0 %v6632_v53  ;;  %10086 = vst [vmem:[#allocation7_spill] sm:$0xff] %v8959_v12  ;;  %v8971_v56 = vld [vmem:[#allocation2 + $0x14] sm:$0x1]  ;;  %v8974_v45 = vld [vmem:[#allocation2 + $0x58] sm:$0xf]  ;;  %v2183_v32 = vrot.slane %v8894_v11, 5 }
  0xe9   : > { %10087 = vst [vmem:[#allocation8_spill] sm:$0xff] %v8961_v57  ;;  %v2193_v30 = vrot.slane %v8971_v56, 5  ;;  %v8027_v53 = vld [vmem:[#allocation2 + $0x54] sm:$0xf]  ;;  %v2130_v1 = vld [vmem:[#allocation2] sm:$0xe] }
  0xea   : > { %v6433_v61 = vcombine.low %v8027_v53, %v8974_v45  ;;  %v8029_v34 = vld [vmem:[#allocation2 + $0x60] sm:$0xf]  ;;  %v8978_v46 = vld [vmem:[#allocation2 + $0x64] sm:$0xf]  ;;  %v2197_v11 = vrot.slane %v8917_v26, 5  ;;  %v9014_v40 = vld [vmem:[%s10040_s3 + $0xb8] sm:$0xff]  }
  0xeb   : > { %7259 = vmatpush3.bf16.msra.mxu1 %v7931_v50  ;;  %v2186_v50 = vrot.slane %v8968_v19, 5  ;;  %v2133_v26 = vld [vmem:[#allocation2 + $0x24] sm:$0xe]  ;;  %v8037_v33 = vld [vmem:[#allocation2 + $0x38] sm:$0x1] }
  0xec   : > { %7260 = vmatprep.subr.bf16.mxu1 %v7935_v44  ;;  %v3047_v47 = vld [vmem:[#allocation2 + $0xc4] sm:$0xf]  ;;  %v2214_v37 = vrot.slane %v8037_v33, 5  ;;  %v2136_v33 = vld [vmem:[#allocation2 + $0x48] sm:$0xe] }
  0xed   : > { %v3926_v36 = vrot.slane %v3047_v47, 5  ;;  %v2132_v47 = vld [vmem:[#allocation2 + $0x18] sm:$0xe]  ;;  %v8041_v57 = vld [vmem:[#allocation2 + $0x68] sm:$0x1] }
  0xee   : > { %7229 = vmatmul.mubr.bf16.gmra.mrb[4].mxu1 %v6429_v7  ;;  %v3048_v51 = vld [vmem:[#allocation2 + $0xc8] sm:$0x1]  ;;  %v3770_v63 = vld [vmem:[#allocation2 + $0xc0] sm:$0xe]  ;;  %v8983_v7 = vld [vmem:[#allocation2 + $0x70] sm:$0xf] }
  0xef   : > { %7232 = vmatprep.mubr.bf16.mxu1 %v6430_v31  ;;  %7261 = vmatpush3.bf16.msra.mxu1 %v7935_v44  ;;  %v6601_v0 = vrot.slane %v3770_v63, 9  ;;  %v3928_v55 = vrot.slane %v3926_v36, 4  ;;  %v3929_v58 = vrot.slane %v3048_v51, 5  ;;  %v6434_v44 = vcombine.low %v8029_v34, %v8978_v46  ;;  %v2131_v31 = vld [vmem:[#allocation2 + $0xc] sm:$0xe] }
  0xf0   : > { %7262 = vmatprep.subr.bf16.mxu1 %v7939_v23  ;;  %v8991_v51 = vld [vmem:[#allocation2 + $0x78] sm:$0xf]  ;;  %v8993_v63 = vld [vmem:[#allocation2 + $0x7c] sm:$0xf]  ;;  %v6451_v49 = vrot.slane %v2131_v31, 9  ;;  %v6453_v34 = vrot.slane %v2133_v26, 9 }
  0xf1   : > { %v3927_v8 = vsel %vm8385_vm14, %v6601_v0, %v3926_v36  ;;  %v3930_v10 = vsel %vm8385_vm14, %v3928_v55, %v3929_v58  ;;  %v2204_v0 = vrot.slane %v8935_v21, 5  ;;  %v7948_v55 = vld [vmem:[#allocation2 + $0x30] sm:$0xff]   ;;  %v7952_v21 = vld [vmem:[%s10040_s3 + $0x1c8] sm:$0xff]   ;;  %v2218_v26 = vrot.slane %v8949_v6, 5 }
  0xf2   : > { %v6633_v16 = vcombine.low %v3927_v8, %v3930_v10  ;;  %v2134_v8 = vld [vmem:[#allocation2 + $0x30] sm:$0xe]  ;;  %v2211_v10 = vrot.slane %v8938_v39, 5  ;;  %v8036_v36 = vld [vmem:[#allocation2 + $0x2c] sm:$0x1]  ;;  %v2225_v6 = vrot.slane %v8956_v43, 5 }
  0xf3   : > { %7263 = vmatpush3.bf16.msra.mxu1 %v7939_v23  ;;  %v2190_v23 = vrot.slane %v8910_v22, 5  ;;  %v7956_v22 = vld [vmem:[%s10040_s3 + $0xb0] sm:$0xff]   ;;  %v2207_v39 = vrot.slane %v8036_v36, 5  ;;  %v6454_v59 = vrot.slane %v2134_v8, 9  ;;  %v1045_v58 = vld [vmem:[#allocation2 + $0xcc] sm:$0xf]  ;;  %v9061_v19 = vsel %vm8385_vm14, %v6453_v34, %v2204_v0 }
  0xf4   : > { %7264 = vmatprep.subr.bf16.mxu1 %v7944_v54  ;;  %7445 = vmatmul.mubr.bf16.gmra.mrb[28].mxu0 %v6633_v16  ;;  %v8035_v16 = vld [vmem:[#allocation2 + $0x20] sm:$0x1]  ;;  %v1046_v36 = vsel %vm8243_vm7, 0, %v1045_v58  ;;  %v7954_v58 = vld [vmem:[#allocation2 + $0x48] sm:$0xff]  }
  0xf5   : > { %7464 = vmatprep.mubr.bf16.mxu0 %v7942_v20  ;;  %v2185_v20 = vrot.slane %v2183_v32, 4  ;;  %v2200_v17 = vrot.slane %v8035_v16, 5  ;;  %v2192_v53 = vrot.slane %v2190_v23, 4  ;;  %v2206_v16 = vrot.slane %v2204_v0, 4  ;;  %1047 = vst [vmem:[#allocation2 + $0xcc] sm:$0xf] %v1046_v36 }
  0xf6   : > { %7233 = vmatmul.mubr.bf16.gmra.mrb[8].mxu1 %v6431_v24  ;;  %v6450_v24 = vrot.slane %v2130_v1, 9  ;;  %v2199_v1 = vrot.slane %v2197_v11, 4  ;;  %v9032_v8 = vsel %vm8385_vm14, %v6451_v49, %v2190_v23  ;;  %v4641_v23 = vld [vmem:[#allocation2 + $0x1c] sm:$0xf]  ;;  %v9076_v0 = vsel %vm8385_vm14, %v6454_v59, %v2211_v10 }
  0xf7   : > { %7236 = vmatprep.mubr.bf16.mxu1 %v6432_v42  ;;  %7265 = vmatpush3.bf16.msra.mxu1 %v7944_v54  ;;  %v6452_v42 = vrot.slane %v2132_v47, 9  ;;  %v2213_v54 = vrot.slane %v2211_v10, 4  ;;  %v9053_v43 = vsel %vm8385_vm14, %v2192_v53, %v2193_v30  ;;  %v8038_v30 = vld [vmem:[#allocation2 + $0x44] sm:$0x1]  ;;  %10088 = vst [vmem:[#allocation9_spill] sm:$0xff] %v9076_v0  ;;  %v6456_v49 = vrot.slane %v2136_v33, 9 }
  0xf8   : > { %7266 = vmatprep.subr.bf16.mxu1 %v7950_v3  ;;  %v9028_v47 = vsel %vm8385_vm14, %v6450_v24, %v2183_v32  ;;  %v9057_v32 = vsel %vm8385_vm14, %v2199_v1, %v2200_v17  ;;  %v9085_v17 = vrot.slane %v2225_v6, 4  ;;  %v4698_v34 = vshll.u32 %v4641_v23, 16  ;;  %v2138_v33 = vld [vmem:[#allocation2 + $0x60] sm:$0xe] }
  0xf9   : > { %v9080_v24 = vsel %vm8385_vm14, %v2213_v54, %v2214_v37  ;;  %v8039_v54 = vld [vmem:[#allocation2 + $0x50] sm:$0x1]  ;;  %v2232_v36 = vrot.slane %v8974_v45, 5  ;;  %v4644_v45 = vld [vmem:[#allocation2 + $0x28] sm:$0xf]  ;;  %v6458_v31 = vrot.slane %v2138_v33, 9 }
  0xfa   : > { %10089 = vst [vmem:[#allocation10_spill] sm:$0xff] %v9080_v24  ;;  %v2228_v10 = vrot.slane %v8039_v54, 5  ;;  %v4645_v24 = vld [vmem:[#allocation2 + $0x2c] sm:$0x1] }
  0xfb   : > { %7267 = vmatpush3.bf16.msra.mxu1 %v7950_v3  ;;  %v9020_v3 = vld [vmem:[#allocation2 + $0x3c] sm:$0xe]  ;;  %v7972_v33 = vld [vmem:[%s10040_s3 + $0x1e8] sm:$0xff]  }
  0xfc   : > { %7268 = vmatprep.subr.bf16.mxu1 %v7956_v22  ;;  %7465 = vmatmul.mubr.bf16.vlgmr.msra.gmra.mrb[0].mxu0 %v7945_v2  ;;  %v9036_v2 = vsel %vm8385_vm14, %v6452_v42, %v2197_v11  ;;  %v6455_v56 = vrot.slane %v9020_v3, 9  ;;  %v2221_v11 = vrot.slane %v8038_v30, 5  ;;  %v7964_v42 = vld [vmem:[%s10040_s3 + $0x1d8] sm:$0xff]   ;;  %v4643_v30 = vld [vmem:[#allocation2 + $0x24] sm:$0xf]  ;;  %v9121_v3 = vrot.slane %v4698_v34, 5 }
  0xfd   : > { %7497 = vmatpush3.bf16.msra.mxu0 %v8792_v48  ;;  %7468 = vmatprep.mubr.bf16.mxu0 %v7948_v55  ;;  %v7958_v48 = vld [vmem:[%s10040_s3 + $0x1d0] sm:$0xff]   ;;  %v7951_v55 = vld [vmem:[#allocation2 + $0x3c] sm:$0xff]   ;;  %v4716_v37 = vshll.u32 %v4643_v30, 16 }
  0xfe   : > { %7237 = vmatmul.mubr.bf16.gmra.mrb[12].mxu1 %v6433_v61  ;;  %v9047_v61 = vsel %vm8385_vm14, %v2185_v20, %v2186_v50  ;;  %7498 = vmatprep.subr.bf16.mxu0 %v7952_v21  ;;  %v9065_v50 = vsel %vm8385_vm14, %v2206_v16, %v2207_v39  ;;  %v2220_v20 = vrot.slane %v2218_v26, 4  ;;  %v9091_v39 = vld [vmem:[#allocation2 + $0x54] sm:$0xe]  ;;  %v4713_v16 = vshrl.u32 %v4643_v30, 16  ;;  %v8040_v34 = vld [vmem:[#allocation2 + $0x5c] sm:$0x1] }
  0xff   : > { %7240 = vmatprep.mubr.bf16.mxu1 %v6434_v44  ;;  %v4640_v44 = vld [vmem:[#allocation2 + $0x18] sm:$0xf]  ;;  %7269 = vmatpush3.bf16.msra.mxu1 %v7956_v22  ;;  %v9072_v22 = vld [vmem:[%s10040_s3 + $0xc0] sm:$0xff]   ;;  %v2235_v59 = vrot.slane %v8040_v34, 5 }
 0x100   : > { %7270 = vmatprep.subr.bf16.mxu1 %v9014_v40  ;;  %v4689_v53 = vshrl.u32 %v4640_v44, 16  ;;  %v4692_v1 = vshll.u32 %v4640_v44, 16  ;;  %v2239_v44 = vrot.slane %v8978_v46, 5  ;;  %v9109_v54 = vsel %vm8385_vm14, %v2220_v20, %v2221_v11  ;;  %v2139_v11 = vld [vmem:[#allocation2 + $0x6c] sm:$0xe]  ;;  %v7980_v34 = vld [vmem:[%s10040_s3 + $0x1f8] sm:$0xff]  }
 0x101   : > { %7499 = vmatpush3.bf16.msra.mxu0 %v7952_v21  ;;  %v4702_v21 = vshrl.u32 %v4641_v23, 16  ;;  %v10090_v46 = vcombine.low %v8981_v35, %v8983_v7  ;;  %v9119_v23 = vsel %vm8385_vm14, %v6456_v49, %v2225_v6  ;;  %v10091_v20 = vcombine.low %v8991_v51, %v8993_v63  ;;  %v7957_v35 = vld [vmem:[#allocation2 + $0x54] sm:$0xff]  }
 0x102   : > { %7500 = vmatprep.subr.bf16.mxu0 %v7958_v48  ;;  %v6457_v6 = vrot.slane %v9091_v39, 9  ;;  %v2234_v49 = vrot.slane %v2232_v36, 4  ;;  %v2241_v12 = vrot.slane %v2239_v44, 4  ;;  %v2242_v51 = vrot.slane %v8041_v57, 5 }
 0x103   : > { %7271 = vmatpush3.bf16.msra.mxu1 %v9014_v40  ;;  %v9105_v40 = vsel %vm8385_vm14, %v6455_v56, %v2218_v26  ;;  %v4691_v26 = vrot.slane %v4689_v53, 4  ;;  %v4694_v56 = vrot.slane %v4692_v1, 5  ;;  %v4722_v53 = vshll.u32 %v4644_v45, 16 }
 0x104   : > { %7469 = vmatmul.mubr.bf16.gmra.mrb[4].mxu0 %v7951_v55  ;;  %7304 = vmatprep.subr.bf16.mxu1 %v9072_v22  ;;  %v7968_v55 = vld [vmem:[%s10040_s3 + $0x1e0] sm:$0xff]   ;;  %v4726_v1 = vshrl.u32 %v4644_v45, 16  ;;  %v6459_v62 = vrot.slane %v2139_v11, 9  ;;  %v4715_v0 = vrot.slane %v4713_v16, 4  ;;  %v4718_v45 = vrot.slane %v4716_v37, 5 }
 0x105   : > { %7472 = vmatprep.mubr.bf16.mxu0 %v7954_v58  ;;  %7501 = vmatpush3.bf16.msra.mxu0 %v7958_v48  ;;  %v4704_v58 = vrot.slane %v4702_v21, 4  ;;  %v4695_v48 = vor.u32 %v4694_v56, %v4691_v26  ;;  %v4708_v21 = vshll.u32 %v4642_v38, 16  ;;  %v9135_v57 = vsel %vm8385_vm14, %v9085_v17, %v2228_v10 }
 0x106   : > { %7241 = vmatmul.mubr.bf16.gmra.mrb[16].mxu1 %v10090_v46  ;;  %v2246_v46 = vrot.slane %v8983_v7, 5  ;;  %7502 = vmatprep.subr.bf16.mxu0 %v7964_v42  ;;  %v8042_v7 = vld [vmem:[#allocation2 + $0x74] sm:$0x1]  ;;  %v9137_v38 = vrot.slane %v4722_v53, 5  ;;  %v4728_v26 = vrot.slane %v4726_v1, 4  ;;  %v9141_v16 = vsel %vm8385_vm14, %v6457_v6, %v2232_v36  ;;  %v7963_v6 = vld [vmem:[#allocation2 + $0x6c] sm:$0xff]  }
 0x107   : > { %7244 = vmatprep.mubr.bf16.mxu1 %v10091_v20  ;;  %v4646_v20 = vld [vmem:[#allocation2 + $0x30] sm:$0xf]  ;;  %v2249_v18 = vrot.slane %v8042_v7, 5  ;;  %v4705_v30 = vor.u32 %v4704_v58, %v9121_v3  ;;  %v9145_v37 = vsel %vm8385_vm14, %v2234_v49, %v2235_v59  ;;  %v9149_v11 = vsel %vm8385_vm14, %v6458_v31, %v2239_v44  ;;  %v7965_v53 = vld [vmem:[#allocation2 + $0x78] sm:$0xff]   ;;  %v8044_v7 = vld [vmem:[#allocation2 + $0x88] sm:$0xf] }
 0x108   : > { %v2248_v39 = vrot.slane %v2246_v46, 4  ;;  %v4737_v56 = vshrl.u32 %v4646_v20, 16  ;;  %v4740_v17 = vshll.u32 %v4646_v20, 16  ;;  %v10092_v10 = vcombine.low %v8729_v4, %v8722_v5  ;;  %v9272_v1 = vld [vmem:[#allocation2 + $0x5c] sm:$0x1] }
 0x109   : > { %7503 = vmatpush3.bf16.msra.mxu0 %v7964_v42  ;;  %v4647_v42 = vld [vmem:[#allocation2 + $0x34] sm:$0xf]  ;;  %v4696_v36 = vrot.slane %v4695_v48, 4  ;;  %v4710_v58 = vrot.slane %v4708_v21, 5  ;;  %v9160_v59 = vsel %vm8385_vm14, %v6459_v62, %v2246_v46  ;;  %v10093_v31 = vcombine.low %v8775_v13, %v8778_v9  ;;  %v4649_v48 = vld [vmem:[#allocation2 + $0x3c] sm:$0xf] }
 0x10a   : > { %7504 = vmatprep.subr.bf16.mxu0 %v7968_v55  ;;  %v4706_v44 = vrot.slane %v4705_v30, 4  ;;  %v9167_v5 = vsel %vm8385_vm14, %v2248_v39, %v2249_v18  ;;  %v4732_v4 = vshll.u32 %v4645_v24, 16  ;;  %v7976_v62 = vld [vmem:[%s10040_s3 + $0x1f0] sm:$0xff]   ;;  %v4729_v46 = vor.u32 %v4728_v26, %v9137_v38  ;;  %v8043_v39 = vld [vmem:[#allocation2 + $0x80] sm:$0x1]  ;;  %10100 = vst [vmem:[#allocation13_spill] sm:$0xff] %v9272_v1 }
 0x10b   : > { %v2253_v13 = vrot.slane %v8993_v63, 5  ;;  %v4739_v9 = vrot.slane %v4737_v56, 4  ;;  %v4750_v24 = vshrl.u32 %v4647_v42, 16  ;;  %v4648_v26 = vld [vmem:[#allocation2 + $0x38] sm:$0x1] }
 0x10c   : > { %7473 = vmatmul.mubr.bf16.gmra.mrb[8].mxu0 %v7957_v35  ;;  %v9156_v35 = vsel %vm8385_vm14, %v2241_v12, %v2242_v51  ;;  %v2140_v12 = vld [vmem:[#allocation2 + $0x78] sm:$0xe]  ;;  %v4701_v51 = vsel %vm8313_vm11, %v4696_v36, %v9121_v3  ;;  %v4711_v21 = vsel %vm8313_vm11, %v4706_v44, %v4710_v58  ;;  %v4730_v56 = vrot.slane %v4729_v46, 4  ;;  %v4652_v3 = vld [vmem:[#allocation2 + $0x48] sm:$0xf] }
 0x10d   : > { %7476 = vmatprep.mubr.bf16.mxu0 %v7960_v14  ;;  %7505 = vmatpush3.bf16.msra.mxu0 %v7968_v55  ;;  %v4719_v14 = vor.u32 %v4718_v45, %v4715_v0  ;;  %v4746_v55 = vshll.u32 %v4647_v42, 16  ;;  %v4742_v0 = vrot.slane %v4740_v17, 5  ;;  %v6460_v20 = vrot.slane %v2140_v12, 9  ;;  %v4650_v42 = vld [vmem:[#allocation2 + $0x40] sm:$0xf] }
 0x10e   : > { %7245 = vmatmul.mubr.bf16.gmra.mrb[20].mxu1 %v10092_v10  ;;  %7506 = vmatprep.subr.bf16.mxu0 %v7972_v33  ;;  %v2256_v45 = vrot.slane %v8043_v39, 5  ;;  %v4734_v17 = vrot.slane %v4732_v4, 5  ;;  %v2255_v10 = vrot.slane %v2253_v13, 4  ;;  %v4752_v36 = vrot.slane %v4750_v24, 4  ;;  %v2141_v12 = vld [vmem:[#allocation2 + $0x84] sm:$0xe] }
 0x10f   : > { %7248 = vmatprep.mubr.bf16.mxu1 %v10093_v31  ;;  %v4720_v30 = vrot.slane %v4719_v14, 4  ;;  %v9192_v31 = vrot.slane %v4746_v55, 5  ;;  %v4761_v58 = vshrl.u32 %v4649_v48, 16  ;;  %v4764_v44 = vshll.u32 %v4649_v48, 16  ;;  %v7967_v24 = vld [vmem:[#allocation2 + $0x84] sm:$0xff]  }
 0x110   : > { %v10094_v14 = vcombine.low %v8814_v15, %v8809_v27  ;;  %v9197_v39 = vcombine.low %v4701_v51, %v4711_v21  ;;  %v2260_v46 = vrot.slane %v8044_v7, 5  ;;  %v4770_v4 = vshll.u32 %v4650_v42, 16  ;;  %v9209_v15 = vld [vmem:[#allocation2 + $0x4c] sm:$0xf]  ;;  %v7969_v51 = vld [vmem:[#allocation2 + $0x90] sm:$0xff]  }
 0x111   : > { %7507 = vmatpush3.bf16.msra.mxu0 %v7972_v33  ;;  %v4743_v33 = vor.u32 %v4742_v0, %v4739_v9  ;;  %v4774_v63 = vshrl.u32 %v4650_v42, 16  ;;  %v10095_v55 = vcombine.low %v8834_v25, %v8841_v60  ;;  %v9207_v27 = vsel %vm8385_vm14, %v6460_v20, %v2253_v13  ;;  %v9216_v25 = vld [vmem:[%s10040_s3 + $0x200] sm:$0xff]  }
 0x112   : > { %7508 = vmatprep.subr.bf16.mxu0 %v7976_v62  ;;  %v4785_v9 = vshrl.u32 %v4652_v3, 16  ;;  %v4788_v0 = vshll.u32 %v4652_v3, 16  ;;  %v9220_v60 = vsel %vm8385_vm14, %v2255_v10, %v2256_v45  ;;  %v4651_v13 = vld [vmem:[#allocation2 + $0x44] sm:$0x1]  ;;  %v4753_v48 = vor.u32 %v4752_v36, %v9192_v31  ;;  %v8045_v10 = vld [vmem:[#allocation2 + $0x8c] sm:$0x1] }
 0x113   : > { %v9222_v20 = vrot.slane %v4743_v33, 4  ;;  %v4763_v21 = vrot.slane %v4761_v58, 4  ;;  %v4766_v7 = vrot.slane %v4764_v44, 5  ;;  %v4776_v42 = vrot.slane %v4774_v63, 4  ;;  %v2142_v58 = vld [vmem:[#allocation2 + $0x90] sm:$0xe] }
 0x114   : > { %7477 = vmatmul.mubr.bf16.gmra.mrb[12].mxu0 %v7963_v6  ;;  %v4725_v6 = vsel %vm8313_vm11, %v4720_v30, %v9137_v38  ;;  %v4756_v38 = vshll.u32 %v4648_v26, 16  ;;  %v9225_v30 = vrot.slane %v4770_v4, 5  ;;  %v2262_v45 = vrot.slane %v2260_v46, 4  ;;  %v8046_v63 = vld [vmem:[#allocation2 + $0x94] sm:$0xf] }
 0x115   : > { %7480 = vmatprep.mubr.bf16.mxu0 %v7965_v53  ;;  %7509 = vmatpush3.bf16.msra.mxu0 %v7976_v62  ;;  %v4735_v53 = vsel %vm8313_vm11, %v4730_v56, %v4734_v17  ;;  %v6461_v62 = vrot.slane %v2141_v12, 9  ;;  %v4794_v56 = vshll.u32 %v9209_v15, 16  ;;  %v4798_v17 = vshrl.u32 %v9209_v15, 16 }
 0x116   : > { %7249 = vmatmul.mubr.bf16.gmra.mrb[24].mxu1 %v10094_v14  ;;  %7510 = vmatprep.subr.bf16.mxu0 %v7980_v34  ;;  %v2263_v26 = vrot.slane %v8045_v10, 5  ;;  %v4787_v3 = vrot.slane %v4785_v9, 4  ;;  %v4790_v12 = vrot.slane %v4788_v0, 5  ;;  %v9229_v14 = vcombine.low %v4725_v6, %v4735_v53  ;;  %v4655_v9 = vld [vmem:[#allocation2 + $0x54] sm:$0xf] }
 0x117   : > { %7252 = vmatprep.mubr.bf16.mxu1 %v10095_v55  ;;  %v4758_v36 = vrot.slane %v4756_v38, 5  ;;  %v2267_v44 = vrot.slane %v8046_v63, 5  ;;  %v4754_v4 = vrot.slane %v4753_v48, 4  ;;  %v9240_v55 = vsel %vm8385_vm14, %v6461_v62, %v2260_v46  ;;  %v9248_v63 = vld [vmem:[#allocation2 + $0x58] sm:$0xf] }
 0x118   : > { %v4780_v6 = vshll.u32 %v4651_v13, 16  ;;  %v10096_v0 = vcombine.low %v8871_v29, %v8869_v28  ;;  %v4767_v53 = vor.u32 %v4766_v7, %v4763_v21  ;;  %v9246_v38 = vrot.slane %v4794_v56, 5  ;;  %10097 = vst [vmem:[#allocation11_spill] sm:$0xff] %v9248_v63  ;;  %v9257_v28 = vld [vmem:[#allocation2 + $0x50] sm:$0x1] }
 0x119   : > { %7511 = vmatpush3.bf16.msra.mxu0 %v7980_v34  ;;  %v4749_v34 = vsel %vm8313_vm11, %v9222_v20, %v9192_v31  ;;  %v4800_v10 = vrot.slane %v4798_v17, 4  ;;  %v10098_v31 = vcombine.low %v9028_v47, %v9047_v61  ;;  %v9255_v46 = vsel %vm8385_vm14, %v2262_v45, %v2263_v26  ;;  %10099 = vst [vmem:[#allocation12_spill] sm:$0xff] %v9257_v28  ;;  %v8047_v13 = vld [vmem:[#allocation2 + $0xa0] sm:$0xf]  ;;  %v8048_v48 = vld [vmem:[#allocation2 + $0x98] sm:$0x1] }
 0x11a   : > { %7544 = vmatprep.subr.bf16.mxu0 %v9216_v25  ;;  %v6462_v62 = vrot.slane %v2142_v58, 9  ;;  %v4791_v29 = vor.u32 %v4790_v12, %v4787_v3  ;;  %v2269_v20 = vrot.slane %v2267_v44, 4  ;;  %v2270_v21 = vrot.slane %v8048_v48, 5  ;;  %v2143_v7 = vld [vmem:[#allocation2 + $0x9c] sm:$0xe]  ;;  %v7970_v3 = vld [vmem:[%s10040_s3 + $0xc8] sm:$0xff]  }
 0x11b   : > { %v4812_v56 = vshll.u32 %v4655_v9, 16  ;;  %v7971_v17 = vld [vmem:[#allocation2 + $0x9c] sm:$0xff]   ;;  %v4759_v47 = vsel %vm8313_vm11, %v4754_v4, %v4758_v36  ;;  %v9261_v61 = vrot.slane %v4780_v6, 5  ;;  %v4818_v45 = vshll.u32 %v9248_v63, 16  ;;  %v7973_v12 = vld [vmem:[#allocation2 + $0xa8] sm:$0xff]  }
 0x11c   : > { %7481 = vmatmul.mubr.bf16.gmra.mrb[16].mxu0 %v7967_v24  ;;  %v4777_v24 = vor.u32 %v4776_v42, %v9225_v30  ;;  %v4809_v42 = vshrl.u32 %v4655_v9, 16  ;;  %v4822_v26 = vshrl.u32 %v9248_v63, 16  ;;  %v4768_v58 = vrot.slane %v4767_v53, 4  ;;  %v8049_v6 = vld [vmem:[#allocation2 + $0xa4] sm:$0x1] }
 0x11d   : > { %7484 = vmatprep.mubr.bf16.mxu0 %v7969_v51  ;;  %v2274_v51 = vrot.slane %v8047_v13, 5  ;;  %v4804_v9 = vshll.u32 %v9257_v28, 16  ;;  %v4658_v13 = vld [vmem:[#allocation2 + $0x60] sm:$0xf]  ;;  %v9270_v48 = vrot.slane %v4791_v29, 4  ;;  %v6463_v36 = vrot.slane %v2143_v7, 9 }
 0x11e   : > { %7253 = vmatmul.mubr.bf16.gmra.mrb[28].mxu1 %v10096_v0  ;;  %v4778_v0 = vrot.slane %v4777_v24, 4  ;;  %v2277_v33 = vrot.slane %v8049_v6, 5  ;;  %v9276_v18 = vsel %vm8385_vm14, %v6462_v62, %v2267_v44  ;;  %v9280_v53 = vsel %vm8385_vm14, %v2269_v20, %v2270_v21  ;;  %v2144_v21 = vld [vmem:[#allocation2 + $0xa8] sm:$0xe]  ;;  %v4664_v44 = vld [vmem:[#allocation2 + $0x78] sm:$0xf] }
 0x11f   : > { %7272 = vmatprep.mubr.bf16.mxu1 %v10098_v31  ;;  %v4801_v31 = vor.u32 %v4800_v10, %v9246_v38  ;;  %v2276_v4 = vrot.slane %v2274_v51, 4  ;;  %v4811_v24 = vrot.slane %v4809_v42, 4  ;;  %v4814_v10 = vrot.slane %v4812_v56, 5  ;;  %v8050_v56 = vld [vmem:[#allocation2 + $0xac] sm:$0xf] }
 0x120   : > { %v9282_v49 = vrot.slane %v4818_v45, 5  ;;  %v4824_v29 = vrot.slane %v4822_v26, 4  ;;  %v4833_v7 = vshrl.u32 %v4658_v13, 16  ;;  %v4836_v63 = vshll.u32 %v4658_v13, 16  ;;  %v4661_v26 = vld [vmem:[#allocation2 + $0x6c] sm:$0xf] }
 0x121   : > { %v10101_v6 = vcombine.low %v9032_v8, %v9053_v43  ;;  %v9287_v28 = vcombine.low %v4749_v34, %v4759_v47  ;;  %v4802_v62 = vrot.slane %v4801_v31, 4  ;;  %v4806_v20 = vrot.slane %v4804_v9, 5  ;;  %v9303_v47 = vld [vmem:[#allocation2 + $0x64] sm:$0xf] }
 0x122   : > { %v10102_v42 = vcombine.low %v9036_v2, %v9057_v32  ;;  %v4773_v8 = vsel %vm8313_vm11, %v4768_v58, %v9225_v30  ;;  %v4783_v43 = vsel %vm8313_vm11, %v4778_v0, %v9261_v61  ;;  %10103 = vst [vmem:[#allocation14_spill] sm:$0xff] %v9303_v47  ;;  %v7974_v2 = vld [vmem:[%s10040_s3 + $0xd0] sm:$0xff]   ;;  %v4797_v32 = vsel %vm8313_vm11, %v9270_v48, %v9246_v38  ;;  %v7977_v13 = vld [vmem:[#allocation2 + $0xc0] sm:$0xff]   ;;  %v7978_v38 = vld [vmem:[%s10040_s3 + $0xd8] sm:$0xff]  }
 0x123   : > { %v9316_v30 = vsel %vm8385_vm14, %v6463_v36, %v2274_v51  ;;  %v9320_v61 = vsel %vm8385_vm14, %v2276_v4, %v2277_v33  ;;  %v4828_v45 = vshll.u32 %v9272_v1, 16  ;;  %v4815_v58 = vor.u32 %v4814_v10, %v4811_v24  ;;  %v8051_v24 = vld [vmem:[#allocation2 + $0xb0] sm:$0x1] }
 0x124   : > { %7485 = vmatmul.mubr.bf16.gmra.mrb[20].mxu0 %v7971_v17  ;;  %v2281_v17 = vrot.slane %v8050_v56, 5  ;;  %10105 = vst [vmem:[#allocation16_spill] sm:$0xff] %v9316_v30  ;;  %10106 = vst [vmem:[#allocation17_spill] sm:$0xff] %v9320_v61  ;;  %v4825_v0 = vor.u32 %v4824_v29, %v9282_v49  ;;  %v4835_v31 = vrot.slane %v4833_v7, 4  ;;  %v4838_v9 = vrot.slane %v4836_v63, 5 }
 0x125   : > { %7488 = vmatprep.mubr.bf16.mxu0 %v7973_v12  ;;  %v7975_v12 = vld [vmem:[#allocation2 + $0xb4] sm:$0xff]   ;;  %v4807_v51 = vsel %vm8313_vm11, %v4802_v62, %v4806_v20  ;;  %v6464_v48 = vrot.slane %v2144_v21, 9  ;;  %v4842_v33 = vshll.u32 %v9303_v47, 16  ;;  %v4846_v36 = vshrl.u32 %v9303_v47, 16  ;;  %v9338_v20 = vld [vmem:[#allocation2 + $0x70] sm:$0xf] }
 0x126   : > { %7273 = vmatmul.mubr.bf16.vlgmr.msra.gmra.mrb[0].mxu1 %v10101_v6  ;;  %v2283_v4 = vrot.slane %v2281_v17, 4  ;;  %v2284_v10 = vrot.slane %v8051_v24, 5  ;;  %v4857_v63 = vshrl.u32 %v4661_v26, 16  ;;  %v9332_v7 = vcombine.low %v4773_v8, %v4783_v43  ;;  %v2145_v62 = vld [vmem:[#allocation2 + $0xb4] sm:$0xe]  ;;  %10107 = vst [vmem:[#allocation18_spill] sm:$0xff] %v9338_v20 }
 0x127   : > { %7305 = vmatpush3.bf16.msra.mxu1 %v9072_v22  ;;  %7276 = vmatprep.mubr.bf16.mxu1 %v10102_v42  ;;  %v9305_v22 = vld [vmem:[#allocation2 + $0x68] sm:$0x1]  ;;  %v9336_v42 = vrot.slane %v4828_v45, 5  ;;  %v4860_v21 = vshll.u32 %v4661_v26, 16  ;;  %v9342_v56 = vrot.slane %v4815_v58, 4  ;;  %v9344_v24 = vrot.slane %v4825_v0, 4 }
 0x128   : > { %10104 = vst [vmem:[#allocation15_spill] sm:$0xff] %v9305_v22  ;;  %7306 = vmatprep.subr.bf16.mxu1 %v7970_v3  ;;  %v4852_v29 = vshll.u32 %v9305_v22, 16  ;;  %v4839_v34 = vor.u32 %v4838_v9, %v4835_v31  ;;  %v10108_v8 = vcombine.low %v9061_v19, %v9065_v50  ;;  %v7981_v43 = vld [vmem:[%s10040_s3 + $0xe0] sm:$0xff]   ;;  %v9354_v45 = vsel %vm8385_vm14, %v6464_v48, %v2281_v17  ;;  %v10110_v0 = vld [vmem:[#allocation9_spill] sm:$0xff]  ;;  %v10111_v31 = vld [vmem:[#allocation10_spill] sm:$0xff] }
 0x129   : > { %10109 = vst [vmem:[#allocation19_spill] sm:$0xff] %v9354_v45  ;;  %v4848_v26 = vrot.slane %v4846_v36, 4  ;;  %v10112_v9 = vcombine.low %v10110_v0, %v10111_v31  ;;  %v7979_v19 = vld [vmem:[#allocation2 + $0xcc] sm:$0xff]   ;;  %v9363_v50 = vsel %vm8385_vm14, %v2283_v4, %v2284_v10  ;;  %v4859_v17 = vrot.slane %v4857_v63, 4  ;;  %v9386_v61 = vld [vmem:[#allocation2 + $0x88] sm:$0xf] }
 0x12a   : > { %10113 = vst [vmem:[#allocation9_spill] sm:$0xff] %v9363_v50  ;;  %v4866_v48 = vshll.u32 %v9338_v20, 16  ;;  %v4870_v36 = vshrl.u32 %v9338_v20, 16  ;;  %v6465_v63 = vrot.slane %v2145_v62, 9  ;;  %10116 = vst [vmem:[#allocation21_spill] sm:$0xff] %v9386_v61 }
 0x12b   : > { %7307 = vmatpush3.bf16.msra.mxu1 %v7970_v3  ;;  %v9340_v3 = vcombine.low %v4797_v32, %v4807_v51  ;;  %v9356_v32 = vrot.slane %v4842_v33, 5  ;;  %v9367_v51 = vld [vmem:[#allocation2 + $0x74] sm:$0x1]  ;;  %v4862_v33 = vrot.slane %v4860_v21, 5  ;;  %v4667_v21 = vld [vmem:[#allocation2 + $0x84] sm:$0xf] }
 0x12c   : > { %7308 = vmatprep.subr.bf16.mxu1 %v7974_v2  ;;  %7489 = vmatmul.mubr.bf16.gmra.mrb[24].mxu0 %v7975_v12  ;;  %v8052_v12 = vld [vmem:[#allocation2 + $0xb8] sm:$0xf]  ;;  %10114 = vst [vmem:[#allocation10_spill] sm:$0xff] %v9367_v51  ;;  %v9388_v4 = vrot.slane %v4866_v48, 5  ;;  %v4876_v30 = vshll.u32 %v9367_v51, 16  ;;  %v4872_v0 = vrot.slane %v4870_v36, 4 }
 0x12d   : > { %7492 = vmatprep.mubr.bf16.mxu0 %v7977_v13  ;;  %v2288_v58 = vrot.slane %v8052_v12, 5  ;;  %v9365_v13 = vrot.slane %v4852_v29, 5  ;;  %v4881_v12 = vshrl.u32 %v4664_v44, 16  ;;  %v9381_v29 = vrot.slane %v4839_v34, 4  ;;  %v9391_v10 = vld [vmem:[#allocation2 + $0x80] sm:$0x1] }
 0x12e   : > { %7277 = vmatmul.mubr.bf16.gmra.mrb[4].mxu1 %v10108_v8  ;;  %v9371_v8 = vld [vmem:[#allocation2 + $0x7c] sm:$0xf]  ;;  %v4849_v31 = vor.u32 %v4848_v26, %v9356_v32  ;;  %10117 = vst [vmem:[#allocation22_spill] sm:$0xff] %v9391_v10  ;;  %v4670_v20 = vld [vmem:[#allocation2 + $0x90] sm:$0xf]  ;;  %v7983_v26 = vld [vmem:[%s10040_s3 + $0xe8] sm:$0xff]  }
 0x12f   : > { %7280 = vmatprep.mubr.bf16.mxu1 %v10112_v9  ;;  %7309 = vmatpush3.bf16.msra.mxu1 %v7974_v2  ;;  %10115 = vst [vmem:[#allocation20_spill] sm:$0xff] %v9371_v8  ;;  %v4884_v2 = vshll.u32 %v4664_v44, 16  ;;  %v2290_v44 = vrot.slane %v2288_v58, 4  ;;  %v8053_v9 = vld [vmem:[#allocation2 + $0xbc] sm:$0x1]  ;;  %v4890_v34 = vshll.u32 %v9371_v8, 16  ;;  %v9410_v45 = vsel %vm8385_vm14, %v6465_v63, %v2288_v58 }
 0x130   : > { %7310 = vmatprep.subr.bf16.mxu1 %v7978_v38  ;;  %v2291_v6 = vrot.slane %v8053_v9, 5  ;;  %v4894_v62 = vshrl.u32 %v9371_v8, 16  ;;  %v4863_v9 = vor.u32 %v4862_v33, %v4859_v17  ;;  %v9398_v50 = vrot.slane %v4881_v12, 4  ;;  %v9402_v48 = vld [vmem:[#allocation2 + $0x94] sm:$0xf] }
 0x131   : > { %10118 = vst [vmem:[#allocation23_spill] sm:$0xff] %v9402_v48  ;;  %v4905_v51 = vshrl.u32 %v4667_v21, 16  ;;  %v4908_v22 = vshll.u32 %v4667_v21, 16  ;;  %v10119_v17 = vcombine.low %v9105_v40, %v9109_v54  ;;  %v4914_v33 = vshll.u32 %v9386_v61, 16 }
 0x132   : > { %v4918_v36 = vshrl.u32 %v9386_v61, 16  ;;  %v4929_v12 = vshrl.u32 %v4670_v20, 16  ;;  %v10120_v58 = vcombine.low %v9119_v23, %v9135_v57  ;;  %v9424_v63 = vrot.slane %v4890_v34, 5  ;;  %v9435_v61 = vld [vmem:[#allocation2 + $0x8c] sm:$0x1] }
 0x133   : > { %7311 = vmatpush3.bf16.msra.mxu1 %v7978_v38  ;;  %v9400_v38 = vrot.slane %v4884_v2, 5  ;;  %v4932_v2 = vshll.u32 %v4670_v20, 16  ;;  %v4896_v40 = vrot.slane %v4894_v62, 4  ;;  %v4938_v54 = vshll.u32 %v9402_v48, 16  ;;  %v9437_v23 = vld [vmem:[#allocation2 + $0x98] sm:$0x1] }
 0x134   : > { %7312 = vmatprep.subr.bf16.mxu1 %v7981_v43  ;;  %7493 = vmatmul.mubr.bf16.gmra.mrb[28].mxu0 %v7979_v19  ;;  %v7985_v19 = vld [vmem:[%s10040_s3 + $0xf0] sm:$0xff]   ;;  %v9428_v21 = vrot.slane %v4849_v31, 4  ;;  %v9432_v8 = vrot.slane %v4876_v30, 5  ;;  %v4900_v20 = vshll.u32 %v9391_v10, 16  ;;  %10121 = vst [vmem:[#allocation24_spill] sm:$0xff] %v9437_v23  ;;  %v9441_v57 = vsel %vm8385_vm14, %v2290_v44, %v2291_v6 }
 0x135   : > { %7512 = vmatprep.mubr.bf16.mxu0 %v9197_v39  ;;  %v4942_v39 = vshrl.u32 %v9402_v48, 16  ;;  %v4907_v34 = vrot.slane %v4905_v51, 4  ;;  %v4910_v62 = vrot.slane %v4908_v22, 5  ;;  %v4673_v31 = vld [vmem:[#allocation2 + $0x9c] sm:$0xf]  ;;  %v4920_v30 = vrot.slane %v4918_v36, 4 }
 0x136   : > { %7281 = vmatmul.mubr.bf16.gmra.mrb[8].mxu1 %v10119_v17  ;;  %v9430_v17 = vrot.slane %v4863_v9, 4  ;;  %v9446_v9 = vrot.slane %v4914_v33, 5  ;;  %v4931_v48 = vrot.slane %v4929_v12, 4  ;;  %v4934_v10 = vrot.slane %v4932_v2, 5  ;;  %v7984_v22 = vld [vmem:[%s10040_s3 + $0x208] sm:$0xff]   ;;  %v7987_v51 = vld [vmem:[%s10040_s3 + $0xf8] sm:$0xff]  }
 0x137   : > { %7284 = vmatprep.mubr.bf16.mxu1 %v10120_v58  ;;  %7313 = vmatpush3.bf16.msra.mxu1 %v7981_v43  ;;  %v4873_v43 = vor.u32 %v4872_v0, %v9388_v4  ;;  %v9444_v58 = vld [vmem:[#allocation2 + $0xa0] sm:$0xf]  ;;  %v4887_v47 = vor.u32 %v9400_v38, %v9398_v50  ;;  %v4897_v1 = vor.u32 %v4896_v40, %v9424_v63  ;;  %v9451_v6 = vrot.slane %v4938_v54, 5  ;;  %v9465_v38 = vld [vmem:[%s10040_s3 + $0x210] sm:$0xff]   ;;  %v4676_v54 = vld [vmem:[#allocation2 + $0xa8] sm:$0xf] }
 0x138   : > { %7314 = vmatprep.subr.bf16.mxu1 %v7983_v26  ;;  %10122 = vst [vmem:[#allocation25_spill] sm:$0xff] %v9444_v58  ;;  %v4944_v44 = vrot.slane %v4942_v39, 4  ;;  %v4953_v0 = vshrl.u32 %v4673_v31, 16  ;;  %v4956_v33 = vshll.u32 %v4673_v31, 16  ;;  %v4966_v50 = vshrl.u32 %v9444_v58, 16 }
 0x139   : > { %v9467_v36 = vrot.slane %v4873_v43, 4  ;;  %v9469_v12 = vrot.slane %v4900_v20, 5  ;;  %v4924_v2 = vshll.u32 %v9435_v61, 16  ;;  %v4948_v40 = vshll.u32 %v9437_v23, 16  ;;  %v559_v43 = vld [vmem:[#allocation2 + $0xd4] sm:$0x1] }
 0x13a   : > { %v10123_v39 = vcombine.low %v9141_v16, %v9145_v37  ;;  %v4921_v31 = vor.u32 %v4920_v30, %v9446_v9  ;;  %v10124_v20 = vcombine.low %v9149_v11, %v9156_v35  ;;  %v9488_v37 = vrot.slane %v4887_v47, 4 }
 0x13b   : > { %7315 = vmatpush3.bf16.msra.mxu1 %v7983_v26  ;;  %v4962_v26 = vshll.u32 %v9444_v58, 16  ;;  %v4935_v58 = vor.u32 %v4934_v10, %v4931_v48  ;;  %v4945_v10 = vor.u32 %v4944_v44, %v9451_v6  ;;  %v9493_v48 = vld [vmem:[#allocation2 + $0xac] sm:$0xf]  ;;  %v4958_v11 = vrot.slane %v4956_v33, 5 }
 0x13c   : > { %7316 = vmatprep.subr.bf16.mxu1 %v7985_v19  ;;  %7513 = vmatmul.mubr.bf16.vlgmr.msra.gmra.mrb[0].mxu0 %v9229_v14  ;;  %v4911_v14 = vor.u32 %v4910_v62, %v4907_v34  ;;  %v4955_v34 = vrot.slane %v4953_v0, 4  ;;  %v9497_v62 = vrot.slane %v4924_v2, 5  ;;  %v4977_v30 = vshrl.u32 %v4676_v54, 16 }
 0x13d   : > { %7545 = vmatpush3.bf16.msra.mxu0 %v9216_v25  ;;  %7516 = vmatprep.mubr.bf16.mxu0 %v9287_v28  ;;  %v9490_v25 = vrot.slane %v4897_v1, 4  ;;  %v9495_v35 = vrot.slane %v4962_v26, 5  ;;  %v4968_v28 = vrot.slane %v4966_v50, 4  ;;  %v560_v1 = vsel %vm8217_vm4, 0, %v559_v43 }
 0x13e   : > { %7285 = vmatmul.mubr.bf16.gmra.mrb[12].mxu1 %v10123_v39  ;;  %7546 = vmatprep.subr.bf16.mxu0 %v7984_v22  ;;  %v4980_v39 = vshll.u32 %v4676_v54, 16  ;;  %v4922_v44 = vrot.slane %v4921_v31, 4  ;;  %v4936_v16 = vrot.slane %v4935_v58, 4  ;;  %v4950_v23 = vrot.slane %v4948_v40, 5  ;;  %561 = vst [vmem:[#allocation2 + $0xd4] sm:$0x1] %v560_v1 }
 0x13f   : > { %7288 = vmatprep.mubr.bf16.mxu1 %v10124_v20  ;;  %7317 = vmatpush3.bf16.msra.mxu1 %v7985_v19  ;;  %v4912_v20 = vrot.slane %v4911_v14, 4  ;;  %v4946_v19 = vrot.slane %v4945_v10, 4  ;;  %v4972_v0 = vshll.u32 %v9478_v52, 16  ;;  %v4986_v33 = vshll.u32 %v9493_v48, 16  ;;  %v9517_v54 = vld [vmem:[#allocation2 + $0xb0] sm:$0x1] }
 0x140   : > { %7318 = vmatprep.subr.bf16.mxu1 %v7987_v51  ;;  %v4990_v26 = vshrl.u32 %v9493_v48, 16  ;;  %v4869_v50 = vsel %vm8313_vm11, %v9430_v17, %v9388_v4  ;;  %v4879_v58 = vsel %vm8313_vm11, %v9467_v36, %v9432_v8  ;;  %v4959_v2 = vor.u32 %v4958_v11, %v4955_v34  ;;  %v9531_v17 = vld [vmem:[%s10040_s3 + $0x100] sm:$0xff]   ;;  %v10126_v14 = vld [vmem:[#allocation6_spill] sm:$0xff]  ;;  %v9551_v10 = vld [vmem:[#allocation2 + $0xb8] sm:$0xf] }
 0x141   : > { %7547 = vmatpush3.bf16.msra.mxu0 %v7984_v22  ;;  %v7988_v22 = vld [vmem:[%s10040_s3 + $0x218] sm:$0xff]   ;;  %v4969_v40 = vor.u32 %v4968_v28, %v9495_v35  ;;  %v4893_v4 = vsel %vm8313_vm11, %v9488_v37, %v9424_v63  ;;  %v4903_v8 = vsel %vm8313_vm11, %v9490_v25, %v9469_v12  ;;  %v4982_v36 = vrot.slane %v4980_v39, 5 }
 0x142   : > { %7548 = vmatprep.subr.bf16.mxu0 %v9465_v38  ;;  %v10127_v31 = vshll.u32 %v10126_v14, 16  ;;  %v10128_v63 = vcombine.low %v9160_v59, %v9167_v5  ;;  %v4917_v12 = vsel %vm8313_vm11, %v4912_v20, %v9446_v9  ;;  %v4927_v37 = vsel %vm8313_vm11, %v4922_v44, %v9497_v62  ;;  %v7991_v5 = vld [vmem:[%s10040_s3 + $0x220] sm:$0xff]   ;;  %v7994_v20 = vld [vmem:[%s10040_s3 + $0x228] sm:$0xff]   ;;  %v9597_v44 = vld [vmem:[#allocation2 + $0xbc] sm:$0x1] }
 0x143   : > { %7319 = vmatpush3.bf16.msra.mxu1 %v7987_v51  ;;  %v4979_v51 = vrot.slane %v4977_v30, 4  ;;  %v4941_v25 = vsel %vm8313_vm11, %v4936_v16, %v9451_v6  ;;  %v10129_v59 = vcombine.low %v9207_v27, %v9220_v60  ;;  %v9562_v9 = vrot.slane %v4972_v0, 5 }
 0x144   : > { %7517 = vmatmul.mubr.bf16.gmra.mrb[4].mxu0 %v9332_v7  ;;  %7592 = vmatprep.subr.bf16.mxu1 %v9531_v17  ;;  %v4679_v7 = vld [vmem:[#allocation2 + $0xb4] sm:$0xf]  ;;  %v9536_v43 = vrot.slane %v10127_v31, 5  ;;  %v9564_v34 = vrot.slane %v4986_v33, 5  ;;  %v4992_v6 = vrot.slane %v4990_v26, 4  ;;  %v9566_v16 = vrot.slane %v4959_v2, 4 }
 0x145   : > { %7520 = vmatprep.mubr.bf16.mxu0 %v9340_v3  ;;  %7549 = vmatpush3.bf16.msra.mxu0 %v9465_v38  ;;  %v4951_v3 = vsel %vm8313_vm11, %v4946_v19, %v4950_v23  ;;  %v9568_v11 = vrot.slane %v4969_v40, 4  ;;  %v4996_v27 = vshll.u32 %v9517_v54, 16  ;;  %v5001_v60 = vshrl.u32 %v4679_v7, 16  ;;  %v1049_v47 = vld [vmem:[#allocation2 + $0xd4] sm:$0x1] }
 0x146   : > { %7289 = vmatmul.mubr.bf16.gmra.mrb[16].mxu1 %v10128_v63  ;;  %7550 = vmatprep.subr.bf16.mxu0 %v7988_v22  ;;  %v10130_v38 = vsel %vm8313_vm11, %v9344_v24, %v9336_v42  ;;  %v10131_v23 = vsel %vm8313_vm11, %v9342_v56, %v9282_v49  ;;  %v4983_v62 = vor.u32 %v4982_v36, %v4979_v51  ;;  %v5004_v30 = vshll.u32 %v4679_v7, 16  ;;  %v9599_v19 = vld [vmem:[#allocation2 + $0xc0] sm:$0xf]  ;;  %v5398_v26 = vld [vmem:[#allocation2 + $0x48] sm:$0xe] }
 0x147   : > { %7292 = vmatprep.mubr.bf16.mxu1 %v10129_v59  ;;  %v6703_v28 = vcombine.low %v10131_v23, %v10130_v38  ;;  %v5010_v39 = vshll.u32 %v9551_v10, 16  ;;  %v10132_v1 = vsel %vm8313_vm11, %v9428_v21, %v9365_v13  ;;  %v10133_v42 = vsel %vm8313_vm11, %v9381_v29, %v9356_v32  ;;  %v5400_v7 = vld [vmem:[#allocation2 + $0x60] sm:$0xe]  ;;  %v9630_v31 = vld [vmem:[#allocation2 + $0xc4] sm:$0xf] }
 0x148   : > { %v6704_v24 = vcombine.low %v10133_v42, %v10132_v1  ;;  %v6497_v49 = vcombine.low %v9410_v45, %v9441_v57  ;;  %v6705_v56 = vcombine.low %v4869_v50, %v4879_v58  ;;  %v1050_v13 = vsel %vm8209_vm3, 0, %v1049_v47  ;;  %v5399_v50 = vld [vmem:[#allocation2 + $0x54] sm:$0xe]  ;;  %v5401_v23 = vld [vmem:[#allocation2 + $0x6c] sm:$0xe] }
 0x149   : > { %7551 = vmatpush3.bf16.msra.mxu0 %v7988_v22  ;;  %v6706_v21 = vcombine.low %v4893_v4, %v4903_v8  ;;  %v9603_v33 = vcombine.low %v4917_v12, %v4927_v37  ;;  %v9605_v32 = vcombine.low %v4941_v25, %v4951_v3  ;;  %v4993_v29 = vor.u32 %v4992_v6, %v9564_v34  ;;  %v10136_v37 = vld [vmem:[#allocation12_spill] sm:$0xff]  ;;  %v10141_v42 = vld [vmem:[#allocation14_spill] sm:$0xff] }
 0x14a   : > { %1051 = vst [vmem:[#allocation2 + $0xd4] sm:$0x1] %v1050_v13  ;;  %7552 = vmatprep.subr.bf16.mxu0 %v7991_v5  ;;  %v4965_v58 = vsel %vm8313_vm11, %v9566_v16, %v9495_v35  ;;  %v4975_v22 = vsel %vm8313_vm11, %v9568_v11, %v9562_v9  ;;  %v9616_v2 = vrot.slane %v4996_v27, 5  ;;  %v9618_v40 = vrot.slane %v5001_v60, 4  ;;  %v4685_v35 = vld [vmem:[#allocation2 + $0xcc] sm:$0xf] }
 0x14b   : > { %v9620_v4 = vrot.slane %v4983_v62, 4  ;;  %v9622_v8 = vrot.slane %v5004_v30, 5  ;;  %v9624_v51 = vrot.slane %v5010_v39, 5  ;;  %v5014_v36 = vshrl.u32 %v9551_v10, 16 }
 0x14c   : > { %7521 = vmatmul.mubr.bf16.gmra.mrb[8].mxu0 %v6703_v28  ;;  %v10135_v14 = vcombine.low %v9240_v55, %v9255_v46  ;;  %v6726_v63 = vrot.slane %v5398_v26, 9  ;;  %v5488_v12 = vrot.slane %v9209_v15, 5  ;;  %v5491_v25 = vrot.slane %v10136_v37, 5  ;;  %v10138_v46 = vld [vmem:[#allocation11_spill] sm:$0xff]  ;;  %v7997_v15 = vld [vmem:[%s10040_s3 + $0x230] sm:$0xff]  }
 0x14d   : > { %7524 = vmatprep.mubr.bf16.mxu0 %v6704_v24  ;;  %v6727_v59 = vrot.slane %v5399_v50, 9  ;;  %v10137_v3 = vcombine.low %v9276_v18, %v9280_v53  ;;  %7553 = vmatpush3.bf16.msra.mxu0 %v7991_v5  ;;  %v4994_v9 = vrot.slane %v4993_v29, 4  ;;  %v5020_v6 = vshll.u32 %v9597_v44, 16  ;;  %v10140_v53 = vld [vmem:[#allocation13_spill] sm:$0xff]  ;;  %v8000_v50 = vld [vmem:[%s10040_s3 + $0x238] sm:$0xff]  }
 0x14e   : > { %7293 = vmatmul.mubr.bf16.gmra.mrb[20].mxu1 %v10135_v14  ;;  %v5025_v55 = vshrl.u32 %v9599_v19, 16  ;;  %v5495_v11 = vrot.slane %v10138_v46, 5  ;;  %7554 = vmatprep.subr.bf16.mxu0 %v7994_v20  ;;  %v5028_v27 = vshll.u32 %v9599_v19, 16  ;;  %v9646_v38 = vsel %vm8385_vm14, %v6726_v63, %v5488_v12  ;;  %v10142_v19 = vld [vmem:[#allocation15_spill] sm:$0xff]  ;;  %v10146_v46 = vld [vmem:[#allocation17_spill] sm:$0xff] }
 0x14f   : > { %7296 = vmatprep.mubr.bf16.mxu1 %v10137_v3  ;;  %v5490_v18 = vrot.slane %v5488_v12, 4  ;;  %v5498_v5 = vrot.slane %v10140_v53, 5  ;;  %v4989_v28 = vsel %vm8313_vm11, %v9620_v4, %v9564_v34  ;;  %v6728_v39 = vrot.slane %v5400_v7, 9  ;;  %v10143_v7 = vld [vmem:[#allocation18_spill] sm:$0xff]  ;;  %v10145_v3 = vld [vmem:[#allocation16_spill] sm:$0xff] }
 0x150   : > { %v9655_v62 = vsel %vm8385_vm14, %v6727_v59, %v5495_v11  ;;  %v5497_v30 = vrot.slane %v5495_v11, 4  ;;  %v9657_v47 = vrot.slane %v5014_v36, 4  ;;  %v5502_v24 = vrot.slane %v10141_v42, 5 }
 0x151   : > { %v9661_v1 = vsel %vm8385_vm14, %v5490_v18, %v5491_v25  ;;  %v5505_v0 = vrot.slane %v10142_v19, 5  ;;  %7555 = vmatpush3.bf16.msra.mxu0 %v7994_v20  ;;  %v5034_v13 = vshll.u32 %v9630_v31, 16  ;;  %v6729_v26 = vrot.slane %v5401_v23, 9  ;;  %v10144_v25 = vld [vmem:[#allocation10_spill] sm:$0xff] }
 0x152   : > { %v6758_v34 = vcombine.low %v9646_v38, %v9661_v1  ;;  %v9670_v29 = vsel %vm8385_vm14, %v5497_v30, %v5498_v5  ;;  %7556 = vmatprep.subr.bf16.mxu0 %v7997_v15  ;;  %v9679_v20 = vsel %vm8385_vm14, %v6728_v39, %v5502_v24  ;;  %v5504_v36 = vrot.slane %v5502_v24, 4  ;;  %v10151_v30 = vld [vmem:[#allocation19_spill] sm:$0xff]  ;;  %v10152_v39 = vld [vmem:[#allocation9_spill] sm:$0xff]  ;;  %v8071_v1 = vld [vmem:[#allocation2 + $0x74] sm:$0x1] }
 0x153   : > { %v6759_v4 = vcombine.low %v9655_v62, %v9670_v29  ;;  %v5509_v14 = vrot.slane %v10143_v7, 5  ;;  %v4999_v63 = vsel %vm8313_vm11, %v4994_v9, %v9616_v2  ;;  %v5027_v12 = vrot.slane %v5025_v55, 4  ;;  %v5402_v9 = vld [vmem:[#allocation2 + $0x78] sm:$0xe]  ;;  %v10148_v55 = vld [vmem:[#allocation8_spill] sm:$0xff] }
 0x154   : > { %7525 = vmatmul.mubr.bf16.gmra.mrb[12].mxu0 %v6705_v56  ;;  %v5030_v37 = vrot.slane %v5028_v27, 5  ;;  %v5512_v59 = vrot.slane %v10144_v25, 5  ;;  %v10147_v11 = vcombine.low %v10145_v3, %v10146_v46  ;;  %v5038_v18 = vshrl.u32 %v9630_v31, 16  ;;  %v10149_v27 = vld [vmem:[#allocation7_spill] sm:$0xff]  ;;  %v5403_v46 = vld [vmem:[#allocation2 + $0x84] sm:$0xe] }
 0x155   : > { %7528 = vmatprep.mubr.bf16.mxu0 %v6706_v21  ;;  %v9692_v53 = vsel %vm8385_vm14, %v5504_v36, %v5505_v0  ;;  %v9696_v56 = vsel %vm8385_vm14, %v6729_v26, %v5509_v14  ;;  %v5511_v2 = vrot.slane %v5509_v14, 4  ;;  %v10150_v5 = vor.u32 %v10148_v55, %v10149_v27  ;;  %7557 = vmatpush3.bf16.msra.mxu0 %v7997_v15  ;;  %v3028_v0 = vld [vmem:[#allocation2 + $0x78] sm:$0xf]  ;;  %v9723_v14 = vld [vmem:[#allocation2 + $0xc8] sm:$0x1] }
 0x156   : > { %7297 = vmatmul.mubr.bf16.gmra.mrb[24].mxu1 %v10147_v11  ;;  %v10153_v21 = vcombine.low %v10151_v30, %v10152_v39  ;;  %v9711_v42 = vcombine.low %v4965_v58, %v4975_v22  ;;  %v5007_v24 = vor.u32 %v9622_v8, %v9618_v40  ;;  %v6760_v19 = vcombine.low %v9679_v20, %v9692_v53  ;;  %v9731_v40 = vld [vmem:[#allocation2 + $0xd0] sm:$0xf] }
 0x157   : > { %v9701_v23 = vrot.slane %v10150_v5, 4  ;;  %v9717_v26 = vcombine.low %v4989_v28, %v4999_v63  ;;  %v5017_v36 = vor.u32 %v9657_v47, %v9624_v51  ;;  %v9721_v7 = vrot.slane %v5020_v6, 5  ;;  %7558 = vmatprep.subr.bf16.mxu0 %v8000_v50  ;;  %v10154_v6 = vld [vmem:[#allocation20_spill] sm:$0xff]  ;;  %v10155_v63 = vld [vmem:[#allocation22_spill] sm:$0xff] }
 0x158   : > { %7300 = vmatprep.mubr.bf16.mxu1 %v10153_v21  ;;  %v9727_v16 = vsel %vm8385_vm14, %v5511_v2, %v5512_v59  ;;  %v5031_v58 = vor.u32 %v5030_v37, %v5027_v12  ;;  %v9729_v22 = vrot.slane %v5034_v13, 5  ;;  %v6730_v15 = vrot.slane %v5402_v9, 9  ;;  %v7989_v11 = vld [vmem:[#allocation2 + $0xc] sm:$0xff]  }
 0x159   : > { %v6761_v8 = vcombine.low %v9696_v56, %v9727_v16  ;;  %v5040_v28 = vrot.slane %v5038_v18, 4  ;;  %v5516_v47 = vrot.slane %v10154_v6, 5  ;;  %v5519_v25 = vrot.slane %v10155_v63, 5  ;;  %7559 = vmatpush3.bf16.msra.mxu0 %v8000_v50  ;;  %v10156_v50 = vld [vmem:[#allocation21_spill] sm:$0xff] }
 0x15a   : > { %v3266_v3 = vshrl.u32 %v3028_v0, 16  ;;  %v5044_v59 = vshll.u32 %v9723_v14, 16  ;;  %v5049_v2 = vshrl.u32 %v4685_v35, 16  ;;  %v3269_v13 = vshll.u32 %v3028_v0, 16 }
 0x15b   : > { %v3288_v12 = vsel %vm8313_vm11, %v9701_v23, %v9536_v43  ;;  %v5052_v37 = vshll.u32 %v4685_v35, 16  ;;  %v9744_v18 = vsel %vm8385_vm14, %v6730_v15, %v5516_v47  ;;  %v5518_v9 = vrot.slane %v5516_v47, 4  ;;  %v5404_v47 = vld [vmem:[#allocation2 + $0x90] sm:$0xe] }
 0x15c   : > { %v3268_v55 = vrot.slane %v3266_v3, 4  ;;  %7529 = vmatmul.mubr.bf16.gmra.mrb[16].mxu0 %v9603_v33  ;;  %v5058_v5 = vshll.u32 %v9731_v40, 16  ;;  %v3271_v30 = vrot.slane %v3269_v13, 5  ;;  %v6731_v39 = vrot.slane %v5403_v46, 9  ;;  %v7990_v46 = vld [vmem:[#allocation2 + $0x18] sm:$0xff]  }
 0x15d   : > { %v5523_v21 = vrot.slane %v10156_v50, 5  ;;  %7532 = vmatprep.mubr.bf16.mxu0 %v9605_v32  ;;  %v5041_v43 = vor.u32 %v5040_v28, %v9729_v22  ;;  %v5062_v23 = vshrl.u32 %v9731_v40, 16  ;;  %v9757_v0 = vsel %vm8385_vm14, %v5518_v9, %v5519_v25 }
 0x15e   : > { %7301 = vmatmul.mubr.bf16.gmra.mrb[28].mxu1 %v6497_v49  ;;  %v5526_v33 = vrot.slane %v9435_v61, 5  ;;  %v6762_v35 = vcombine.low %v9744_v18, %v9757_v0  ;;  %v3272_v15 = vor.u32 %v3271_v30, %v3268_v55  ;;  %v5008_v49 = vrot.slane %v5007_v24, 4  ;;  %v7992_v24 = vld [vmem:[#allocation2 + $0x24] sm:$0xff]  }
 0x15f   : > { %7320 = vmatprep.mubr.bf16.mxu1 %v7989_v11  ;;  %v9764_v45 = vsel %vm8385_vm14, %v6731_v39, %v5523_v21  ;;  %v5525_v57 = vrot.slane %v5523_v21, 4  ;;  %v5018_v32 = vrot.slane %v5017_v36, 4  ;;  %v5032_v28 = vrot.slane %v5031_v58, 4  ;;  %v9774_v36 = vld [vmem:[#allocation2 + $0xd4] sm:$0x1]  ;;  %v10158_v39 = vld [vmem:[#allocation24_spill] sm:$0xff] }
 0x160   : > { %v5046_v6 = vrot.slane %v5044_v59, 5  ;;  %v5051_v63 = vrot.slane %v5049_v2, 4  ;;  %v5054_v25 = vrot.slane %v5052_v37, 5  ;;  %v3273_v3 = vrot.slane %v3272_v15, 4  ;;  %v10157_v2 = vld [vmem:[#allocation23_spill] sm:$0xff] }
 0x161   : > { %v9768_v61 = vsel %vm8385_vm14, %v5525_v57, %v5526_v33  ;;  %v5042_v11 = vrot.slane %v5041_v43, 4  ;;  %v9770_v13 = vrot.slane %v5058_v5, 5  ;;  %v5064_v9 = vrot.slane %v5062_v23, 4  ;;  %v5394_v33 = vld [vmem:[#allocation2 + $0x18] sm:$0xe] }
 0x162   : > { %v6763_v55 = vcombine.low %v9764_v45, %v9768_v61  ;;  %v3278_v58 = vsel %vm8313_vm11, %v3273_v3, %v10149_v27  ;;  %v6732_v59 = vrot.slane %v5404_v47, 9  ;;  %v5530_v37 = vrot.slane %v10157_v2, 5  ;;  %v5405_v15 = vld [vmem:[#allocation2 + $0x9c] sm:$0xe]  ;;  %v8057_v2 = vld [vmem:[#allocation2 + $0x20] sm:$0x1] }
 0x163   : > { %v5013_v30 = vsel %vm8313_vm11, %v5008_v49, %v9624_v51  ;;  %v9783_v5 = vcombine.low %v3278_v58, %v3288_v12  ;;  %v5533_v50 = vrot.slane %v10158_v39, 5  ;;  %v5023_v21 = vsel %vm8313_vm11, %v5018_v32, %v9721_v7  ;;  %v8055_v57 = vld [vmem:[#allocation2 + $0x1c] sm:$0xf] }
 0x164   : > { %7533 = vmatmul.mubr.bf16.gmra.mrb[20].mxu0 %v9711_v42  ;;  %v5055_v43 = vor.u32 %v5054_v25, %v5051_v63  ;;  %v9792_v27 = vsel %vm8385_vm14, %v6732_v59, %v5530_v37  ;;  %v5532_v23 = vrot.slane %v5530_v37, 4  ;;  %v5037_v51 = vsel %vm8313_vm11, %v5032_v28, %v9729_v22  ;;  %v8056_v22 = vld [vmem:[%s10040_s3 + $0x108] sm:$0xff]   ;;  %v7993_v25 = vld [vmem:[#allocation2 + $0x30] sm:$0xff]   ;;  %v7995_v58 = vld [vmem:[#allocation2 + $0x3c] sm:$0xff]  }
 0x165   : > { %7536 = vmatprep.mubr.bf16.mxu0 %v9717_v26  ;;  %v5047_v42 = vsel %vm8313_vm11, %v5042_v11, %v5046_v6  ;;  %v5065_v12 = vor.u32 %v5064_v9, %v9770_v13  ;;  %v5068_v7 = vshll.u32 %v9774_v36, 16  ;;  %v5460_v49 = vrot.slane %v8055_v57, 5  ;;  %v10159_v11 = vld [vmem:[#allocation25_spill] sm:$0xff] }
 0x166   : > { %7321 = vmatmul.mubr.bf16.vlgmr.msra.gmra.mrb[0].mxu1 %v7990_v46  ;;  %v9805_v26 = vsel %vm8385_vm14, %v5532_v23, %v5533_v50  ;;  %v6711_v32 = vcombine.low %v5013_v30, %v5023_v21  ;;  %v6712_v6 = vcombine.low %v5037_v51, %v5047_v42  ;;  %v5056_v47 = vrot.slane %v5055_v43, 4  ;;  %v8058_v30 = vld [vmem:[%s10040_s3 + $0x110] sm:$0xff]   ;;  %v5406_v21 = vld [vmem:[#allocation2 + $0xa8] sm:$0xe]  ;;  %v5395_v43 = vld [vmem:[#allocation2 + $0x24] sm:$0xe] }
 0x167   : > { %7600 = vmatpush3.bf16.msra.mxu1 %v9531_v17  ;;  %7324 = vmatprep.mubr.bf16.mxu1 %v7992_v24  ;;  %v6764_v28 = vcombine.low %v9792_v27, %v9805_v26  ;;  %v6722_v63 = vrot.slane %v5394_v33, 9  ;;  %v6733_v17 = vrot.slane %v5405_v15, 9  ;;  %v5066_v3 = vrot.slane %v5065_v12, 4  ;;  %v8059_v23 = vld [vmem:[#allocation2 + $0x28] sm:$0xf] }
 0x168   : > { %7593 = vmatprep.subr.bf16.mxu1 %v8056_v22  ;;  %v5070_v46 = vrot.slane %v5068_v7, 5  ;;  %v5537_v9 = vrot.slane %v10159_v11, 5  ;;  %v5540_v24 = vrot.slane %v9478_v52, 5  ;;  %v5462_v59 = vrot.slane %v5460_v49, 4  ;;  %v8060_v15 = vld [vmem:[#allocation2 + $0x34] sm:$0xf] }
 0x169   : > { %v5463_v37 = vrot.slane %v8057_v2, 5  ;;  %v5461_v52 = vsel %vm8385_vm14, %v6722_v63, %v5460_v49  ;;  %v5467_v51 = vrot.slane %v8059_v23, 5  ;;  %v5061_v42 = vsel %vm8313_vm11, %v5056_v47, %v9770_v13  ;;  %v8061_v13 = vld [vmem:[%s10040_s3 + $0x118] sm:$0xff]   ;;  %v7996_v11 = vld [vmem:[#allocation2 + $0x48] sm:$0xff]  }
 0x16a   : > { %v9819_v39 = vsel %vm8385_vm14, %v6733_v17, %v5537_v9  ;;  %v5539_v50 = vrot.slane %v5537_v9, 4  ;;  %v5071_v12 = vsel %vm8313_vm11, %v5066_v3, %v5070_v46  ;;  %v5474_v57 = vrot.slane %v8060_v15, 5 }
 0x16b   : > { %7601 = vmatpush3.bf16.msra.mxu1 %v8056_v22  ;;  %v5464_v33 = vsel %vm8385_vm14, %v5462_v59, %v5463_v37  ;;  %v6734_v22 = vrot.slane %v5406_v21, 9  ;;  %v5544_v47 = vrot.slane %v9493_v48, 5  ;;  %v6713_v63 = vcombine.low %v5061_v42, %v5071_v12  ;;  %v7998_v59 = vld [vmem:[#allocation2 + $0x54] sm:$0xff]   ;;  %v8064_v21 = vld [vmem:[%s10040_s3 + $0x120] sm:$0xff]   ;;  %v5397_v42 = vld [vmem:[#allocation2 + $0x3c] sm:$0xe] }
 0x16c   : > { %7594 = vmatprep.subr.bf16.mxu1 %v8058_v30  ;;  %7537 = vmatmul.mubr.bf16.gmra.mrb[24].mxu0 %v6711_v32  ;;  %v9830_v7 = vsel %vm8385_vm14, %v5539_v50, %v5540_v24  ;;  %v6723_v32 = vrot.slane %v5395_v43, 9  ;;  %v5469_v17 = vrot.slane %v5467_v51, 4  ;;  %v5547_v46 = vrot.slane %v9517_v54, 5  ;;  %v5407_v48 = vld [vmem:[#allocation2 + $0xb4] sm:$0xe] }
 0x16d   : > { %7540 = vmatprep.mubr.bf16.mxu0 %v6712_v6  ;;  %v6765_v49 = vcombine.low %v9819_v39, %v9830_v7  ;;  %v5396_v6 = vld [vmem:[#allocation2 + $0x30] sm:$0xe]  ;;  %v6754_v9 = vcombine.low %v5461_v52, %v5464_v33  ;;  %v9843_v24 = vsel %vm8385_vm14, %v6734_v22, %v5544_v47  ;;  %v5476_v37 = vrot.slane %v5474_v57, 4  ;;  %v8065_v12 = vld [vmem:[#allocation2 + $0x40] sm:$0xf] }
 0x16e   : > { %7325 = vmatmul.mubr.bf16.gmra.mrb[4].mxu1 %v7993_v25  ;;  %v8062_v25 = vld [vmem:[#allocation2 + $0x2c] sm:$0x1]  ;;  %v6724_v2 = vrot.slane %v5396_v6, 9  ;;  %v5468_v52 = vsel %vm8385_vm14, %v6723_v32, %v5467_v51  ;;  %v5481_v33 = vrot.slane %v8065_v12, 5  ;;  %v6735_v15 = vrot.slane %v5407_v48, 9 }
 0x16f   : > { %7328 = vmatprep.mubr.bf16.mxu1 %v7995_v58  ;;  %7602 = vmatpush3.bf16.msra.mxu1 %v8058_v30  ;;  %v5470_v3 = vrot.slane %v8062_v25, 5  ;;  %v5546_v58 = vrot.slane %v5544_v47, 4  ;;  %v8063_v30 = vld [vmem:[#allocation2 + $0x38] sm:$0x1]  ;;  %v5551_v22 = vrot.slane %v9551_v10, 5  ;;  %v8066_v6 = vld [vmem:[%s10040_s3 + $0x128] sm:$0xff]  }
 0x170   : > { %7595 = vmatprep.subr.bf16.mxu1 %v8061_v13  ;;  %v5477_v50 = vrot.slane %v8063_v30, 5  ;;  %v5475_v51 = vsel %vm8385_vm14, %v6724_v2, %v5474_v57  ;;  %v7999_v25 = vld [vmem:[#allocation2 + $0x60] sm:$0xff]   ;;  %v5558_v30 = vrot.slane %v9630_v31, 5  ;;  %v8069_v31 = vld [vmem:[%s10040_s3 + $0x138] sm:$0xff]  }
 0x171   : > { %v9850_v54 = vsel %vm8385_vm14, %v5546_v58, %v5547_v46  ;;  %v5471_v43 = vsel %vm8385_vm14, %v5469_v17, %v5470_v3  ;;  %v9869_v47 = vsel %vm8385_vm14, %v6735_v15, %v5551_v22  ;;  %v5553_v10 = vrot.slane %v5551_v22, 4  ;;  %v8067_v57 = vld [vmem:[#allocation2 + $0x44] sm:$0x1]  ;;  %v8001_v58 = vld [vmem:[#allocation2 + $0x6c] sm:$0xff]   ;;  %v8002_v15 = vld [vmem:[#allocation2 + $0x78] sm:$0xff]  }
 0x172   : > { %v6766_v23 = vcombine.low %v9843_v24, %v9850_v54  ;;  %v5478_v32 = vsel %vm8385_vm14, %v5476_v37, %v5477_v50  ;;  %v6725_v17 = vrot.slane %v5397_v42, 9  ;;  %v5483_v46 = vrot.slane %v5481_v33, 4  ;;  %v8068_v37 = vld [vmem:[%s10040_s3 + $0x130] sm:$0xff]   ;;  %v5409_v42 = vld [vmem:[#allocation2 + $0xcc] sm:$0xe] }
 0x173   : > { %7603 = vmatpush3.bf16.msra.mxu1 %v8061_v13  ;;  %v5554_v13 = vrot.slane %v9597_v44, 5  ;;  %v6755_v44 = vcombine.low %v5468_v52, %v5471_v43  ;;  %v6756_v3 = vcombine.low %v5475_v51, %v5478_v32  ;;  %v5561_v50 = vrot.slane %v9723_v14, 5  ;;  %v3025_v22 = vld [vmem:[#allocation2 + $0x6c] sm:$0xf] }
 0x174   : > { %7596 = vmatprep.subr.bf16.mxu1 %v8064_v21  ;;  %7541 = vmatmul.mubr.bf16.gmra.mrb[28].mxu0 %v6713_v63  ;;  %v5408_v63 = vld [vmem:[#allocation2 + $0xc0] sm:$0xe]  ;;  %v5482_v48 = vsel %vm8385_vm14, %v6725_v17, %v5481_v33  ;;  %v5560_v43 = vrot.slane %v5558_v30, 4  ;;  %v5565_v51 = vrot.slane %v9731_v40, 5  ;;  %v5568_v32 = vrot.slane %v9774_v36, 5 }
 0x175   : > { %7560 = vmatprep.mubr.bf16.mxu0 %v6754_v9  ;;  %v9873_v9 = vsel %vm8385_vm14, %v5553_v10, %v5554_v13  ;;  %v6736_v2 = vrot.slane %v5408_v63, 9  ;;  %v6737_v13 = vrot.slane %v5409_v42, 9  ;;  %v3245_v17 = vshll.u32 %v3025_v22, 16 }
 0x176   : > { %7329 = vmatmul.mubr.bf16.gmra.mrb[8].mxu1 %v7996_v11  ;;  %v5484_v11 = vrot.slane %v8067_v57, 5  ;;  %v9895_v14 = vsel %vm8385_vm14, %v5560_v43, %v5561_v50  ;;  %v5567_v63 = vrot.slane %v5565_v51, 4  ;;  %v3031_v50 = vld [vmem:[#allocation2 + $0x84] sm:$0xf]  ;;  %v8072_v43 = vld [vmem:[#allocation2 + $0x88] sm:$0xf] }
 0x177   : > { %7332 = vmatprep.mubr.bf16.mxu1 %v7998_v59  ;;  %7604 = vmatpush3.bf16.msra.mxu1 %v8064_v21  ;;  %v6767_v59 = vcombine.low %v9869_v47, %v9873_v9  ;;  %v9888_v52 = vsel %vm8385_vm14, %v6736_v2, %v5558_v30  ;;  %v9903_v10 = vsel %vm8385_vm14, %v6737_v13, %v5565_v51  ;;  %v8005_v30 = vld [vmem:[#allocation2 + $0x9c] sm:$0xff]   ;;  %v3299_v42 = vshll.u32 %v8072_v43, 16 }
 0x178   : > { %7597 = vmatprep.subr.bf16.mxu1 %v8066_v6  ;;  %v5485_v21 = vsel %vm8385_vm14, %v5483_v46, %v5484_v11  ;;  %v6768_v33 = vcombine.low %v9888_v52, %v9895_v14  ;;  %v9910_v36 = vsel %vm8385_vm14, %v5567_v63, %v5568_v32  ;;  %v3247_v11 = vrot.slane %v3245_v17, 5  ;;  %v3037_v51 = vld [vmem:[#allocation2 + $0x9c] sm:$0xf]  ;;  %v8007_v32 = vld [vmem:[#allocation2 + $0xb4] sm:$0xff]  }
 0x179   : > { %v6757_v12 = vcombine.low %v5482_v48, %v5485_v21  ;;  %v6769_v46 = vcombine.low %v9903_v10, %v9910_v36  ;;  %v3290_v48 = vshrl.u32 %v3031_v50, 16  ;;  %v3293_v21 = vshll.u32 %v3031_v50, 16  ;;  %v8073_v63 = vld [vmem:[#allocation2 + $0x94] sm:$0xf] }
 0x17a   : > { %v9920_v20 = vrot.slane %v3299_v42, 5  ;;  %v3327_v17 = vshrl.u32 %v8073_v63, 16 }
 0x17b   : > { %7605 = vmatpush3.bf16.msra.mxu1 %v8066_v6  ;;  %v8003_v6 = vld [vmem:[#allocation2 + $0x84] sm:$0xff]   ;;  %v3295_v13 = vrot.slane %v3293_v21, 5 }
 0x17c   : > { %7598 = vmatprep.subr.bf16.mxu1 %v8068_v37  ;;  %7561 = vmatmul.mubr.bf16.vlgmr.msra.gmra.mrb[0].mxu0 %v6755_v44  ;;  %v3242_v44 = vshrl.u32 %v3025_v22, 16 }
 0x17d   : > { %7564 = vmatprep.mubr.bf16.mxu0 %v6756_v3 }
 0x17e   : > { %7333 = vmatmul.mubr.bf16.gmra.mrb[12].mxu1 %v7999_v25  ;;  %v8070_v25 = vld [vmem:[#allocation2 + $0x70] sm:$0xf]  ;;  %v3244_v57 = vrot.slane %v3242_v44, 4  ;;  %v3323_v44 = vshll.u32 %v8073_v63, 16 }
 0x17f   : > { %7336 = vmatprep.mubr.bf16.mxu1 %v8001_v58  ;;  %7606 = vmatpush3.bf16.msra.mxu1 %v8068_v37  ;;  %v3251_v3 = vshll.u32 %v8070_v25, 16  ;;  %v3255_v40 = vshrl.u32 %v8070_v25, 16  ;;  %v8004_v58 = vld [vmem:[#allocation2 + $0x90] sm:$0xff]   ;;  %v3338_v25 = vshrl.u32 %v3037_v51, 16 }
 0x180   : > { %7599 = vmatprep.subr.bf16.mxu1 %v8069_v31  ;;  %v3248_v38 = vor.u32 %v3247_v11, %v3244_v57 }
 0x181   : > { %v3253_v2 = vrot.slane %v3251_v3, 5  ;;  %v3257_v37 = vrot.slane %v3255_v40, 4  ;;  %v3341_v3 = vshll.u32 %v3037_v51, 16  ;;  %v8074_v40 = vld [vmem:[#allocation2 + $0xa0] sm:$0xf] }
 0x182   : > { %v3249_v22 = vrot.slane %v3248_v38, 4  ;;  %v3347_v57 = vshll.u32 %v8074_v40, 16  ;;  %v3351_v11 = vshrl.u32 %v8074_v40, 16  ;;  %v8079_v40 = vld [vmem:[#allocation2 + $0xb8] sm:$0xf] }
 0x183   : > { %7607 = vmatpush3.bf16.msra.mxu1 %v8069_v31  ;;  %v3258_v60 = vor.u32 %v3257_v37, %v3253_v2  ;;  %v3303_v31 = vshrl.u32 %v8072_v43, 16  ;;  %v8008_v43 = vld [vmem:[#allocation2 + $0xc0] sm:$0xff]   ;;  %v3395_v27 = vshll.u32 %v8079_v40, 16  ;;  %v3399_v26 = vshrl.u32 %v8079_v40, 16 }
 0x184   : > { %7565 = vmatmul.mubr.bf16.gmra.mrb[4].mxu0 %v6757_v12  ;;  %v3034_v12 = vld [vmem:[#allocation2 + $0x90] sm:$0xf]  ;;  %v3353_v21 = vrot.slane %v3351_v11, 4 }
 0x185   : > { %7568 = vmatprep.mubr.bf16.mxu0 %v6758_v34  ;;  %v3261_v34 = vshll.u32 %v8071_v1, 16  ;;  %v3259_v62 = vrot.slane %v3258_v60, 4  ;;  %v3305_v53 = vrot.slane %v3303_v31, 4  ;;  %v9933_v60 = vrot.slane %v3323_v44, 5 }
 0x186   : > { %7337 = vmatmul.mubr.bf16.gmra.mrb[16].mxu1 %v8002_v15  ;;  %v8006_v15 = vld [vmem:[#allocation2 + $0xa8] sm:$0xff]   ;;  %v3329_v1 = vrot.slane %v3327_v17, 4 }
 0x187   : > { %7340 = vmatprep.mubr.bf16.mxu1 %v8003_v6  ;;  %v3263_v29 = vrot.slane %v3261_v34, 5  ;;  %v3317_v6 = vshll.u32 %v3034_v12, 16  ;;  %v3306_v16 = vor.u32 %v3305_v53, %v9920_v20  ;;  %v3340_v34 = vrot.slane %v3338_v25, 4 }
 0x189   : > { %v3264_v37 = vsel %vm8313_vm11, %v3259_v62, %v3263_v29  ;;  %v3319_v38 = vrot.slane %v3317_v6, 5  ;;  %v3330_v62 = vor.u32 %v3329_v1, %v9933_v60  ;;  %v8078_v6 = vld [vmem:[#allocation2 + $0xac] sm:$0xf]  ;;  %v3401_v1 = vrot.slane %v3399_v26, 4 }
 0x18a   : > { %v3371_v63 = vshll.u32 %v8078_v6, 16  ;;  %v3375_v44 = vshrl.u32 %v8078_v6, 16 }
 0x18c   : > { %7569 = vmatmul.mubr.bf16.gmra.mrb[8].mxu0 %v6759_v4  ;;  %v3292_v4 = vrot.slane %v3290_v48, 4  ;;  %v9935_v48 = vrot.slane %v3347_v57, 5 }
 0x18d   : > { %7572 = vmatprep.mubr.bf16.mxu0 %v6760_v19  ;;  %v3314_v19 = vshrl.u32 %v3034_v12, 16  ;;  %v8076_v12 = vld [vmem:[#allocation2 + $0x98] sm:$0x1] }
 0x18e   : > { %7341 = vmatmul.mubr.bf16.gmra.mrb[20].mxu1 %v8004_v58  ;;  %v3254_v58 = vsel %vm8313_vm11, %v3249_v22, %v3253_v2  ;;  %v3296_v56 = vor.u32 %v3295_v13, %v3292_v4  ;;  %v3343_v2 = vrot.slane %v3341_v3, 5  ;;  %v3040_v22 = vld [vmem:[#allocation2 + $0xa8] sm:$0xf]  ;;  %v3354_v4 = vor.u32 %v3353_v21, %v9935_v48  ;;  %v8077_v13 = vld [vmem:[#allocation2 + $0xa4] sm:$0x1] }
 0x18f   : > { %7344 = vmatprep.mubr.bf16.mxu1 %v8005_v30  ;;  %v8075_v30 = vld [vmem:[#allocation2 + $0x8c] sm:$0x1]  ;;  %v6570_v42 = vcombine.low %v3254_v58, %v3264_v37  ;;  %v3357_v51 = vshll.u32 %v8077_v13, 16  ;;  %v3362_v53 = vshrl.u32 %v3040_v22, 16 }
 0x190   : > { %v3309_v50 = vshll.u32 %v8075_v30, 16  ;;  %v3297_v0 = vrot.slane %v3296_v56, 4  ;;  %v3344_v29 = vor.u32 %v3343_v2, %v3340_v34  ;;  %v3355_v11 = vrot.slane %v3354_v4, 4  ;;  %v3046_v34 = vld [vmem:[#allocation2 + $0xc0] sm:$0xf] }
 0x191   : > { %v3359_v58 = vrot.slane %v3357_v51, 5  ;;  %v3364_v37 = vrot.slane %v3362_v53, 4  ;;  %v3377_v56 = vrot.slane %v3375_v44, 4  ;;  %v3410_v39 = vshrl.u32 %v3046_v34, 16 }
 0x192   : > { %v3311_v18 = vrot.slane %v3309_v50, 5  ;;  %v3302_v45 = vsel %vm8313_vm11, %v3297_v0, %v9920_v20  ;;  %v3345_v57 = vrot.slane %v3344_v29, 4  ;;  %v3373_v50 = vrot.slane %v3371_v63, 5  ;;  %v8080_v0 = vld [vmem:[#allocation2 + $0xb0] sm:$0x1] }
 0x193   : > { %v3413_v7 = vshll.u32 %v3046_v34, 16  ;;  %v3412_v54 = vrot.slane %v3410_v39, 4 }
 0x194   : > { %7573 = vmatmul.mubr.bf16.gmra.mrb[12].mxu0 %v6761_v8  ;;  %v3316_v8 = vrot.slane %v3314_v19, 4  ;;  %v3365_v19 = vshll.u32 %v3040_v22, 16 }
 0x195   : > { %7576 = vmatprep.mubr.bf16.mxu0 %v6762_v35  ;;  %v3307_v35 = vrot.slane %v3306_v16, 4 }
 0x196   : > { %7345 = vmatmul.mubr.bf16.gmra.mrb[24].mxu1 %v8006_v15  ;;  %v3320_v31 = vor.u32 %v3319_v38, %v3316_v8  ;;  %v3333_v15 = vshll.u32 %v8076_v12, 16  ;;  %v3367_v30 = vrot.slane %v3365_v19, 5  ;;  %v3397_v38 = vrot.slane %v3395_v27, 5 }
 0x197   : > { %7348 = vmatprep.mubr.bf16.mxu1 %v8007_v32  ;;  %v3043_v32 = vld [vmem:[#allocation2 + $0xb4] sm:$0xf]  ;;  %v3312_v61 = vsel %vm8313_vm11, %v3307_v35, %v3311_v18  ;;  %v3378_v18 = vor.u32 %v3377_v56, %v3373_v50  ;;  %v3381_v35 = vshll.u32 %v8080_v0, 16 }
 0x198   : > { %v3335_v17 = vrot.slane %v3333_v15, 5  ;;  %v3386_v25 = vshrl.u32 %v3043_v32, 16  ;;  %v3389_v3 = vshll.u32 %v3043_v32, 16  ;;  %v6572_v16 = vcombine.low %v3302_v45, %v3312_v61 }
 0x199   : > { %v3402_v15 = vor.u32 %v3401_v1, %v3397_v38  ;;  %v3379_v13 = vrot.slane %v3378_v18, 4  ;;  %v3383_v24 = vrot.slane %v3381_v35, 5 }
 0x19a   : > { %v3388_v20 = vrot.slane %v3386_v25, 4  ;;  %v3391_v8 = vrot.slane %v3389_v3, 5 }
 0x19b   : > { %v3403_v19 = vrot.slane %v3402_v15, 4  ;;  %v3384_v44 = vsel %vm8313_vm11, %v3379_v13, %v3383_v24 }
 0x19c   : > { %7577 = vmatmul.mubr.bf16.gmra.mrb[16].mxu0 %v6763_v55  ;;  %v3321_v55 = vrot.slane %v3320_v31, 4 }
 0x19d   : > { %7580 = vmatprep.mubr.bf16.mxu0 %v6764_v28  ;;  %v3331_v28 = vrot.slane %v3330_v62, 4 }
 0x19e   : > { %7349 = vmatmul.mubr.bf16.gmra.mrb[28].mxu1 %v8008_v43  ;;  %v3326_v2 = vsel %vm8313_vm11, %v3321_v55, %v9933_v60  ;;  %v3350_v43 = vsel %vm8313_vm11, %v3345_v57, %v9935_v48  ;;  %v3368_v60 = vor.u32 %v3367_v30, %v3364_v37  ;;  %v3392_v48 = vor.u32 %v3391_v8, %v3388_v20  ;;  %v8083_v55 = vld [vmem:[#allocation2 + $0xc8] sm:$0x1] }
 0x19f   : > { %7384 = vmatprep.mubr.bf16.mxu1 %v6570_v42  ;;  %v3336_v21 = vsel %vm8313_vm11, %v3331_v28, %v3335_v17  ;;  %v3360_v42 = vsel %vm8313_vm11, %v3355_v11, %v3359_v58  ;;  %v3429_v17 = vshll.u32 %v8083_v55, 16 }
 0x1a0   : > { %v6573_v62 = vcombine.low %v3326_v2, %v3336_v21  ;;  %v6574_v29 = vcombine.low %v3350_v43, %v3360_v42  ;;  %v3369_v4 = vrot.slane %v3368_v60, 4  ;;  %v3393_v53 = vrot.slane %v3392_v48, 4 }
 0x1a1   : > { %v3431_v52 = vrot.slane %v3429_v17, 5 }
 0x1a2   : > { %v3374_v63 = vsel %vm8313_vm11, %v3369_v4, %v3373_v50  ;;  %v3398_v47 = vsel %vm8313_vm11, %v3393_v53, %v3397_v38 }
 0x1a4   : > { %7581 = vmatmul.mubr.bf16.gmra.mrb[20].mxu0 %v6765_v49  ;;  %v8081_v49 = vld [vmem:[#allocation2 + $0xc4] sm:$0xf] }
 0x1a5   : > { %7584 = vmatprep.mubr.bf16.mxu0 %v6766_v23  ;;  %v3419_v31 = vshll.u32 %v8081_v49, 16  ;;  %v3423_v12 = vshrl.u32 %v8081_v49, 16  ;;  %v3415_v23 = vrot.slane %v3413_v7, 5 }
 0x1a6   : > { %7385 = vmatmul.mubr.bf16.vlgmr.msra.gmra.mrb[16].mxu1 %v9783_v5  ;;  %v8082_v5 = vld [vmem:[#allocation2 + $0xbc] sm:$0x1] }
 0x1a7   : > { %7388 = vmatprep.mubr.bf16.mxu1 %v6572_v16  ;;  %v3405_v22 = vshll.u32 %v8082_v5, 16  ;;  %v3421_v51 = vrot.slane %v3419_v31, 5  ;;  %v3425_v32 = vrot.slane %v3423_v12, 4  ;;  %v3416_v45 = vor.u32 %v3415_v23, %v3412_v54 }
 0x1a9   : > { %v3407_v6 = vrot.slane %v3405_v22, 5  ;;  %v3426_v61 = vor.u32 %v3425_v32, %v3421_v51  ;;  %v3417_v3 = vrot.slane %v3416_v45, 4 }
 0x1ab   : > { %v3408_v9 = vsel %vm8313_vm11, %v3403_v19, %v3407_v6  ;;  %v3427_v40 = vrot.slane %v3426_v61, 4  ;;  %v3422_v14 = vsel %vm8313_vm11, %v3417_v3, %v3421_v51 }
 0x1ac   : > { %7585 = vmatmul.mubr.bf16.gmra.mrb[24].mxu0 %v6767_v59  ;;  %v6575_v59 = vcombine.low %v3374_v63, %v3384_v44  ;;  %v6576_v25 = vcombine.low %v3398_v47, %v3408_v9 }
 0x1ad   : > { %7588 = vmatprep.mubr.bf16.mxu0 %v6768_v33  ;;  %v3432_v33 = vsel %vm8313_vm11, %v3427_v40, %v3431_v52 }
 0x1ae   : > { %7389 = vmatmul.mubr.bf16.gmra.mrb[20].mxu1 %v6573_v62  ;;  %v6577_v27 = vcombine.low %v3422_v14, %v3432_v33 }
 0x1af   : > { %7392 = vmatprep.mubr.bf16.mxu1 %v6574_v29 }
 0x1b4   : > { %7589 = vmatmul.mubr.bf16.gmra.mrb[28].mxu0 %v6769_v46 }
 0x1b6   : > { %7393 = vmatmul.mubr.bf16.gmra.mrb[24].mxu1 %v6575_v59 }
 0x1b7   : > { %7396 = vmatprep.mubr.bf16.mxu1 %v6576_v25 }
 0x1be   : > { %7397 = vmatmul.mubr.bf16.gmra.mrb[28].mxu1 %v6577_v27 }
 0x239   : > { %v7322_v26 = vpop.f32.mrb[0].mxu1 }
 0x23a   : > { %v2842_v28 = vpop.f32.mrb[1].mxu1 }
 0x23b   : > { %v7323_v57 = vpop.f32.mrb[2].mxu1 }
 0x23c   : > { %v2845_v11 = vpop.f32.mrb[3].mxu1 }
 0x241   : > { %v7326_v58 = vpop.f32.mrb[4].mxu1 }
 0x242   : > { %v2858_v37 = vpop.f32.mrb[5].mxu1 }
 0x243   : > { %v7327_v30 = vpop.f32.mrb[6].mxu1 }
 0x244   : > { %v2861_v50 = vpop.f32.mrb[7].mxu1 }
 0x249   : > { %v7330_v10 = vpop.f32.mrb[8].mxu1 }
 0x24a   : > { %v2874_v36 = vpop.f32.mrb[9].mxu1 }
 0x24b   : > { %v7331_v46 = vpop.f32.mrb[10].mxu1 }
 0x24c   : > { %v2877_v56 = vpop.f32.mrb[11].mxu1 }
 0x24f   : > { %v7562_v16 = vpop.f32.mrb[0].mxu0 }
 0x250   : > { %v7608_v41 = vadd.f32 %v7562_v16, %v7322_v26  ;;  %v5733_v8 = vpop.f32.mrb[1].mxu0 }
 0x251   : > { %v9988_v20 = vpop.f32.mrb[12].mxu1  ;;  %v7609_v1 = vadd.f32 %v5733_v8, %v2842_v28  ;;  %v7563_v34 = vpop.f32.mrb[2].mxu0 }
 0x252   : > { %v9990_v38 = vpop.f32.mrb[13].mxu1  ;;  %v7610_v21 = vadd.f32 %v7563_v34, %v7323_v57  ;;  %v5736_v43 = vpop.f32.mrb[3].mxu0 }
 0x253   : > { %v9992_v2 = vpop.f32.mrb[14].mxu1  ;;  %v7611_v60 = vadd.f32 %v5736_v43, %v2845_v11 }
 0x254   : > { %v9994_v42 = vpop.f32.mrb[15].mxu1  ;;  %v5893_v18 = vpack.c.bf16 %v7610_v21, %v7608_v41 }
 0x255   : > { %v5892_v0 = vpack.c.bf16 %v7611_v60, %v7609_v1 }
 0x256   : > { %6929 = vst [vmem:[%s10001_s10 + $0x8] sm:$0xff] %v5893_v18   ;;  %v6054_v35 = vunpack.c.l.bf16 %v5893_v18  ;;  %v6055_v31 = vunpack.c.h.bf16 %v5893_v18 }
 0x257   : > { %6853 = vst [vmem:[%s10001_s10] sm:$0xff] %v5892_v0   ;;  %v6052_v39 = vunpack.c.l.bf16 %v5892_v0  ;;  %v6053_v7 = vunpack.c.h.bf16 %v5892_v0  ;;  %v7566_v49 = vpop.f32.mrb[4].mxu0 }
 0x258   : > { %v7612_v12 = vadd.f32 %v7566_v49, %v7326_v58  ;;  %v5749_v48 = vpop.f32.mrb[5].mxu0  ;;  %v6123_v24 = vmul.f32 %v6054_v35, %v6054_v35  ;;  %v6124_v53 = vmul.f32 %v6055_v31, %v6055_v31 }
 0x259   : > { %v6084_v15 = vadd.f32 %v6053_v7, %v6052_v39  ;;  %v6121_v5 = vmul.f32 %v6052_v39, %v6052_v39  ;;  %v6122_v22 = vmul.f32 %v6053_v7, %v6053_v7  ;;  %v7613_v62 = vadd.f32 %v5749_v48, %v2858_v37  ;;  %v7567_v29 = vpop.f32.mrb[6].mxu0 }
 0x25a   : > { %v7614_v4 = vadd.f32 %v7567_v29, %v7327_v30  ;;  %v5752_v13 = vpop.f32.mrb[7].mxu0 }
 0x25b   : > { %v6085_v54 = vadd.f32 %v6084_v15, %v6054_v35  ;;  %v6153_v23 = vadd.f32 %v6122_v22, %v6121_v5  ;;  %v7615_v51 = vadd.f32 %v5752_v13, %v2861_v50 }
 0x25c   : > { %v5895_v32 = vpack.c.bf16 %v7614_v4, %v7612_v12 }
 0x25d   : > { %v6154_v19 = vadd.f32 %v6153_v23, %v6123_v24  ;;  %v5894_v6 = vpack.c.bf16 %v7615_v51, %v7613_v62  ;;  %v6086_v63 = vadd.f32 %v6085_v54, %v6055_v31 }
 0x25e   : > { %6931 = vst [vmem:[%s10001_s10 + $0x18] sm:$0xff] %v5895_v32   ;;  %v6058_v9 = vunpack.c.l.bf16 %v5895_v32  ;;  %v6059_v52 = vunpack.c.h.bf16 %v5895_v32 }
 0x25f   : > { %6930 = vst [vmem:[%s10001_s10 + $0x10] sm:$0xff] %v5894_v6   ;;  %v6056_v44 = vunpack.c.l.bf16 %v5894_v6  ;;  %v6057_v45 = vunpack.c.h.bf16 %v5894_v6  ;;  %v6155_v61 = vadd.f32 %v6154_v19, %v6124_v53  ;;  %v7570_v55 = vpop.f32.mrb[8].mxu0 }
 0x260   : > { %v7616_v17 = vadd.f32 %v7570_v55, %v7330_v10  ;;  %v5765_v47 = vpop.f32.mrb[9].mxu0  ;;  %v6127_v58 = vmul.f32 %v6058_v9, %v6058_v9  ;;  %v6128_v10 = vmul.f32 %v6059_v52, %v6059_v52 }
 0x261   : > { %v6087_v59 = vadd.f32 %v6086_v63, %v6056_v44  ;;  %v6125_v25 = vmul.f32 %v6056_v44, %v6056_v44  ;;  %v7617_v3 = vadd.f32 %v5765_v47, %v2874_v36  ;;  %v7571_v40 = vpop.f32.mrb[10].mxu0  ;;  %v6126_v26 = vmul.f32 %v6057_v45, %v6057_v45 }
 0x262   : > { %v7618_v14 = vadd.f32 %v7571_v40, %v7331_v46  ;;  %v5768_v33 = vpop.f32.mrb[11].mxu0 }
 0x263   : > { %v6088_v27 = vadd.f32 %v6087_v59, %v6057_v45  ;;  %v6156_v28 = vadd.f32 %v6155_v61, %v6125_v25  ;;  %v7619_v57 = vadd.f32 %v5768_v33, %v2877_v56 }
 0x264   : > { %v5897_v11 = vpack.c.bf16 %v7618_v14, %v7616_v17 }
 0x265   : > { %v6089_v37 = vadd.f32 %v6088_v27, %v6058_v9  ;;  %v6157_v30 = vadd.f32 %v6156_v28, %v6126_v26  ;;  %v5896_v50 = vpack.c.bf16 %v7619_v57, %v7617_v3 }
 0x266   : > { %6933 = vst [vmem:[%s10001_s10 + $0x28] sm:$0xff] %v5897_v11   ;;  %v6062_v21 = vunpack.c.l.bf16 %v5897_v11  ;;  %v6063_v0 = vunpack.c.h.bf16 %v5897_v11 }
 0x267   : > { %v6158_v16 = vadd.f32 %v6157_v30, %v6127_v58  ;;  %6932 = vst [vmem:[%s10001_s10 + $0x20] sm:$0xff] %v5896_v50   ;;  %v6060_v41 = vunpack.c.l.bf16 %v5896_v50  ;;  %v6061_v36 = vunpack.c.h.bf16 %v5896_v50  ;;  %v6090_v8 = vadd.f32 %v6089_v37, %v6059_v52  ;;  %v7574_v1 = vpop.f32.mrb[12].mxu0 }
 0x268   : > { %v7620_v46 = vadd.f32 %v7574_v1, %v9988_v20  ;;  %v5781_v34 = vpop.f32.mrb[13].mxu0  ;;  %v6131_v15 = vmul.f32 %v6062_v21, %v6062_v21  ;;  %v6132_v29 = vmul.f32 %v6063_v0, %v6063_v0 }
 0x269   : > { %v6091_v43 = vadd.f32 %v6090_v8, %v6060_v41  ;;  %v6129_v60 = vmul.f32 %v6060_v41, %v6060_v41  ;;  %v6159_v56 = vadd.f32 %v6158_v16, %v6128_v10  ;;  %v7575_v18 = vpop.f32.mrb[14].mxu0  ;;  %v7621_v35 = vadd.f32 %v5781_v34, %v9990_v38 }
 0x26a   : > { %v7622_v39 = vadd.f32 %v7575_v18, %v9992_v2  ;;  %v5784_v7 = vpop.f32.mrb[15].mxu0  ;;  %v6130_v31 = vmul.f32 %v6061_v36, %v6061_v36 }
 0x26b   : > { %v6092_v49 = vadd.f32 %v6091_v43, %v6061_v36  ;;  %v6160_v12 = vadd.f32 %v6159_v56, %v6129_v60  ;;  %v7623_v48 = vadd.f32 %v5784_v7, %v9994_v42 }
 0x26c   : > { %v5899_v20 = vpack.c.bf16 %v7622_v39, %v7620_v46 }
 0x26d   : > { %v6093_v5 = vadd.f32 %v6092_v49, %v6062_v21  ;;  %v6161_v22 = vadd.f32 %v6160_v12, %v6130_v31  ;;  %v5898_v62 = vpack.c.bf16 %v7623_v48, %v7621_v35 }
 0x26e   : > { %6935 = vst [vmem:[%s10001_s10 + $0x38] sm:$0xff] %v5899_v20   ;;  %v6066_v23 = vunpack.c.l.bf16 %v5899_v20  ;;  %v6067_v6 = vunpack.c.h.bf16 %v5899_v20 }
 0x26f   : > { %v6162_v4 = vadd.f32 %v6161_v22, %v6131_v15  ;;  %6934 = vst [vmem:[%s10001_s10 + $0x30] sm:$0xff] %v5898_v62   ;;  %v6064_v13 = vunpack.c.l.bf16 %v5898_v62  ;;  %v6065_v24 = vunpack.c.h.bf16 %v5898_v62  ;;  %v6094_v38 = vadd.f32 %v6093_v5, %v6063_v0  ;;  %v7578_v54 = vpop.f32.mrb[16].mxu0 }
 0x270   : > { %v5797_v2 = vpop.f32.mrb[17].mxu0  ;;  %v6135_v61 = vmul.f32 %v6066_v23, %v6066_v23  ;;  %v6136_v47 = vmul.f32 %v6067_v6, %v6067_v6 }
 0x271   : > { %v6095_v51 = vadd.f32 %v6094_v38, %v6064_v13  ;;  %v6133_v32 = vmul.f32 %v6064_v13, %v6064_v13  ;;  %v6163_v53 = vadd.f32 %v6162_v4, %v6132_v29  ;;  %v7579_v19 = vpop.f32.mrb[18].mxu0  ;;  %v6134_v44 = vmul.f32 %v6065_v24, %v6065_v24 }
 0x272   : > { %v5800_v42 = vpop.f32.mrb[19].mxu0 }
 0x273   : > { %v6096_v63 = vadd.f32 %v6095_v51, %v6065_v24  ;;  %v6164_v45 = vadd.f32 %v6163_v53, %v6133_v32 }
 0x275   : > { %v6097_v55 = vadd.f32 %v6096_v63, %v6066_v23  ;;  %v6165_v17 = vadd.f32 %v6164_v45, %v6134_v44 }
 0x277   : > { %v6166_v9 = vadd.f32 %v6165_v17, %v6135_v61  ;;  %v6098_v59 = vadd.f32 %v6097_v55, %v6067_v6  ;;  %v7582_v25 = vpop.f32.mrb[20].mxu0 }
 0x278   : > { %v5813_v40 = vpop.f32.mrb[21].mxu0 }
 0x279   : > { %v7386_v3 = vpop.f32.mrb[16].mxu1  ;;  %v6167_v33 = vadd.f32 %v6166_v9, %v6136_v47  ;;  %v7583_v27 = vpop.f32.mrb[22].mxu0 }
 0x27a   : > { %v7624_v52 = vadd.f32 %v7578_v54, %v7386_v3  ;;  %v3660_v14 = vpop.f32.mrb[17].mxu1  ;;  %v5816_v57 = vpop.f32.mrb[23].mxu0 }
 0x27b   : > { %v7625_v26 = vadd.f32 %v5797_v2, %v3660_v14  ;;  %v7387_v28 = vpop.f32.mrb[18].mxu1 }
 0x27c   : > { %v7626_v11 = vadd.f32 %v7579_v19, %v7387_v28  ;;  %v3663_v58 = vpop.f32.mrb[19].mxu1 }
 0x27d   : > { %v7627_v37 = vadd.f32 %v5800_v42, %v3663_v58 }
 0x27e   : > { %v5901_v30 = vpack.c.bf16 %v7626_v11, %v7624_v52 }
 0x27f   : > { %v5900_v50 = vpack.c.bf16 %v7627_v37, %v7625_v26  ;;  %v7586_v10 = vpop.f32.mrb[24].mxu0 }
 0x280   : > { %6937 = vst [vmem:[%s10001_s10 + $0x48] sm:$0xff] %v5901_v30   ;;  %v5829_v8 = vpop.f32.mrb[25].mxu0  ;;  %v6070_v21 = vunpack.c.l.bf16 %v5901_v30  ;;  %v6071_v35 = vunpack.c.h.bf16 %v5901_v30 }
 0x281   : > { %6936 = vst [vmem:[%s10001_s10 + $0x40] sm:$0xff] %v5900_v50   ;;  %v6068_v16 = vunpack.c.l.bf16 %v5900_v50  ;;  %v6069_v41 = vunpack.c.h.bf16 %v5900_v50  ;;  %v7390_v36 = vpop.f32.mrb[20].mxu1  ;;  %v7587_v34 = vpop.f32.mrb[26].mxu0 }
 0x282   : > { %v7628_v1 = vadd.f32 %v7582_v25, %v7390_v36  ;;  %v3676_v46 = vpop.f32.mrb[21].mxu1  ;;  %v5832_v0 = vpop.f32.mrb[27].mxu0  ;;  %v6139_v15 = vmul.f32 %v6070_v21, %v6070_v21  ;;  %v6140_v29 = vmul.f32 %v6071_v35, %v6071_v35 }
 0x283   : > { %v6099_v43 = vadd.f32 %v6098_v59, %v6068_v16  ;;  %v6137_v60 = vmul.f32 %v6068_v16, %v6068_v16  ;;  %v7629_v56 = vadd.f32 %v5813_v40, %v3676_v46  ;;  %v7391_v18 = vpop.f32.mrb[22].mxu1  ;;  %v6138_v31 = vmul.f32 %v6069_v41, %v6069_v41 }
 0x284   : > { %v7630_v39 = vadd.f32 %v7583_v27, %v7391_v18  ;;  %v3679_v7 = vpop.f32.mrb[23].mxu1 }
 0x285   : > { %v6100_v49 = vadd.f32 %v6099_v43, %v6069_v41  ;;  %v6168_v12 = vadd.f32 %v6167_v33, %v6137_v60  ;;  %v7631_v48 = vadd.f32 %v5816_v57, %v3679_v7 }
 0x286   : > { %v5903_v20 = vpack.c.bf16 %v7630_v39, %v7628_v1 }
 0x287   : > { %v6101_v5 = vadd.f32 %v6100_v49, %v6070_v21  ;;  %v6169_v22 = vadd.f32 %v6168_v12, %v6138_v31  ;;  %v5902_v62 = vpack.c.bf16 %v7631_v48, %v7629_v56  ;;  %v7590_v4 = vpop.f32.mrb[28].mxu0 }
 0x288   : > { %6939 = vst [vmem:[%s10001_s10 + $0x58] sm:$0xff] %v5903_v20   ;;  %v5845_v23 = vpop.f32.mrb[29].mxu0  ;;  %v6074_v19 = vunpack.c.l.bf16 %v5903_v20  ;;  %v6075_v61 = vunpack.c.h.bf16 %v5903_v20 }
 0x289   : > { %v6170_v13 = vadd.f32 %v6169_v22, %v6139_v15  ;;  %6938 = vst [vmem:[%s10001_s10 + $0x50] sm:$0xff] %v5902_v62   ;;  %v6072_v24 = vunpack.c.l.bf16 %v5902_v62  ;;  %v6073_v38 = vunpack.c.h.bf16 %v5902_v62  ;;  %v6102_v54 = vadd.f32 %v6101_v5, %v6071_v35  ;;  %v7394_v2 = vpop.f32.mrb[24].mxu1  ;;  %v7591_v53 = vpop.f32.mrb[30].mxu0 }
 0x28a   : > { %v7632_v51 = vadd.f32 %v7586_v10, %v7394_v2  ;;  %v3692_v32 = vpop.f32.mrb[25].mxu1  ;;  %v5848_v45 = vpop.f32.mrb[31].mxu0  ;;  %v6143_v52 = vmul.f32 %v6074_v19, %v6074_v19  ;;  %v6144_v26 = vmul.f32 %v6075_v61, %v6075_v61 }
 0x28b   : > { %v6103_v42 = vadd.f32 %v6102_v54, %v6072_v24  ;;  %v6141_v6 = vmul.f32 %v6072_v24, %v6072_v24  ;;  %v6171_v63 = vadd.f32 %v6170_v13, %v6140_v29  ;;  %v7395_v44 = vpop.f32.mrb[26].mxu1  ;;  %v7633_v55 = vadd.f32 %v5829_v8, %v3692_v32 }
 0x28c   : > { %v7634_v17 = vadd.f32 %v7587_v34, %v7395_v44  ;;  %v3695_v47 = vpop.f32.mrb[27].mxu1  ;;  %v6142_v59 = vmul.f32 %v6073_v38, %v6073_v38 }
 0x28d   : > { %v6104_v9 = vadd.f32 %v6103_v42, %v6073_v38  ;;  %v6172_v25 = vadd.f32 %v6171_v63, %v6141_v6  ;;  %v7635_v3 = vadd.f32 %v5832_v0, %v3695_v47 }
 0x28e   : > { %v5905_v40 = vpack.c.bf16 %v7634_v17, %v7632_v51 }
 0x28f   : > { %v6105_v14 = vadd.f32 %v6104_v9, %v6074_v19  ;;  %v6173_v33 = vadd.f32 %v6172_v25, %v6142_v59  ;;  %v5904_v27 = vpack.c.bf16 %v7635_v3, %v7633_v55 }
 0x290   : > { %6941 = vst [vmem:[%s10001_s10 + $0x68] sm:$0xff] %v5905_v40   ;;  %v6078_v10 = vunpack.c.l.bf16 %v5905_v40  ;;  %v6079_v1 = vunpack.c.h.bf16 %v5905_v40 }
 0x291   : > { %v6174_v28 = vadd.f32 %v6173_v33, %v6143_v52  ;;  %6940 = vst [vmem:[%s10001_s10 + $0x60] sm:$0xff] %v5904_v27   ;;  %v6076_v57 = vunpack.c.l.bf16 %v5904_v27  ;;  %v6077_v11 = vunpack.c.h.bf16 %v5904_v27  ;;  %v6106_v58 = vadd.f32 %v6105_v14, %v6075_v61  ;;  %v7398_v37 = vpop.f32.mrb[28].mxu1 }
 0x292   : > { %v7636_v30 = vadd.f32 %v7590_v4, %v7398_v37  ;;  %v3708_v50 = vpop.f32.mrb[29].mxu1  ;;  %v6147_v35 = vmul.f32 %v6078_v10, %v6078_v10  ;;  %v6148_v31 = vmul.f32 %v6079_v1, %v6079_v1 }
 0x293   : > { %v6107_v16 = vadd.f32 %v6106_v58, %v6076_v57  ;;  %v6145_v41 = vmul.f32 %v6076_v57, %v6076_v57  ;;  %v6175_v36 = vadd.f32 %v6174_v28, %v6144_v26  ;;  %v7399_v8 = vpop.f32.mrb[30].mxu1  ;;  %v7637_v46 = vadd.f32 %v5845_v23, %v3708_v50 }
 0x294   : > { %v7638_v34 = vadd.f32 %v7591_v53, %v7399_v8  ;;  %v3711_v21 = vpop.f32.mrb[31].mxu1  ;;  %v6146_v60 = vmul.f32 %v6077_v11, %v6077_v11 }
 0x295   : > { %v6108_v43 = vadd.f32 %v6107_v16, %v6077_v11  ;;  %v6176_v56 = vadd.f32 %v6175_v36, %v6145_v41  ;;  %v7639_v18 = vadd.f32 %v5848_v45, %v3711_v21 }
 0x296   : > { %v5907_v0 = vpack.c.bf16 %v7638_v34, %v7636_v30 }
 0x297   : > { %v6109_v39 = vadd.f32 %v6108_v43, %v6078_v10  ;;  %v6177_v7 = vadd.f32 %v6176_v56, %v6146_v60  ;;  %v5906_v49 = vpack.c.bf16 %v7639_v18, %v7637_v46 }
 0x298   : > { %6943 = vst [vmem:[%s10001_s10 + $0x78] sm:$0xff] %v5907_v0   ;;  %v6082_v5 = vunpack.c.l.bf16 %v5907_v0  ;;  %v6083_v4 = vunpack.c.h.bf16 %v5907_v0 }
 0x299   : > { %v6178_v12 = vadd.f32 %v6177_v7, %v6147_v35  ;;  %6942 = vst [vmem:[%s10001_s10 + $0x70] sm:$0xff] %v5906_v49   ;;  %v6080_v48 = vunpack.c.l.bf16 %v5906_v49  ;;  %v6081_v20 = vunpack.c.h.bf16 %v5906_v49  ;;  %v6110_v15 = vadd.f32 %v6109_v39, %v6079_v1 }
 0x29a   : > { %v6151_v54 = vmul.f32 %v6082_v5, %v6082_v5  ;;  %v6152_v51 = vmul.f32 %v6083_v4, %v6083_v4 }
 0x29b   : > { %v6111_v22 = vadd.f32 %v6110_v15, %v6080_v48  ;;  %v6149_v62 = vmul.f32 %v6080_v48, %v6080_v48  ;;  %v6179_v29 = vadd.f32 %v6178_v12, %v6148_v31  ;;  %v6150_v24 = vmul.f32 %v6081_v20, %v6081_v20 }
 0x29d   : > { %v6112_v13 = vadd.f32 %v6111_v22, %v6081_v20  ;;  %v6180_v38 = vadd.f32 %v6179_v29, %v6149_v62 }
 0x29f   : > { %v6113_v2 = vadd.f32 %v6112_v13, %v6082_v5  ;;  %v6181_v23 = vadd.f32 %v6180_v38, %v6150_v24 }
 0x2a1   : > { %v6114_v32 = vadd.f32 %v6113_v2, %v6083_v4  ;;  %v6182_v53 = vadd.f32 %v6181_v23, %v6151_v54 }
 0x2a3   : > { %v6115_v19 = vrot.slane %v6114_v32, 4  ;;  %v6183_v42 = vadd.f32 %v6182_v53, %v6152_v51 }
 0x2a5   : > { %v6116_v6 = vadd.f32 %v6115_v19, %v6114_v32  ;;  %v6184_v63 = vrot.slane %v6183_v42, 4 }
 0x2a7   : > { %v6117_v44 = vrot.slane %v6116_v6, 2  ;;  %v6185_v45 = vadd.f32 %v6184_v63, %v6183_v42 }
 0x2a9   : > { %v6118_v61 = vadd.f32 %v6117_v44, %v6116_v6  ;;  %v6186_v55 = vrot.slane %v6185_v45, 2 }
 0x2ab   : > { %v6119_v17 = vrot.slane %v6118_v61, 1  ;;  %v6187_v47 = vadd.f32 %v6186_v55, %v6185_v45 }
 0x2ad   : > { %v6188_v9 = vrot.slane %v6187_v47, 1  ;;  %v6120_v59 = vadd.f32 %v6119_v17, %v6118_v61 }
 0x2af   : > { %v6189_v25 = vadd.f32 %v6188_v9, %v6187_v47 }
 0x2b1   : > { %v6191_v3 = vsel %vm449_vm0, %v6120_v59, %v6189_v25 }
 0x2b2   : > { %6192 = vst [vmem:[%s411_s13] sm:$0x3] %v6191_v3 }
 0x2b3 PF: > { %s16_s20 = sadd.s32 1, %s8106_s20   ;;  %s10160_s18 = smov %s8102_s19 }
 0x2b4   : > { %p13_p5 = scmp.ge.s32.totalorder %s16_s20, 4   ;;  %s10161_s19 = smov %s10163_s1 }
 0x2b6   :  { %15 = sbr.rel (!%p13_p5) target bundleno = 2 (0x2), region = 112 }

// kernel: double_conv.4
= control target key start
LH: loop header
LB: loop body
LE: loop exit
PB: predicated region body
PF: predicated region fallthrough
CT: control target
= control target key end

     0   :  { %s8633_s24 = smov 0   ;;  %s8635_s1 = smov 0   ;;  %s10567_s0 = inlined_call_operand.vmem [shape: bf16[2,16,16,128], index: 0, kind: input, shape index: {}, may-alias: {0,1,2}]   ;;  %s10568_s1 = inlined_call_operand.vmem [shape: bf16[2,16,16,128], index: 1, kind: input, shape index: {}, may-alias: {0,1,2}]   ;;  %s10569_s2 = inlined_call_operand.vmem [shape: bf16[2,16,16,128], index: 2, kind: input, shape index: {}, may-alias: {0,1,2}]   ;;  %s10570_s3 = inlined_call_operand.vmem [shape: f32[1,128], index: 3, kind: input, shape index: {}]   ;;  %s10571_s4 = inlined_call_operand.vmem [shape: f32[1,128], index: 4, kind: input, shape index: {}]   ;;  %s10572_s5 = inlined_call_operand.vmem [shape: bf16[9,128,128], index: 5, kind: input, shape index: {}]   ;;  %s10573_s6 = inlined_call_operand.vmem [shape: bf16[2,16,16,128], index: 6, kind: output, shape index: {0}]   ;;  %s10574_s7 = inlined_call_operand.vmem [shape: f32[2,1,2,128], index: 7, kind: output, shape index: {1}]  }
   0x1   :  { %s8637_s2 = smov 0  }
   0x2 LB: > { %s30_s25 = sadd.s32 1, %s8586_s1  ;;  %p6696_p0 = scmp.ge.s32.totalorder %s8590_s2, 1  ;;  %s8590_s2 = sphi %s8637_s2, %s18_s2   ;;  %s8586_s1 = sphi %s8635_s1, %s10668_s1   ;;  %s8582_s24 = sphi %s8633_s24, %s10667_s24  }
   0x3   : > { %p32_p1 = scmp.ge.s32.totalorder %s30_s25, 2  ;;  %p328_p2 = scmp.lt.s32.totalorder %s8590_s2, 3 }
   0x5   : > { %s10670_s25 = smov (%p32_p1, %s30_s25), 0  ;;  %p329_p3 = pnand %p6696_p0, %p328_p2 }
   0x7   : > { %332 = sbr.rel (%p329_p3) target bundleno = 728 (0x2d8), region = 44 }
   0xe   : > { %v8362_v0 = vld [vmem:[%s10572_s5 + $0x40] sm:$0xff]   ;;  %v8364_v2 = vld [vmem:[%s10572_s5 + $0x48] sm:$0xff]   ;;  %v8592_v4 = vmov 0   ;;  %v8366_v5 = vld [vmem:[%s10572_s5 + $0x50] sm:$0xff]   ;;  %p404_p4 = scmp.lt.s32.totalorder %s8582_s24, 1  ;;  %vm679_vm0 = vcmask 1040384  }
   0xf   : > { %v8363_v1 = vld [vmem:[%s10572_s5 + $0x100] sm:$0xff]   ;;  %7633 = vmatprep.subr.bf16.mxu1 %v8362_v0  ;;  %v8365_v3 = vld [vmem:[%s10572_s5 + $0x108] sm:$0xff]   ;;  %1316 = vst [vmem:[#allocation2 + $0x4] sm:$0xf] %v8592_v4  ;;  %1363 = vst [vmem:[#allocation2 + $0xd0] sm:$0xf] %v8592_v4 }
  0x10   : > { %7825 = vmatprep.subr.bf16.mxu0 %v8363_v1  ;;  %7634 = vmatpush3.bf16.msra.mxu1 %v8362_v0  ;;  %v8367_v6 = vld [vmem:[%s10572_s5 + $0x110] sm:$0xff]   ;;  %v8368_v7 = vld [vmem:[%s10572_s5 + $0x58] sm:$0xff]   ;;  %s10672_s24 = smov (!%p404_p4, %s8582_s24), 1  ;;  %v8370_v9 = vld [vmem:[%s10572_s5 + $0x60] sm:$0xff]   ;;  %vm680_vm1 = vsmask.f32 256 }
  0x11   : > { %7826 = vmatpush3.bf16.msra.mxu0 %v8363_v1  ;;  %7635 = vmatprep.subr.bf16.mxu1 %v8364_v2  ;;  %v8369_v8 = vld [vmem:[%s10572_s5 + $0x118] sm:$0xff]   ;;  %s7170_s21 = sshll.u32 %s10672_s24, 7  ;;  %v8371_v10 = vld [vmem:[%s10572_s5 + $0x120] sm:$0xff]   ;;  %v8372_v11 = vld [vmem:[%s10572_s5 + $0x68] sm:$0xff]   ;;  %vm736_vm2 = vsmask.f32 7938 }
  0x12   : > { %7827 = vmatprep.subr.bf16.mxu0 %v8365_v3  ;;  %v8373_v12 = vld [vmem:[%s10572_s5 + $0x128] sm:$0xff]   ;;  %s8699_s9 = scalar_lea.vmem %s10567_s0, %s7170_s21  ;;  %v682_v13 = vld [vmem:[#allocation2] sm:$0x1]  ;;  %vm8703_vm3 = vmand %vm679_vm0, %vm680_vm1  ;;  %v10592_v14 = vmov 0  ;;  %vm1195_vm5 = vcmask 1043456   ;;  %vm2498_vm12 = vcmask 1042432  }
  0x13   : > { %v10593_v14 = vsel %vm8703_vm3, 4294967295, %v10592_v14  ;;  %v738_v15 = vld [vmem:[#allocation2 + $0x8] sm:$0x1]  ;;  %v8374_v17 = vld [vmem:[%s10572_s5 + $0x70] sm:$0xff]   ;;  %v683_v18 = vsel %vm8703_vm3, 0, %v682_v13  ;;  %vm8714_vm4 = vmand %vm679_vm0, %vm736_vm2  ;;  %vm2499_vm13 = vcmask 1046532  }
  0x14   : > { %7636 = vmatpush3.bf16.msra.mxu1 %v8364_v2  ;;  %10594 = vst [vmem:[#allocation3_spill] sm:$0xff] %v10593_v14  ;;  %v7244_v22 = vld [vmem:[%s8699_s9] sm:$0xff]   ;;  %v8375_v23 = vld [vmem:[%s10572_s5 + $0x130] sm:$0xff]   ;;  %684 = vst [vmem:[#allocation2] sm:$0x1] %v683_v18  ;;  %v739_v24 = vsel %vm8714_vm4, 0, %v738_v15 }
  0x15   : > { %7828 = vmatpush3.bf16.msra.mxu0 %v8365_v3  ;;  %7637 = vmatprep.subr.bf16.mxu1 %v8366_v5  ;;  %v8727_v25 = vld [vmem:[%s10570_s3] ss:$0 sm:$0xff]  ;;  %v7245_v27 = vunpack.c.l.bf16 %v7244_v22  ;;  %v7246_v28 = vunpack.c.h.bf16 %v7244_v22  ;;  %740 = vst [vmem:[#allocation2 + $0x8] sm:$0x1] %v739_v24  ;;  %v685_v31 = vld [vmem:[#allocation2 + $0xc] sm:$0x1]  ;;  %vm8754_vm6 = vmand %vm1195_vm5, %vm736_vm2 }
  0x16   : > { %7829 = vmatprep.subr.bf16.mxu0 %v8367_v6  ;;  %v1405_v16 = vld [vmem:[#allocation2 + $0x4] sm:$0xf]  ;;  %v8732_v26 = vld [vmem:[%s10571_s4] ss:$0 sm:$0xff]  ;;  %v741_v32 = vld [vmem:[#allocation2 + $0x14] sm:$0x1] }
  0x17   : > { %v1481_v20 = vshll.u32 %v1405_v16, 16  ;;  %v1485_v21 = vshrl.u32 %v1405_v16, 16  ;;  %v539_v33 = vmul.f32 %v7245_v27, %v8727_v25  ;;  %v540_v34 = vmul.f32 %v7246_v28, %v8727_v25  ;;  %v8376_v37 = vld [vmem:[%s10572_s5 + $0x78] sm:$0xff]   ;;  %v7387_v42 = vld [vmem:[%s8699_s9 + $0x8] sm:$0xff]   ;;  %v744_v47 = vld [vmem:[#allocation2 + $0x20] sm:$0x1] }
  0x18   : > { %7638 = vmatpush3.bf16.msra.mxu1 %v8366_v5  ;;  %v686_v35 = vsel %vm8703_vm3, 0, %v685_v31  ;;  %v742_v36 = vsel %vm8714_vm4, 0, %v741_v32  ;;  %v8377_v39 = vld [vmem:[%s10572_s5 + $0x138] sm:$0xff]   ;;  %vm872_vm7 = vsmask.f32 4368  ;;  %v7249_v44 = vunpack.c.l.bf16 %v7387_v42  ;;  %v7388_v56 = vld [vmem:[%s8699_s9 + $0x10] sm:$0xff]   ;;  %vm9171_vm14 = vmor %vm2498_vm12, %vm2499_vm13 }
  0x19   : > { %7830 = vmatpush3.bf16.msra.mxu0 %v8367_v6  ;;  %7639 = vmatprep.subr.bf16.mxu1 %v8368_v7  ;;  %v8734_v29 = vrot.slane %v1481_v20, 5  ;;  %v1487_v30 = vrot.slane %v1485_v21, 4  ;;  %687 = vst [vmem:[#allocation2 + $0xc] sm:$0x1] %v686_v35  ;;  %743 = vst [vmem:[#allocation2 + $0x14] sm:$0x1] %v742_v36  ;;  %v577_v40 = vadd.f32 %v8732_v26, %v539_v33  ;;  %v7250_v45 = vunpack.c.h.bf16 %v7387_v42 }
  0x1a   : > { %7831 = vmatprep.subr.bf16.mxu0 %v8369_v8  ;;  %v578_v41 = vadd.f32 %v8732_v26, %v540_v34  ;;  %v688_v46 = vld [vmem:[#allocation2 + $0x18] sm:$0x1]  ;;  %v745_v51 = vsel %vm8714_vm4, 0, %v744_v47  ;;  %v541_v54 = vmul.f32 %v7249_v44, %v8727_v25  ;;  %vm1468_vm8 = vsmask.f32 3328  ;;  %v8774_v0 = vld [vmem:[%s10572_s5] sm:$0xff]   ;;  %vm8787_vm10 = vmor %vm680_vm1, %vm872_vm7 }
  0x1b   : > { %v1488_v38 = vor.u32 %v1487_v30, %v8734_v29  ;;  %v609_v48 = vmax.f32 %v577_v40, 0.0  ;;  %v689_v50 = vsel %vm8703_vm3, 0, %v688_v46  ;;  %v1313_v52 = vld [vmem:[#allocation2] sm:$0xf]  ;;  %v542_v55 = vmul.f32 %v7250_v45, %v8727_v25  ;;  %746 = vst [vmem:[#allocation2 + $0x20] sm:$0x1] %v745_v51 }
  0x1c   : > { %7640 = vmatpush3.bf16.msra.mxu1 %v8368_v7  ;;  %v610_v49 = vmax.f32 %v578_v41, 0.0  ;;  %690 = vst [vmem:[#allocation2 + $0x18] sm:$0x1] %v689_v50  ;;  %v1314_v57 = vsel %vm8754_vm6, 0, %v1313_v52  ;;  %v1317_v58 = vld [vmem:[#allocation2 + $0x8] sm:$0x1]  ;;  %v7253_v61 = vunpack.c.l.bf16 %v7388_v56  ;;  %v579_v1 = vadd.f32 %v8732_v26, %v541_v54 }
  0x1d   : > { %7832 = vmatpush3.bf16.msra.mxu0 %v8369_v8  ;;  %7641 = vmatprep.subr.bf16.mxu1 %v8370_v9  ;;  %v8762_v53 = vrot.slane %v1488_v38, 4  ;;  %vm1469_vm9 = vsmask.f32 7440  ;;  %v7175_v59 = vpack.c.bf16 %v609_v48, %v609_v48  ;;  %v691_v62 = vld [vmem:[#allocation2 + $0x24] sm:$0x1]  ;;  %v1318_v63 = vsel %vm8703_vm3, 0, %v1317_v58 }
  0x1e   : > { %7833 = vmatprep.subr.bf16.mxu0 %v8371_v10  ;;  %v7176_v60 = vpack.c.bf16 %v610_v49, %v610_v49  ;;  %1315 = vst [vmem:[#allocation2] sm:$0xf] %v1314_v57  ;;  %v580_v2 = vadd.f32 %v8732_v26, %v542_v55  ;;  %v7254_v3 = vunpack.c.h.bf16 %v7388_v56  ;;  %v747_v4 = vld [vmem:[#allocation2 + $0x2c] sm:$0x1]  ;;  %1319 = vst [vmem:[#allocation2 + $0x8] sm:$0x1] %v1318_v63 }
  0x1f   : > { %v875_v5 = vshrl.u32 %v7175_v59, 16  ;;  %v878_v6 = vshll.u32 %v7175_v59, 16  ;;  %v692_v18 = vsel %vm8703_vm3, 0, %v691_v62  ;;  %v748_v20 = vsel %vm8714_vm4, 0, %v747_v4  ;;  %v8806_v52 = vld [vmem:[%s8699_s9 + $0x18] sm:$0xff]   ;;  %vm8810_vm11 = vmor %vm1468_vm8, %vm1469_vm9 }
  0x20   : > { %7642 = vmatpush3.bf16.msra.mxu1 %v8370_v9  ;;  %v883_v7 = vshrl.u32 %v7176_v60, 16  ;;  %v886_v8 = vshll.u32 %v7176_v60, 16  ;;  %v8781_v9 = vld [vmem:[%s10572_s5 + $0x140] sm:$0xff]   ;;  %v544_v13 = vmul.f32 %v7254_v3, %v8727_v25  ;;  %v1197_v21 = vld [vmem:[#allocation2 + $0xc] sm:$0xf]  ;;  %v7257_v4 = vunpack.c.l.bf16 %v8806_v52 }
  0x21   : > { %7834 = vmatpush3.bf16.msra.mxu0 %v8371_v10  ;;  %7643 = vmatprep.subr.bf16.mxu1 %v8372_v11  ;;  %v611_v10 = vmax.f32 %v579_v1, 0.0  ;;  %v877_v16 = vrot.slane %v875_v5, 7  ;;  %v1201_v22 = vld [vmem:[#allocation2 + $0x14] sm:$0x1]  ;;  %693 = vst [vmem:[#allocation2 + $0x24] sm:$0x1] %v692_v18 }
  0x22   : > { %7835 = vmatprep.subr.bf16.mxu0 %v8373_v12  ;;  %749 = vst [vmem:[#allocation2 + $0x2c] sm:$0x1] %v748_v20  ;;  %v582_v41 = vadd.f32 %v8732_v26, %v544_v13  ;;  %v1208_v59 = vld [vmem:[#allocation2 + $0x20] sm:$0x1]  ;;  %v7258_v20 = vunpack.c.h.bf16 %v8806_v52 }
  0x23   : > { %v880_v28 = vor.u32 %v878_v6, %v877_v16  ;;  %v881_v30 = vrot.slane %v877_v16, 4  ;;  %v1204_v49 = vld [vmem:[#allocation2 + $0x18] sm:$0xf]  ;;  %v8822_v5 = vld [vmem:[%s8699_s9 + $0x20] sm:$0xff]  }
  0x24   : > { %7644 = vmatpush3.bf16.msra.mxu1 %v8372_v11  ;;  %v612_v11 = vmax.f32 %v580_v2, 0.0  ;;  %v614_v51 = vmax.f32 %v582_v41, 0.0 }
  0x25   : > { %7836 = vmatpush3.bf16.msra.mxu0 %v8373_v12  ;;  %7645 = vmatprep.subr.bf16.mxu1 %v8374_v17  ;;  %v543_v12 = vmul.f32 %v7253_v61, %v8727_v25  ;;  %v1452_v42 = vld [vmem:[#allocation2 + $0x8] sm:$0x1] }
  0x26   : > { %7837 = vmatprep.subr.bf16.mxu0 %v8375_v23  ;;  %v7178_v24 = vpack.c.bf16 %v612_v11, %v612_v11  ;;  %v1491_v48 = vshll.u32 %v1452_v42, 16  ;;  %v8818_v3 = vpack.c.bf16 %v614_v51, %v614_v51 }
  0x27   : > { %v581_v27 = vadd.f32 %v8732_v26, %v543_v12 }
  0x28   : > { %7646 = vmatpush3.bf16.msra.mxu1 %v8374_v17  ;;  %v885_v17 = vrot.slane %v883_v7, 7  ;;  %v900_v35 = vshrl.u32 %v7178_v24, 16  ;;  %v903_v36 = vshll.u32 %v7178_v24, 16  ;;  %v1493_v60 = vrot.slane %v1491_v48, 5 }
  0x29   : > { %7838 = vmatpush3.bf16.msra.mxu0 %v8375_v23  ;;  %7647 = vmatprep.subr.bf16.mxu1 %v8376_v37  ;;  %v7177_v23 = vpack.c.bf16 %v611_v10, %v611_v10  ;;  %v613_v50 = vmax.f32 %v581_v27, 0.0  ;;  %v917_v13 = vshrl.u32 %v8818_v3, 16  ;;  %v920_v16 = vshll.u32 %v8818_v3, 16 }
  0x2a   : > { %7839 = vmatprep.subr.bf16.mxu0 %v8377_v39  ;;  %v888_v31 = vor.u32 %v886_v8, %v885_v17  ;;  %v890_v32 = vrot.slane %v885_v17, 4  ;;  %v902_v47 = vrot.slane %v900_v35, 7  ;;  %v1494_v6 = vsel %vm8810_vm11, %v8762_v53, %v1493_v60 }
  0x2b   : > { %v892_v33 = vshrl.u32 %v7177_v23, 16  ;;  %v895_v34 = vshll.u32 %v7177_v23, 16  ;;  %v8814_v63 = vpack.c.bf16 %v613_v50, %v613_v50  ;;  %v7262_v35 = vunpack.c.h.bf16 %v8822_v5 }
  0x2c   : > { %7648 = vmatpush3.bf16.msra.mxu1 %v8376_v37  ;;  %v1404_v37 = vld [vmem:[#allocation2] sm:$0xf]  ;;  %v889_v38 = vsel %vm8787_vm10, %v881_v30, %v888_v31  ;;  %v1202_v40 = vsel %vm8703_vm3, %v890_v32, %v1201_v22  ;;  %v905_v61 = vor.u32 %v903_v36, %v902_v47  ;;  %v907_v62 = vrot.slane %v902_v47, 4 }
  0x2d   : > { %7840 = vmatpush3.bf16.msra.mxu0 %v8377_v39  ;;  %7681 = vmatprep.subr.bf16.mxu1 %v8774_v0  ;;  %v1198_v39 = vsel %vm8754_vm6, %v880_v28, %v1197_v21  ;;  %v1472_v44 = vshrl.u32 %v1404_v37, 16  ;;  %v1475_v45 = vshll.u32 %v1404_v37, 16  ;;  %1200 = vst [vmem:[#allocation2 + $0x10] sm:$0xf] %v889_v38  ;;  %1203 = vst [vmem:[#allocation2 + $0x14] sm:$0x1] %v1202_v40  ;;  %v7261_v22 = vunpack.c.l.bf16 %v8822_v5 }
  0x2e   : > { %7873 = vmatprep.subr.bf16.mxu0 %v8781_v9  ;;  %1199 = vst [vmem:[#allocation2 + $0xc] sm:$0xf] %v1198_v39  ;;  %v894_v46 = vrot.slane %v892_v33, 7  ;;  %v1209_v8 = vsel %vm8703_vm3, %v907_v62, %v1208_v59  ;;  %v909_v10 = vshrl.u32 %v8814_v63, 16  ;;  %v912_v12 = vshll.u32 %v8814_v63, 16 }
  0x2f   : > { %v1474_v55 = vrot.slane %v1472_v44, 4  ;;  %v1477_v56 = vrot.slane %v1475_v45, 5  ;;  %1210 = vst [vmem:[#allocation2 + $0x20] sm:$0x1] %v1209_v8  ;;  %v8837_v21 = vmul.f32 %v7257_v4, %v8727_v25 }
  0x30   : > { %v897_v57 = vor.u32 %v895_v34, %v894_v46  ;;  %v898_v58 = vrot.slane %v894_v46, 4 }
  0x31   : > { %v1478_v1 = vor.u32 %v1477_v56, %v1474_v55  ;;  %v583_v3 = vadd.f32 %v8732_v26, %v8837_v21 }
  0x32   : > { %v1205_v2 = vsel %vm8754_vm6, %v897_v57, %v1204_v49  ;;  %v906_v7 = vsel %vm8787_vm10, %v898_v58, %v905_v61 }
  0x33   : > { %1206 = vst [vmem:[#allocation2 + $0x18] sm:$0xf] %v1205_v2  ;;  %v1479_v11 = vrot.slane %v1478_v1, 4  ;;  %1207 = vst [vmem:[#allocation2 + $0x1c] sm:$0xf] %v906_v7 }
  0x34   : > { %v1407_v53 = vld [vmem:[#allocation2 + $0x10] sm:$0xf]  ;;  %v1453_v18 = vld [vmem:[#allocation2 + $0x14] sm:$0x1] }
  0x35   : > { %v1406_v17 = vld [vmem:[#allocation2 + $0xc] sm:$0xf]  ;;  %v1484_v23 = vsel %vm8810_vm11, %v1479_v11, %v8734_v29  ;;  %v1505_v28 = vshll.u32 %v1407_v53, 16  ;;  %v1509_v32 = vshrl.u32 %v1407_v53, 16  ;;  %v1515_v33 = vshll.u32 %v1453_v18, 16 }
  0x36   : > { %v1496_v24 = vshrl.u32 %v1406_v17, 16  ;;  %v1499_v27 = vshll.u32 %v1406_v17, 16  ;;  %v3321_v30 = vld [vmem:[#allocation2 + $0xc] sm:$0xf]  ;;  %v6760_v31 = vcombine.low %v1484_v23, %v1494_v6  ;;  %v3322_v34 = vld [vmem:[#allocation2 + $0x10] sm:$0xf] }
  0x37   : > { %v1507_v38 = vrot.slane %v1505_v28, 5  ;;  %v8844_v39 = vld [vmem:[#allocation2 + $0x14] sm:$0x1]  ;;  %v3370_v40 = vshrl.u32 %v3321_v30, 16  ;;  %v1511_v41 = vrot.slane %v1509_v32, 4  ;;  %v1517_v42 = vrot.slane %v1515_v33, 5 }
  0x38   : > { %v1498_v36 = vrot.slane %v1496_v24, 4  ;;  %v1501_v37 = vrot.slane %v1499_v27, 5  ;;  %7649 = vmatprep.mubr.bf16.mxu1 %v6760_v31  ;;  %v3373_v29 = vshll.u32 %v3321_v30, 16  ;;  %v3379_v44 = vshll.u32 %v3322_v34, 16  ;;  %v8850_v2 = vld [vmem:[#allocation2 + $0x20] sm:$0x1] }
  0x39   : > { %v3372_v46 = vrot.slane %v3370_v40, 4  ;;  %v3383_v47 = vshrl.u32 %v3322_v34, 16  ;;  %v3389_v48 = vshll.u32 %v8844_v39, 16  ;;  %v1512_v50 = vor.u32 %v1511_v41, %v1507_v38  ;;  %v8381_v33 = vld [vmem:[%s10572_s5 + $0x8] sm:$0xff]  }
  0x3a   : > { %v1502_v45 = vor.u32 %v1501_v37, %v1498_v36  ;;  %v3324_v49 = vld [vmem:[#allocation2 + $0x18] sm:$0xf]  ;;  %v3375_v51 = vrot.slane %v3373_v29, 5  ;;  %v3381_v55 = vrot.slane %v3379_v44, 5  ;;  %v4144_v56 = vrot.slane %v8844_v39, 5 }
  0x3b   : > { %v8848_v57 = vld [vmem:[#allocation2 + $0x1c] sm:$0xf]  ;;  %v3385_v59 = vrot.slane %v3383_v47, 4  ;;  %v3391_v60 = vrot.slane %v3389_v48, 5  ;;  %v3394_v61 = vshrl.u32 %v3324_v49, 16  ;;  %v1513_v62 = vrot.slane %v1512_v50, 4 }
  0x3c   : > { %v1503_v58 = vrot.slane %v1502_v45, 4  ;;  %v3376_v1 = vor.u32 %v3375_v51, %v3372_v46  ;;  %v3397_v4 = vshll.u32 %v3324_v49, 16  ;;  %v3403_v6 = vshll.u32 %v8848_v57, 16  ;;  %v1408_v27 = vld [vmem:[#allocation2 + $0x18] sm:$0xf]  ;;  %v8384_v50 = vld [vmem:[%s10572_s5 + $0x10] sm:$0xff]  }
  0x3d   : > { %v3386_v8 = vor.u32 %v3385_v59, %v3381_v55  ;;  %v3396_v11 = vrot.slane %v3394_v61, 4  ;;  %v3407_v17 = vshrl.u32 %v8848_v57, 16  ;;  %v1518_v53 = vsel %vm8810_vm11, %v1513_v62, %v1517_v42  ;;  %v1409_v40 = vld [vmem:[#allocation2 + $0x1c] sm:$0xf]  ;;  %v1454_v44 = vld [vmem:[#allocation2 + $0x20] sm:$0x1] }
  0x3e   : > { %v1508_v7 = vsel %vm8810_vm11, %v1503_v58, %v1507_v38  ;;  %v3377_v18 = vrot.slane %v3376_v1, 4  ;;  %v3399_v23 = vrot.slane %v3397_v4, 5  ;;  %v3405_v24 = vrot.slane %v3403_v6, 5  ;;  %v694_v1 = vld [vmem:[#allocation2 + $0x30] sm:$0x1] }
  0x3f   : > { %v6761_v28 = vcombine.low %v1508_v7, %v1518_v53  ;;  %v3387_v30 = vrot.slane %v3386_v8, 4  ;;  %v3409_v31 = vrot.slane %v3407_v17, 4  ;;  %v3413_v32 = vshll.u32 %v8850_v2, 16  ;;  %v750_v17 = vld [vmem:[#allocation2 + $0x38] sm:$0x1] }
  0x40   : > { %v3382_v34 = vsel %vm8810_vm11, %v3377_v18, %v3381_v55  ;;  %v3400_v36 = vor.u32 %v3399_v23, %v3396_v11  ;;  %v4148_v37 = vrot.slane %v8848_v57, 5  ;;  %v4151_v38 = vrot.slane %v8850_v2, 5  ;;  %v1211_v11 = vld [vmem:[#allocation2 + $0x24] sm:$0xf]  ;;  %v8380_v18 = vld [vmem:[%s10572_s5 + $0x148] sm:$0xff]  }
  0x41   : > { %7650 = vmatmul.mubr.bf16.vlgmr.msra.gmra.mrb[0].mxu1 %v6761_v28  ;;  %v3392_v41 = vsel %vm8810_vm11, %v3387_v30, %v3391_v60  ;;  %v3410_v42 = vor.u32 %v3409_v31, %v3405_v24  ;;  %v3415_v29 = vrot.slane %v3413_v32, 5  ;;  %v1520_v45 = vshrl.u32 %v1408_v27, 16  ;;  %v697_v28 = vld [vmem:[#allocation2 + $0x3c] sm:$0x1] }
  0x42   : > { %v6920_v46 = vcombine.low %v3382_v34, %v3392_v41  ;;  %7682 = vmatpush3.bf16.msra.mxu1 %v8774_v0  ;;  %v3401_v47 = vrot.slane %v3400_v36, 4  ;;  %v8871_v48 = vrot.slane %v4148_v37, 4  ;;  %v1523_v49 = vshll.u32 %v1408_v27, 16  ;;  %v1215_v27 = vld [vmem:[#allocation2 + $0x2c] sm:$0x1]  ;;  %v8387_v34 = vld [vmem:[%s10572_s5 + $0x18] sm:$0xff]  }
  0x43   : > { %v3411_v51 = vrot.slane %v3410_v42, 4  ;;  %v1522_v55 = vrot.slane %v1520_v45, 4  ;;  %v1529_v58 = vshll.u32 %v1409_v40, 16  ;;  %v1533_v59 = vshrl.u32 %v1409_v40, 16  ;;  %7683 = vmatprep.subr.bf16.mxu1 %v8381_v33  ;;  %v8382_v42 = vld [vmem:[%s10572_s5 + $0x150] sm:$0xff]  }
  0x44   : > { %7841 = vmatprep.mubr.bf16.mxu0 %v6920_v46  ;;  %v3406_v60 = vsel %vm8810_vm11, %v3401_v47, %v3405_v24  ;;  %v1525_v0 = vrot.slane %v1523_v49, 5  ;;  %v1539_v61 = vshll.u32 %v1454_v44, 16  ;;  %v911_v62 = vrot.slane %v909_v10, 7 }
  0x45   : > { %v3416_v4 = vsel %vm8810_vm11, %v3411_v51, %v3415_v29  ;;  %v1531_v6 = vrot.slane %v1529_v58, 5  ;;  %v1535_v7 = vrot.slane %v1533_v59, 4  ;;  %v919_v8 = vrot.slane %v917_v13, 7  ;;  %v700_v51 = vld [vmem:[#allocation2 + $0x48] sm:$0x1] }
  0x46   : > { %v6921_v53 = vcombine.low %v3406_v60, %v3416_v4  ;;  %v1526_v23 = vor.u32 %v1525_v0, %v1522_v55  ;;  %v1541_v24 = vrot.slane %v1539_v61, 5  ;;  %v914_v10 = vor.u32 %v912_v12, %v911_v62  ;;  %7684 = vmatpush3.bf16.msra.mxu1 %v8381_v33  ;;  %v8937_v61 = vld [vmem:[%s8699_s9 + $0x30] sm:$0xff]  }
  0x47   : > { %v1536_v30 = vor.u32 %v1535_v7, %v1531_v6  ;;  %v915_v31 = vrot.slane %v911_v62, 4  ;;  %v922_v13 = vor.u32 %v920_v16, %v919_v8  ;;  %v924_v32 = vrot.slane %v919_v8, 4  ;;  %7685 = vmatprep.subr.bf16.mxu1 %v8384_v50  ;;  %v753_v16 = vld [vmem:[#allocation2 + $0x44] sm:$0x1] }
  0x48   : > { %7842 = vmatmul.mubr.bf16.vlgmr.msra.gmra.mrb[0].mxu0 %v6921_v53  ;;  %v1527_v36 = vrot.slane %v1526_v23, 4  ;;  %v1212_v63 = vsel %vm8754_vm6, %v914_v10, %v1211_v11  ;;  %v546_v12 = vmul.f32 %v7258_v20, %v8727_v25  ;;  %v695_v52 = vsel %vm8703_vm3, 0, %v694_v1  ;;  %v7391_v20 = vld [vmem:[%s8699_s9 + $0x28] sm:$0xff]  }
  0x49   : > { %7874 = vmatpush3.bf16.msra.mxu0 %v8781_v9  ;;  %v1537_v33 = vrot.slane %v1536_v30, 4  ;;  %v923_v40 = vsel %vm8787_vm10, %v915_v31, %v922_v13  ;;  %1213 = vst [vmem:[#allocation2 + $0x24] sm:$0xf] %v1212_v63  ;;  %v1216_v41 = vsel %vm8703_vm3, %v924_v32, %v1215_v27  ;;  %v615_v29 = vmax.f32 %v583_v3, 0.0  ;;  %696 = vst [vmem:[#allocation2 + $0x30] sm:$0x1] %v695_v52 }
  0x4a   : > { %7875 = vmatprep.subr.bf16.mxu0 %v8380_v18  ;;  %v1532_v9 = vsel %vm8810_vm11, %v1527_v36, %v1531_v6  ;;  %1214 = vst [vmem:[#allocation2 + $0x28] sm:$0xf] %v923_v40  ;;  %1217 = vst [vmem:[#allocation2 + $0x2c] sm:$0x1] %v1216_v41  ;;  %v584_v21 = vadd.f32 %v8732_v26, %v546_v12  ;;  %v751_v44 = vsel %vm8714_vm4, 0, %v750_v17  ;;  %7686 = vmatpush3.bf16.msra.mxu1 %v8384_v50  ;;  %v8383_v6 = vld [vmem:[%s10572_s5 + $0x158] sm:$0xff]  }
  0x4b   : > { %v1542_v45 = vsel %vm8810_vm11, %v1537_v33, %v1541_v24  ;;  %752 = vst [vmem:[#allocation2 + $0x38] sm:$0x1] %v751_v44  ;;  %v547_v46 = vmul.f32 %v7261_v22, %v8727_v25  ;;  %v548_v47 = vmul.f32 %v7262_v35, %v8727_v25  ;;  %v698_v49 = vsel %vm8703_vm3, 0, %v697_v28  ;;  %7687 = vmatprep.subr.bf16.mxu1 %v8387_v34  ;;  %v8390_v22 = vld [vmem:[%s10572_s5 + $0x20] sm:$0xff]  }
  0x4c   : > { %v6762_v55 = vcombine.low %v1532_v9, %v1542_v45  ;;  %v616_v50 = vmax.f32 %v584_v21, 0.0  ;;  %v8927_v58 = vpack.c.bf16 %v615_v29, %v615_v29  ;;  %699 = vst [vmem:[#allocation2 + $0x3c] sm:$0x1] %v698_v49  ;;  %v754_v59 = vsel %vm8714_vm4, 0, %v753_v16  ;;  %v8385_v28 = vld [vmem:[%s10572_s5 + $0x160] sm:$0xff]  }
  0x4d   : > { %7876 = vmatpush3.bf16.msra.mxu0 %v8380_v18  ;;  %v585_v5 = vadd.f32 %v8732_v26, %v547_v46  ;;  %v586_v35 = vadd.f32 %v8732_v26, %v548_v47  ;;  %755 = vst [vmem:[#allocation2 + $0x44] sm:$0x1] %v754_v59  ;;  %v7265_v60 = vunpack.c.l.bf16 %v7391_v20  ;;  %v7266_v0 = vunpack.c.h.bf16 %v7391_v20  ;;  %v8392_v18 = vld [vmem:[%s10572_s5 + $0x28] sm:$0xff]  }
  0x4e   : > { %7653 = vmatprep.mubr.bf16.mxu1 %v6762_v55  ;;  %7877 = vmatprep.subr.bf16.mxu0 %v8382_v42  ;;  %v8939_v62 = vpack.c.bf16 %v616_v50, %v616_v50  ;;  %v926_v1 = vshrl.u32 %v8927_v58, 16  ;;  %v929_v4 = vshll.u32 %v8927_v58, 16  ;;  %v701_v7 = vsel %vm8703_vm3, 0, %v700_v51 }
  0x4f   : > { %v617_v8 = vmax.f32 %v585_v5, 0.0  ;;  %v618_v11 = vmax.f32 %v586_v35, 0.0  ;;  %v8949_v17 = vmul.f32 %v7265_v60, %v8727_v25  ;;  %v8952_v53 = vmul.f32 %v7266_v0, %v8727_v25  ;;  %702 = vst [vmem:[#allocation2 + $0x48] sm:$0x1] %v701_v7  ;;  %7688 = vmatpush3.bf16.msra.mxu1 %v8387_v34 }
  0x50   : > { %v1410_v23 = vld [vmem:[#allocation2 + $0x24] sm:$0xf]  ;;  %v8957_v10 = vrot.slane %v926_v1, 7  ;;  %v934_v27 = vshrl.u32 %v8939_v62, 16  ;;  %v7269_v30 = vunpack.c.l.bf16 %v8937_v61  ;;  %v7270_v31 = vunpack.c.h.bf16 %v8937_v61  ;;  %7689 = vmatprep.subr.bf16.mxu1 %v8390_v22  ;;  %v1218_v50 = vld [vmem:[#allocation2 + $0x30] sm:$0xf] }
  0x51   : > { %v3327_v24 = vld [vmem:[#allocation2 + $0x24] sm:$0xf]  ;;  %v1411_v13 = vld [vmem:[#allocation2 + $0x28] sm:$0xf]  ;;  %v1455_v32 = vld [vmem:[#allocation2 + $0x2c] sm:$0x1]  ;;  %7878 = vmatpush3.bf16.msra.mxu0 %v8382_v42  ;;  %v8965_v63 = vpack.c.bf16 %v617_v8, %v617_v8  ;;  %v8967_v12 = vpack.c.bf16 %v618_v11, %v618_v11 }
  0x52   : > { %v1544_v34 = vshrl.u32 %v1410_v23, 16  ;;  %v1547_v36 = vshll.u32 %v1410_v23, 16  ;;  %v1553_v3 = vshll.u32 %v1411_v13, 16  ;;  %v1557_v16 = vshrl.u32 %v1411_v13, 16  ;;  %v3328_v40 = vld [vmem:[#allocation2 + $0x28] sm:$0xf]  ;;  %7879 = vmatprep.subr.bf16.mxu0 %v8383_v6 }
  0x53   : > { %v1563_v33 = vshll.u32 %v1455_v32, 16  ;;  %v3418_v41 = vshrl.u32 %v3327_v24, 16  ;;  %v3329_v9 = vld [vmem:[#allocation2 + $0x2c] sm:$0x1]  ;;  %v3421_v21 = vshll.u32 %v3327_v24, 16  ;;  %v3427_v29 = vshll.u32 %v3328_v40, 16  ;;  %7690 = vmatpush3.bf16.msra.mxu1 %v8390_v22 }
  0x54   : > { %v1546_v52 = vrot.slane %v1544_v34, 4  ;;  %v1549_v20 = vrot.slane %v1547_v36, 5  ;;  %v1555_v44 = vrot.slane %v1553_v3, 5  ;;  %v1559_v45 = vrot.slane %v1557_v16, 4  ;;  %7691 = vmatprep.subr.bf16.mxu1 %v8392_v18  ;;  %v8386_v22 = vld [vmem:[%s10572_s5 + $0x168] sm:$0xff]   ;;  %v8388_v3 = vld [vmem:[%s10572_s5 + $0x170] sm:$0xff]  }
  0x55   : > { %v1565_v46 = vrot.slane %v1563_v33, 5  ;;  %v3420_v42 = vrot.slane %v3418_v41, 4  ;;  %v3423_v49 = vrot.slane %v3421_v21, 5  ;;  %v3429_v51 = vrot.slane %v3427_v29, 5  ;;  %7880 = vmatpush3.bf16.msra.mxu0 %v8383_v6  ;;  %v756_v36 = vld [vmem:[#allocation2 + $0x50] sm:$0x1] }
  0x56   : > { %v1550_v47 = vor.u32 %v1549_v20, %v1546_v52  ;;  %v3431_v55 = vshrl.u32 %v3328_v40, 16  ;;  %v1560_v58 = vor.u32 %v1559_v45, %v1555_v44  ;;  %v3437_v59 = vshll.u32 %v3329_v9, 16  ;;  %7881 = vmatprep.subr.bf16.mxu0 %v8385_v28  ;;  %v703_v41 = vld [vmem:[#allocation2 + $0x54] sm:$0x1]  ;;  %v1225_v29 = vld [vmem:[#allocation2 + $0x3c] sm:$0xf] }
  0x57   : > { %v931_v5 = vor.u32 %v929_v4, %v8957_v10  ;;  %v932_v35 = vrot.slane %v8957_v10, 4  ;;  %v3424_v0 = vor.u32 %v3423_v49, %v3420_v42  ;;  %v936_v7 = vrot.slane %v934_v27, 7  ;;  %7692 = vmatpush3.bf16.msra.mxu1 %v8392_v18  ;;  %v1222_v4 = vld [vmem:[#allocation2 + $0x38] sm:$0x1] }
  0x58   : > { %v1551_v60 = vrot.slane %v1550_v47, 4  ;;  %v3433_v1 = vrot.slane %v3431_v55, 4  ;;  %v1561_v8 = vrot.slane %v1560_v58, 4  ;;  %v3439_v11 = vrot.slane %v3437_v59, 5  ;;  %v1229_v55 = vld [vmem:[#allocation2 + $0x44] sm:$0x1] }
  0x59   : > { %v937_v6 = vshll.u32 %v8939_v62, 16  ;;  %v1219_v23 = vsel %vm8754_vm6, %v931_v5, %v1218_v50  ;;  %v3425_v10 = vrot.slane %v3424_v0, 4  ;;  %v941_v32 = vrot.slane %v936_v7, 4  ;;  %7882 = vmatpush3.bf16.msra.mxu0 %v8385_v28 }
  0x5a   : > { %v1556_v24 = vsel %vm8810_vm11, %v1551_v60, %v1555_v44  ;;  %v3434_v13 = vor.u32 %v3433_v1, %v3429_v51  ;;  %1220 = vst [vmem:[#allocation2 + $0x30] sm:$0xf] %v1219_v23  ;;  %v1566_v27 = vsel %vm8810_vm11, %v1561_v8, %v1565_v46  ;;  %v943_v34 = vshrl.u32 %v8965_v63, 16  ;;  %7883 = vmatprep.subr.bf16.mxu0 %v8386_v22 }
  0x5b   : > { %v939_v18 = vor.u32 %v937_v6, %v936_v7  ;;  %v946_v62 = vshll.u32 %v8965_v63, 16  ;;  %v6763_v16 = vcombine.low %v1556_v24, %v1566_v27  ;;  %v3430_v33 = vsel %vm8810_vm11, %v3425_v10, %v3429_v51 }
  0x5c   : > { %v3435_v40 = vrot.slane %v3434_v13, 4  ;;  %v1223_v28 = vsel %vm8703_vm3, %v941_v32, %v1222_v4  ;;  %v945_v63 = vrot.slane %v943_v34, 7  ;;  %v951_v20 = vshrl.u32 %v8967_v12, 16  ;;  %v9029_v4 = vld [vmem:[%s10572_s5 + $0x180] sm:$0xff]  }
  0x5d   : > { %v940_v52 = vsel %vm8787_vm10, %v932_v35, %v939_v18  ;;  %1224 = vst [vmem:[#allocation2 + $0x38] sm:$0x1] %v1223_v28  ;;  %v954_v9 = vshll.u32 %v8967_v12, 16  ;;  %7654 = vmatmul.mubr.bf16.gmra.mrb[4].mxu1 %v6763_v16  ;;  %v587_v44 = vadd.f32 %v8732_v26, %v8949_v17  ;;  %v588_v45 = vadd.f32 %v8732_v26, %v8952_v53  ;;  %v8389_v12 = vld [vmem:[%s10572_s5 + $0x178] sm:$0xff]  }
  0x5e   : > { %v3440_v21 = vsel %vm8810_vm11, %v3435_v40, %v3439_v11  ;;  %1221 = vst [vmem:[#allocation2 + $0x34] sm:$0xf] %v940_v52  ;;  %v757_v46 = vsel %vm8714_vm4, 0, %v756_v36  ;;  %7884 = vmatpush3.bf16.msra.mxu0 %v8386_v22  ;;  %v948_v47 = vor.u32 %v946_v62, %v945_v63  ;;  %v949_v49 = vrot.slane %v945_v63, 4 }
  0x5f   : > { %v6922_v42 = vcombine.low %v3430_v33, %v3440_v21  ;;  %v953_v51 = vrot.slane %v951_v20, 7  ;;  %758 = vst [vmem:[#allocation2 + $0x50] sm:$0x1] %v757_v46  ;;  %7885 = vmatprep.subr.bf16.mxu0 %v8388_v3  ;;  %v619_v50 = vmax.f32 %v587_v44, 0.0  ;;  %v620_v17 = vmax.f32 %v588_v45, 0.0 }
  0x60   : > { %v551_v53 = vmul.f32 %v7269_v30, %v8727_v25  ;;  %v552_v58 = vmul.f32 %v7270_v31, %v8727_v25  ;;  %v1226_v60 = vsel %vm8754_vm6, %v948_v47, %v1225_v29  ;;  %v704_v0 = vsel %vm8703_vm3, 0, %v703_v41  ;;  %v9016_v30 = vld [vmem:[%s8699_s9 + $0x38] sm:$0xff]  }
  0x61   : > { %7845 = vmatprep.mubr.bf16.mxu0 %v6922_v42  ;;  %v3330_v59 = vld [vmem:[#allocation2 + $0x30] sm:$0xf]  ;;  %v956_v35 = vor.u32 %v954_v9, %v953_v51  ;;  %v958_v22 = vrot.slane %v953_v51, 4  ;;  %1227 = vst [vmem:[#allocation2 + $0x3c] sm:$0xf] %v1226_v60  ;;  %v9022_v6 = vpack.c.bf16 %v619_v50, %v619_v50  ;;  %v9024_v23 = vpack.c.bf16 %v620_v17, %v620_v17 }
  0x62   : > { %v1412_v5 = vld [vmem:[#allocation2 + $0x30] sm:$0xf]  ;;  %v3442_v1 = vshrl.u32 %v3330_v59, 16  ;;  %v3445_v7 = vshll.u32 %v3330_v59, 16  ;;  %705 = vst [vmem:[#allocation2 + $0x54] sm:$0x1] %v704_v0  ;;  %7886 = vmatpush3.bf16.msra.mxu0 %v8388_v3  ;;  %v9034_v27 = vadd.f32 %v8732_v26, %v551_v53  ;;  %v9037_v18 = vadd.f32 %v8732_v26, %v552_v58 }
  0x63   : > { %v1568_v8 = vshrl.u32 %v1412_v5, 16  ;;  %v1571_v11 = vshll.u32 %v1412_v5, 16  ;;  %v957_v61 = vsel %vm8787_vm10, %v949_v49, %v956_v35  ;;  %v1230_v31 = vsel %vm8703_vm3, %v958_v22, %v1229_v55  ;;  %7887 = vmatprep.subr.bf16.mxu0 %v8389_v12  ;;  %v8394_v26 = vld [vmem:[%s10572_s5 + $0x30] sm:$0xff]  }
  0x64   : > { %v9031_v24 = vld [vmem:[#allocation2 + $0x38] sm:$0x1]  ;;  %v3444_v10 = vrot.slane %v3442_v1, 4  ;;  %v3447_v13 = vrot.slane %v3445_v7, 5  ;;  %1228 = vst [vmem:[#allocation2 + $0x40] sm:$0xf] %v957_v61  ;;  %v7273_v16 = vunpack.c.l.bf16 %v9016_v30  ;;  %v7274_v33 = vunpack.c.h.bf16 %v9016_v30  ;;  %7693 = vmatprep.subr.bf16.mxu1 %v8394_v26 }
  0x65   : > { %v1456_v32 = vld [vmem:[#allocation2 + $0x38] sm:$0x1]  ;;  %1231 = vst [vmem:[#allocation2 + $0x44] sm:$0x1] %v1230_v31  ;;  %v9039_v34 = vld [vmem:[#allocation2 + $0x34] sm:$0xf]  ;;  %7694 = vmatpush3.bf16.msra.mxu1 %v8394_v26 }
  0x66   : > { %v3461_v62 = vshll.u32 %v9031_v24, 16  ;;  %v1413_v36 = vld [vmem:[#allocation2 + $0x34] sm:$0xf]  ;;  %v1570_v3 = vrot.slane %v1568_v8, 4  ;;  %v3448_v40 = vor.u32 %v3447_v13, %v3444_v10  ;;  %v3451_v28 = vshll.u32 %v9039_v34, 16  ;;  %7888 = vmatpush3.bf16.msra.mxu0 %v8389_v12 }
  0x67   : > { %v3455_v41 = vshrl.u32 %v9039_v34, 16  ;;  %v1573_v52 = vrot.slane %v1571_v11, 5  ;;  %v1577_v20 = vshll.u32 %v1413_v36, 16  ;;  %v1581_v9 = vshrl.u32 %v1413_v36, 16  ;;  %7921 = vmatprep.subr.bf16.mxu0 %v9029_v4 }
  0x68   : > { %v3463_v63 = vrot.slane %v3461_v62, 5  ;;  %v1587_v21 = vshll.u32 %v1456_v32, 16  ;;  %v3449_v29 = vrot.slane %v3448_v40, 4  ;;  %v3453_v44 = vrot.slane %v3451_v28, 5  ;;  %v1414_v51 = vld [vmem:[#allocation2 + $0x3c] sm:$0xf] }
  0x69   : > { %v3457_v45 = vrot.slane %v3455_v41, 4  ;;  %v1574_v46 = vor.u32 %v1573_v52, %v1570_v3  ;;  %v1579_v42 = vrot.slane %v1577_v20, 5  ;;  %v1583_v47 = vrot.slane %v1581_v9, 4  ;;  %v3333_v58 = vld [vmem:[#allocation2 + $0x3c] sm:$0xf] }
  0x6a   : > { %v1589_v49 = vrot.slane %v1587_v21, 5  ;;  %v960_v12 = vshrl.u32 %v9022_v6, 16  ;;  %v3454_v55 = vsel %vm8810_vm11, %v3449_v29, %v3453_v44  ;;  %v1592_v53 = vshrl.u32 %v1414_v51, 16 }
  0x6b   : > { %v3458_v50 = vor.u32 %v3457_v45, %v3453_v44  ;;  %v1575_v17 = vrot.slane %v1574_v46, 4  ;;  %v1584_v59 = vor.u32 %v1583_v47, %v1579_v42  ;;  %v1415_v5 = vld [vmem:[#allocation2 + $0x40] sm:$0xf]  ;;  %v1595_v22 = vshll.u32 %v1414_v51, 16 }
  0x6c   : > { %v1457_v35 = vld [vmem:[#allocation2 + $0x44] sm:$0x1]  ;;  %v3466_v60 = vshrl.u32 %v3333_v58, 16  ;;  %v9054_v0 = vmul.f32 %v7273_v16, %v8727_v25  ;;  %v1594_v8 = vrot.slane %v1592_v53, 4  ;;  %v1601_v11 = vshll.u32 %v1415_v5, 16 }
  0x6d   : > { %v3459_v1 = vrot.slane %v3458_v50, 4  ;;  %v1580_v7 = vsel %vm8810_vm11, %v1575_v17, %v1579_v42  ;;  %v1585_v61 = vrot.slane %v1584_v59, 4  ;;  %v1597_v31 = vrot.slane %v1595_v22, 5  ;;  %v3334_v32 = vld [vmem:[#allocation2 + $0x40] sm:$0xf] }
  0x6e   : > { %v1605_v10 = vshrl.u32 %v1415_v5, 16  ;;  %v1611_v13 = vshll.u32 %v1457_v35, 16  ;;  %v1603_v36 = vrot.slane %v1601_v11, 5  ;;  %v3335_v3 = vld [vmem:[#allocation2 + $0x44] sm:$0x1]  ;;  %v3468_v40 = vrot.slane %v3466_v60, 4 }
  0x6f   : > { %v3464_v62 = vsel %vm8810_vm11, %v3459_v1, %v3463_v63  ;;  %v3469_v28 = vshll.u32 %v3333_v58, 16  ;;  %v1590_v16 = vsel %vm8810_vm11, %v1585_v61, %v1589_v49  ;;  %v1598_v41 = vor.u32 %v1597_v31, %v1594_v8  ;;  %v1232_v63 = vld [vmem:[#allocation2 + $0x48] sm:$0xf]  ;;  %v759_v50 = vld [vmem:[#allocation2 + $0x5c] sm:$0x1] }
  0x70   : > { %v6923_v25 = vcombine.low %v3454_v55, %v3464_v62  ;;  %v1607_v52 = vrot.slane %v1605_v10, 4  ;;  %v6764_v26 = vcombine.low %v1580_v7, %v1590_v16  ;;  %v1613_v20 = vrot.slane %v1611_v13, 5  ;;  %v1236_v7 = vld [vmem:[#allocation2 + $0x50] sm:$0x1]  ;;  %v706_v62 = vld [vmem:[#allocation2 + $0x60] sm:$0x1] }
  0x71   : > { %v3471_v9 = vrot.slane %v3469_v28, 5  ;;  %v3475_v21 = vshll.u32 %v3334_v32, 16  ;;  %v1599_v29 = vrot.slane %v1598_v41, 4  ;;  %v3479_v45 = vshrl.u32 %v3334_v32, 16  ;;  %v7394_v16 = vld [vmem:[%s8699_s9 + $0x40] sm:$0xff]  }
  0x72   : > { %7846 = vmatmul.mubr.bf16.gmra.mrb[4].mxu0 %v6923_v25  ;;  %v1608_v44 = vor.u32 %v1607_v52, %v1603_v36  ;;  %v3485_v46 = vshll.u32 %v3335_v3, 16  ;;  %7657 = vmatprep.mubr.bf16.mxu1 %v6764_v26  ;;  %v962_v51 = vrot.slane %v960_v12, 7  ;;  %v963_v55 = vshll.u32 %v9022_v6, 16 }
  0x73   : > { %v3472_v42 = vor.u32 %v3471_v9, %v3468_v40  ;;  %v3477_v47 = vrot.slane %v3475_v21, 5  ;;  %v1604_v49 = vsel %vm8810_vm11, %v1599_v29, %v1603_v36  ;;  %v3481_v53 = vrot.slane %v3479_v45, 4  ;;  %v762_v36 = vld [vmem:[#allocation2 + $0x68] sm:$0x1]  ;;  %v9080_v40 = vld [vmem:[%s10570_s3] ss:$0 sm:$0xff] }
  0x74   : > { %v1609_v17 = vrot.slane %v1608_v44, 4  ;;  %v3487_v58 = vrot.slane %v3485_v46, 5  ;;  %v965_v5 = vor.u32 %v963_v55, %v962_v51  ;;  %v966_v35 = vrot.slane %v962_v51, 4  ;;  %v709_v9 = vld [vmem:[#allocation2 + $0x6c] sm:$0x1] }
  0x75   : > { %v3473_v59 = vrot.slane %v3472_v42, 4  ;;  %v968_v22 = vshrl.u32 %v9024_v23, 16  ;;  %v3482_v1 = vor.u32 %v3481_v53, %v3477_v47  ;;  %v971_v12 = vshll.u32 %v9024_v23, 16  ;;  %v1239_v46 = vld [vmem:[#allocation2 + $0x54] sm:$0xf] }
  0x76   : > { %v1614_v60 = vsel %vm8810_vm11, %v1609_v17, %v1613_v20  ;;  %v621_v6 = vmax.f32 %v9034_v27, 0.0  ;;  %v1233_v31 = vsel %vm8754_vm6, %v965_v5, %v1232_v63  ;;  %v622_v13 = vmax.f32 %v9037_v18, 0.0  ;;  %v9088_v18 = vld [vmem:[%s10571_s4] ss:$0 sm:$0xff] }
  0x77   : > { %v6765_v8 = vcombine.low %v1604_v49, %v1614_v60  ;;  %v3478_v11 = vsel %vm8810_vm11, %v3473_v59, %v3477_v47  ;;  %v970_v61 = vrot.slane %v968_v22, 7  ;;  %v3483_v10 = vrot.slane %v3482_v1, 4  ;;  %1234 = vst [vmem:[#allocation2 + $0x48] sm:$0xf] %v1233_v31 }
  0x78   : > { %v760_v32 = vsel %vm8714_vm4, 0, %v759_v50  ;;  %v7187_v23 = vpack.c.bf16 %v621_v6, %v621_v6  ;;  %v554_v28 = vmul.f32 %v9080_v40, %v7274_v33  ;;  %v591_v25 = vadd.f32 %v9088_v18, %v9054_v0 }
  0x79   : > { %7658 = vmatmul.mubr.bf16.gmra.mrb[8].mxu1 %v6765_v8  ;;  %v973_v27 = vor.u32 %v971_v12, %v970_v61  ;;  %v975_v3 = vrot.slane %v970_v61, 4  ;;  %761 = vst [vmem:[#allocation2 + $0x5c] sm:$0x1] %v760_v32  ;;  %v3488_v41 = vsel %vm8810_vm11, %v3483_v10, %v3487_v58  ;;  %v7188_v52 = vpack.c.bf16 %v622_v13, %v622_v13 }
  0x7a   : > { %v977_v26 = vshrl.u32 %v7187_v23, 16  ;;  %v980_v20 = vshll.u32 %v7187_v23, 16  ;;  %v6924_v21 = vcombine.low %v3478_v11, %v3488_v41  ;;  %v592_v29 = vadd.f32 %v9088_v18, %v554_v28 }
  0x7b   : > { %v974_v30 = vsel %vm8787_vm10, %v966_v35, %v973_v27  ;;  %v1237_v33 = vsel %vm8703_vm3, %v975_v3, %v1236_v7  ;;  %v985_v44 = vshrl.u32 %v7188_v52, 16  ;;  %v988_v45 = vshll.u32 %v7188_v52, 16 }
  0x7c   : > { %1235 = vst [vmem:[#allocation2 + $0x4c] sm:$0xf] %v974_v30  ;;  %1238 = vst [vmem:[#allocation2 + $0x50] sm:$0x1] %v1237_v33  ;;  %v979_v0 = vrot.slane %v977_v26, 7  ;;  %v623_v63 = vmax.f32 %v591_v25, 0.0  ;;  %7849 = vmatprep.mubr.bf16.mxu0 %v6924_v21  ;;  %v7277_v55 = vunpack.c.l.bf16 %v7394_v16  ;;  %v7278_v35 = vunpack.c.h.bf16 %v7394_v16 }
  0x7d   : > { %v624_v42 = vmax.f32 %v592_v29, 0.0  ;;  %v707_v47 = vsel %vm8703_vm3, 0, %v706_v62  ;;  %v763_v51 = vsel %vm8714_vm4, 0, %v762_v36  ;;  %v987_v17 = vrot.slane %v985_v44, 7  ;;  %v8396_v36 = vld [vmem:[%s10572_s5 + $0x38] sm:$0xff]  }
  0x7e   : > { %v982_v50 = vor.u32 %v980_v20, %v979_v0  ;;  %v983_v49 = vrot.slane %v979_v0, 4  ;;  %708 = vst [vmem:[#allocation2 + $0x60] sm:$0x1] %v707_v47  ;;  %764 = vst [vmem:[#allocation2 + $0x68] sm:$0x1] %v763_v51  ;;  %v9104_v53 = vpack.c.bf16 %v623_v63, %v623_v63  ;;  %v555_v22 = vmul.f32 %v9080_v40, %v7277_v55 }
  0x7f   : > { %v3336_v58 = vld [vmem:[#allocation2 + $0x48] sm:$0xf]  ;;  %v9106_v5 = vpack.c.bf16 %v624_v42, %v624_v42  ;;  %v710_v60 = vsel %vm8703_vm3, 0, %v709_v9  ;;  %v990_v11 = vor.u32 %v988_v45, %v987_v17  ;;  %v992_v61 = vrot.slane %v987_v17, 4  ;;  %7695 = vmatprep.subr.bf16.mxu1 %v8396_v36 }
  0x80   : > { %v1416_v59 = vld [vmem:[#allocation2 + $0x48] sm:$0xf]  ;;  %v3490_v1 = vshrl.u32 %v3336_v58, 16  ;;  %v3493_v12 = vshll.u32 %v3336_v58, 16  ;;  %v1243_v8 = vld [vmem:[#allocation2 + $0x5c] sm:$0x1]  ;;  %v1240_v31 = vsel %vm8754_vm6, %v982_v50, %v1239_v46  ;;  %v556_v41 = vmul.f32 %v9080_v40, %v7278_v35  ;;  %7696 = vmatpush3.bf16.msra.mxu1 %v8396_v36 }
  0x81   : > { %v1616_v7 = vshrl.u32 %v1416_v59, 16  ;;  %v1619_v6 = vshll.u32 %v1416_v59, 16  ;;  %711 = vst [vmem:[#allocation2 + $0x6c] sm:$0x1] %v710_v60  ;;  %v994_v10 = vshrl.u32 %v9104_v53, 16  ;;  %v991_v25 = vsel %vm8787_vm10, %v983_v49, %v990_v11 }
  0x82   : > { %v3492_v13 = vrot.slane %v3490_v1, 4  ;;  %v3495_v32 = vrot.slane %v3493_v12, 5  ;;  %1241 = vst [vmem:[#allocation2 + $0x54] sm:$0xf] %v1240_v31  ;;  %v1244_v16 = vsel %vm8703_vm3, %v992_v61, %v1243_v8  ;;  %v9127_v52 = vadd.f32 %v9088_v18, %v555_v22  ;;  %1242 = vst [vmem:[#allocation2 + $0x58] sm:$0xf] %v991_v25 }
  0x83   : > { %v1618_v23 = vrot.slane %v1616_v7, 4  ;;  %v1621_v62 = vrot.slane %v1619_v6, 5  ;;  %v9117_v27 = vld [vmem:[#allocation2 + $0x4c] sm:$0xf]  ;;  %v9119_v3 = vld [vmem:[#allocation2 + $0x50] sm:$0x1] }
  0x84   : > { %v1417_v28 = vld [vmem:[#allocation2 + $0x4c] sm:$0xf]  ;;  %v3496_v26 = vor.u32 %v3495_v32, %v3492_v13  ;;  %v3499_v20 = vshll.u32 %v9117_v27, 16  ;;  %v3503_v9 = vshrl.u32 %v9117_v27, 16  ;;  %v3509_v21 = vshll.u32 %v9119_v3, 16 }
  0x85   : > { %v1458_v30 = vld [vmem:[#allocation2 + $0x50] sm:$0x1]  ;;  %1245 = vst [vmem:[#allocation2 + $0x5c] sm:$0x1] %v1244_v16  ;;  %v1622_v33 = vor.u32 %v1621_v62, %v1618_v23  ;;  %v1625_v29 = vshll.u32 %v1417_v28, 16  ;;  %v1629_v0 = vshrl.u32 %v1417_v28, 16  ;;  %v594_v23 = vadd.f32 %v9088_v18, %v556_v41 }
  0x86   : > { %v1635_v44 = vshll.u32 %v1458_v30, 16  ;;  %v3497_v45 = vrot.slane %v3496_v26, 4  ;;  %v3501_v46 = vrot.slane %v3499_v20, 5  ;;  %v3505_v63 = vrot.slane %v3503_v9, 4 }
  0x87   : > { %v3511_v42 = vrot.slane %v3509_v21, 5  ;;  %v1623_v47 = vrot.slane %v1622_v33, 4  ;;  %v1627_v51 = vrot.slane %v1625_v29, 5  ;;  %v1631_v55 = vrot.slane %v1629_v0, 4 }
  0x88   : > { %v1637_v50 = vrot.slane %v1635_v44, 5  ;;  %v3502_v49 = vsel %vm8810_vm11, %v3497_v45, %v3501_v46  ;;  %v3506_v17 = vor.u32 %v3505_v63, %v3501_v46  ;;  %v9134_v58 = vrot.slane %v994_v10, 7  ;;  %v1246_v44 = vld [vmem:[#allocation2 + $0x60] sm:$0xf] }
  0x89   : > { %v997_v59 = vshll.u32 %v9104_v53, 16  ;;  %v1628_v35 = vsel %vm8810_vm11, %v1623_v47, %v1627_v51  ;;  %v1632_v22 = vor.u32 %v1631_v55, %v1627_v51  ;;  %v1418_v60 = vld [vmem:[#allocation2 + $0x54] sm:$0xf]  ;;  %v1002_v12 = vshrl.u32 %v9106_v5, 16  ;;  %v1419_v13 = vld [vmem:[#allocation2 + $0x58] sm:$0xf] }
  0x8a   : > { %v3339_v1 = vld [vmem:[#allocation2 + $0x54] sm:$0xf]  ;;  %v1005_v7 = vshll.u32 %v9106_v5, 16  ;;  %v3507_v6 = vrot.slane %v3506_v17, 4  ;;  %v1640_v8 = vshrl.u32 %v1418_v60, 16  ;;  %v1643_v11 = vshll.u32 %v1418_v60, 16 }
  0x8b   : > { %v3514_v61 = vshrl.u32 %v3339_v1, 16  ;;  %v1633_v31 = vrot.slane %v1632_v22, 4  ;;  %v3517_v32 = vshll.u32 %v3339_v1, 16  ;;  %v999_v53 = vor.u32 %v997_v59, %v9134_v58  ;;  %v3340_v16 = vld [vmem:[#allocation2 + $0x58] sm:$0xf]  ;;  %v8400_v5 = vld [vmem:[%s10572_s5 + $0x80] sm:$0xff]  }
  0x8c   : > { %v1459_v10 = vld [vmem:[#allocation2 + $0x5c] sm:$0x1]  ;;  %v3512_v62 = vsel %vm8810_vm11, %v3507_v6, %v3511_v42  ;;  %v1642_v36 = vrot.slane %v1640_v8, 4  ;;  %v1645_v28 = vrot.slane %v1643_v11, 5  ;;  %v1649_v25 = vshll.u32 %v1419_v13, 16  ;;  %7729 = vmatprep.subr.bf16.mxu1 %v8400_v5 }
  0x8d   : > { %v6925_v26 = vcombine.low %v3502_v49, %v3512_v62  ;;  %v1638_v20 = vsel %vm8810_vm11, %v1633_v31, %v1637_v50  ;;  %v1653_v9 = vshrl.u32 %v1419_v13, 16  ;;  %v1659_v21 = vshll.u32 %v1459_v10, 16  ;;  %v3341_v30 = vld [vmem:[#allocation2 + $0x5c] sm:$0x1]  ;;  %v765_v47 = vld [vmem:[#allocation2 + $0x74] sm:$0x1] }
  0x8e   : > { %v6766_v33 = vcombine.low %v1628_v35, %v1638_v20  ;;  %v1646_v41 = vor.u32 %v1645_v28, %v1642_v36  ;;  %v1651_v29 = vrot.slane %v1649_v25, 5  ;;  %v3516_v0 = vrot.slane %v3514_v61, 4  ;;  %v1250_v11 = vld [vmem:[#allocation2 + $0x68] sm:$0x1]  ;;  %v4075_v61 = vld [vmem:[#allocation2 + $0xc] sm:$0xe] }
  0x8f   : > { %7850 = vmatmul.mubr.bf16.gmra.mrb[8].mxu0 %v6925_v26  ;;  %v1655_v45 = vrot.slane %v1653_v9, 4  ;;  %v1661_v46 = vrot.slane %v1659_v21, 5  ;;  %v3519_v63 = vrot.slane %v3517_v32, 5  ;;  %v3523_v42 = vshll.u32 %v3340_v16, 16  ;;  %v9167_v26 = vld [vmem:[%s8699_s9 + $0x48] sm:$0xff]  }
  0x90   : > { %7661 = vmatprep.mubr.bf16.mxu1 %v6766_v33  ;;  %v1647_v51 = vrot.slane %v1646_v41, 4  ;;  %v3527_v55 = vshrl.u32 %v3340_v16, 16  ;;  %v3533_v49 = vshll.u32 %v3341_v30, 16  ;;  %v1000_v50 = vrot.slane %v9134_v58, 4  ;;  %v8484_v9 = vld [vmem:[#allocation2 + $0x10] sm:$0xf] }
  0x91   : > { %v1656_v17 = vor.u32 %v1655_v45, %v1651_v29  ;;  %v3520_v59 = vor.u32 %v3519_v63, %v3516_v0  ;;  %v3525_v35 = vrot.slane %v3523_v42, 5  ;;  %v1004_v22 = vrot.slane %v1002_v12, 7 }
  0x92   : > { %v1652_v60 = vsel %vm8810_vm11, %v1647_v51, %v1651_v29  ;;  %v3529_v1 = vrot.slane %v3527_v55, 4  ;;  %v3535_v6 = vrot.slane %v3533_v49, 5  ;;  %v1247_v8 = vsel %vm8754_vm6, %v999_v53, %v1246_v44 }
  0x93   : > { %v1657_v31 = vrot.slane %v1656_v17, 4  ;;  %v3521_v13 = vrot.slane %v3520_v59, 4  ;;  %v1007_v10 = vor.u32 %v1005_v7, %v1004_v22  ;;  %v1009_v32 = vrot.slane %v1004_v22, 4  ;;  %1248 = vst [vmem:[#allocation2 + $0x60] sm:$0xf] %v1247_v8 }
  0x94   : > { %v3530_v58 = vor.u32 %v3529_v1, %v3525_v35  ;;  %v625_v62 = vmax.f32 %v9127_v52, 0.0  ;;  %v626_v12 = vmax.f32 %v594_v23, 0.0  ;;  %v766_v36 = vsel %vm8714_vm4, 0, %v765_v47 }
  0x95   : > { %v1662_v28 = vsel %vm8810_vm11, %v1657_v31, %v1661_v46  ;;  %v3526_v53 = vsel %vm8810_vm11, %v3521_v13, %v3525_v35  ;;  %v1008_v25 = vsel %vm8787_vm10, %v1000_v50, %v1007_v10  ;;  %v1251_v7 = vsel %vm8703_vm3, %v1009_v32, %v1250_v11  ;;  %767 = vst [vmem:[#allocation2 + $0x74] sm:$0x1] %v766_v36  ;;  %v1253_v13 = vld [vmem:[#allocation2 + $0x6c] sm:$0xf] }
  0x96   : > { %v6767_v16 = vcombine.low %v1652_v60, %v1662_v28  ;;  %v3531_v5 = vrot.slane %v3530_v58, 4  ;;  %1249 = vst [vmem:[#allocation2 + $0x64] sm:$0xf] %v1008_v25  ;;  %1252 = vst [vmem:[#allocation2 + $0x68] sm:$0x1] %v1251_v7  ;;  %v7191_v52 = vpack.c.bf16 %v625_v62, %v625_v62  ;;  %v7192_v23 = vpack.c.bf16 %v626_v12, %v626_v12 }
  0x97   : > { %v6944_v20 = vrot.slane %v4075_v61, 9  ;;  %v4141_v21 = vrot.slane %v8484_v9, 5  ;;  %v9184_v49 = vsel %vm9171_vm14, %v8871_v48, %v4151_v38  ;;  %v7281_v50 = vunpack.c.l.bf16 %v9167_v26 }
  0x98   : > { %7662 = vmatmul.mubr.bf16.gmra.mrb[12].mxu1 %v6767_v16  ;;  %v3536_v30 = vsel %vm8810_vm11, %v3531_v5, %v3535_v6  ;;  %v1011_v33 = vshrl.u32 %v7191_v52, 16  ;;  %v1014_v41 = vshll.u32 %v7191_v52, 16  ;;  %v1019_v29 = vshrl.u32 %v7192_v23, 16  ;;  %v4076_v16 = vld [vmem:[#allocation2 + $0x18] sm:$0xe] }
  0x99   : > { %v6926_v44 = vcombine.low %v3526_v53, %v3536_v30  ;;  %v1022_v45 = vshll.u32 %v7192_v23, 16  ;;  %v9177_v46 = vsel %vm9171_vm14, %v6944_v20, %v4141_v21  ;;  %v4143_v63 = vrot.slane %v4141_v21, 4 }
  0x9a   : > { %v3342_v42 = vld [vmem:[#allocation2 + $0x60] sm:$0xf]  ;;  %v1013_v51 = vrot.slane %v1011_v33, 7  ;;  %v1021_v55 = vrot.slane %v1019_v29, 7  ;;  %v7282_v48 = vunpack.c.h.bf16 %v9167_v26  ;;  %v712_v26 = vld [vmem:[#allocation2 + $0x78] sm:$0x1] }
  0x9b   : > { %v1420_v47 = vld [vmem:[#allocation2 + $0x60] sm:$0xf]  ;;  %7853 = vmatprep.mubr.bf16.mxu0 %v6926_v44  ;;  %v3538_v17 = vshrl.u32 %v3342_v42, 16  ;;  %v3541_v59 = vshll.u32 %v3342_v42, 16  ;;  %v9195_v38 = vsel %vm9171_vm14, %v4143_v63, %v4144_v56 }
  0x9c   : > { %v1664_v35 = vshrl.u32 %v1420_v47, 16  ;;  %v1667_v22 = vshll.u32 %v1420_v47, 16  ;;  %v1016_v60 = vor.u32 %v1014_v41, %v1013_v51  ;;  %v1017_v1 = vrot.slane %v1013_v51, 4  ;;  %v1257_v36 = vld [vmem:[#allocation2 + $0x74] sm:$0x1] }
  0x9d   : > { %v1024_v6 = vor.u32 %v1022_v45, %v1021_v55  ;;  %v1026_v8 = vrot.slane %v1021_v55, 4  ;;  %v9187_v11 = vld [vmem:[#allocation2 + $0x64] sm:$0xf]  ;;  %v9189_v61 = vld [vmem:[#allocation2 + $0x68] sm:$0x1]  ;;  %v3540_v2 = vrot.slane %v3538_v17, 4 }
  0x9e   : > { %v3543_v31 = vrot.slane %v3541_v59, 5  ;;  %v3547_v10 = vshll.u32 %v9187_v11, 16  ;;  %v3551_v32 = vshrl.u32 %v9187_v11, 16  ;;  %v3557_v58 = vshll.u32 %v9189_v61, 16  ;;  %v1421_v62 = vld [vmem:[#allocation2 + $0x64] sm:$0xf] }
  0x9f   : > { %v1666_v12 = vrot.slane %v1664_v35, 4  ;;  %v1460_v53 = vld [vmem:[#allocation2 + $0x68] sm:$0x1]  ;;  %v1669_v25 = vrot.slane %v1667_v22, 5  ;;  %v1673_v7 = vshll.u32 %v1421_v62, 16  ;;  %v1677_v39 = vshrl.u32 %v1421_v62, 16 }
  0xa0   : > { %v3544_v28 = vor.u32 %v3543_v31, %v3540_v2  ;;  %v3549_v5 = vrot.slane %v3547_v10, 5  ;;  %v3553_v56 = vrot.slane %v3551_v32, 4  ;;  %v3559_v52 = vrot.slane %v3557_v58, 5  ;;  %v768_v45 = vld [vmem:[#allocation2 + $0x80] sm:$0x1]  ;;  %v7396_v55 = vld [vmem:[%s8699_s9 + $0x50] sm:$0xff]  }
  0xa1   : > { %v1683_v23 = vshll.u32 %v1460_v53, 16  ;;  %v1670_v9 = vor.u32 %v1669_v25, %v1666_v12  ;;  %v1675_v21 = vrot.slane %v1673_v7, 5  ;;  %v1679_v30 = vrot.slane %v1677_v39, 4 }
  0xa2   : > { %v3545_v20 = vrot.slane %v3544_v28, 4  ;;  %v3554_v33 = vor.u32 %v3553_v56, %v3549_v5  ;;  %v1025_v29 = vsel %vm8787_vm10, %v1017_v1, %v1024_v6  ;;  %v1254_v44 = vsel %vm8754_vm6, %v1016_v60, %v1253_v13  ;;  %v715_v60 = vld [vmem:[#allocation2 + $0x84] sm:$0x1]  ;;  %v771_v1 = vld [vmem:[#allocation2 + $0x8c] sm:$0x1] }
  0xa3   : > { %v1685_v41 = vrot.slane %v1683_v23, 5  ;;  %v1671_v42 = vrot.slane %v1670_v9, 4  ;;  %v1680_v47 = vor.u32 %v1679_v30, %v1675_v21  ;;  %1255 = vst [vmem:[#allocation2 + $0x6c] sm:$0xf] %v1254_v44  ;;  %1256 = vst [vmem:[#allocation2 + $0x70] sm:$0xf] %v1025_v29  ;;  %v1258_v51 = vsel %vm8703_vm3, %v1026_v8, %v1257_v36 }
  0xa4   : > { %v3550_v63 = vsel %vm8810_vm11, %v3545_v20, %v3549_v5  ;;  %v3555_v17 = vrot.slane %v3554_v33, 4  ;;  %1259 = vst [vmem:[#allocation2 + $0x74] sm:$0x1] %v1258_v51  ;;  %v6976_v59 = vcombine.low %v9177_v46, %v9195_v38  ;;  %v6945_v35 = vrot.slane %v4076_v16, 9  ;;  %v9213_v6 = vld [vmem:[#allocation2 + $0x24] sm:$0xe] }
  0xa5   : > { %v557_v22 = vmul.f32 %v9080_v40, %v7281_v50  ;;  %v1676_v2 = vsel %vm8810_vm11, %v1671_v42, %v1675_v21  ;;  %v1681_v31 = vrot.slane %v1680_v47, 4  ;;  %v558_v13 = vmul.f32 %v9080_v40, %v7282_v48 }
  0xa6   : > { %v713_v8 = vsel %vm8703_vm3, 0, %v712_v26  ;;  %v3560_v10 = vsel %vm8810_vm11, %v3555_v17, %v3559_v52  ;;  %v4149_v46 = vsel %vm9171_vm14, %v6945_v35, %v4148_v37  ;;  %v769_v38 = vsel %vm8714_vm4, 0, %v768_v45  ;;  %v8485_v52 = vld [vmem:[#allocation2 + $0x28] sm:$0xf] }
  0xa7   : > { %v595_v50 = vadd.f32 %v9088_v18, %v557_v22  ;;  %714 = vst [vmem:[#allocation2 + $0x78] sm:$0x1] %v713_v8  ;;  %v6927_v32 = vcombine.low %v3550_v63, %v3560_v10  ;;  %v1686_v48 = vsel %vm8810_vm11, %v1681_v31, %v1685_v41  ;;  %v6977_v58 = vcombine.low %v4149_v46, %v9184_v49 }
  0xa8   : > { %v596_v62 = vadd.f32 %v9088_v18, %v558_v13  ;;  %770 = vst [vmem:[#allocation2 + $0x80] sm:$0x1] %v769_v38  ;;  %v6768_v12 = vcombine.low %v1676_v2, %v1686_v48  ;;  %v7285_v36 = vunpack.c.l.bf16 %v7396_v55  ;;  %v7286_v28 = vunpack.c.h.bf16 %v7396_v55  ;;  %v8393_v2 = vld [vmem:[%s10572_s5 + $0x188] sm:$0xff]  }
  0xa9   : > { %v627_v57 = vmax.f32 %v595_v50, 0.0  ;;  %7854 = vmatmul.mubr.bf16.gmra.mrb[12].mxu0 %v6927_v32  ;;  %v716_v53 = vsel %vm8703_vm3, 0, %v715_v60  ;;  %v772_v25 = vsel %vm8714_vm4, 0, %v771_v1  ;;  %v6946_v7 = vrot.slane %v9213_v6, 9 }
  0xaa   : > { %v628_v37 = vmax.f32 %v596_v62, 0.0  ;;  %7665 = vmatprep.mubr.bf16.mxu1 %v6768_v12  ;;  %v1422_v39 = vld [vmem:[#allocation2 + $0x6c] sm:$0xf]  ;;  %v1423_v49 = vld [vmem:[#allocation2 + $0x70] sm:$0xf]  ;;  %7889 = vmatprep.mubr.bf16.mxu0 %v6976_v59  ;;  %v559_v5 = vmul.f32 %v9080_v40, %v7285_v36  ;;  %v560_v56 = vmul.f32 %v9080_v40, %v7286_v28  ;;  %v4155_v23 = vrot.slane %v8485_v52, 5 }
  0xab   : > { %v7193_v16 = vpack.c.bf16 %v627_v57, %v627_v57  ;;  %717 = vst [vmem:[#allocation2 + $0x84] sm:$0x1] %v716_v53  ;;  %773 = vst [vmem:[#allocation2 + $0x8c] sm:$0x1] %v772_v25  ;;  %v1461_v26 = vld [vmem:[#allocation2 + $0x74] sm:$0x1] }
  0xac   : > { %v1688_v20 = vshrl.u32 %v1422_v39, 16  ;;  %v1691_v9 = vshll.u32 %v1422_v39, 16  ;;  %v1697_v21 = vshll.u32 %v1423_v49, 16  ;;  %v1701_v30 = vshrl.u32 %v1423_v49, 16  ;;  %v4078_v28 = vld [vmem:[#allocation2 + $0x30] sm:$0xe] }
  0xad   : > { %v1707_v33 = vshll.u32 %v1461_v26, 16  ;;  %v7194_v41 = vpack.c.bf16 %v628_v37, %v628_v37  ;;  %v1028_v29 = vshrl.u32 %v7193_v16, 16  ;;  %v1031_v44 = vshll.u32 %v7193_v16, 16  ;;  %v7397_v52 = vld [vmem:[%s8699_s9 + $0x58] sm:$0xff]  }
  0xae   : > { %v1690_v45 = vrot.slane %v1688_v20, 4  ;;  %v1693_v63 = vrot.slane %v1691_v9, 5  ;;  %v1699_v42 = vrot.slane %v1697_v21, 5  ;;  %v1703_v47 = vrot.slane %v1701_v30, 4  ;;  %v1260_v60 = vld [vmem:[#allocation2 + $0x78] sm:$0xf] }
  0xaf   : > { %v1709_v51 = vrot.slane %v1707_v33, 5  ;;  %v1030_v55 = vrot.slane %v1028_v29, 7  ;;  %v1036_v17 = vshrl.u32 %v7194_v41, 16  ;;  %v1039_v59 = vshll.u32 %v7194_v41, 16  ;;  %v1264_v38 = vld [vmem:[#allocation2 + $0x80] sm:$0x1] }
  0xb0   : > { %v1694_v35 = vor.u32 %v1693_v63, %v1690_v45  ;;  %v1704_v22 = vor.u32 %v1703_v47, %v1699_v42  ;;  %v597_v1 = vadd.f32 %v9088_v18, %v559_v5  ;;  %v598_v6 = vadd.f32 %v9088_v18, %v560_v56  ;;  %v8486_v5 = vld [vmem:[#allocation2 + $0x2c] sm:$0x1]  ;;  %v774_v21 = vld [vmem:[#allocation2 + $0x98] sm:$0x1] }
  0xb1   : > { %v1033_v31 = vor.u32 %v1031_v44, %v1030_v55  ;;  %v1034_v13 = vrot.slane %v1030_v55, 4  ;;  %v1038_v8 = vrot.slane %v1036_v17, 7  ;;  %v4156_v10 = vsel %vm9171_vm14, %v6946_v7, %v4155_v23  ;;  %7890 = vmatmul.mubr.bf16.vlgmr.msra.gmra.mrb[0].mxu0 %v6977_v58  ;;  %v718_v7 = vld [vmem:[#allocation2 + $0x90] sm:$0x1]  ;;  %v8397_v44 = vld [vmem:[%s10572_s5 + $0x198] sm:$0xff]  }
  0xb2   : > { %v1695_v46 = vrot.slane %v1694_v35, 4  ;;  %v1705_v50 = vrot.slane %v1704_v22, 4  ;;  %v629_v32 = vmax.f32 %v597_v1, 0.0  ;;  %v630_v48 = vmax.f32 %v598_v6, 0.0  ;;  %7922 = vmatpush3.bf16.msra.mxu0 %v9029_v4  ;;  %v8395_v4 = vld [vmem:[%s10572_s5 + $0x190] sm:$0xff]  }
  0xb3   : > { %v1041_v62 = vor.u32 %v1039_v59, %v1038_v8  ;;  %v1043_v12 = vrot.slane %v1038_v8, 4  ;;  %v1261_v57 = vsel %vm8754_vm6, %v1033_v31, %v1260_v60  ;;  %v4157_v36 = vrot.slane %v4155_v23, 4  ;;  %7923 = vmatprep.subr.bf16.mxu0 %v8393_v2  ;;  %v1271_v1 = vld [vmem:[#allocation2 + $0x8c] sm:$0x1] }
  0xb4   : > { %v1700_v37 = vsel %vm8810_vm11, %v1695_v46, %v1699_v42  ;;  %v1710_v53 = vsel %vm8810_vm11, %v1705_v50, %v1709_v51  ;;  %1262 = vst [vmem:[#allocation2 + $0x78] sm:$0xf] %v1261_v57  ;;  %v7195_v58 = vpack.c.bf16 %v629_v32, %v629_v32  ;;  %v7196_v25 = vpack.c.bf16 %v630_v48, %v630_v48  ;;  %v1267_v51 = vld [vmem:[#allocation2 + $0x84] sm:$0xf] }
  0xb5   : > { %v6769_v39 = vcombine.low %v1700_v37, %v1710_v53  ;;  %v1042_v49 = vsel %vm8787_vm10, %v1034_v13, %v1041_v62  ;;  %v1265_v16 = vsel %vm8703_vm3, %v1043_v12, %v1264_v38  ;;  %v4158_v56 = vrot.slane %v8486_v5, 5  ;;  %v7398_v32 = vld [vmem:[%s8699_s9 + $0x60] sm:$0xff]  }
  0xb6   : > { %1263 = vst [vmem:[#allocation2 + $0x7c] sm:$0xf] %v1042_v49  ;;  %1266 = vst [vmem:[#allocation2 + $0x80] sm:$0x1] %v1265_v16  ;;  %v1045_v23 = vshrl.u32 %v7195_v58, 16  ;;  %v1048_v26 = vshll.u32 %v7195_v58, 16  ;;  %7924 = vmatpush3.bf16.msra.mxu0 %v8393_v2  ;;  %v7289_v47 = vunpack.c.l.bf16 %v7397_v52  ;;  %v7290_v59 = vunpack.c.h.bf16 %v7397_v52 }
  0xb7   : > { %v1053_v20 = vshrl.u32 %v7196_v25, 16  ;;  %v1056_v9 = vshll.u32 %v7196_v25, 16  ;;  %7666 = vmatmul.mubr.bf16.gmra.mrb[16].mxu1 %v6769_v39  ;;  %v4159_v30 = vsel %vm9171_vm14, %v4157_v36, %v4158_v56  ;;  %v6947_v33 = vrot.slane %v4078_v28, 9  ;;  %7925 = vmatprep.subr.bf16.mxu0 %v8395_v4  ;;  %v8401_v37 = vld [vmem:[%s10572_s5 + $0x1a0] sm:$0xff]  }
  0xb8   : > { %v4162_v41 = vrot.slane %v9039_v34, 5  ;;  %v4165_v29 = vrot.slane %v9031_v24, 5  ;;  %v1047_v45 = vrot.slane %v1045_v23, 7  ;;  %v6978_v42 = vcombine.low %v4156_v10, %v4159_v30 }
  0xb9   : > { %v1055_v63 = vrot.slane %v1053_v20, 7  ;;  %v719_v34 = vsel %vm8703_vm3, 0, %v718_v7  ;;  %v561_v31 = vmul.f32 %v9080_v40, %v7289_v47  ;;  %v562_v13 = vmul.f32 %v9080_v40, %v7290_v59 }
  0xba   : > { %v4163_v55 = vsel %vm9171_vm14, %v6947_v33, %v4162_v41  ;;  %v4164_v17 = vrot.slane %v4162_v41, 4  ;;  %v1050_v24 = vor.u32 %v1048_v26, %v1047_v45  ;;  %v1051_v35 = vrot.slane %v1047_v45, 4  ;;  %7893 = vmatprep.mubr.bf16.mxu0 %v6978_v42  ;;  %720 = vst [vmem:[#allocation2 + $0x90] sm:$0x1] %v719_v34  ;;  %7926 = vmatpush3.bf16.msra.mxu0 %v8395_v4  ;;  %v721_v4 = vld [vmem:[#allocation2 + $0x9c] sm:$0x1] }
  0xbb   : > { %v1058_v22 = vor.u32 %v1056_v9, %v1055_v63  ;;  %v1060_v60 = vrot.slane %v1055_v63, 4  ;;  %v1424_v6 = vld [vmem:[#allocation2 + $0x78] sm:$0xf]  ;;  %v775_v8 = vsel %vm8714_vm4, 0, %v774_v21  ;;  %7927 = vmatprep.subr.bf16.mxu0 %v8397_v44  ;;  %v599_v36 = vadd.f32 %v9088_v18, %v561_v31  ;;  %v8405_v33 = vld [vmem:[%s10572_s5 + $0x1a8] sm:$0xff]  }
  0xbc   : > { %v4166_v2 = vsel %vm9171_vm14, %v4164_v17, %v4165_v29  ;;  %v1712_v10 = vshrl.u32 %v1424_v6, 16  ;;  %v1715_v46 = vshll.u32 %v1424_v6, 16  ;;  %v1268_v38 = vsel %vm8754_vm6, %v1050_v24, %v1267_v51  ;;  %776 = vst [vmem:[#allocation2 + $0x98] sm:$0x1] %v775_v8 }
  0xbd   : > { %v1059_v50 = vsel %vm8787_vm10, %v1051_v35, %v1058_v22  ;;  %v1425_v48 = vld [vmem:[#allocation2 + $0x7c] sm:$0xf]  ;;  %v1462_v62 = vld [vmem:[#allocation2 + $0x80] sm:$0x1]  ;;  %1269 = vst [vmem:[#allocation2 + $0x84] sm:$0xf] %v1268_v38  ;;  %v1272_v12 = vsel %vm8703_vm3, %v1060_v60, %v1271_v1  ;;  %v6979_v57 = vcombine.low %v4163_v55, %v4166_v2  ;;  %v600_v28 = vadd.f32 %v9088_v18, %v562_v13 }
  0xbe   : > { %1270 = vst [vmem:[#allocation2 + $0x88] sm:$0xf] %v1059_v50  ;;  %v1714_v53 = vrot.slane %v1712_v10, 4  ;;  %v1717_v58 = vrot.slane %v1715_v46, 5  ;;  %v1721_v25 = vshll.u32 %v1425_v48, 16  ;;  %v1725_v7 = vshrl.u32 %v1425_v48, 16  ;;  %7928 = vmatpush3.bf16.msra.mxu0 %v8397_v44 }
  0xbf   : > { %1273 = vst [vmem:[#allocation2 + $0x8c] sm:$0x1] %v1272_v12  ;;  %v1731_v39 = vshll.u32 %v1462_v62, 16  ;;  %7894 = vmatmul.mubr.bf16.gmra.mrb[4].mxu0 %v6979_v57  ;;  %v631_v49 = vmax.f32 %v599_v36, 0.0  ;;  %v632_v16 = vmax.f32 %v600_v28, 0.0  ;;  %v7293_v5 = vunpack.c.l.bf16 %v7398_v32  ;;  %7929 = vmatprep.subr.bf16.mxu0 %v8401_v37 }
  0xc0   : > { %v1718_v56 = vor.u32 %v1717_v58, %v1714_v53  ;;  %v1723_v52 = vrot.slane %v1721_v25, 5  ;;  %v1727_v23 = vrot.slane %v1725_v7, 4  ;;  %v7294_v26 = vunpack.c.h.bf16 %v7398_v32  ;;  %v4079_v7 = vld [vmem:[#allocation2 + $0x3c] sm:$0xe] }
  0xc1   : > { %v1733_v20 = vrot.slane %v1731_v39, 5  ;;  %v7197_v9 = vpack.c.bf16 %v631_v49, %v631_v49  ;;  %v7198_v21 = vpack.c.bf16 %v632_v16, %v632_v16  ;;  %v563_v30 = vmul.f32 %v9080_v40, %v7293_v5  ;;  %v1274_v48 = vld [vmem:[#allocation2 + $0x90] sm:$0xf] }
  0xc2   : > { %v1719_v41 = vrot.slane %v1718_v56, 4  ;;  %v1728_v29 = vor.u32 %v1727_v23, %v1723_v52  ;;  %v564_v45 = vmul.f32 %v9080_v40, %v7294_v26  ;;  %v722_v63 = vsel %vm8703_vm3, 0, %v721_v4  ;;  %7930 = vmatpush3.bf16.msra.mxu0 %v8401_v37  ;;  %v8409_v40 = vld [vmem:[%s10572_s5 + $0x1b0] sm:$0xff]   ;;  %v8413_v4 = vld [vmem:[%s10572_s5 + $0x1b8] sm:$0xff]  }
  0xc3   : > { %v1062_v42 = vshrl.u32 %v7197_v9, 16  ;;  %v1065_v47 = vshll.u32 %v7197_v9, 16  ;;  %v1070_v44 = vshrl.u32 %v7198_v21, 16  ;;  %v1073_v51 = vshll.u32 %v7198_v21, 16  ;;  %723 = vst [vmem:[#allocation2 + $0x9c] sm:$0x1] %v722_v63  ;;  %7931 = vmatprep.subr.bf16.mxu0 %v8405_v33 }
  0xc4   : > { %v1724_v55 = vsel %vm8810_vm11, %v1719_v41, %v1723_v52  ;;  %v1729_v17 = vrot.slane %v1728_v29, 4  ;;  %v1426_v59 = vld [vmem:[#allocation2 + $0x84] sm:$0xf]  ;;  %v601_v24 = vadd.f32 %v9088_v18, %v563_v30  ;;  %v602_v35 = vadd.f32 %v9088_v18, %v564_v45  ;;  %v1278_v28 = vld [vmem:[#allocation2 + $0x98] sm:$0x1] }
  0xc5   : > { %v9300_v34 = vld [vmem:[#allocation2 + $0x88] sm:$0xf]  ;;  %v1736_v60 = vshrl.u32 %v1426_v59, 16  ;;  %v1739_v1 = vshll.u32 %v1426_v59, 16  ;;  %v1064_v8 = vrot.slane %v1062_v42, 7  ;;  %v1072_v10 = vrot.slane %v1070_v44, 7 }
  0xc6   : > { %v1463_v22 = vld [vmem:[#allocation2 + $0x8c] sm:$0x1]  ;;  %v1745_v6 = vshll.u32 %v9300_v34, 16  ;;  %v1749_v2 = vshrl.u32 %v9300_v34, 16  ;;  %v1734_v31 = vsel %vm8810_vm11, %v1729_v17, %v1733_v20  ;;  %v777_v18 = vld [vmem:[#allocation2 + $0xa4] sm:$0x1]  ;;  %7932 = vmatpush3.bf16.msra.mxu0 %v8405_v33 }
  0xc7   : > { %v1755_v13 = vshll.u32 %v1463_v22, 16  ;;  %v6770_v46 = vcombine.low %v1724_v55, %v1734_v31  ;;  %v1738_v50 = vrot.slane %v1736_v60, 4  ;;  %v1741_v38 = vrot.slane %v1739_v1, 5  ;;  %7933 = vmatprep.subr.bf16.mxu0 %v8409_v40  ;;  %v4080_v20 = vld [vmem:[#allocation2 + $0x48] sm:$0xe] }
  0xc8   : > { %v1747_v32 = vrot.slane %v1745_v6, 5  ;;  %v1751_v62 = vrot.slane %v1749_v2, 4  ;;  %v1067_v57 = vor.u32 %v1065_v47, %v1064_v8  ;;  %v1068_v36 = vrot.slane %v1064_v8, 4  ;;  %v8487_v33 = vld [vmem:[#allocation2 + $0x40] sm:$0xf]  ;;  %v7399_v44 = vld [vmem:[%s8699_s9 + $0x68] sm:$0xff]  }
  0xc9   : > { %v1757_v12 = vrot.slane %v1755_v13, 5  ;;  %7669 = vmatprep.mubr.bf16.mxu1 %v6770_v46  ;;  %v1742_v37 = vor.u32 %v1741_v38, %v1738_v50  ;;  %v1075_v53 = vor.u32 %v1073_v51, %v1072_v10  ;;  %v1077_v58 = vrot.slane %v1072_v10, 4  ;;  %v8488_v42 = vld [vmem:[#allocation2 + $0x44] sm:$0x1] }
  0xca   : > { %v633_v25 = vmax.f32 %v601_v24, 0.0  ;;  %v1752_v39 = vor.u32 %v1751_v62, %v1747_v32  ;;  %v1275_v49 = vsel %vm8754_vm6, %v1067_v57, %v1274_v48  ;;  %v634_v16 = vmax.f32 %v602_v35, 0.0  ;;  %7934 = vmatpush3.bf16.msra.mxu0 %v8409_v40  ;;  %v9328_v51 = vld [vmem:[%s10572_s5 + $0x1c0] sm:$0xff]   ;;  %v1281_v6 = vld [vmem:[#allocation2 + $0x9c] sm:$0xf] }
  0xcb   : > { %v778_v5 = vsel %vm8714_vm4, 0, %v777_v18  ;;  %v1743_v56 = vrot.slane %v1742_v37, 4  ;;  %v1076_v52 = vsel %vm8787_vm10, %v1068_v36, %v1075_v53  ;;  %1276 = vst [vmem:[#allocation2 + $0x90] sm:$0xf] %v1275_v49  ;;  %v1279_v23 = vsel %vm8703_vm3, %v1077_v58, %v1278_v28  ;;  %7935 = vmatprep.subr.bf16.mxu0 %v8413_v4  ;;  %v9352_v53 = vld [vmem:[%s10570_s3] ss:$0 sm:$0xff] }
  0xcc   : > { %779 = vst [vmem:[#allocation2 + $0xa4] sm:$0x1] %v778_v5  ;;  %v7199_v26 = vpack.c.bf16 %v633_v25, %v633_v25  ;;  %v1753_v9 = vrot.slane %v1752_v39, 4  ;;  %1277 = vst [vmem:[#allocation2 + $0x94] sm:$0xf] %v1076_v52  ;;  %v7200_v21 = vpack.c.bf16 %v634_v16, %v634_v16  ;;  %v6948_v30 = vrot.slane %v4079_v7, 9 }
  0xcd   : > { %1280 = vst [vmem:[#allocation2 + $0x98] sm:$0x1] %v1279_v23  ;;  %v4169_v41 = vrot.slane %v8487_v33, 5  ;;  %v1748_v29 = vsel %vm8810_vm11, %v1743_v56, %v1747_v32  ;;  %v4172_v47 = vrot.slane %v8488_v42, 5  ;;  %v6949_v60 = vrot.slane %v4080_v20, 9 }
  0xce   : > { %v1079_v45 = vshrl.u32 %v7199_v26, 16  ;;  %v1082_v63 = vshll.u32 %v7199_v26, 16  ;;  %v1758_v55 = vsel %vm8810_vm11, %v1753_v9, %v1757_v12  ;;  %v1087_v17 = vshrl.u32 %v7200_v21, 16  ;;  %7936 = vmatpush3.bf16.msra.mxu0 %v8413_v4  ;;  %v780_v49 = vld [vmem:[#allocation2 + $0xb0] sm:$0x1] }
  0xcf   : > { %v1090_v59 = vshll.u32 %v7200_v21, 16  ;;  %v4170_v24 = vsel %vm9171_vm14, %v6948_v30, %v4169_v41  ;;  %v6771_v35 = vcombine.low %v1748_v29, %v1758_v55  ;;  %v4171_v22 = vrot.slane %v4169_v41, 4  ;;  %7969 = vmatprep.subr.bf16.mxu0 %v9328_v51  ;;  %v727_v23 = vld [vmem:[#allocation2 + $0xb4] sm:$0x1]  ;;  %v783_v33 = vld [vmem:[#allocation2 + $0xbc] sm:$0x1] }
  0xd0   : > { %v1081_v40 = vrot.slane %v1079_v45, 7  ;;  %v1089_v1 = vrot.slane %v1087_v17, 7  ;;  %v4176_v2 = vrot.slane %v9117_v27, 5  ;;  %v4179_v31 = vrot.slane %v9119_v3, 5  ;;  %v724_v3 = vld [vmem:[#allocation2 + $0xa8] sm:$0x1] }
  0xd1   : > { %v7297_v13 = vunpack.c.l.bf16 %v7399_v44  ;;  %7670 = vmatmul.mubr.bf16.gmra.mrb[20].mxu1 %v6771_v35  ;;  %v4173_v18 = vsel %vm9171_vm14, %v4171_v22, %v4172_v47  ;;  %v7298_v46 = vunpack.c.h.bf16 %v7399_v44  ;;  %v7400_v30 = vld [vmem:[%s8699_s9 + $0x70] sm:$0xff]   ;;  %v9368_v45 = vld [vmem:[%s10571_s4] ss:$0 sm:$0xff]  ;;  %v725_v42 = vsel %vm8703_vm3, 0, %v724_v3 }
  0xd2   : > { %v1084_v8 = vor.u32 %v1082_v63, %v1081_v40  ;;  %v1085_v10 = vrot.slane %v1081_v40, 4  ;;  %v9339_v50 = vld [vmem:[#allocation2 + $0x90] sm:$0xf]  ;;  %v1092_v38 = vor.u32 %v1090_v59, %v1089_v1  ;;  %v1094_v32 = vrot.slane %v1089_v1, 4  ;;  %726 = vst [vmem:[#allocation2 + $0xa8] sm:$0x1] %v725_v42 }
  0xd3   : > { %v1285_v48 = vld [vmem:[#allocation2 + $0xa4] sm:$0x1]  ;;  %v6980_v62 = vcombine.low %v4170_v24, %v4173_v18  ;;  %v4177_v27 = vsel %vm9171_vm14, %v6949_v60, %v4176_v2  ;;  %v9343_v12 = vld [vmem:[#allocation2 + $0x94] sm:$0xf]  ;;  %v1760_v36 = vshrl.u32 %v9339_v50, 16  ;;  %v1763_v28 = vshll.u32 %v9339_v50, 16 }
  0xd4   : > { %v1464_v57 = vld [vmem:[#allocation2 + $0x98] sm:$0x1]  ;;  %v1282_v37 = vsel %vm8754_vm6, %v1084_v8, %v1281_v6  ;;  %v565_v58 = vmul.f32 %v9352_v53, %v7297_v13  ;;  %v1769_v25 = vshll.u32 %v9343_v12, 16  ;;  %v1773_v7 = vshrl.u32 %v9343_v12, 16 }
  0xd5   : > { %v1779_v4 = vshll.u32 %v1464_v57, 16  ;;  %v1093_v39 = vsel %vm8787_vm10, %v1085_v10, %v1092_v38  ;;  %1283 = vst [vmem:[#allocation2 + $0x9c] sm:$0xf] %v1282_v37  ;;  %7897 = vmatprep.mubr.bf16.mxu0 %v6980_v62  ;;  %v1762_v16 = vrot.slane %v1760_v36, 4  ;;  %v1765_v5 = vrot.slane %v1763_v28, 5 }
  0xd6   : > { %1284 = vst [vmem:[#allocation2 + $0xa0] sm:$0xf] %v1093_v39  ;;  %v1286_v56 = vsel %vm8703_vm3, %v1094_v32, %v1285_v48  ;;  %v4178_v52 = vrot.slane %v4176_v2, 4  ;;  %v1771_v26 = vrot.slane %v1769_v25, 5  ;;  %v1775_v20 = vrot.slane %v1773_v7, 4 }
  0xd7   : > { %v1781_v9 = vrot.slane %v1779_v4, 5  ;;  %1287 = vst [vmem:[#allocation2 + $0xa4] sm:$0x1] %v1286_v56  ;;  %v566_v21 = vmul.f32 %v9352_v53, %v7298_v46  ;;  %v1766_v41 = vor.u32 %v1765_v5, %v1762_v16  ;;  %v603_v63 = vadd.f32 %v9368_v45, %v565_v58 }
  0xd8   : > { %v4180_v29 = vsel %vm9171_vm14, %v4178_v52, %v4179_v31  ;;  %v1776_v47 = vor.u32 %v1775_v20, %v1771_v26  ;;  %v781_v17 = vsel %vm8714_vm4, 0, %v780_v49  ;;  %v7301_v35 = vunpack.c.l.bf16 %v7400_v30 }
  0xd9   : > { %v6981_v44 = vcombine.low %v4177_v27, %v4180_v29  ;;  %v604_v55 = vadd.f32 %v9368_v45, %v566_v21  ;;  %v1767_v59 = vrot.slane %v1766_v41, 4  ;;  %v635_v24 = vmax.f32 %v603_v63, 0.0  ;;  %782 = vst [vmem:[#allocation2 + $0xb0] sm:$0x1] %v781_v17  ;;  %v1288_v52 = vld [vmem:[#allocation2 + $0xa8] sm:$0xf] }
  0xda   : > { %v7302_v40 = vunpack.c.h.bf16 %v7400_v30  ;;  %v1777_v22 = vrot.slane %v1776_v47, 4  ;;  %v728_v1 = vsel %vm8703_vm3, 0, %v727_v23  ;;  %v784_v6 = vsel %vm8714_vm4, 0, %v783_v33  ;;  %v4081_v30 = vld [vmem:[#allocation2 + $0x54] sm:$0xe] }
  0xdb   : > { %7898 = vmatmul.mubr.bf16.gmra.mrb[8].mxu0 %v6981_v44  ;;  %v636_v60 = vmax.f32 %v604_v55, 0.0  ;;  %v1772_v2 = vsel %vm8810_vm11, %v1767_v59, %v1771_v26  ;;  %v7201_v13 = vpack.c.bf16 %v635_v24, %v635_v24  ;;  %v567_v8 = vmul.f32 %v9352_v53, %v7301_v35  ;;  %729 = vst [vmem:[#allocation2 + $0xb4] sm:$0x1] %v728_v1 }
  0xdc   : > { %v9382_v31 = vld [vmem:[#allocation2 + $0x9c] sm:$0xf]  ;;  %v568_v10 = vmul.f32 %v9352_v53, %v7302_v40  ;;  %785 = vst [vmem:[#allocation2 + $0xbc] sm:$0x1] %v784_v6  ;;  %v1782_v18 = vsel %vm8810_vm11, %v1777_v22, %v1781_v9  ;;  %v6950_v35 = vrot.slane %v4081_v30, 9 }
  0xdd   : > { %v9388_v46 = vld [vmem:[#allocation2 + $0xa0] sm:$0xf]  ;;  %v1784_v38 = vshrl.u32 %v9382_v31, 16  ;;  %v1787_v32 = vshll.u32 %v9382_v31, 16  ;;  %v7202_v48 = vpack.c.bf16 %v636_v60, %v636_v60  ;;  %v6772_v62 = vcombine.low %v1772_v2, %v1782_v18  ;;  %v8491_v6 = vld [vmem:[#allocation2 + $0x58] sm:$0xf] }
  0xde   : > { %v1465_v27 = vld [vmem:[#allocation2 + $0xa4] sm:$0x1]  ;;  %v1793_v3 = vshll.u32 %v9388_v46, 16  ;;  %v1797_v57 = vshrl.u32 %v9388_v46, 16  ;;  %v1096_v36 = vshrl.u32 %v7201_v13, 16  ;;  %v1099_v25 = vshll.u32 %v7201_v13, 16 }
  0xdf   : > { %v1786_v28 = vrot.slane %v1784_v38, 4  ;;  %v1789_v37 = vrot.slane %v1787_v32, 5  ;;  %v1803_v58 = vshll.u32 %v1465_v27, 16  ;;  %7673 = vmatprep.mubr.bf16.mxu1 %v6772_v62  ;;  %v1104_v49 = vshrl.u32 %v7202_v48, 16  ;;  %v4082_v40 = vld [vmem:[#allocation2 + $0x60] sm:$0xe] }
  0xe0   : > { %v1795_v7 = vrot.slane %v1793_v3, 5  ;;  %v1799_v4 = vrot.slane %v1797_v57, 4  ;;  %v1098_v39 = vrot.slane %v1096_v36, 7  ;;  %v1107_v56 = vshll.u32 %v7202_v48, 16  ;;  %v1292_v41 = vld [vmem:[#allocation2 + $0xb0] sm:$0x1] }
  0xe1   : > { %v1790_v16 = vor.u32 %v1789_v37, %v1786_v28  ;;  %v1805_v5 = vrot.slane %v1803_v58, 5  ;;  %v605_v23 = vadd.f32 %v9368_v45, %v567_v8  ;;  %v1106_v21 = vrot.slane %v1104_v49, 7  ;;  %v4083_v38 = vld [vmem:[#allocation2 + $0x6c] sm:$0xe]  ;;  %v8492_v62 = vld [vmem:[#allocation2 + $0x5c] sm:$0x1] }
  0xe2   : > { %v1800_v26 = vor.u32 %v1799_v4, %v1795_v7  ;;  %v1101_v20 = vor.u32 %v1099_v25, %v1098_v39  ;;  %v1102_v9 = vrot.slane %v1098_v39, 4  ;;  %v606_v29 = vadd.f32 %v9368_v45, %v568_v10  ;;  %v3346_v57 = vld [vmem:[#allocation2 + $0x70] sm:$0xf]  ;;  %v3347_v25 = vld [vmem:[#allocation2 + $0x74] sm:$0x1] }
  0xe3   : > { %v1791_v33 = vrot.slane %v1790_v16, 4  ;;  %v637_v63 = vmax.f32 %v605_v23, 0.0  ;;  %v1109_v47 = vor.u32 %v1107_v56, %v1106_v21  ;;  %v1111_v44 = vrot.slane %v1106_v21, 4  ;;  %v1295_v56 = vld [vmem:[#allocation2 + $0xb4] sm:$0xf] }
  0xe4   : > { %v1801_v42 = vrot.slane %v1800_v26, 4  ;;  %v1289_v55 = vsel %vm8754_vm6, %v1101_v20, %v1288_v52  ;;  %v638_v59 = vmax.f32 %v606_v29, 0.0  ;;  %v4183_v2 = vrot.slane %v8491_v6, 5 }
  0xe5   : > { %v1796_v17 = vsel %vm8810_vm11, %v1791_v33, %v1795_v7  ;;  %1290 = vst [vmem:[#allocation2 + $0xa8] sm:$0xf] %v1289_v55  ;;  %v7203_v24 = vpack.c.bf16 %v637_v63, %v637_v63  ;;  %v1110_v60 = vsel %vm8787_vm10, %v1102_v9, %v1109_v47  ;;  %v1293_v1 = vsel %vm8703_vm3, %v1111_v44, %v1292_v41  ;;  %v1299_v41 = vld [vmem:[#allocation2 + $0xbc] sm:$0x1] }
  0xe6   : > { %v1806_v22 = vsel %vm8810_vm11, %v1801_v42, %v1805_v5  ;;  %1291 = vst [vmem:[#allocation2 + $0xac] sm:$0xf] %v1110_v60  ;;  %1294 = vst [vmem:[#allocation2 + $0xb0] sm:$0x1] %v1293_v1  ;;  %v7204_v8 = vpack.c.bf16 %v638_v59, %v638_v59  ;;  %v4184_v32 = vsel %vm9171_vm14, %v6950_v35, %v4183_v2  ;;  %v4185_v48 = vrot.slane %v4183_v2, 4 }
  0xe7   : > { %v6773_v13 = vcombine.low %v1796_v17, %v1806_v22  ;;  %v1113_v10 = vshrl.u32 %v7203_v24, 16  ;;  %v1116_v18 = vshll.u32 %v7203_v24, 16  ;;  %v4186_v27 = vrot.slane %v8492_v62, 5  ;;  %v9432_v2 = vld [vmem:[#allocation2 + $0x7c] sm:$0xf] }
  0xe8   : > { %v6951_v3 = vrot.slane %v4082_v40, 9  ;;  %v1121_v28 = vshrl.u32 %v7204_v8, 16  ;;  %v1124_v37 = vshll.u32 %v7204_v8, 16  ;;  %v4190_v58 = vrot.slane %v9187_v11, 5  ;;  %v4084_v40 = vld [vmem:[#allocation2 + $0x78] sm:$0xe] }
  0xe9   : > { %7674 = vmatmul.mubr.bf16.gmra.mrb[24].mxu1 %v6773_v13  ;;  %v1115_v36 = vrot.slane %v1113_v10, 7  ;;  %v4187_v7 = vsel %vm9171_vm14, %v4185_v48, %v4186_v27  ;;  %v4193_v4 = vrot.slane %v9189_v61, 5  ;;  %v6952_v39 = vrot.slane %v4083_v38, 9  ;;  %v9436_v38 = vld [vmem:[#allocation2 + $0x80] sm:$0x1] }
  0xea   : > { %v1123_v5 = vrot.slane %v1121_v28, 7  ;;  %v6982_v52 = vcombine.low %v4184_v32, %v4187_v7  ;;  %v4191_v26 = vsel %vm9171_vm14, %v6951_v3, %v4190_v58  ;;  %v4192_v20 = vrot.slane %v4190_v58, 4  ;;  %v4085_v28 = vld [vmem:[#allocation2 + $0x84] sm:$0xe] }
  0xeb   : > { %v1118_v49 = vor.u32 %v1116_v18, %v1115_v36  ;;  %v1119_v16 = vrot.slane %v1115_v36, 4  ;;  %v4197_v9 = vrot.slane %v3346_v57, 5  ;;  %v4200_v11 = vrot.slane %v3347_v25, 5  ;;  %v3352_v25 = vld [vmem:[#allocation2 + $0x88] sm:$0xf] }
  0xec   : > { %v9412_v23 = vld [vmem:[#allocation2 + $0xa8] sm:$0xf]  ;;  %v1126_v33 = vor.u32 %v1124_v37, %v1123_v5  ;;  %v1128_v61 = vrot.slane %v1123_v5, 4  ;;  %7901 = vmatprep.mubr.bf16.mxu0 %v6982_v52  ;;  %v4194_v47 = vsel %vm9171_vm14, %v4192_v20, %v4193_v4  ;;  %v6953_v3 = vrot.slane %v4084_v40, 9  ;;  %v3356_v20 = vld [vmem:[#allocation2 + $0x98] sm:$0x1] }
  0xed   : > { %v1808_v21 = vshrl.u32 %v9412_v23, 16  ;;  %v1811_v30 = vshll.u32 %v9412_v23, 16  ;;  %v9418_v29 = vld [vmem:[#allocation2 + $0xac] sm:$0xf]  ;;  %v1466_v63 = vld [vmem:[#allocation2 + $0xb0] sm:$0x1]  ;;  %v1296_v42 = vsel %vm8754_vm6, %v1118_v49, %v1295_v56  ;;  %v4198_v44 = vsel %vm9171_vm14, %v6952_v39, %v4197_v9 }
  0xee   : > { %v4199_v55 = vrot.slane %v4197_v9, 4  ;;  %v1817_v24 = vshll.u32 %v9418_v29, 16  ;;  %v1821_v35 = vshrl.u32 %v9418_v29, 16  ;;  %1297 = vst [vmem:[#allocation2 + $0xb4] sm:$0xf] %v1296_v42  ;;  %v1827_v22 = vshll.u32 %v1466_v63, 16 }
  0xef   : > { %v1810_v17 = vrot.slane %v1808_v21, 4  ;;  %v1813_v59 = vrot.slane %v1811_v30, 5  ;;  %v1127_v60 = vsel %vm8787_vm10, %v1119_v16, %v1126_v33  ;;  %v1300_v1 = vsel %vm8703_vm3, %v1128_v61, %v1299_v41  ;;  %v3353_v49 = vld [vmem:[#allocation2 + $0x8c] sm:$0x1] }
  0xf0   : > { %v6983_v6 = vcombine.low %v4191_v26, %v4194_v47  ;;  %v1819_v8 = vrot.slane %v1817_v24, 5  ;;  %v1823_v10 = vrot.slane %v1821_v35, 4  ;;  %1298 = vst [vmem:[#allocation2 + $0xb8] sm:$0xf] %v1127_v60  ;;  %1301 = vst [vmem:[#allocation2 + $0xbc] sm:$0x1] %v1300_v1  ;;  %v4201_v18 = vsel %vm9171_vm14, %v4199_v55, %v4200_v11 }
  0xf1   : > { %v1814_v13 = vor.u32 %v1813_v59, %v1810_v17  ;;  %v6984_v32 = vcombine.low %v4198_v44, %v4201_v18  ;;  %v1829_v27 = vrot.slane %v1827_v22, 5  ;;  %v4204_v57 = vrot.slane %v9432_v2, 5  ;;  %v3355_v26 = vld [vmem:[#allocation2 + $0x94] sm:$0xf]  ;;  %v4086_v47 = vld [vmem:[#allocation2 + $0x90] sm:$0xe] }
  0xf2   : > { %7902 = vmatmul.mubr.bf16.gmra.mrb[12].mxu0 %v6983_v6  ;;  %v1824_v62 = vor.u32 %v1823_v10, %v1819_v8  ;;  %v4207_v36 = vrot.slane %v9436_v38, 5  ;;  %v6954_v52 = vrot.slane %v4085_v28, 9  ;;  %v4211_v33 = vrot.slane %v3352_v25, 5  ;;  %v4087_v24 = vld [vmem:[#allocation2 + $0x9c] sm:$0xe] }
  0xf3   : > { %v1815_v48 = vrot.slane %v1814_v13, 4  ;;  %7905 = vmatprep.mubr.bf16.mxu0 %v6984_v32  ;;  %v4205_v4 = vsel %vm9171_vm14, %v6953_v3, %v4204_v57  ;;  %v4206_v39 = vrot.slane %v4204_v57, 4  ;;  %v4214_v60 = vrot.slane %v3353_v49, 5  ;;  %v3358_v1 = vld [vmem:[#allocation2 + $0xa0] sm:$0xf] }
  0xf4   : > { %v1825_v58 = vrot.slane %v1824_v62, 4  ;;  %v4212_v17 = vsel %vm9171_vm14, %v6954_v52, %v4211_v33  ;;  %v4213_v59 = vrot.slane %v4211_v33, 4  ;;  %v6955_v6 = vrot.slane %v4086_v47, 9  ;;  %v3359_v10 = vld [vmem:[#allocation2 + $0xa4] sm:$0x1] }
  0xf5   : > { %v1820_v37 = vsel %vm8810_vm11, %v1815_v48, %v1819_v8  ;;  %v9442_v7 = vld [vmem:[#allocation2 + $0xb4] sm:$0xf]  ;;  %v4208_v30 = vsel %vm9171_vm14, %v4206_v39, %v4207_v36  ;;  %v4218_v13 = vrot.slane %v3355_v26, 5  ;;  %v4221_v8 = vrot.slane %v3356_v20, 5  ;;  %v4088_v3 = vld [vmem:[#allocation2 + $0xa8] sm:$0xe] }
  0xf6   : > { %v1830_v16 = vsel %vm8810_vm11, %v1825_v58, %v1829_v27  ;;  %v1832_v5 = vshrl.u32 %v9442_v7, 16  ;;  %v1835_v56 = vshll.u32 %v9442_v7, 16  ;;  %v6985_v55 = vcombine.low %v4205_v4, %v4208_v30  ;;  %v3361_v27 = vld [vmem:[#allocation2 + $0xac] sm:$0xf]  ;;  %v9460_v57 = vld [vmem:[#allocation2 + $0x4] sm:$0xf] }
  0xf7   : > { %v6774_v9 = vcombine.low %v1820_v37, %v1830_v16  ;;  %v9450_v11 = vld [vmem:[#allocation2 + $0xb8] sm:$0xf]  ;;  %v1467_v21 = vld [vmem:[#allocation2 + $0xbc] sm:$0x1]  ;;  %v4215_v62 = vsel %vm9171_vm14, %v4213_v59, %v4214_v60  ;;  %v8494_v36 = vld [vmem:[#allocation2] sm:$0xf]  ;;  %v4219_v58 = vsel %vm9171_vm14, %v6955_v6, %v4218_v13 }
  0xf8   : > { %v1834_v61 = vrot.slane %v1832_v5, 4  ;;  %v1837_v41 = vrot.slane %v1835_v56, 5  ;;  %v1841_v63 = vshll.u32 %v9450_v11, 16  ;;  %v1845_v42 = vshrl.u32 %v9450_v11, 16  ;;  %v3362_v5 = vld [vmem:[#allocation2 + $0xb0] sm:$0x1] }
  0xf9   : > { %7677 = vmatprep.mubr.bf16.mxu1 %v6774_v9  ;;  %v1851_v44 = vshll.u32 %v1467_v21, 16  ;;  %v6784_v28 = vcombine.low %v8494_v36, %v9460_v57  ;;  %v6986_v37 = vcombine.low %v4212_v17, %v4215_v62  ;;  %v4220_v25 = vrot.slane %v4218_v13, 4  ;;  %v4089_v9 = vld [vmem:[#allocation2 + $0xb4] sm:$0xe]  ;;  %v730_v17 = vld [vmem:[#allocation2 + $0xc0] sm:$0x1] }
  0xfa   : > { %v1838_v35 = vor.u32 %v1837_v41, %v1834_v61  ;;  %v1843_v40 = vrot.slane %v1841_v63, 5  ;;  %v1847_v22 = vrot.slane %v1845_v42, 4  ;;  %7906 = vmatmul.mubr.bf16.gmra.mrb[16].mxu0 %v6985_v55  ;;  %v6956_v49 = vrot.slane %v4087_v24, 9  ;;  %v3364_v41 = vld [vmem:[#allocation2 + $0xb8] sm:$0xf] }
  0xfb   : > { %v1853_v48 = vrot.slane %v1851_v44, 5  ;;  %v4225_v16 = vrot.slane %v3358_v1, 5  ;;  %7909 = vmatprep.mubr.bf16.mxu0 %v6986_v37  ;;  %v4222_v56 = vsel %vm9171_vm14, %v4220_v25, %v4221_v8  ;;  %v4228_v52 = vrot.slane %v3359_v10, 5  ;;  %v3365_v63 = vld [vmem:[#allocation2 + $0xbc] sm:$0x1] }
  0xfc   : > { %v1839_v18 = vrot.slane %v1838_v35, 4  ;;  %v1848_v32 = vor.u32 %v1847_v22, %v1843_v40  ;;  %v6957_v26 = vrot.slane %v4088_v3, 9  ;;  %v4232_v20 = vrot.slane %v3361_v27, 5  ;;  %v7401_v55 = vld [vmem:[%s8699_s9 + $0x78] sm:$0xff]   ;;  %v786_v35 = vld [vmem:[#allocation2 + $0xc8] sm:$0x1]  ;;  %s10531_s9 = scalar_lea.vmem %s10573_s6, %s7170_s21 }
  0xfd   : > { %v6987_v30 = vcombine.low %v4219_v58, %v4222_v56  ;;  %v4226_v33 = vsel %vm9171_vm14, %v6956_v49, %v4225_v16  ;;  %v4227_v61 = vrot.slane %v4225_v16, 4  ;;  %v4235_v44 = vrot.slane %v3362_v5, 5  ;;  %v8495_v3 = vld [vmem:[#allocation2 + $0xc] sm:$0xf]  ;;  %v9488_v36 = vld [vmem:[#allocation2 + $0x10] sm:$0xf] }
  0xfe   : > { %v1844_v4 = vsel %vm8810_vm11, %v1839_v18, %v1843_v40  ;;  %v1849_v39 = vrot.slane %v1848_v32, 4  ;;  %v4234_v47 = vrot.slane %v4232_v20, 4  ;;  %v6958_v24 = vrot.slane %v4089_v9, 9  ;;  %v8497_v25 = vld [vmem:[#allocation2 + $0x18] sm:$0xf]  ;;  %s6705_s21 = sshll.u32 %s10672_s24, 1 }
  0xff   : > { %v4229_v59 = vsel %vm9171_vm14, %v4227_v61, %v4228_v52  ;;  %v4233_v22 = vsel %vm9171_vm14, %v6957_v26, %v4232_v20  ;;  %v4239_v60 = vrot.slane %v3364_v41, 5  ;;  %v4242_v1 = vrot.slane %v3365_v63, 5  ;;  %v8499_v26 = vld [vmem:[%s10572_s5 + $0x80] sm:$0xff]   ;;  %v9507_v63 = vld [vmem:[#allocation2 + $0x28] sm:$0xf]  ;;  %s465_s30 = scalar_lea.vmem %s10574_s7, %s6705_s21 }
 0x100   : > { %v1854_v21 = vsel %vm8810_vm11, %v1849_v39, %v1853_v48  ;;  %v6988_v40 = vcombine.low %v4226_v33, %v4229_v59  ;;  %v4236_v6 = vsel %vm9171_vm14, %v4234_v47, %v4235_v44  ;;  %v7305_v13 = vunpack.c.l.bf16 %v7401_v55  ;;  %v8500_v41 = vld [vmem:[#allocation2 + $0x24] sm:$0xf]  ;;  %v8502_v47 = vld [vmem:[#allocation2 + $0x30] sm:$0xf]  ;;  %v9510_v44 = vld [vmem:[#allocation2 + $0x34] sm:$0xf] }
 0x101   : > { %v6775_v42 = vcombine.low %v1844_v4, %v1854_v21  ;;  %v7306_v8 = vunpack.c.h.bf16 %v7401_v55  ;;  %v731_v10 = vsel %vm8703_vm3, 0, %v730_v17  ;;  %v4241_v18 = vrot.slane %v4239_v60, 4  ;;  %v9493_v4 = vld [vmem:[#allocation2 + $0x1c] sm:$0xf] }
 0x102   : > { %7910 = vmatmul.mubr.bf16.gmra.mrb[20].mxu0 %v6987_v30  ;;  %732 = vst [vmem:[#allocation2 + $0xc0] sm:$0x1] %v731_v10  ;;  %v787_v32 = vsel %vm8714_vm4, 0, %v786_v35  ;;  %v4240_v48 = vsel %vm9171_vm14, %v6958_v24, %v4239_v60  ;;  %v569_v62 = vmul.f32 %v9352_v53, %v7305_v13  ;;  %v6989_v37 = vcombine.low %v4233_v22, %v4236_v6  ;;  %v8412_v24 = vld [vmem:[%s10572_s5 + $0x98] sm:$0xff]  }
 0x103   : > { %7678 = vmatmul.mubr.bf16.gmra.mrb[28].mxu1 %v6775_v42  ;;  %7913 = vmatprep.mubr.bf16.mxu0 %v6988_v40  ;;  %v570_v27 = vmul.f32 %v9352_v53, %v7306_v8  ;;  %788 = vst [vmem:[#allocation2 + $0xc8] sm:$0x1] %v787_v32  ;;  %v4243_v58 = vsel %vm9171_vm14, %v4241_v18, %v4242_v1  ;;  %v8404_v53 = vld [vmem:[%s10572_s5 + $0x88] sm:$0xff]   ;;  %v8416_v18 = vld [vmem:[%s10572_s5 + $0xa0] sm:$0xff]   ;;  %v8504_v32 = vld [vmem:[#allocation2 + $0x3c] sm:$0xf] }
 0x104   : > { %7697 = vmatprep.mubr.bf16.mxu1 %v6784_v28  ;;  %v6785_v28 = vcombine.low %v8495_v3, %v9488_v36  ;;  %v6786_v39 = vcombine.low %v8497_v25, %v9493_v4  ;;  %v607_v49 = vadd.f32 %v9368_v45, %v569_v62  ;;  %v6990_v5 = vcombine.low %v4240_v48, %v4243_v58  ;;  %v9525_v48 = vld [vmem:[#allocation2 + $0x40] sm:$0xf]  ;;  %v733_v62 = vld [vmem:[#allocation2 + $0xcc] sm:$0x1] }
 0x105   : > { %v608_v16 = vadd.f32 %v9368_v45, %v570_v27  ;;  %v8408_v45 = vld [vmem:[%s10572_s5 + $0x90] sm:$0xff]   ;;  %v6787_v42 = vcombine.low %v8500_v41, %v9507_v63  ;;  %v6788_v55 = vcombine.low %v8502_v47, %v9510_v44  ;;  %v6789_v15 = vcombine.low %v8504_v32, %v9525_v48  ;;  %v8506_v27 = vld [vmem:[#allocation2 + $0x48] sm:$0xf]  ;;  %v9528_v3 = vld [vmem:[#allocation2 + $0x4c] sm:$0xf] }
 0x106   : > { %v639_v56 = vmax.f32 %v607_v49, 0.0  ;;  %v734_v58 = vsel %vm8703_vm3, 0, %v733_v62  ;;  %v3595_v25 = vshll.u32 %v9432_v2, 16  ;;  %v2524_v32 = vrot.slane %v9507_v63, 5  ;;  %v9573_v63 = vld [vmem:[%s10572_s5 + $0xc0] sm:$0xff]  }
 0x107   : > { %v640_v52 = vmax.f32 %v608_v16, 0.0  ;;  %735 = vst [vmem:[#allocation2 + $0xcc] sm:$0x1] %v734_v58  ;;  %v4962_v62 = vld [vmem:[#allocation2 + $0x20] sm:$0x1] }
 0x108   : > { %v7205_v20 = vpack.c.bf16 %v639_v56, %v639_v56 }
 0x109   : > { %v7206_v9 = vpack.c.bf16 %v640_v52, %v640_v52  ;;  %v1302_v35 = vld [vmem:[#allocation2 + $0xc0] sm:$0xf] }
 0x10a   : > { %7914 = vmatmul.mubr.bf16.gmra.mrb[24].mxu0 %v6989_v37  ;;  %v1130_v21 = vshrl.u32 %v7205_v20, 16  ;;  %v1133_v30 = vshll.u32 %v7205_v20, 16  ;;  %v1306_v40 = vld [vmem:[#allocation2 + $0xc8] sm:$0x1]  ;;  %v8508_v20 = vld [vmem:[#allocation2 + $0x54] sm:$0xf] }
 0x10b   : > { %7698 = vmatmul.mubr.bf16.vlgmr.msra.gmra.mrb[0].mxu1 %v6785_v28  ;;  %7917 = vmatprep.mubr.bf16.mxu0 %v6990_v5  ;;  %v1138_v33 = vshrl.u32 %v7206_v9, 16  ;;  %v1141_v61 = vshll.u32 %v7206_v9, 16  ;;  %v6790_v28 = vcombine.low %v8506_v27, %v9528_v3  ;;  %v8422_v37 = vld [vmem:[%s10572_s5 + $0xa8] sm:$0xff]   ;;  %v3599_v5 = vshrl.u32 %v9432_v2, 16  ;;  %v9541_v9 = vld [vmem:[#allocation2 + $0x58] sm:$0xf] }
 0x10c   : > { %7730 = vmatpush3.bf16.msra.mxu1 %v8499_v26  ;;  %7701 = vmatprep.mubr.bf16.mxu1 %v6786_v39  ;;  %v1132_v17 = vrot.slane %v1130_v21, 7  ;;  %v8428_v39 = vld [vmem:[%s10572_s5 + $0xb0] sm:$0xff]   ;;  %v9549_v2 = vrot.slane %v3595_v25, 5  ;;  %v8514_v27 = vld [vmem:[#allocation2 + $0x6c] sm:$0xf] }
 0x10d   : > { %7731 = vmatprep.subr.bf16.mxu1 %v8404_v53  ;;  %v1140_v59 = vrot.slane %v1138_v33, 7  ;;  %v8510_v33 = vld [vmem:[#allocation2 + $0x60] sm:$0xf]  ;;  %v9551_v47 = vrot.slane %v3599_v5, 4 }
 0x10e   : > { %v1135_v22 = vor.u32 %v1133_v30, %v1132_v17  ;;  %v1136_v60 = vrot.slane %v1132_v17, 4  ;;  %10605 = vst [vmem:[#allocation4_spill] sm:$0xff] %v9549_v2  ;;  %v2450_v17 = vld [vmem:[#allocation2] sm:$0xe] }
 0x10f   : > { %v1143_v1 = vor.u32 %v1141_v61, %v1140_v59  ;;  %v1145_v6 = vrot.slane %v1140_v59, 4  ;;  %v9546_v61 = vld [vmem:[#allocation2 + $0x64] sm:$0xf]  ;;  %10606 = vst [vmem:[#allocation5_spill] sm:$0xff] %v9551_v47  ;;  %v9840_v47 = vld [vmem:[#allocation2 + $0x5c] sm:$0x1] }
 0x110   : > { %7732 = vmatpush3.bf16.msra.mxu1 %v8404_v53  ;;  %v1303_v8 = vsel %vm8754_vm6, %v1135_v22, %v1302_v35  ;;  %v6792_v41 = vcombine.low %v8510_v33, %v9546_v61  ;;  %v2503_v35 = vrot.slane %v9460_v57, 5  ;;  %v1360_v22 = vld [vmem:[#allocation2 + $0xcc] sm:$0xf]  ;;  %v8513_v57 = vld [vmem:[#allocation2 + $0x14] sm:$0x1] }
 0x111   : > { %7733 = vmatprep.subr.bf16.mxu1 %v8408_v45  ;;  %v1144_v13 = vsel %vm8787_vm10, %v1136_v60, %v1143_v1  ;;  %v1307_v10 = vsel %vm8703_vm3, %v1145_v6, %v1306_v40  ;;  %1304 = vst [vmem:[#allocation2 + $0xc0] sm:$0xf] %v1303_v8  ;;  %v2451_v40 = vld [vmem:[#allocation2 + $0xc] sm:$0xe]  ;;  %v2510_v60 = vrot.slane %v9488_v36, 5  ;;  %v2517_v6 = vrot.slane %v9493_v4, 5 }
 0x112   : > { %1305 = vst [vmem:[#allocation2 + $0xc4] sm:$0xf] %v1144_v13  ;;  %1308 = vst [vmem:[#allocation2 + $0xc8] sm:$0x1] %v1307_v10  ;;  %v2452_v1 = vld [vmem:[#allocation2 + $0x18] sm:$0xe] }
 0x113   : > { %7702 = vmatmul.mubr.bf16.gmra.mrb[4].mxu1 %v6787_v42  ;;  %v8417_v42 = vld [vmem:[#allocation2 + $0x18] sm:$0xff]   ;;  %v1361_v13 = vsel %vm8754_vm6, 0, %v1360_v22  ;;  %v8512_v8 = vld [vmem:[#allocation2 + $0x8] sm:$0x1]  ;;  %v9567_v4 = vld [vmem:[#allocation2 + $0x70] sm:$0xf] }
 0x114   : > { %7705 = vmatprep.mubr.bf16.mxu1 %v6788_v55  ;;  %7734 = vmatpush3.bf16.msra.mxu1 %v8408_v45  ;;  %v6791_v45 = vcombine.low %v8508_v20, %v9541_v9  ;;  %v2506_v10 = vrot.slane %v8512_v8, 5  ;;  %1362 = vst [vmem:[#allocation2 + $0xcc] sm:$0xf] %v1361_v13  ;;  %v6793_v43 = vcombine.low %v8514_v27, %v9567_v4  ;;  %v6809_v58 = vrot.slane %v2451_v40, 9  ;;  %v8517_v20 = vld [vmem:[#allocation2 + $0x78] sm:$0xf] }
 0x115   : > { %7735 = vmatprep.subr.bf16.mxu1 %v8412_v24  ;;  %v6810_v25 = vrot.slane %v2452_v1, 9  ;;  %v2519_v5 = vrot.slane %v2517_v6, 4  ;;  %v8519_v33 = vld [vmem:[#allocation2 + $0x2c] sm:$0x1]  ;;  %v2454_v1 = vld [vmem:[#allocation2 + $0x30] sm:$0xe] }
 0x116   : > { %v9602_v8 = vsel %vm9171_vm14, %v6809_v58, %v2510_v60  ;;  %v2538_v27 = vrot.slane %v9525_v48, 5  ;;  %v8521_v58 = vld [vmem:[#allocation2 + $0x38] sm:$0x1]  ;;  %v4963_v36 = vld [vmem:[#allocation2 + $0x24] sm:$0xf] }
 0x117   : > { %v2460_v22 = vld [vmem:[#allocation2 + $0x78] sm:$0xe] }
 0x118   : > { %7736 = vmatpush3.bf16.msra.mxu1 %v8412_v24  ;;  %v4090_v53 = vld [vmem:[#allocation2 + $0xc0] sm:$0xe]  ;;  %v8434_v24 = vld [vmem:[%s10572_s5 + $0xb8] sm:$0xff]  }
 0x119   : > { %7737 = vmatprep.subr.bf16.mxu1 %v8416_v18  ;;  %v3367_v49 = vld [vmem:[#allocation2 + $0xc4] sm:$0xf]  ;;  %v3368_v16 = vld [vmem:[#allocation2 + $0xc8] sm:$0x1]  ;;  %v6959_v56 = vrot.slane %v4090_v53, 9  ;;  %v2512_v53 = vrot.slane %v2510_v60, 4 }
 0x11a   : > { %v4246_v52 = vrot.slane %v3367_v49, 5  ;;  %v4249_v26 = vrot.slane %v3368_v16, 5  ;;  %v8419_v49 = vld [vmem:[#allocation2 + $0x24] sm:$0xff]   ;;  %v8423_v16 = vld [vmem:[#allocation2 + $0x30] sm:$0xff]  }
 0x11b   : > { %7706 = vmatmul.mubr.bf16.gmra.mrb[8].mxu1 %v6789_v15  ;;  %v2513_v15 = vrot.slane %v8513_v57, 5  ;;  %v4960_v57 = vld [vmem:[#allocation2 + $0x18] sm:$0xf] }
 0x11c   : > { %7709 = vmatprep.mubr.bf16.mxu1 %v6790_v28  ;;  %7738 = vmatpush3.bf16.msra.mxu1 %v8416_v18  ;;  %v4247_v21 = vsel %vm9171_vm14, %v6959_v56, %v4246_v52  ;;  %v4248_v30 = vrot.slane %v4246_v52, 4  ;;  %v2453_v18 = vld [vmem:[#allocation2 + $0x24] sm:$0xe]  ;;  %v6808_v28 = vrot.slane %v2450_v17, 9  ;;  %v8516_v56 = vld [vmem:[#allocation2 + $0x20] sm:$0x1] }
 0x11d   : > { %7739 = vmatprep.subr.bf16.mxu1 %v8422_v37  ;;  %v2520_v52 = vrot.slane %v8516_v56, 5  ;;  %v8425_v56 = vld [vmem:[#allocation2 + $0x3c] sm:$0xff]  }
 0x11e   : > { %v4250_v55 = vsel %vm9171_vm14, %v4248_v30, %v4249_v26  ;;  %v6811_v26 = vrot.slane %v2453_v18, 9  ;;  %v2526_v30 = vrot.slane %v2524_v32, 4  ;;  %v9594_v13 = vsel %vm9171_vm14, %v6808_v28, %v2503_v35  ;;  %v4961_v28 = vld [vmem:[#allocation2 + $0x1c] sm:$0xf] }
 0x11f   : > { %v6991_v59 = vcombine.low %v4247_v21, %v4250_v55  ;;  %v8424_v21 = vld [vmem:[%s10572_s5 + $0x1c8] sm:$0xff]   ;;  %v9582_v55 = vld [vmem:[#allocation2 + $0x84] sm:$0xf]  ;;  %v9607_v18 = vsel %vm9171_vm14, %v6810_v25, %v2517_v6  ;;  %v8430_v6 = vld [vmem:[%s10572_s5 + $0x1d0] sm:$0xff]   ;;  %v2534_v25 = vrot.slane %v8521_v58, 5 }
 0x120   : > { %7740 = vmatpush3.bf16.msra.mxu1 %v8422_v37  ;;  %v2505_v37 = vrot.slane %v2503_v35, 4  ;;  %v6795_v17 = vcombine.low %v9582_v55, %v9300_v34  ;;  %v9611_v35 = vsel %vm9171_vm14, %v2512_v53, %v2513_v15  ;;  %v9619_v60 = vsel %vm9171_vm14, %v6811_v26, %v2524_v32  ;;  %v2456_v53 = vld [vmem:[#allocation2 + $0x48] sm:$0xe]  ;;  %v9659_v26 = vld [vmem:[#allocation2 + $0x6c] sm:$0xe] }
 0x121   : > { %7741 = vmatprep.subr.bf16.mxu1 %v8428_v39  ;;  %7918 = vmatmul.mubr.bf16.gmra.mrb[28].mxu0 %v6991_v59  ;;  %v6796_v59 = vcombine.low %v9339_v50, %v9343_v12  ;;  %v2545_v32 = vrot.slane %v9528_v3, 5  ;;  %v8522_v3 = vld [vmem:[#allocation2 + $0x44] sm:$0x1]  ;;  %v6814_v58 = vrot.slane %v2456_v53, 9  ;;  %v2458_v53 = vld [vmem:[#allocation2 + $0x60] sm:$0xe] }
 0x122   : > { %7937 = vmatprep.mubr.bf16.mxu0 %v8417_v42  ;;  %v2531_v42 = vrot.slane %v9510_v44, 5  ;;  %v9598_v44 = vsel %vm9171_vm14, %v2505_v37, %v2506_v10  ;;  %v9615_v10 = vsel %vm9171_vm14, %v2519_v5, %v2520_v52  ;;  %v5012_v5 = vshll.u32 %v4960_v57, 16  ;;  %v8440_v50 = vld [vmem:[%s10572_s5 + $0x1e0] sm:$0xff]  }
 0x123   : > { %7710 = vmatmul.mubr.bf16.gmra.mrb[12].mxu1 %v6791_v45  ;;  %v9575_v45 = vld [vmem:[#allocation2 + $0x7c] sm:$0xf]  ;;  %v9679_v34 = vsel %vm9171_vm14, %v6814_v58, %v2545_v32  ;;  %v2566_v55 = vrot.slane %v9567_v4, 5  ;;  %v8525_v58 = vld [vmem:[#allocation2 + $0x68] sm:$0x1] }
 0x124   : > { %7713 = vmatprep.mubr.bf16.mxu1 %v6792_v41  ;;  %7742 = vmatpush3.bf16.msra.mxu1 %v8428_v39  ;;  %v6794_v39 = vcombine.low %v8517_v20, %v9575_v45  ;;  %v2527_v41 = vrot.slane %v8519_v33, 5  ;;  %v2533_v37 = vrot.slane %v2531_v42, 4  ;;  %v5018_v20 = vshll.u32 %v4961_v28, 16 }
 0x125   : > { %7743 = vmatprep.subr.bf16.mxu1 %v8434_v24  ;;  %v2541_v33 = vrot.slane %v8522_v3, 5  ;;  %v8436_v3 = vld [vmem:[%s10572_s5 + $0x1d8] sm:$0xff]  }
 0x126   : > { %v9627_v15 = vsel %vm9171_vm14, %v2526_v30, %v2527_v41  ;;  %v9639_v41 = vld [vmem:[#allocation2 + $0x54] sm:$0xe]  ;;  %v2547_v30 = vrot.slane %v2545_v32, 4  ;;  %v6816_v32 = vrot.slane %v2458_v53, 9 }
 0x128   : > { %7744 = vmatpush3.bf16.msra.mxu1 %v8434_v24  ;;  %v2455_v24 = vld [vmem:[#allocation2 + $0x3c] sm:$0xe] }
 0x129   : > { %7777 = vmatprep.subr.bf16.mxu1 %v9573_v63  ;;  %7938 = vmatmul.mubr.bf16.vlgmr.msra.gmra.mrb[0].mxu0 %v8419_v49  ;;  %v6813_v48 = vrot.slane %v2455_v24, 9  ;;  %v5009_v49 = vshrl.u32 %v4960_v57, 16  ;;  %v2552_v24 = vrot.slane %v9541_v9, 5 }
 0x12a   : > { %7970 = vmatpush3.bf16.msra.mxu0 %v9328_v51  ;;  %7941 = vmatprep.mubr.bf16.mxu0 %v8423_v16  ;;  %v2540_v16 = vrot.slane %v2538_v27, 4 }
 0x12b   : > { %7714 = vmatmul.mubr.bf16.gmra.mrb[16].mxu1 %v6793_v43  ;;  %v6812_v43 = vrot.slane %v2454_v1, 9  ;;  %7971 = vmatprep.subr.bf16.mxu0 %v8424_v21  ;;  %v8429_v1 = vld [vmem:[#allocation2 + $0x48] sm:$0xff]   ;;  %v9656_v51 = vsel %vm9171_vm14, %v6813_v48, %v2538_v27  ;;  %v6815_v48 = vrot.slane %v9639_v41, 9  ;;  %v5028_v41 = vshll.u32 %v4962_v62, 16 }
 0x12c   : > { %7717 = vmatprep.mubr.bf16.mxu1 %v6794_v39  ;;  %v5022_v39 = vshrl.u32 %v4961_v28, 16  ;;  %v9649_v28 = vsel %vm9171_vm14, %v2533_v37, %v2534_v25  ;;  %v8523_v37 = vld [vmem:[#allocation2 + $0x50] sm:$0x1]  ;;  %v9670_v9 = vsel %vm9171_vm14, %v2540_v16, %v2541_v33  ;;  %v8524_v16 = vld [vmem:[#allocation2 + $0x5c] sm:$0x1]  ;;  %v6817_v62 = vrot.slane %v9659_v26, 9 }
 0x12d   : > { %v9645_v57 = vsel %vm9171_vm14, %v6812_v43, %v2531_v42  ;;  %v5011_v42 = vrot.slane %v5009_v49, 4  ;;  %v5014_v43 = vrot.slane %v5012_v5, 5  ;;  %v2548_v25 = vrot.slane %v8523_v37, 5  ;;  %v4964_v5 = vld [vmem:[#allocation2 + $0x28] sm:$0xf] }
 0x12e   : > { %7972 = vmatpush3.bf16.msra.mxu0 %v8424_v21  ;;  %v9661_v21 = vrot.slane %v5018_v20, 5  ;;  %v5024_v52 = vrot.slane %v5022_v39, 4  ;;  %v2559_v49 = vrot.slane %v9546_v61, 5  ;;  %v5036_v20 = vshll.u32 %v4963_v36, 16  ;;  %v4965_v26 = vld [vmem:[#allocation2 + $0x2c] sm:$0x1] }
 0x12f   : > { %7973 = vmatprep.subr.bf16.mxu0 %v8430_v6  ;;  %v2554_v39 = vrot.slane %v2552_v24, 4  ;;  %v2555_v33 = vrot.slane %v8524_v16, 5  ;;  %v5015_v61 = vor.u32 %v5014_v43, %v5011_v42  ;;  %v9687_v12 = vsel %vm9171_vm14, %v2547_v30, %v2548_v25  ;;  %v8444_v43 = vld [vmem:[%s10572_s5 + $0x1e8] sm:$0xff]   ;;  %v8526_v16 = vld [vmem:[#allocation2 + $0x74] sm:$0x1] }
 0x130   : > { %v5025_v4 = vor.u32 %v5024_v52, %v9661_v21  ;;  %v2562_v42 = vrot.slane %v8525_v58, 5  ;;  %v2568_v37 = vrot.slane %v2566_v55, 4  ;;  %v2569_v27 = vrot.slane %v8526_v16, 5  ;;  %v9771_v16 = vld [vmem:[#allocation2 + $0x4c] sm:$0xf] }
 0x131   : > { %7942 = vmatmul.mubr.bf16.gmra.mrb[4].mxu0 %v8425_v56  ;;  %v8431_v56 = vld [vmem:[#allocation2 + $0x54] sm:$0xff]   ;;  %v5038_v25 = vrot.slane %v5036_v20, 5  ;;  %v9698_v53 = vsel %vm9171_vm14, %v6815_v48, %v2552_v24  ;;  %v5030_v58 = vrot.slane %v5028_v41, 5  ;;  %v2461_v20 = vld [vmem:[#allocation2 + $0x84] sm:$0xe]  ;;  %v9710_v48 = vsel %vm9171_vm14, %v2554_v39, %v2555_v33  ;;  %10610 = vst [vmem:[#allocation6_spill] sm:$0xff] %v9771_v16 }
 0x132   : > { %7945 = vmatprep.mubr.bf16.mxu0 %v8429_v1  ;;  %7974 = vmatpush3.bf16.msra.mxu0 %v8430_v6  ;;  %v8435_v6 = vld [vmem:[#allocation2 + $0x60] sm:$0xff]   ;;  %v2561_v1 = vrot.slane %v2559_v49, 4  ;;  %v5026_v40 = vrot.slane %v5025_v4, 4  ;;  %v9729_v39 = vsel %vm9171_vm14, %v2568_v37, %v2569_v27  ;;  %v5052_v33 = vshll.u32 %v4965_v26, 16  ;;  %v4967_v4 = vld [vmem:[#allocation2 + $0x34] sm:$0xf] }
 0x133   : > { %7718 = vmatmul.mubr.bf16.gmra.mrb[20].mxu1 %v6795_v17  ;;  %v5033_v17 = vshrl.u32 %v4963_v36, 16  ;;  %7975 = vmatprep.subr.bf16.mxu0 %v8436_v3  ;;  %v5042_v36 = vshll.u32 %v4964_v5, 16 }
 0x134   : > { %7721 = vmatprep.mubr.bf16.mxu1 %v6796_v59  ;;  %v5046_v59 = vshrl.u32 %v4964_v5, 16  ;;  %v5016_v5 = vrot.slane %v5015_v61, 4  ;;  %v9714_v61 = vsel %vm9171_vm14, %v6816_v32, %v2559_v49  ;;  %v9718_v41 = vsel %vm9171_vm14, %v2561_v1, %v2562_v42 }
 0x135   : > { %v5035_v30 = vrot.slane %v5033_v17, 4  ;;  %v9700_v14 = vrot.slane %v5042_v36, 5  ;;  %v2573_v17 = vrot.slane %v9575_v45, 5  ;;  %v4966_v45 = vld [vmem:[#allocation2 + $0x30] sm:$0xf]  ;;  %v6818_v36 = vrot.slane %v2460_v22, 9 }
 0x136   : > { %7976 = vmatpush3.bf16.msra.mxu0 %v8436_v3  ;;  %v5048_v2 = vrot.slane %v5046_v59, 4  ;;  %v10607_v3 = vcombine.low %v9382_v31, %v9388_v46  ;;  %v10608_v31 = vcombine.low %v9412_v23, %v9418_v29  ;;  %v9725_v46 = vsel %vm9171_vm14, %v6817_v62, %v2566_v55  ;;  %v8527_v23 = vld [vmem:[#allocation2 + $0x80] sm:$0x1]  ;;  %v8448_v55 = vld [vmem:[%s10572_s5 + $0x1f0] sm:$0xff]  }
 0x137   : > { %7977 = vmatprep.subr.bf16.mxu0 %v8440_v50  ;;  %v5039_v49 = vor.u32 %v5038_v25, %v5035_v30  ;;  %v2576_v29 = vrot.slane %v8527_v23, 5  ;;  %v6819_v59 = vrot.slane %v2461_v20, 9  ;;  %v5031_v27 = vsel %vm8810_vm11, %v5026_v40, %v5030_v58  ;;  %v8437_v62 = vld [vmem:[#allocation2 + $0x6c] sm:$0xff]   ;;  %v8528_v25 = vld [vmem:[#allocation2 + $0x88] sm:$0xf]  ;;  %v8452_v58 = vld [vmem:[%s10572_s5 + $0x1f8] sm:$0xff]  }
 0x138   : > { %v5049_v32 = vor.u32 %v5048_v2, %v9700_v14  ;;  %v5066_v22 = vshll.u32 %v4967_v4, 16  ;;  %v5070_v42 = vshrl.u32 %v4967_v4, 16  ;;  %v2580_v40 = vrot.slane %v8528_v25, 5  ;;  %v8439_v2 = vld [vmem:[#allocation2 + $0x78] sm:$0xff]  }
 0x139   : > { %7946 = vmatmul.mubr.bf16.gmra.mrb[8].mxu0 %v8431_v56  ;;  %v5021_v56 = vsel %vm8810_vm11, %v5016_v5, %v9661_v21  ;;  %v5060_v21 = vshll.u32 %v4966_v45, 16  ;;  %v5040_v30 = vrot.slane %v5039_v49, 4  ;;  %v4969_v5 = vld [vmem:[#allocation2 + $0x3c] sm:$0xf]  ;;  %v5054_v20 = vrot.slane %v5052_v33, 5 }
 0x13a   : > { %7949 = vmatprep.mubr.bf16.mxu0 %v8435_v6  ;;  %7978 = vmatpush3.bf16.msra.mxu0 %v8440_v50  ;;  %v2575_v6 = vrot.slane %v2573_v17, 4  ;;  %v5057_v50 = vshrl.u32 %v4966_v45, 16  ;;  %v9749_v26 = vcombine.low %v5021_v56, %v5031_v27  ;;  %v9755_v45 = vld [vmem:[#allocation2 + $0x8c] sm:$0x1]  ;;  %v4970_v49 = vld [vmem:[#allocation2 + $0x40] sm:$0xf]  ;;  %v9764_v56 = vsel %vm9171_vm14, %v6819_v59, %v2580_v40 }
 0x13b   : > { %7722 = vmatmul.mubr.bf16.gmra.mrb[24].mxu1 %v10607_v3  ;;  %7979 = vmatprep.subr.bf16.mxu0 %v8444_v43  ;;  %v9753_v3 = vsel %vm9171_vm14, %v6818_v36, %v2573_v17  ;;  %v5050_v4 = vrot.slane %v5049_v32, 4  ;;  %v4968_v33 = vld [vmem:[#allocation2 + $0x38] sm:$0x1]  ;;  %v4972_v27 = vld [vmem:[#allocation2 + $0x48] sm:$0xf]  ;;  %v10609_v17 = vcombine.low %v9442_v7, %v9450_v11  ;;  %v5062_v36 = vrot.slane %v5060_v21, 5 }
 0x13c   : > { %7725 = vmatprep.mubr.bf16.mxu1 %v10608_v31  ;;  %v2583_v31 = vrot.slane %v9755_v45, 5  ;;  %v5059_v23 = vrot.slane %v5057_v50, 4  ;;  %v9769_v25 = vrot.slane %v5066_v22, 5  ;;  %v5072_v45 = vrot.slane %v5070_v42, 4  ;;  %v2462_v42 = vld [vmem:[#allocation2 + $0x90] sm:$0xe] }
 0x13d   : > { %v5081_v32 = vshrl.u32 %v4969_v5, 16  ;;  %v5045_v59 = vsel %vm8810_vm11, %v5040_v30, %v9700_v14  ;;  %v5084_v50 = vshll.u32 %v4969_v5, 16  ;;  %v5090_v7 = vshll.u32 %v4970_v49, 16  ;;  %v8442_v21 = vld [vmem:[%s10572_s5 + $0xc8] sm:$0xff]  }
 0x13e   : > { %7980 = vmatpush3.bf16.msra.mxu0 %v8444_v43  ;;  %v9760_v43 = vsel %vm9171_vm14, %v2575_v6, %v2576_v29  ;;  %v10611_v29 = vcombine.low %v9594_v13, %v9598_v44  ;;  %v4971_v6 = vld [vmem:[#allocation2 + $0x44] sm:$0x1]  ;;  %v5094_v11 = vshrl.u32 %v4970_v49, 16  ;;  %v2582_v22 = vrot.slane %v2580_v40, 4 }
 0x13f   : > { %7981 = vmatprep.subr.bf16.mxu0 %v8448_v55  ;;  %v9784_v13 = vld [vmem:[%s10572_s5 + $0x200] sm:$0xff]   ;;  %v5055_v14 = vsel %vm8810_vm11, %v5050_v4, %v5054_v20  ;;  %v5076_v44 = vshll.u32 %v4968_v33, 16  ;;  %v5114_v30 = vshll.u32 %v9771_v16, 16  ;;  %v5063_v5 = vor.u32 %v5062_v36, %v5059_v23  ;;  %v8443_v33 = vld [vmem:[#allocation2 + $0x90] sm:$0xff]  }
 0x140   : > { %10612 = vst [vmem:[#allocation7_spill] sm:$0xff] %v9784_v13  ;;  %v5073_v40 = vor.u32 %v5072_v45, %v9769_v25  ;;  %v5100_v49 = vshll.u32 %v4971_v6, 16  ;;  %v5086_v37 = vrot.slane %v5084_v50, 5  ;;  %v9794_v1 = vrot.slane %v5090_v7, 5  ;;  %v8530_v23 = vld [vmem:[#allocation2 + $0x94] sm:$0xf] }
 0x141   : > { %7950 = vmatmul.mubr.bf16.gmra.mrb[12].mxu0 %v8437_v62  ;;  %v5105_v62 = vshrl.u32 %v4972_v27, 16  ;;  %v5096_v20 = vrot.slane %v5094_v11, 4  ;;  %v6820_v4 = vrot.slane %v2462_v42, 9  ;;  %v9796_v24 = vcombine.low %v5045_v59, %v5055_v14  ;;  %v9798_v45 = vld [vmem:[#allocation2 + $0x50] sm:$0x1] }
 0x142   : > { %7953 = vmatprep.mubr.bf16.mxu0 %v8439_v2  ;;  %7982 = vmatpush3.bf16.msra.mxu0 %v8448_v55  ;;  %v5118_v55 = vshrl.u32 %v9771_v16, 16  ;;  %v5083_v2 = vrot.slane %v5081_v32, 4  ;;  %v2587_v36 = vrot.slane %v8530_v23, 5  ;;  %10613 = vst [vmem:[#allocation8_spill] sm:$0xff] %v9798_v45  ;;  %v9801_v52 = vrot.slane %v5114_v30, 5 }
 0x143   : > { %7726 = vmatmul.mubr.bf16.gmra.mrb[28].mxu1 %v10609_v17  ;;  %v5108_v17 = vshll.u32 %v4972_v27, 16  ;;  %7983 = vmatprep.subr.bf16.mxu0 %v8452_v58  ;;  %v4975_v27 = vld [vmem:[#allocation2 + $0x54] sm:$0xf]  ;;  %v5107_v32 = vrot.slane %v5105_v62, 4  ;;  %v9803_v50 = vld [vmem:[#allocation2 + $0x58] sm:$0xf]  ;;  %v9810_v59 = vsel %vm9171_vm14, %v2582_v22, %v2583_v31  ;;  %v5097_v30 = vor.u32 %v5096_v20, %v9794_v1 }
 0x144   : > { %7745 = vmatprep.mubr.bf16.mxu1 %v10611_v29  ;;  %v8441_v29 = vld [vmem:[#allocation2 + $0x84] sm:$0xff]   ;;  %v5120_v16 = vrot.slane %v5118_v55, 4  ;;  %10614 = vst [vmem:[#allocation9_spill] sm:$0xff] %v9803_v50  ;;  %v5129_v7 = vshrl.u32 %v4975_v27, 16  ;;  %v5132_v11 = vshll.u32 %v4975_v27, 16  ;;  %v9812_v42 = vrot.slane %v5063_v5, 4 }
 0x145   : > { %v5110_v6 = vrot.slane %v5108_v17, 5  ;;  %v9814_v62 = vrot.slane %v5073_v40, 4  ;;  %v9816_v17 = vrot.slane %v5076_v44, 5  ;;  %v5087_v14 = vor.u32 %v5086_v37, %v5083_v2  ;;  %v8446_v31 = vld [vmem:[%s10572_s5 + $0xd0] sm:$0xff]   ;;  %v8531_v22 = vld [vmem:[#allocation2 + $0xa0] sm:$0xf] }
 0x146   : > { %7984 = vmatpush3.bf16.msra.mxu0 %v8452_v58  ;;  %v10615_v58 = vcombine.low %v9602_v8, %v9611_v35  ;;  %v9820_v55 = vrot.slane %v5100_v49, 5  ;;  %v9824_v8 = vsel %vm9171_vm14, %v6820_v4, %v2587_v36  ;;  %v10616_v35 = vcombine.low %v9607_v18, %v9615_v10  ;;  %v8532_v20 = vld [vmem:[#allocation2 + $0x98] sm:$0x1]  ;;  %v2464_v23 = vld [vmem:[#allocation2 + $0xa8] sm:$0xe] }
 0x147   : > { %8017 = vmatprep.subr.bf16.mxu0 %v9784_v13  ;;  %v2594_v37 = vrot.slane %v8531_v22, 5  ;;  %v5111_v44 = vor.u32 %v5110_v6, %v5107_v32  ;;  %v5124_v5 = vshll.u32 %v9798_v45, 16  ;;  %v5138_v40 = vshll.u32 %v9803_v50, 16  ;;  %v8533_v32 = vld [vmem:[#allocation2 + $0xac] sm:$0xf] }
 0x148   : > { %v5121_v2 = vor.u32 %v5120_v16, %v9801_v52  ;;  %v5131_v49 = vrot.slane %v5129_v7, 4  ;;  %v5134_v27 = vrot.slane %v5132_v11, 5  ;;  %v5142_v18 = vshrl.u32 %v9803_v50, 16  ;;  %v8534_v11 = vld [vmem:[#allocation2 + $0xa4] sm:$0x1] }
 0x149   : > { %7954 = vmatmul.mubr.bf16.gmra.mrb[16].mxu0 %v8441_v29  ;;  %v5069_v10 = vsel %vm8810_vm11, %v9812_v42, %v9769_v25  ;;  %v2589_v29 = vrot.slane %v2587_v36, 4  ;;  %v2590_v4 = vrot.slane %v8532_v20, 5  ;;  %v2601_v6 = vrot.slane %v8533_v32, 5  ;;  %v8450_v36 = vld [vmem:[%s10572_s5 + $0xd8] sm:$0xff]   ;;  %v8535_v32 = vld [vmem:[#allocation2 + $0xb0] sm:$0x1] }
 0x14a   : > { %7957 = vmatprep.mubr.bf16.mxu0 %v8443_v33  ;;  %v8447_v33 = vld [vmem:[#allocation2 + $0xa8] sm:$0xff]   ;;  %v5098_v16 = vrot.slane %v5097_v30, 4  ;;  %v2597_v22 = vrot.slane %v8534_v11, 5  ;;  %v2596_v50 = vrot.slane %v2594_v37, 4  ;;  %v5112_v45 = vrot.slane %v5111_v44, 4 }
 0x14b   : > { %7746 = vmatmul.mubr.bf16.vlgmr.msra.gmra.mrb[0].mxu1 %v10615_v58  ;;  %v8445_v58 = vld [vmem:[#allocation2 + $0x9c] sm:$0xff]   ;;  %v5126_v13 = vrot.slane %v5124_v5, 5  ;;  %v9842_v25 = vrot.slane %v5138_v40, 5  ;;  %v5135_v42 = vor.u32 %v5134_v27, %v5131_v49  ;;  %v5144_v20 = vrot.slane %v5142_v18, 4  ;;  %v2465_v30 = vld [vmem:[#allocation2 + $0xb4] sm:$0xe] }
 0x14c   : > { %7778 = vmatpush3.bf16.msra.mxu1 %v9573_v63  ;;  %7749 = vmatprep.mubr.bf16.mxu1 %v10616_v35  ;;  %v2463_v63 = vld [vmem:[#allocation2 + $0x9c] sm:$0xe]  ;;  %v5088_v35 = vrot.slane %v5087_v14, 4  ;;  %v6822_v14 = vrot.slane %v2464_v23, 9  ;;  %v5079_v44 = vsel %vm8810_vm11, %v9814_v62, %v9816_v17  ;;  %v9856_v5 = vsel %vm9171_vm14, %v2589_v29, %v2590_v4  ;;  %v4981_v11 = vld [vmem:[#allocation2 + $0x6c] sm:$0xf] }
 0x14d   : > { %7779 = vmatprep.subr.bf16.mxu1 %v8442_v21  ;;  %v6821_v7 = vrot.slane %v2463_v63, 9  ;;  %v10617_v63 = vcombine.low %v9619_v60, %v9627_v15  ;;  %v2603_v40 = vrot.slane %v2601_v6, 4  ;;  %v10618_v49 = vshll.u32 %v9436_v38, 16  ;;  %v4978_v38 = vld [vmem:[#allocation2 + $0x60] sm:$0xf] }
 0x14e   : > { %v10620_v60 = vcombine.low %v9645_v57, %v9649_v28  ;;  %v5093_v15 = vsel %vm8810_vm11, %v5088_v35, %v9794_v1  ;;  %v5103_v62 = vsel %vm8810_vm11, %v5098_v16, %v9820_v55  ;;  %v9877_v18 = vsel %vm9171_vm14, %v2596_v50, %v2597_v22  ;;  %v8454_v55 = vld [vmem:[%s10572_s5 + $0xe0] sm:$0xff]  }
 0x14f   : > { %v9860_v27 = vrot.slane %v10618_v49, 5  ;;  %v9873_v17 = vsel %vm9171_vm14, %v6821_v7, %v2594_v37  ;;  %10622 = vst [vmem:[#allocation12_spill] sm:$0xff] %v9877_v18  ;;  %v5117_v57 = vsel %vm8810_vm11, %v5112_v45, %v9801_v52  ;;  %v5148_v28 = vshll.u32 %v9840_v47, 16  ;;  %v8536_v45 = vld [vmem:[#allocation2 + $0xb8] sm:$0xf]  ;;  %v8451_v22 = vld [vmem:[#allocation2 + $0xc0] sm:$0xff]  }
 0x150   : > { %7780 = vmatpush3.bf16.msra.mxu1 %v8442_v21  ;;  %v5122_v21 = vrot.slane %v5121_v2, 4  ;;  %v2604_v2 = vrot.slane %v8535_v32, 5  ;;  %10621 = vst [vmem:[#allocation11_spill] sm:$0xff] %v9873_v17  ;;  %v6823_v1 = vrot.slane %v2465_v30, 9  ;;  %v5145_v50 = vor.u32 %v5144_v20, %v9842_v25  ;;  %v9907_v7 = vld [vmem:[#allocation2 + $0x64] sm:$0xf] }
 0x151   : > { %7781 = vmatprep.subr.bf16.mxu1 %v8446_v31  ;;  %10619 = vst [vmem:[#allocation10_spill] sm:$0xff] %v9860_v27  ;;  %7958 = vmatmul.mubr.bf16.gmra.mrb[20].mxu0 %v8445_v58  ;;  %v9893_v29 = vsel %vm9171_vm14, %v6822_v14, %v2601_v6  ;;  %v2608_v4 = vrot.slane %v8536_v45, 5  ;;  %v5153_v23 = vshrl.u32 %v4978_v38, 16  ;;  %v5156_v58 = vshll.u32 %v4978_v38, 16  ;;  %v9915_v14 = vld [vmem:[#allocation2 + $0xbc] sm:$0x1] }
 0x152   : > { %7961 = vmatprep.mubr.bf16.mxu0 %v8447_v33  ;;  %v5127_v37 = vsel %vm8810_vm11, %v5122_v21, %v5126_v13  ;;  %10623 = vst [vmem:[#allocation13_spill] sm:$0xff] %v9893_v29  ;;  %v9897_v52 = vsel %vm9171_vm14, %v2603_v40, %v2604_v2  ;;  %v8449_v33 = vld [vmem:[#allocation2 + $0xb4] sm:$0xff]   ;;  %v9901_v35 = vcombine.low %v5069_v10, %v5079_v44  ;;  %v9913_v20 = vrot.slane %v5148_v28, 5  ;;  %v9918_v30 = vld [vmem:[#allocation2 + $0x68] sm:$0x1]  ;;  %v8453_v13 = vld [vmem:[#allocation2 + $0xcc] sm:$0xff]  }
 0x153   : > { %7750 = vmatmul.mubr.bf16.gmra.mrb[4].mxu1 %v10617_v63  ;;  %10624 = vst [vmem:[#allocation14_spill] sm:$0xff] %v9897_v52  ;;  %v9903_v16 = vcombine.low %v5093_v15, %v5103_v62  ;;  %10625 = vst [vmem:[#allocation15_spill] sm:$0xff] %v9918_v30  ;;  %v9920_v63 = vld [vmem:[#allocation2 + $0x70] sm:$0xf]  ;;  %v9929_v40 = vrot.slane %v5145_v50, 4  ;;  %v9935_v2 = vsel %vm9171_vm14, %v6823_v1, %v2608_v4  ;;  %v9942_v62 = vrot.slane %v2608_v4, 4 }
 0x154   : > { %7753 = vmatprep.mubr.bf16.mxu1 %v10620_v60  ;;  %7782 = vmatpush3.bf16.msra.mxu1 %v8446_v31  ;;  %v9888_v31 = vrot.slane %v5135_v42, 4  ;;  %v9911_v42 = vcombine.low %v5117_v57, %v5127_v37  ;;  %10626 = vst [vmem:[#allocation16_spill] sm:$0xff] %v9920_v63  ;;  %v4984_v49 = vld [vmem:[#allocation2 + $0x78] sm:$0xf]  ;;  %v9937_v60 = vld [vmem:[#allocation2 + $0x7c] sm:$0xf]  ;;  %v10628_v15 = vcombine.low %v9656_v51, %v9670_v9 }
 0x155   : > { %7783 = vmatprep.subr.bf16.mxu1 %v8450_v36  ;;  %10627 = vst [vmem:[#allocation17_spill] sm:$0xff] %v9937_v60  ;;  %v5155_v38 = vrot.slane %v5153_v23, 4  ;;  %v5158_v57 = vrot.slane %v5156_v58, 5  ;;  %v5162_v28 = vshll.u32 %v9907_v7, 16  ;;  %v4987_v37 = vld [vmem:[#allocation2 + $0x84] sm:$0xf]  ;;  %v10629_v50 = vcombine.low %v9679_v34, %v9687_v12 }
 0x156   : > { %v5166_v1 = vshrl.u32 %v9907_v7, 16  ;;  %v5177_v45 = vshrl.u32 %v4981_v11, 16  ;;  %v5180_v32 = vshll.u32 %v4981_v11, 16  ;;  %v5186_v21 = vshll.u32 %v9920_v63, 16  ;;  %v9950_v51 = vld [vmem:[#allocation2 + $0x88] sm:$0xf] }
 0x157   : > { %10630 = vst [vmem:[#allocation18_spill] sm:$0xff] %v9950_v51  ;;  %v5190_v9 = vshrl.u32 %v9920_v63, 16  ;;  %v5201_v4 = vshrl.u32 %v4984_v49, 16  ;;  %v5204_v23 = vshll.u32 %v4984_v49, 16  ;;  %v5210_v58 = vshll.u32 %v9937_v60, 16  ;;  %v8458_v34 = vld [vmem:[%s10572_s5 + $0xf0] sm:$0xff]  }
 0x158   : > { %7784 = vmatpush3.bf16.msra.mxu1 %v8450_v36  ;;  %v8456_v36 = vld [vmem:[%s10572_s5 + $0xe8] sm:$0xff]   ;;  %v5172_v12 = vshll.u32 %v9918_v30, 16  ;;  %v5225_v11 = vshrl.u32 %v4987_v37, 16  ;;  %v5238_v49 = vshrl.u32 %v9950_v51, 16  ;;  %v4990_v6 = vld [vmem:[#allocation2 + $0x90] sm:$0xf]  ;;  %v10633_v19 = vcombine.low %v9725_v46, %v9729_v39 }
 0x159   : > { %7785 = vmatprep.subr.bf16.mxu1 %v8454_v55  ;;  %7962 = vmatmul.mubr.bf16.gmra.mrb[24].mxu0 %v8449_v33  ;;  %v5214_v33 = vshrl.u32 %v9937_v60, 16  ;;  %v8460_v44 = vld [vmem:[%s10572_s5 + $0xf8] sm:$0xff]   ;;  %v5168_v10 = vrot.slane %v5166_v1, 4  ;;  %v5179_v27 = vrot.slane %v5177_v45, 4  ;;  %v5182_v52 = vrot.slane %v5180_v32, 5  ;;  %v10635_v39 = vld [vmem:[#allocation5_spill] sm:$0xff] }
 0x15a   : > { %7965 = vmatprep.mubr.bf16.mxu0 %v8451_v22  ;;  %v9959_v22 = vrot.slane %v5162_v28, 5  ;;  %v9966_v29 = vrot.slane %v5186_v21, 5  ;;  %v5206_v28 = vrot.slane %v5204_v23, 5  ;;  %v9970_v60 = vrot.slane %v5210_v58, 5 }
 0x15b   : > { %7754 = vmatmul.mubr.bf16.gmra.mrb[8].mxu1 %v10628_v15  ;;  %v5228_v15 = vshll.u32 %v4987_v37, 16  ;;  %v9968_v37 = vld [vmem:[#allocation2 + $0x74] sm:$0x1]  ;;  %v5216_v63 = vrot.slane %v5214_v33, 4  ;;  %v5227_v18 = vrot.slane %v5225_v11, 4  ;;  %v5249_v30 = vshrl.u32 %v4990_v6, 16 }
 0x15c   : > { %7757 = vmatprep.mubr.bf16.mxu1 %v10629_v50  ;;  %7786 = vmatpush3.bf16.msra.mxu1 %v8454_v55  ;;  %v5159_v50 = vor.u32 %v5158_v57, %v5155_v38  ;;  %v5234_v55 = vshll.u32 %v9950_v51, 16  ;;  %v5192_v38 = vrot.slane %v5190_v9, 4  ;;  %v5203_v57 = vrot.slane %v5201_v4, 4  ;;  %v9972_v51 = vld [vmem:[#allocation2 + $0x80] sm:$0x1] }
 0x15d   : > { %7787 = vmatprep.subr.bf16.mxu1 %v8456_v36  ;;  %v5230_v17 = vrot.slane %v5228_v15, 5  ;;  %v10631_v32 = vcombine.low %v9698_v53, %v9710_v48  ;;  %v5151_v21 = vsel %vm8810_vm11, %v9929_v40, %v9913_v20  ;;  %v5240_v45 = vrot.slane %v5238_v49, 4  ;;  %v9994_v33 = vld [vmem:[#allocation2 + $0x94] sm:$0xf]  ;;  %v8461_v20 = vld [vmem:[%s10572_s5 + $0x218] sm:$0xff]  }
 0x15e   : > { %v9983_v1 = vrot.slane %v5234_v55, 5  ;;  %v5252_v9 = vshll.u32 %v4990_v6, 16  ;;  %v10632_v4 = vcombine.low %v9714_v61, %v9718_v41  ;;  %v9988_v23 = vrot.slane %v5159_v50, 4  ;;  %v4993_v41 = vld [vmem:[#allocation2 + $0x9c] sm:$0xf] }
 0x15f   : > { %v5169_v53 = vor.u32 %v5168_v10, %v9959_v22  ;;  %v9991_v48 = vrot.slane %v5172_v12, 5  ;;  %v5196_v58 = vshll.u32 %v9968_v37, 16  ;;  %v5183_v11 = vor.u32 %v5182_v52, %v5179_v27  ;;  %v789_v55 = vld [vmem:[#allocation2 + $0xd4] sm:$0x1] }
 0x160   : > { %7788 = vmatpush3.bf16.msra.mxu1 %v8456_v36  ;;  %v9981_v36 = vld [vmem:[#allocation2 + $0x8c] sm:$0x1]  ;;  %v5207_v6 = vor.u32 %v5206_v28, %v5203_v57  ;;  %v5220_v61 = vshll.u32 %v9972_v51, 16  ;;  %v5217_v15 = vor.u32 %v5216_v63, %v9970_v60  ;;  %v5231_v10 = vor.u32 %v5230_v17, %v5227_v18  ;;  %v10004_v17 = vld [vmem:[#allocation2 + $0xa0] sm:$0xf] }
 0x161   : > { %7789 = vmatprep.subr.bf16.mxu1 %v8458_v34  ;;  %7966 = vmatmul.mubr.bf16.gmra.mrb[28].mxu0 %v8453_v13  ;;  %v5193_v13 = vor.u32 %v5192_v38, %v9966_v29  ;;  %v5244_v12 = vshll.u32 %v9981_v36, 16  ;;  %v5251_v50 = vrot.slane %v5249_v30, 4  ;;  %v5241_v49 = vor.u32 %v5240_v45, %v9983_v1  ;;  %v8457_v30 = vld [vmem:[%s10572_s5 + $0x208] sm:$0xff]   ;;  %v10014_v45 = vld [vmem:[%s10572_s5 + $0x100] sm:$0xff]  }
 0x162   : > { %7985 = vmatprep.mubr.bf16.mxu0 %v9749_v26  ;;  %v5258_v26 = vshll.u32 %v9994_v33, 16  ;;  %v5262_v27 = vshrl.u32 %v9994_v33, 16  ;;  %v5170_v52 = vrot.slane %v5169_v53, 4  ;;  %v5273_v38 = vshrl.u32 %v4993_v41, 16 }
 0x163   : > { %7758 = vmatmul.mubr.bf16.gmra.mrb[12].mxu1 %v10631_v32  ;;  %v5254_v32 = vrot.slane %v5252_v9, 5  ;;  %v5276_v57 = vshll.u32 %v4993_v41, 16  ;;  %v5184_v28 = vrot.slane %v5183_v11, 4  ;;  %v5222_v63 = vrot.slane %v5220_v61, 5 }
 0x164   : > { %7761 = vmatprep.mubr.bf16.mxu1 %v10632_v4  ;;  %7790 = vmatpush3.bf16.msra.mxu1 %v8458_v34  ;;  %v5198_v34 = vrot.slane %v5196_v58, 5  ;;  %v5194_v4 = vrot.slane %v5193_v13, 4  ;;  %v790_v18 = vsel %vm8714_vm4, 0, %v789_v55  ;;  %v5218_v9 = vrot.slane %v5217_v15, 4 }
 0x165   : > { %7791 = vmatprep.subr.bf16.mxu1 %v8460_v44  ;;  %v5232_v53 = vrot.slane %v5231_v10, 4  ;;  %v5246_v58 = vrot.slane %v5244_v12, 5  ;;  %791 = vst [vmem:[#allocation2 + $0xd4] sm:$0x1] %v790_v18  ;;  %v5242_v11 = vrot.slane %v5241_v49, 4  ;;  %v5255_v13 = vor.u32 %v5254_v32, %v5251_v50  ;;  %v10636_v49 = vld [vmem:[#allocation4_spill] sm:$0xff] }
 0x166   : > { %v10020_v61 = vrot.slane %v5258_v26, 5  ;;  %v5264_v41 = vrot.slane %v5262_v27, 4  ;;  %v10634_v55 = vcombine.low %v9753_v3, %v9760_v43  ;;  %v5275_v15 = vrot.slane %v5273_v38, 4  ;;  %v10638_v26 = vld [vmem:[#allocation7_spill] sm:$0xff] }
 0x167   : > { %v5278_v10 = vrot.slane %v5276_v57, 5  ;;  %v5282_v12 = vshll.u32 %v10004_v17, 16  ;;  %v5286_v46 = vshrl.u32 %v10004_v17, 16  ;;  %v10637_v50 = vor.u32 %v10635_v39, %v10636_v49 }
 0x168   : > { %7792 = vmatpush3.bf16.msra.mxu1 %v8460_v44  ;;  %v5208_v44 = vrot.slane %v5207_v6, 4  ;;  %v10026_v6 = vld [vmem:[#allocation2 + $0x98] sm:$0x1]  ;;  %v5165_v43 = vsel %vm8810_vm11, %v9988_v23, %v9959_v22  ;;  %v5175_v27 = vsel %vm8810_vm11, %v5170_v52, %v9991_v48  ;;  %v5223_v23 = vsel %vm8810_vm11, %v5218_v9, %v5222_v63  ;;  %v4996_v48 = vld [vmem:[#allocation2 + $0xa8] sm:$0xf] }
 0x169   : > { %8065 = vmatprep.subr.bf16.mxu1 %v10014_v45  ;;  %7986 = vmatmul.mubr.bf16.vlgmr.msra.gmra.mrb[0].mxu0 %v9796_v24  ;;  %v10033_v32 = vrot.slane %v10637_v50, 4  ;;  %v10639_v24 = vrot.slane %v9915_v14, 5  ;;  %v5189_v14 = vsel %vm8810_vm11, %v5184_v28, %v9966_v29  ;;  %v5237_v52 = vsel %vm8810_vm11, %v5232_v53, %v9983_v1  ;;  %v10095_v53 = vld [vmem:[#allocation2 + $0xa4] sm:$0x1] }
 0x16a   : > { %8018 = vmatpush3.bf16.msra.mxu0 %v10638_v26  ;;  %7989 = vmatprep.mubr.bf16.mxu0 %v9901_v35  ;;  %v8459_v35 = vld [vmem:[%s10572_s5 + $0x210] sm:$0xff]   ;;  %v5213_v22 = vsel %vm8810_vm11, %v5208_v44, %v9970_v60  ;;  %v5247_v38 = vsel %vm8810_vm11, %v5242_v11, %v5246_v58  ;;  %v5265_v29 = vor.u32 %v5264_v41, %v10020_v61  ;;  %v5268_v57 = vshll.u32 %v10026_v6, 16  ;;  %v5718_v11 = vld [vmem:[#allocation2 + $0x48] sm:$0xe] }
 0x16b   : > { %7762 = vmatmul.mubr.bf16.gmra.mrb[16].mxu1 %v10633_v19  ;;  %v10042_v3 = vsel %vm9171_vm14, %v9942_v62, %v10639_v24  ;;  %8019 = vmatprep.subr.bf16.mxu0 %v8457_v30  ;;  %v5199_v62 = vsel %vm8810_vm11, %v5194_v4, %v5198_v34  ;;  %v10071_v34 = vld [vmem:[#allocation2 + $0xac] sm:$0xf]  ;;  %v10073_v28 = vrot.slane %v5255_v13, 4  ;;  %v5279_v60 = vor.u32 %v5278_v10, %v5275_v15  ;;  %v10132_v26 = vld [vmem:[#allocation2 + $0xb0] sm:$0x1] }
 0x16c   : > { %7765 = vmatprep.mubr.bf16.mxu1 %v10634_v55  ;;  %v10075_v4 = vrot.slane %v5282_v12, 5  ;;  %v10077_v63 = vrot.slane %v5286_v46, 4  ;;  %v10640_v1 = vsel %vm8810_vm11, %v9888_v31, %v9842_v25  ;;  %v6855_v44 = vcombine.low %v9935_v2, %v10042_v3  ;;  %v1364_v58 = vld [vmem:[#allocation2 + $0xd4] sm:$0x1]  ;;  %v5719_v12 = vld [vmem:[#allocation2 + $0x54] sm:$0xe] }
 0x16d   : > { %v10089_v18 = vcombine.low %v10640_v1, %v5151_v21  ;;  %v10093_v9 = vcombine.low %v5165_v43, %v5175_v27  ;;  %v10100_v40 = vcombine.low %v5189_v14, %v5199_v62  ;;  %v5300_v19 = vshll.u32 %v4996_v48, 16  ;;  %v10644_v24 = vld [vmem:[#allocation6_spill] sm:$0xff]  ;;  %v10645_v27 = vld [vmem:[#allocation8_spill] sm:$0xff]  ;;  %v10252_v2 = vld [vmem:[#allocation2 + $0xbc] sm:$0x1] }
 0x16e   : > { %8020 = vmatpush3.bf16.msra.mxu0 %v8457_v30  ;;  %v5297_v30 = vshrl.u32 %v4996_v48, 16  ;;  %v5306_v25 = vshll.u32 %v10071_v34, 16  ;;  %v1365_v21 = vsel %vm8703_vm3, 0, %v1364_v58  ;;  %v10642_v13 = vcombine.low %v9764_v56, %v9810_v59  ;;  %v8464_v56 = vld [vmem:[%s10572_s5 + $0x220] sm:$0xff]  }
 0x16f   : > { %8021 = vmatprep.subr.bf16.mxu0 %v8459_v35  ;;  %v10108_v41 = vcombine.low %v5213_v22, %v5223_v23  ;;  %v10110_v55 = vcombine.low %v5237_v52, %v5247_v38  ;;  %v10112_v15 = vrot.slane %v5265_v29, 4  ;;  %v10114_v10 = vrot.slane %v5268_v57, 5  ;;  %1366 = vst [vmem:[#allocation2 + $0xd4] sm:$0x1] %v1365_v21  ;;  %v5720_v62 = vld [vmem:[#allocation2 + $0x60] sm:$0xe] }
 0x170   : > { %v10643_v46 = vcombine.low %v9824_v8, %v9856_v5  ;;  %v10127_v39 = vrot.slane %v5279_v60, 4  ;;  %v5289_v50 = vor.u32 %v10077_v63, %v10075_v4  ;;  %v10135_v8 = vrot.slane %v5297_v30, 4  ;;  %v4999_v52 = vld [vmem:[#allocation2 + $0xb4] sm:$0xf]  ;;  %v10646_v29 = vld [vmem:[#allocation9_spill] sm:$0xff] }
 0x171   : > { %7990 = vmatmul.mubr.bf16.gmra.mrb[4].mxu0 %v9903_v16  ;;  %v5292_v16 = vshll.u32 %v10095_v53, 16  ;;  %v7084_v5 = vrot.slane %v5718_v11, 9  ;;  %v5808_v43 = vrot.slane %v10644_v24, 5  ;;  %v5811_v14 = vrot.slane %v10645_v27, 5  ;;  %v5721_v63 = vld [vmem:[#allocation2 + $0x6c] sm:$0xe] }
 0x172   : > { %7993 = vmatprep.mubr.bf16.mxu0 %v9911_v42  ;;  %8022 = vmatpush3.bf16.msra.mxu0 %v8459_v35  ;;  %v5302_v22 = vrot.slane %v5300_v19, 5  ;;  %v10139_v23 = vrot.slane %v5306_v25, 5  ;;  %v5310_v48 = vshrl.u32 %v10071_v34, 16  ;;  %v7085_v38 = vrot.slane %v5719_v12, 9  ;;  %v10647_v19 = vld [vmem:[#allocation15_spill] sm:$0xff] }
 0x173   : > { %7766 = vmatmul.mubr.bf16.gmra.mrb[20].mxu1 %v10642_v13  ;;  %8023 = vmatprep.subr.bf16.mxu0 %v8461_v20  ;;  %v10144_v42 = vsel %vm9171_vm14, %v7084_v5, %v5808_v43  ;;  %v5810_v35 = vrot.slane %v5808_v43, 4  ;;  %v5815_v57 = vrot.slane %v10646_v29, 5  ;;  %v5818_v60 = vrot.slane %v9840_v47, 5  ;;  %v8467_v47 = vld [vmem:[%s10572_s5 + $0x228] sm:$0xff]   ;;  %v10162_v12 = vld [vmem:[#allocation2 + $0xb8] sm:$0xf] }
 0x174   : > { %7769 = vmatprep.mubr.bf16.mxu1 %v10643_v46  ;;  %v5316_v1 = vshll.u32 %v10132_v26, 16  ;;  %v7086_v30 = vrot.slane %v5720_v62, 9  ;;  %v5822_v58 = vrot.slane %v9907_v7, 5  ;;  %v5825_v25 = vrot.slane %v10647_v19, 5  ;;  %v10648_v24 = vld [vmem:[#allocation11_spill] sm:$0xff]  ;;  %v10649_v43 = vld [vmem:[#allocation12_spill] sm:$0xff] }
 0x175   : > { %v5321_v31 = vshrl.u32 %v4999_v52, 16  ;;  %v10153_v21 = vsel %vm9171_vm14, %v5810_v35, %v5811_v14  ;;  %v10157_v11 = vsel %vm9171_vm14, %v7085_v38, %v5815_v57  ;;  %v5817_v13 = vrot.slane %v5815_v57, 4  ;;  %v10651_v38 = vld [vmem:[#allocation16_spill] sm:$0xff]  ;;  %v10652_v57 = vld [vmem:[#allocation13_spill] sm:$0xff]  ;;  %v10656_v7 = vld [vmem:[#allocation10_spill] sm:$0xff] }
 0x176   : > { %8024 = vmatpush3.bf16.msra.mxu0 %v8461_v20  ;;  %v10168_v20 = vsel %vm9171_vm14, %v7086_v30, %v5822_v58  ;;  %v5824_v46 = vrot.slane %v5822_v58, 4  ;;  %v7087_v5 = vrot.slane %v5721_v63, 9  ;;  %v10650_v27 = vcombine.low %v10648_v24, %v10649_v43  ;;  %v10653_v30 = vld [vmem:[#allocation14_spill] sm:$0xff] }
 0x177   : > { %8025 = vmatprep.subr.bf16.mxu0 %v8464_v56  ;;  %v5324_v14 = vshll.u32 %v4999_v52, 16  ;;  %v10175_v62 = vsel %vm9171_vm14, %v5817_v13, %v5818_v60  ;;  %v5829_v35 = vrot.slane %v10651_v38, 5  ;;  %v5832_v29 = vrot.slane %v9968_v37, 5  ;;  %v3348_v13 = vld [vmem:[#allocation2 + $0x78] sm:$0xf] }
 0x178   : > { %v10654_v19 = vcombine.low %v10652_v57, %v10653_v30  ;;  %v5303_v63 = vor.u32 %v5302_v22, %v10135_v8  ;;  %v5312_v58 = vrot.slane %v5310_v48, 4  ;;  %v10188_v60 = vsel %vm9171_vm14, %v5824_v46, %v5825_v25  ;;  %v8470_v46 = vld [vmem:[%s10572_s5 + $0x230] sm:$0xff]   ;;  %v10231_v52 = vld [vmem:[#allocation2 + $0xc4] sm:$0xf] }
 0x179   : > { %7994 = vmatmul.mubr.bf16.gmra.mrb[8].mxu0 %v10089_v18  ;;  %v5330_v37 = vshll.u32 %v10162_v12, 16  ;;  %v10196_v8 = vsel %vm9171_vm14, %v7087_v5, %v5829_v35  ;;  %v5831_v22 = vrot.slane %v5829_v35, 4  ;;  %v10208_v25 = vrot.slane %v5292_v16, 5  ;;  %v5002_v5 = vld [vmem:[#allocation2 + $0xc0] sm:$0xf]  ;;  %v8462_v57 = vld [vmem:[#allocation2 + $0xc] sm:$0xff]  }
 0x17a   : > { %7997 = vmatprep.mubr.bf16.mxu0 %v10093_v9  ;;  %8026 = vmatpush3.bf16.msra.mxu0 %v8464_v56  ;;  %v10206_v56 = vrot.slane %v5289_v50, 4  ;;  %v10213_v24 = vrot.slane %v5316_v1, 5  ;;  %v10215_v43 = vrot.slane %v5321_v31, 4  ;;  %v3586_v38 = vshrl.u32 %v3348_v13, 16  ;;  %v5722_v35 = vld [vmem:[#allocation2 + $0x78] sm:$0xe] }
 0x17b   : > { %7770 = vmatmul.mubr.bf16.gmra.mrb[24].mxu1 %v10650_v27  ;;  %8027 = vmatprep.subr.bf16.mxu0 %v8467_v47  ;;  %v10219_v27 = vsel %vm9171_vm14, %v5831_v22, %v5832_v29  ;;  %v10221_v50 = vrot.slane %v5303_v63, 4  ;;  %v10223_v16 = vrot.slane %v5324_v14, 5  ;;  %v5334_v30 = vshrl.u32 %v10162_v12, 16  ;;  %v5723_v1 = vld [vmem:[#allocation2 + $0x84] sm:$0xe]  ;;  %v8473_v14 = vld [vmem:[%s10572_s5 + $0x238] sm:$0xff]  }
 0x17c   : > { %7773 = vmatprep.mubr.bf16.mxu1 %v10654_v19  ;;  %10655 = vst [vmem:[#allocation5_spill] sm:$0xff] %v10219_v27  ;;  %v5313_v31 = vor.u32 %v5312_v58, %v10139_v23  ;;  %v10229_v18 = vrot.slane %v5330_v37, 5  ;;  %v3588_v29 = vrot.slane %v3586_v38, 4  ;;  %v3589_v22 = vshll.u32 %v3348_v13, 16  ;;  %v10657_v9 = vld [vmem:[#allocation17_spill] sm:$0xff] }
 0x17d   : > { %v5345_v63 = vshrl.u32 %v5002_v5, 16  ;;  %v3608_v19 = vsel %vm8810_vm11, %v10033_v32, %v10656_v7  ;;  %v5836_v58 = vrot.slane %v10657_v9, 5  ;;  %v5348_v13 = vshll.u32 %v5002_v5, 16  ;;  %v10658_v7 = vld [vmem:[#allocation18_spill] sm:$0xff] }
 0x17e   : > { %8028 = vmatpush3.bf16.msra.mxu0 %v8467_v47  ;;  %v7088_v47 = vrot.slane %v5722_v35, 9  ;;  %v3591_v37 = vrot.slane %v3589_v22, 5  ;;  %v5839_v38 = vrot.slane %v9972_v51, 5  ;;  %v7089_v59 = vrot.slane %v5723_v1, 9 }
 0x17f   : > { %8029 = vmatprep.subr.bf16.mxu0 %v8470_v46  ;;  %v5336_v48 = vrot.slane %v5334_v30, 4  ;;  %v5838_v32 = vrot.slane %v5836_v58, 4  ;;  %v5843_v9 = vrot.slane %v10658_v7, 5  ;;  %v5354_v3 = vshll.u32 %v10231_v52, 16  ;;  %v8463_v30 = vld [vmem:[#allocation2 + $0x18] sm:$0xff]  }
 0x180   : > { %v10248_v27 = vsel %vm9171_vm14, %v7088_v47, %v5836_v58  ;;  %v5358_v51 = vshrl.u32 %v10231_v52, 16  ;;  %v5314_v5 = vrot.slane %v5313_v31, 4  ;;  %v5347_v1 = vrot.slane %v5345_v63, 4  ;;  %v5005_v58 = vld [vmem:[#allocation2 + $0xcc] sm:$0xf]  ;;  %v8465_v63 = vld [vmem:[#allocation2 + $0x24] sm:$0xff]  }
 0x181   : > { %7998 = vmatmul.mubr.bf16.gmra.mrb[12].mxu0 %v10100_v40  ;;  %v5846_v40 = vrot.slane %v9981_v36, 5  ;;  %v10259_v35 = vsel %vm9171_vm14, %v5838_v32, %v5839_v38  ;;  %v5350_v22 = vrot.slane %v5348_v13, 5  ;;  %v5295_v31 = vsel %vm8810_vm11, %v10206_v56, %v10208_v25 }
 0x182   : > { %8001 = vmatprep.mubr.bf16.mxu0 %v10108_v41  ;;  %8030 = vmatpush3.bf16.msra.mxu0 %v8470_v46  ;;  %v5845_v41 = vrot.slane %v5843_v9, 4  ;;  %v10265_v46 = vld [vmem:[#allocation2 + $0xc8] sm:$0x1]  ;;  %v7120_v36 = vcombine.low %v10248_v27, %v10259_v35  ;;  %v10280_v13 = vrot.slane %v5354_v3, 5  ;;  %v5360_v38 = vrot.slane %v5358_v51, 4 }
 0x183   : > { %7774 = vmatmul.mubr.bf16.gmra.mrb[28].mxu1 %v6855_v44  ;;  %v3592_v44 = vor.u32 %v3591_v37, %v3588_v29  ;;  %8031 = vmatprep.subr.bf16.mxu0 %v8473_v14  ;;  %v5327_v29 = vor.u32 %v10223_v16, %v10215_v43  ;;  %v10659_v25 = vsel %vm8810_vm11, %v10112_v15, %v10114_v10  ;;  %v5364_v7 = vshll.u32 %v10265_v46, 16  ;;  %v5724_v3 = vld [vmem:[#allocation2 + $0x90] sm:$0xe]  ;;  %v3366_v27 = vld [vmem:[#allocation2 + $0xc0] sm:$0xf] }
 0x184   : > { %7793 = vmatprep.mubr.bf16.mxu1 %v8462_v57  ;;  %v10263_v57 = vsel %vm9171_vm14, %v7089_v59, %v5843_v9  ;;  %v5340_v59 = vshll.u32 %v10252_v2, 16  ;;  %v10278_v37 = vsel %vm9171_vm14, %v5845_v41, %v5846_v40  ;;  %v10660_v43 = vsel %vm8810_vm11, %v10073_v28, %v10020_v61  ;;  %v10299_v9 = vld [vmem:[#allocation2 + $0xd0] sm:$0xf] }
 0x185   : > { %v3593_v47 = vrot.slane %v3592_v44, 4  ;;  %v7121_v56 = vcombine.low %v10263_v57, %v10278_v37  ;;  %v7066_v16 = vcombine.low %v10660_v43, %v10659_v25  ;;  %v5309_v15 = vsel %vm8810_vm11, %v10221_v50, %v10139_v23  ;;  %v5725_v23 = vld [vmem:[#allocation2 + $0x9c] sm:$0xe] }
 0x186   : > { %8032 = vmatpush3.bf16.msra.mxu0 %v8473_v14  ;;  %v5337_v14 = vor.u32 %v5336_v48, %v10229_v18  ;;  %v5319_v61 = vsel %vm8810_vm11, %v5314_v5, %v10213_v24  ;;  %v5351_v28 = vor.u32 %v5350_v22, %v5347_v1  ;;  %v5369_v10 = vshrl.u32 %v5005_v58, 16  ;;  %v8539_v24 = vld [vmem:[%s10572_s5 + $0x108] sm:$0xff]   ;;  %v8466_v1 = vld [vmem:[#allocation2 + $0x30] sm:$0xff]  }
 0x187   : > { %v3598_v32 = vsel %vm8810_vm11, %v3593_v47, %v10636_v49  ;;  %v10661_v48 = vsel %vm8810_vm11, %v10127_v39, %v10075_v4  ;;  %v5328_v51 = vrot.slane %v5327_v29, 4  ;;  %v5342_v44 = vrot.slane %v5340_v59, 5  ;;  %v8468_v59 = vld [vmem:[#allocation2 + $0x3c] sm:$0xff]  }
 0x188   : > { %v10301_v49 = vcombine.low %v3598_v32, %v3608_v19  ;;  %v7067_v19 = vcombine.low %v10661_v48, %v5295_v31  ;;  %v5372_v40 = vshll.u32 %v5005_v58, 16  ;;  %v5382_v50 = vshrl.u32 %v10299_v9, 16 }
 0x189   : > { %8002 = vmatmul.mubr.bf16.gmra.mrb[16].mxu0 %v10110_v55  ;;  %v5378_v55 = vshll.u32 %v10299_v9, 16  ;;  %v7090_v5 = vrot.slane %v5724_v3, 9  ;;  %v7068_v4 = vcombine.low %v5309_v15, %v5319_v61  ;;  %v5338_v39 = vrot.slane %v5337_v14, 4  ;;  %v10336_v14 = vld [vmem:[#allocation2 + $0xd4] sm:$0x1] }
 0x18a   : > { %8005 = vmatprep.mubr.bf16.mxu0 %v7066_v16  ;;  %v5366_v41 = vrot.slane %v5364_v7, 5  ;;  %v5352_v22 = vrot.slane %v5351_v28, 4  ;;  %v5371_v47 = vrot.slane %v5369_v10, 4  ;;  %v5853_v31 = vrot.slane %v10026_v6, 5 }
 0x18b   : > { %7794 = vmatmul.mubr.bf16.vlgmr.msra.gmra.mrb[0].mxu1 %v8463_v30  ;;  %v5850_v30 = vrot.slane %v9994_v33, 5  ;;  %v7091_v29 = vrot.slane %v5725_v23, 9  ;;  %v5374_v58 = vrot.slane %v5372_v40, 5  ;;  %v5857_v32 = vrot.slane %v10004_v17, 5  ;;  %v8540_v33 = vld [vmem:[%s10572_s5 + $0x110] sm:$0xff]  }
 0x18c   : > { %8073 = vmatpush3.bf16.msra.mxu1 %v10014_v45  ;;  %7797 = vmatprep.mubr.bf16.mxu1 %v8465_v63  ;;  %v5361_v45 = vor.u32 %v5360_v38, %v10280_v13  ;;  %v10333_v43 = vrot.slane %v5378_v55, 5  ;;  %v5384_v6 = vrot.slane %v5382_v50, 4  ;;  %v5860_v16 = vrot.slane %v10095_v53, 5  ;;  %v5714_v55 = vld [vmem:[#allocation2 + $0x18] sm:$0xe] }
 0x18d   : > { %8066 = vmatprep.subr.bf16.mxu1 %v8539_v24  ;;  %v10327_v63 = vsel %vm9171_vm14, %v7090_v5, %v5850_v30  ;;  %v5852_v38 = vrot.slane %v5850_v30, 4  ;;  %v5333_v17 = vsel %vm8810_vm11, %v5328_v51, %v10229_v18  ;;  %v10349_v15 = vsel %vm9171_vm14, %v7091_v29, %v5857_v32  ;;  %v8471_v5 = vld [vmem:[#allocation2 + $0x54] sm:$0xff]  }
 0x18e   : > { %v5362_v25 = vrot.slane %v5361_v45, 4  ;;  %v5859_v61 = vrot.slane %v5857_v32, 4  ;;  %v5343_v53 = vsel %vm8810_vm11, %v5338_v39, %v5342_v44  ;;  %v5357_v28 = vsel %vm8810_vm11, %v5352_v22, %v10280_v13  ;;  %v8541_v44 = vld [vmem:[%s10572_s5 + $0x118] sm:$0xff]   ;;  %v8469_v45 = vld [vmem:[#allocation2 + $0x48] sm:$0xff]  }
 0x18f   : > { %v10340_v7 = vsel %vm9171_vm14, %v5852_v38, %v5853_v31  ;;  %v5375_v10 = vor.u32 %v5374_v58, %v5371_v47  ;;  %v5385_v48 = vor.u32 %v5384_v6, %v10333_v43  ;;  %v5388_v51 = vshll.u32 %v10336_v14, 16  ;;  %v8542_v13 = vld [vmem:[#allocation2 + $0x1c] sm:$0xf]  ;;  %v5727_v47 = vld [vmem:[#allocation2 + $0xb4] sm:$0xe]  ;;  %v8543_v31 = vld [vmem:[%s10572_s5 + $0x120] sm:$0xff]  }
 0x190   : > { %8074 = vmatpush3.bf16.msra.mxu1 %v8539_v24  ;;  %v7122_v3 = vcombine.low %v10327_v63, %v10340_v7  ;;  %v5367_v18 = vsel %vm8810_vm11, %v5362_v25, %v5366_v41  ;;  %v5780_v40 = vrot.slane %v8542_v13, 5  ;;  %v5726_v24 = vld [vmem:[#allocation2 + $0xa8] sm:$0xe]  ;;  %v7069_v50 = vcombine.low %v5333_v17, %v5343_v53  ;;  %v8544_v58 = vld [vmem:[#allocation2 + $0x20] sm:$0x1] }
 0x191   : > { %8067 = vmatprep.subr.bf16.mxu1 %v8540_v33  ;;  %8006 = vmatmul.mubr.bf16.gmra.mrb[20].mxu0 %v7067_v19  ;;  %v10362_v19 = vsel %vm9171_vm14, %v5859_v61, %v5860_v16  ;;  %v5376_v39 = vrot.slane %v5375_v10, 4  ;;  %v5386_v41 = vrot.slane %v5385_v48, 4  ;;  %v5390_v30 = vrot.slane %v5388_v51, 5  ;;  %v8545_v6 = vld [vmem:[#allocation2 + $0x28] sm:$0xf] }
 0x192   : > { %8009 = vmatprep.mubr.bf16.mxu0 %v7068_v4  ;;  %v7123_v23 = vcombine.low %v10349_v15, %v10362_v19  ;;  %v7070_v4 = vcombine.low %v5357_v28, %v5367_v18  ;;  %v5864_v22 = vrot.slane %v10071_v34, 5  ;;  %v7080_v29 = vrot.slane %v5714_v55, 9  ;;  %v5715_v34 = vld [vmem:[#allocation2 + $0x24] sm:$0xe]  ;;  %v8546_v17 = vld [vmem:[#allocation2 + $0x34] sm:$0xf] }
 0x193   : > { %7798 = vmatmul.mubr.bf16.gmra.mrb[4].mxu1 %v8466_v1  ;;  %v7092_v1 = vrot.slane %v5726_v24, 9  ;;  %v5783_v38 = vrot.slane %v8544_v58, 5  ;;  %v5867_v25 = vrot.slane %v10132_v26, 5  ;;  %v5787_v16 = vrot.slane %v8545_v6, 5  ;;  %v5716_v18 = vld [vmem:[#allocation2 + $0x30] sm:$0xe] }
 0x194   : > { %7801 = vmatprep.mubr.bf16.mxu1 %v8468_v59  ;;  %8075 = vmatpush3.bf16.msra.mxu1 %v8540_v33  ;;  %v5782_v59 = vrot.slane %v5780_v40, 4  ;;  %v5866_v33 = vrot.slane %v5864_v22, 4  ;;  %v5794_v61 = vrot.slane %v8546_v17, 5  ;;  %v7093_v53 = vrot.slane %v5727_v47, 9  ;;  %v8549_v47 = vld [vmem:[#allocation2 + $0x38] sm:$0x1] }
 0x195   : > { %8068 = vmatprep.subr.bf16.mxu1 %v8541_v44  ;;  %v10375_v32 = vsel %vm9171_vm14, %v7092_v1, %v5864_v22  ;;  %v5381_v28 = vsel %vm8810_vm11, %v5376_v39, %v10333_v43  ;;  %v5391_v10 = vsel %vm8810_vm11, %v5386_v41, %v5390_v30  ;;  %v5871_v48 = vrot.slane %v10162_v12, 5  ;;  %v8547_v43 = vld [vmem:[%s10572_s5 + $0x128] sm:$0xff]  }
 0x196   : > { %v10385_v26 = vsel %vm9171_vm14, %v5866_v33, %v5867_v25  ;;  %v5781_v51 = vsel %vm9171_vm14, %v7080_v29, %v5780_v40  ;;  %v5874_v24 = vrot.slane %v10252_v2, 5  ;;  %v7081_v55 = vrot.slane %v5715_v34, 9  ;;  %v8548_v39 = vld [vmem:[#allocation2 + $0x2c] sm:$0x1]  ;;  %v8550_v29 = vld [vmem:[%s10572_s5 + $0x130] sm:$0xff]  }
 0x197   : > { %v7124_v13 = vcombine.low %v10375_v32, %v10385_v26  ;;  %v10400_v12 = vsel %vm9171_vm14, %v7093_v53, %v5871_v48  ;;  %v5873_v40 = vrot.slane %v5871_v48, 4  ;;  %v5790_v41 = vrot.slane %v8548_v39, 5  ;;  %v8551_v33 = vld [vmem:[#allocation2 + $0x40] sm:$0xf]  ;;  %v5729_v34 = vld [vmem:[#allocation2 + $0xcc] sm:$0xe] }
 0x198   : > { %8076 = vmatpush3.bf16.msra.mxu1 %v8541_v44  ;;  %v5784_v44 = vsel %vm9171_vm14, %v5782_v59, %v5783_v38  ;;  %v7082_v30 = vrot.slane %v5716_v18, 9  ;;  %v5796_v22 = vrot.slane %v5794_v61, 4  ;;  %v5788_v58 = vsel %vm9171_vm14, %v7081_v55, %v5787_v16  ;;  %v5717_v53 = vld [vmem:[#allocation2 + $0x3c] sm:$0xe] }
 0x199   : > { %8069 = vmatprep.subr.bf16.mxu1 %v8543_v31  ;;  %8010 = vmatmul.mubr.bf16.gmra.mrb[24].mxu0 %v7069_v50  ;;  %v7071_v50 = vcombine.low %v5381_v28, %v5391_v10  ;;  %v7112_v1 = vcombine.low %v5781_v51, %v5784_v44  ;;  %v10404_v2 = vsel %vm9171_vm14, %v5873_v40, %v5874_v24  ;;  %v5801_v25 = vrot.slane %v8551_v33, 5  ;;  %v8552_v28 = vld [vmem:[%s10572_s5 + $0x138] sm:$0xff]   ;;  %v8476_v51 = vld [vmem:[#allocation2 + $0x84] sm:$0xff]   ;;  %v8477_v33 = vld [vmem:[#allocation2 + $0x90] sm:$0xff]  }
 0x19a   : > { %8013 = vmatprep.mubr.bf16.mxu0 %v7070_v4  ;;  %v5789_v4 = vrot.slane %v5787_v16, 4  ;;  %v7125_v59 = vcombine.low %v10400_v12, %v10404_v2  ;;  %v5795_v6 = vsel %vm9171_vm14, %v7082_v30, %v5794_v61  ;;  %v3345_v16 = vld [vmem:[#allocation2 + $0x6c] sm:$0xf]  ;;  %v8475_v10 = vld [vmem:[#allocation2 + $0x78] sm:$0xff]   ;;  %v7095_v48 = vrot.slane %v5729_v34, 9 }
 0x19b   : > { %7802 = vmatmul.mubr.bf16.gmra.mrb[8].mxu1 %v8469_v45  ;;  %v8472_v45 = vld [vmem:[#allocation2 + $0x60] sm:$0xff]   ;;  %v5803_v24 = vrot.slane %v5801_v25, 4  ;;  %v3562_v55 = vshrl.u32 %v3345_v16, 16  ;;  %v3565_v40 = vshll.u32 %v3345_v16, 16 }
 0x19c   : > { %7805 = vmatprep.mubr.bf16.mxu1 %v8471_v5  ;;  %8077 = vmatpush3.bf16.msra.mxu1 %v8543_v31  ;;  %v8474_v5 = vld [vmem:[#allocation2 + $0x6c] sm:$0xff]   ;;  %v5797_v31 = vrot.slane %v8549_v47, 5  ;;  %v5791_v38 = vsel %vm9171_vm14, %v5789_v4, %v5790_v41 }
 0x19d   : > { %8070 = vmatprep.subr.bf16.mxu1 %v8547_v43  ;;  %v7113_v18 = vcombine.low %v5788_v58, %v5791_v38  ;;  %v8554_v4 = vld [vmem:[#allocation2 + $0x70] sm:$0xf]  ;;  %v3564_v47 = vrot.slane %v3562_v55, 4 }
 0x19e   : > { %v5798_v17 = vsel %vm9171_vm14, %v5796_v22, %v5797_v31  ;;  %v3571_v39 = vshll.u32 %v8554_v4, 16  ;;  %v3575_v41 = vshrl.u32 %v8554_v4, 16 }
 0x19f   : > { %v7114_v44 = vcombine.low %v5795_v6, %v5798_v17  ;;  %v8478_v6 = vld [vmem:[#allocation2 + $0x9c] sm:$0xff]   ;;  %v3351_v17 = vld [vmem:[#allocation2 + $0x84] sm:$0xf] }
 0x1a0   : > { %8078 = vmatpush3.bf16.msra.mxu1 %v8547_v43  ;;  %v7083_v43 = vrot.slane %v5717_v53, 9  ;;  %v3577_v58 = vrot.slane %v3575_v41, 4 }
 0x1a1   : > { %8071 = vmatprep.subr.bf16.mxu1 %v8550_v29  ;;  %8014 = vmatmul.mubr.bf16.gmra.mrb[28].mxu0 %v7071_v50  ;;  %v5885_v50 = vrot.slane %v10299_v9, 5 }
 0x1a2   : > { %8033 = vmatprep.mubr.bf16.mxu0 %v7112_v1  ;;  %v5802_v22 = vsel %vm9171_vm14, %v7083_v43, %v5801_v25  ;;  %v10662_v43 = vcombine.low %v10144_v42, %v10153_v21  ;;  %v8557_v21 = vld [vmem:[#allocation2 + $0x8c] sm:$0x1] }
 0x1a3   : > { %7806 = vmatmul.mubr.bf16.gmra.mrb[12].mxu1 %v8472_v45  ;;  %v8553_v45 = vld [vmem:[#allocation2 + $0x44] sm:$0x1]  ;;  %v10426_v30 = vsel %vm9171_vm14, %v7095_v48, %v5885_v50  ;;  %v5887_v1 = vrot.slane %v5885_v50, 4  ;;  %v8556_v48 = vld [vmem:[#allocation2 + $0x88] sm:$0xf]  ;;  %v8480_v50 = vld [vmem:[#allocation2 + $0xb4] sm:$0xff]  }
 0x1a4   : > { %7809 = vmatprep.mubr.bf16.mxu1 %v8474_v5  ;;  %8079 = vmatpush3.bf16.msra.mxu1 %v8550_v29  ;;  %v5804_v61 = vrot.slane %v8553_v45, 5  ;;  %v5888_v5 = vrot.slane %v10336_v14, 5  ;;  %v3567_v14 = vrot.slane %v3565_v40, 5  ;;  %v3573_v29 = vrot.slane %v3571_v39, 5  ;;  %v3354_v45 = vld [vmem:[#allocation2 + $0x90] sm:$0xf] }
 0x1a5   : > { %8072 = vmatprep.subr.bf16.mxu1 %v8552_v28  ;;  %v8479_v40 = vld [vmem:[#allocation2 + $0xa8] sm:$0xff]  }
 0x1a6   : > { %v5805_v9 = vsel %vm9171_vm14, %v5803_v24, %v5804_v61  ;;  %v10434_v31 = vsel %vm9171_vm14, %v5887_v1, %v5888_v5  ;;  %v3568_v25 = vor.u32 %v3567_v14, %v3564_v47  ;;  %v3578_v53 = vor.u32 %v3577_v58, %v3573_v29  ;;  %v8558_v58 = vld [vmem:[#allocation2 + $0x94] sm:$0xf] }
 0x1a7   : > { %v7127_v38 = vcombine.low %v10426_v30, %v10434_v31  ;;  %v7115_v34 = vcombine.low %v5802_v22, %v5805_v9  ;;  %v3634_v1 = vshrl.u32 %v3354_v45, 16  ;;  %v3637_v22 = vshll.u32 %v3354_v45, 16  ;;  %v3357_v9 = vld [vmem:[#allocation2 + $0x9c] sm:$0xf] }
 0x1a8   : > { %8080 = vmatpush3.bf16.msra.mxu1 %v8552_v28  ;;  %v8555_v28 = vld [vmem:[#allocation2 + $0x74] sm:$0x1]  ;;  %v3569_v24 = vrot.slane %v3568_v25, 4  ;;  %v3579_v61 = vrot.slane %v3578_v53, 4  ;;  %v3629_v14 = vshll.u32 %v8557_v21, 16 }
 0x1a9   : > { %8034 = vmatmul.mubr.bf16.vlgmr.msra.gmra.mrb[0].mxu0 %v7113_v18  ;;  %v3581_v16 = vshll.u32 %v8555_v28, 16  ;;  %v3613_v18 = vshll.u32 %v3351_v17, 16  ;;  %v8559_v25 = vld [vmem:[#allocation2 + $0xa0] sm:$0xf]  ;;  %v3363_v21 = vld [vmem:[#allocation2 + $0xb4] sm:$0xf] }
 0x1aa   : > { %8037 = vmatprep.mubr.bf16.mxu0 %v7114_v44  ;;  %v3623_v44 = vshrl.u32 %v8556_v48, 16  ;;  %v3574_v47 = vsel %vm8810_vm11, %v3569_v24, %v3573_v29  ;;  %v3667_v53 = vshll.u32 %v8559_v25, 16  ;;  %v3671_v28 = vshrl.u32 %v8559_v25, 16 }
 0x1ab   : > { %7810 = vmatmul.mubr.bf16.gmra.mrb[16].mxu1 %v8475_v10  ;;  %v3610_v10 = vshrl.u32 %v3351_v17, 16  ;;  %v3583_v55 = vrot.slane %v3581_v16, 5  ;;  %v3615_v4 = vrot.slane %v3613_v18, 5  ;;  %v3661_v17 = vshll.u32 %v3357_v9, 16 }
 0x1ac   : > { %7813 = vmatprep.mubr.bf16.mxu1 %v8476_v51  ;;  %v3619_v51 = vshll.u32 %v8556_v48, 16  ;;  %v3625_v41 = vrot.slane %v3623_v44, 4  ;;  %v10663_v16 = vcombine.low %v10157_v11, %v10175_v62  ;;  %v3636_v18 = vrot.slane %v3634_v1, 4  ;;  %v8481_v44 = vld [vmem:[#allocation2 + $0xc0] sm:$0xff]   ;;  %v8560_v1 = vld [vmem:[#allocation2 + $0x98] sm:$0x1] }
 0x1ad   : > { %v3612_v5 = vrot.slane %v3610_v10, 4  ;;  %v3584_v42 = vsel %vm8810_vm11, %v3579_v61, %v3583_v55  ;;  %v3639_v48 = vrot.slane %v3637_v22, 5  ;;  %v3631_v24 = vrot.slane %v3629_v14, 5 }
 0x1ae   : > { %v10441_v39 = vrot.slane %v3619_v51, 5  ;;  %v10664_v51 = vcombine.low %v10168_v20, %v10188_v60  ;;  %v10456_v11 = vrot.slane %v3667_v53, 5  ;;  %v3673_v62 = vrot.slane %v3671_v28, 4  ;;  %v8561_v60 = vld [vmem:[#allocation2 + $0xa4] sm:$0x1] }
 0x1af   : > { %v3616_v29 = vor.u32 %v3615_v4, %v3612_v5  ;;  %v3653_v22 = vshll.u32 %v8560_v1, 16 }
 0x1b0   : > { %v3626_v10 = vor.u32 %v3625_v41, %v10441_v39  ;;  %v3640_v41 = vor.u32 %v3639_v48, %v3636_v18  ;;  %v3709_v18 = vshll.u32 %v3363_v21, 16  ;;  %v8563_v48 = vld [vmem:[#allocation2 + $0xb8] sm:$0xf] }
 0x1b1   : > { %8038 = vmatmul.mubr.bf16.gmra.mrb[4].mxu0 %v7115_v34  ;;  %v3647_v34 = vshrl.u32 %v8558_v58, 16  ;;  %v3617_v5 = vrot.slane %v3616_v29, 4  ;;  %v3655_v29 = vrot.slane %v3653_v22, 5  ;;  %v8564_v22 = vld [vmem:[#allocation2 + $0xb0] sm:$0x1] }
 0x1b2   : > { %8041 = vmatprep.mubr.bf16.mxu0 %v10662_v43  ;;  %v6928_v43 = vcombine.low %v3574_v47, %v3584_v42  ;;  %v3627_v4 = vrot.slane %v3626_v10, 4  ;;  %v3706_v10 = vshrl.u32 %v3363_v21, 16  ;;  %v3733_v21 = vshll.u32 %v3366_v27, 16 }
 0x1b3   : > { %7814 = vmatmul.mubr.bf16.gmra.mrb[20].mxu1 %v8477_v33  ;;  %v3643_v33 = vshll.u32 %v8558_v58, 16  ;;  %v3649_v61 = vrot.slane %v3647_v34, 4  ;;  %v3674_v58 = vor.u32 %v3673_v62, %v10456_v11  ;;  %v3622_v53 = vsel %vm8810_vm11, %v3617_v5, %v10441_v39 }
 0x1b4   : > { %7817 = vmatprep.mubr.bf16.mxu1 %v8478_v6  ;;  %v3658_v6 = vshrl.u32 %v3357_v9, 16  ;;  %v3677_v9 = vshll.u32 %v8561_v60, 16  ;;  %v3632_v28 = vsel %vm8810_vm11, %v3627_v4, %v3631_v24  ;;  %v3708_v5 = vrot.slane %v3706_v10, 4 }
 0x1b5   : > { %v10454_v45 = vrot.slane %v3643_v33, 5  ;;  %v8562_v33 = vld [vmem:[#allocation2 + $0xac] sm:$0xf]  ;;  %v3675_v39 = vrot.slane %v3674_v58, 4  ;;  %v6930_v24 = vcombine.low %v3622_v53, %v3632_v28  ;;  %v3711_v4 = vrot.slane %v3709_v18, 5 }
 0x1b6   : > { %v3660_v55 = vrot.slane %v3658_v6, 4  ;;  %v3691_v34 = vshll.u32 %v8562_v33, 16  ;;  %v3695_v6 = vshrl.u32 %v8562_v33, 16  ;;  %v5728_v28 = vld [vmem:[#allocation2 + $0xc0] sm:$0xe] }
 0x1b7   : > { %v3650_v20 = vor.u32 %v3649_v61, %v10454_v45  ;;  %v7094_v7 = vrot.slane %v5728_v28, 9 }
 0x1b8   : > { %v3693_v62 = vrot.slane %v3691_v34, 5  ;;  %v8566_v34 = vld [vmem:[#allocation2 + $0xbc] sm:$0x1] }
 0x1b9   : > { %8042 = vmatmul.mubr.bf16.gmra.mrb[8].mxu0 %v10663_v16  ;;  %v3641_v16 = vrot.slane %v3640_v41, 4 }
 0x1ba   : > { %8045 = vmatprep.mubr.bf16.mxu0 %v10664_v51  ;;  %v3715_v51 = vshll.u32 %v8563_v48, 16 }
 0x1bb   : > { %7818 = vmatmul.mubr.bf16.gmra.mrb[24].mxu1 %v8479_v40  ;;  %v3663_v40 = vrot.slane %v3661_v17, 5  ;;  %v10665_v17 = vld [vmem:[#allocation5_spill] sm:$0xff]  ;;  %v3646_v35 = vsel %vm8810_vm11, %v3641_v16, %v10454_v45  ;;  %v3730_v45 = vshrl.u32 %v3366_v27, 16 }
 0x1bc   : > { %7821 = vmatprep.mubr.bf16.mxu1 %v8480_v50  ;;  %v3360_v50 = vld [vmem:[#allocation2 + $0xa8] sm:$0xf]  ;;  %v10666_v25 = vcombine.low %v10196_v8, %v10665_v17  ;;  %v3719_v8 = vshrl.u32 %v8563_v48, 16  ;;  %v3717_v41 = vrot.slane %v3715_v51, 5 }
 0x1bd   : > { %v3682_v47 = vshrl.u32 %v3360_v50, 16  ;;  %v3685_v42 = vshll.u32 %v3360_v50, 16  ;;  %v3664_v14 = vor.u32 %v3663_v40, %v3660_v55  ;;  %v3697_v50 = vrot.slane %v3695_v6, 4 }
 0x1be   : > { %v3721_v1 = vrot.slane %v3719_v8, 4  ;;  %v3725_v6 = vshll.u32 %v8566_v34, 16  ;;  %v3732_v16 = vrot.slane %v3730_v45, 4  ;;  %v5881_v8 = vrot.slane %v10265_v46, 5 }
 0x1bf   : > { %v3684_v61 = vrot.slane %v3682_v47, 4  ;;  %v3687_v55 = vrot.slane %v3685_v42, 5  ;;  %v3665_v40 = vrot.slane %v3664_v14, 4  ;;  %v3698_v42 = vor.u32 %v3697_v50, %v3693_v62  ;;  %v8565_v14 = vld [vmem:[#allocation2 + $0xc4] sm:$0xf] }
 0x1c0   : > { %v3739_v58 = vshll.u32 %v8565_v14, 16  ;;  %v3743_v33 = vshrl.u32 %v8565_v14, 16  ;;  %v3727_v63 = vrot.slane %v3725_v6, 5 }
 0x1c1   : > { %8046 = vmatmul.mubr.bf16.gmra.mrb[12].mxu0 %v10666_v25  ;;  %v3670_v60 = vsel %vm8810_vm11, %v3665_v40, %v10456_v11  ;;  %v3688_v47 = vor.u32 %v3687_v55, %v3684_v61  ;;  %v3722_v11 = vor.u32 %v3721_v1, %v3717_v41  ;;  %v5878_v25 = vrot.slane %v10231_v52, 5  ;;  %v8567_v55 = vld [vmem:[#allocation2 + $0xc8] sm:$0x1] }
 0x1c2   : > { %8049 = vmatprep.mubr.bf16.mxu0 %v7120_v36  ;;  %v3699_v37 = vrot.slane %v3698_v42, 4  ;;  %v3741_v10 = vrot.slane %v3739_v58, 5  ;;  %v3745_v18 = vrot.slane %v3743_v33, 4  ;;  %v3749_v40 = vshll.u32 %v8567_v55, 16 }
 0x1c3   : > { %7822 = vmatmul.mubr.bf16.gmra.mrb[28].mxu1 %v8481_v44  ;;  %v3651_v44 = vrot.slane %v3650_v20, 4  ;;  %v3701_v20 = vshll.u32 %v8564_v22, 16  ;;  %v3689_v57 = vrot.slane %v3688_v47, 4  ;;  %v3723_v51 = vrot.slane %v3722_v11, 4 }
 0x1c4   : > { %7857 = vmatprep.mubr.bf16.mxu1 %v6928_v43  ;;  %v3679_v43 = vrot.slane %v3677_v9, 5  ;;  %v3746_v61 = vor.u32 %v3745_v18, %v3741_v10  ;;  %v5879_v15 = vsel %vm9171_vm14, %v7094_v7, %v5878_v25 }
 0x1c5   : > { %v3656_v36 = vsel %vm8810_vm11, %v3651_v44, %v3655_v29  ;;  %v3735_v29 = vrot.slane %v3733_v21, 5  ;;  %v3694_v52 = vsel %vm8810_vm11, %v3689_v57, %v3693_v62 }
 0x1c6   : > { %v3680_v9 = vsel %vm8810_vm11, %v3675_v39, %v3679_v43  ;;  %v6931_v17 = vcombine.low %v3646_v35, %v3656_v36  ;;  %v3728_v39 = vsel %vm8810_vm11, %v3723_v51, %v3727_v63 }
 0x1c7   : > { %v6932_v53 = vcombine.low %v3670_v60, %v3680_v9  ;;  %v3736_v43 = vor.u32 %v3735_v29, %v3732_v16 }
 0x1c9   : > { %8050 = vmatmul.mubr.bf16.gmra.mrb[16].mxu0 %v7121_v56  ;;  %v3703_v56 = vrot.slane %v3701_v20, 5  ;;  %v3737_v50 = vrot.slane %v3736_v43, 4 }
 0x1ca   : > { %8053 = vmatprep.mubr.bf16.mxu0 %v7122_v3  ;;  %v5880_v3 = vrot.slane %v5878_v25, 4 }
 0x1cb   : > { %7858 = vmatmul.mubr.bf16.vlgmr.msra.gmra.mrb[16].mxu1 %v10301_v49  ;;  %v3712_v49 = vor.u32 %v3711_v4, %v3708_v5  ;;  %v3704_v44 = vsel %vm8810_vm11, %v3699_v37, %v3703_v56  ;;  %v3751_v5 = vrot.slane %v3749_v40, 5  ;;  %v3742_v32 = vsel %vm8810_vm11, %v3737_v50, %v3741_v10 }
 0x1cc   : > { %7861 = vmatprep.mubr.bf16.mxu1 %v6930_v24  ;;  %v5882_v19 = vsel %vm9171_vm14, %v5880_v3, %v5881_v8  ;;  %v3747_v24 = vrot.slane %v3746_v61, 4 }
 0x1cd   : > { %v3713_v48 = vrot.slane %v3712_v49, 4  ;;  %v7126_v4 = vcombine.low %v5879_v15, %v5882_v19 }
 0x1ce   : > { %v3752_v26 = vsel %vm8810_vm11, %v3747_v24, %v3751_v5 }
 0x1cf   : > { %v3718_v46 = vsel %vm8810_vm11, %v3713_v48, %v3717_v41  ;;  %v6935_v0 = vcombine.low %v3742_v32, %v3752_v26 }
 0x1d0   : > { %v6934_v62 = vcombine.low %v3718_v46, %v3728_v39 }
 0x1d1   : > { %8054 = vmatmul.mubr.bf16.gmra.mrb[20].mxu0 %v7123_v23  ;;  %v6933_v23 = vcombine.low %v3694_v52, %v3704_v44 }
 0x1d2   : > { %8057 = vmatprep.mubr.bf16.mxu0 %v7124_v13 }
 0x1d3   : > { %7862 = vmatmul.mubr.bf16.gmra.mrb[20].mxu1 %v6931_v17 }
 0x1d4   : > { %7865 = vmatprep.mubr.bf16.mxu1 %v6932_v53 }
 0x1d9   : > { %8058 = vmatmul.mubr.bf16.gmra.mrb[24].mxu0 %v7125_v59 }
 0x1da   : > { %8061 = vmatprep.mubr.bf16.mxu0 %v7126_v4 }
 0x1db   : > { %7866 = vmatmul.mubr.bf16.gmra.mrb[24].mxu1 %v6933_v23 }
 0x1dc   : > { %7869 = vmatprep.mubr.bf16.mxu1 %v6934_v62 }
 0x1e1   : > { %8062 = vmatmul.mubr.bf16.gmra.mrb[28].mxu0 %v7127_v38 }
 0x1e3   : > { %7870 = vmatmul.mubr.bf16.gmra.mrb[28].mxu1 %v6935_v0 }
 0x25e   : > { %v7795_v13 = vpop.f32.mrb[0].mxu1 }
 0x25f   : > { %v3162_v41 = vpop.f32.mrb[1].mxu1 }
 0x260   : > { %v7796_v1 = vpop.f32.mrb[2].mxu1 }
 0x261   : > { %v3165_v27 = vpop.f32.mrb[3].mxu1 }
 0x266   : > { %v7799_v12 = vpop.f32.mrb[4].mxu1 }
 0x267   : > { %v3178_v2 = vpop.f32.mrb[5].mxu1 }
 0x268   : > { %v7800_v59 = vpop.f32.mrb[6].mxu1 }
 0x269   : > { %v3181_v35 = vpop.f32.mrb[7].mxu1 }
 0x26e   : > { %v7803_v36 = vpop.f32.mrb[8].mxu1 }
 0x26f   : > { %v3194_v22 = vpop.f32.mrb[9].mxu1 }
 0x270   : > { %v7804_v54 = vpop.f32.mrb[10].mxu1 }
 0x271   : > { %v3197_v20 = vpop.f32.mrb[11].mxu1 }
 0x276   : > { %v10518_v60 = vpop.f32.mrb[12].mxu1 }
 0x277   : > { %v10520_v9 = vpop.f32.mrb[13].mxu1 }
 0x278   : > { %v10522_v47 = vpop.f32.mrb[14].mxu1 }
 0x279   : > { %v10524_v30 = vpop.f32.mrb[15].mxu1 }
 0x27c   : > { %v8035_v31 = vpop.f32.mrb[0].mxu0 }
 0x27d   : > { %v8081_v38 = vadd.f32 %v8035_v31, %v7795_v13  ;;  %v6053_v42 = vpop.f32.mrb[1].mxu0 }
 0x27e   : > { %v8082_v45 = vadd.f32 %v6053_v42, %v3162_v41  ;;  %v8036_v21 = vpop.f32.mrb[2].mxu0 }
 0x27f   : > { %v8083_v14 = vadd.f32 %v8036_v21, %v7796_v1  ;;  %v6056_v58 = vpop.f32.mrb[3].mxu0 }
 0x280   : > { %v8084_v33 = vadd.f32 %v6056_v58, %v3165_v27 }
 0x281   : > { %v6213_v49 = vpack.c.bf16 %v8083_v14, %v8081_v38 }
 0x282   : > { %v6212_v11 = vpack.c.bf16 %v8084_v33, %v8082_v45 }
 0x283   : > { %7402 = vst [vmem:[%s10531_s9 + $0x8] sm:$0xff] %v6213_v49   ;;  %v6374_v34 = vunpack.c.l.bf16 %v6213_v49  ;;  %v6375_v53 = vunpack.c.h.bf16 %v6213_v49 }
 0x284   : > { %7311 = vst [vmem:[%s10531_s9] sm:$0xff] %v6212_v11   ;;  %v6372_v6 = vunpack.c.l.bf16 %v6212_v11  ;;  %v6373_v17 = vunpack.c.h.bf16 %v6212_v11  ;;  %v8039_v25 = vpop.f32.mrb[4].mxu0 }
 0x285   : > { %v8085_v57 = vadd.f32 %v8039_v25, %v7799_v12  ;;  %v6069_v37 = vpop.f32.mrb[5].mxu0  ;;  %v6443_v51 = vmul.f32 %v6374_v34, %v6374_v34  ;;  %v6444_v52 = vmul.f32 %v6375_v53, %v6375_v53 }
 0x286   : > { %v6404_v56 = vadd.f32 %v6373_v17, %v6372_v6  ;;  %v6441_v28 = vmul.f32 %v6372_v6, %v6372_v6  ;;  %v6442_v16 = vmul.f32 %v6373_v17, %v6373_v17  ;;  %v8086_v29 = vadd.f32 %v6069_v37, %v3178_v2  ;;  %v8040_v10 = vpop.f32.mrb[6].mxu0 }
 0x287   : > { %v8087_v18 = vadd.f32 %v8040_v10, %v7800_v59  ;;  %v6072_v48 = vpop.f32.mrb[7].mxu0 }
 0x288   : > { %v6405_v63 = vadd.f32 %v6404_v56, %v6374_v34  ;;  %v6473_v7 = vadd.f32 %v6442_v16, %v6441_v28  ;;  %v8088_v3 = vadd.f32 %v6072_v48, %v3181_v35 }
 0x289   : > { %v6215_v8 = vpack.c.bf16 %v8087_v18, %v8085_v57 }
 0x28a   : > { %v6474_v44 = vadd.f32 %v6473_v7, %v6443_v51  ;;  %v6214_v43 = vpack.c.bf16 %v8088_v3, %v8086_v29  ;;  %v6406_v61 = vadd.f32 %v6405_v63, %v6375_v53 }
 0x28b   : > { %7404 = vst [vmem:[%s10531_s9 + $0x18] sm:$0xff] %v6215_v8   ;;  %v6378_v23 = vunpack.c.l.bf16 %v6215_v8  ;;  %v6379_v4 = vunpack.c.h.bf16 %v6215_v8 }
 0x28c   : > { %7403 = vst [vmem:[%s10531_s9 + $0x10] sm:$0xff] %v6214_v43   ;;  %v6376_v55 = vunpack.c.l.bf16 %v6214_v43  ;;  %v6377_v40 = vunpack.c.h.bf16 %v6214_v43  ;;  %v6475_v46 = vadd.f32 %v6474_v44, %v6444_v52  ;;  %v8043_v39 = vpop.f32.mrb[8].mxu0 }
 0x28d   : > { %v8089_v15 = vadd.f32 %v8043_v39, %v7803_v36  ;;  %v6085_v19 = vpop.f32.mrb[9].mxu0  ;;  %v6447_v12 = vmul.f32 %v6378_v23, %v6378_v23  ;;  %v6448_v36 = vmul.f32 %v6379_v4, %v6379_v4 }
 0x28e   : > { %v6407_v62 = vadd.f32 %v6406_v61, %v6376_v55  ;;  %v6445_v50 = vmul.f32 %v6376_v55, %v6376_v55  ;;  %v8090_v24 = vadd.f32 %v6085_v19, %v3194_v22  ;;  %v8044_v5 = vpop.f32.mrb[10].mxu0  ;;  %v6446_v13 = vmul.f32 %v6377_v40, %v6377_v40 }
 0x28f   : > { %v8091_v32 = vadd.f32 %v8044_v5, %v7804_v54  ;;  %v6088_v26 = vpop.f32.mrb[11].mxu0 }
 0x290   : > { %v6408_v0 = vadd.f32 %v6407_v62, %v6377_v40  ;;  %v6476_v41 = vadd.f32 %v6475_v46, %v6445_v50  ;;  %v8092_v1 = vadd.f32 %v6088_v26, %v3197_v20 }
 0x291   : > { %v6217_v27 = vpack.c.bf16 %v8091_v32, %v8089_v15 }
 0x292   : > { %v6409_v2 = vadd.f32 %v6408_v0, %v6378_v23  ;;  %v6477_v59 = vadd.f32 %v6476_v41, %v6446_v13  ;;  %v6216_v35 = vpack.c.bf16 %v8092_v1, %v8090_v24 }
 0x293   : > { %7406 = vst [vmem:[%s10531_s9 + $0x28] sm:$0xff] %v6217_v27   ;;  %v6382_v14 = vunpack.c.l.bf16 %v6217_v27  ;;  %v6383_v11 = vunpack.c.h.bf16 %v6217_v27 }
 0x294   : > { %v6478_v31 = vadd.f32 %v6477_v59, %v6447_v12  ;;  %7405 = vst [vmem:[%s10531_s9 + $0x20] sm:$0xff] %v6216_v35   ;;  %v6380_v38 = vunpack.c.l.bf16 %v6216_v35  ;;  %v6381_v22 = vunpack.c.h.bf16 %v6216_v35  ;;  %v6410_v42 = vadd.f32 %v6409_v2, %v6379_v4  ;;  %v8047_v45 = vpop.f32.mrb[12].mxu0 }
 0x295   : > { %v8093_v54 = vadd.f32 %v8047_v45, %v10518_v60  ;;  %v6101_v21 = vpop.f32.mrb[13].mxu0  ;;  %v6451_v56 = vmul.f32 %v6382_v14, %v6382_v14  ;;  %v6452_v10 = vmul.f32 %v6383_v11, %v6383_v11 }
 0x296   : > { %v6411_v58 = vadd.f32 %v6410_v42, %v6380_v38  ;;  %v6449_v33 = vmul.f32 %v6380_v38, %v6380_v38  ;;  %v6479_v20 = vadd.f32 %v6478_v31, %v6448_v36  ;;  %v8048_v49 = vpop.f32.mrb[14].mxu0  ;;  %v8094_v34 = vadd.f32 %v6101_v21, %v10520_v9 }
 0x297   : > { %v8095_v6 = vadd.f32 %v8048_v49, %v10522_v47  ;;  %v6104_v17 = vpop.f32.mrb[15].mxu0  ;;  %v6450_v53 = vmul.f32 %v6381_v22, %v6381_v22 }
 0x298   : > { %v6412_v25 = vadd.f32 %v6411_v58, %v6381_v22  ;;  %v6480_v57 = vadd.f32 %v6479_v20, %v6449_v33  ;;  %v8096_v37 = vadd.f32 %v6104_v17, %v10524_v30 }
 0x299   : > { %v6219_v60 = vpack.c.bf16 %v8095_v6, %v8093_v54 }
 0x29a   : > { %v6413_v28 = vadd.f32 %v6412_v25, %v6382_v14  ;;  %v6481_v16 = vadd.f32 %v6480_v57, %v6450_v53  ;;  %v6218_v29 = vpack.c.bf16 %v8096_v37, %v8094_v34 }
 0x29b   : > { %7408 = vst [vmem:[%s10531_s9 + $0x38] sm:$0xff] %v6219_v60   ;;  %v6386_v44 = vunpack.c.l.bf16 %v6219_v60  ;;  %v6387_v46 = vunpack.c.h.bf16 %v6219_v60 }
 0x29c   : > { %v6482_v48 = vadd.f32 %v6481_v16, %v6451_v56  ;;  %7407 = vst [vmem:[%s10531_s9 + $0x30] sm:$0xff] %v6218_v29   ;;  %v6384_v9 = vunpack.c.l.bf16 %v6218_v29  ;;  %v6385_v51 = vunpack.c.h.bf16 %v6218_v29  ;;  %v6414_v63 = vadd.f32 %v6413_v28, %v6383_v11  ;;  %v8051_v7 = vpop.f32.mrb[16].mxu0 }
 0x29d   : > { %v6117_v52 = vpop.f32.mrb[17].mxu0  ;;  %v6455_v4 = vmul.f32 %v6386_v44, %v6386_v44  ;;  %v6456_v13 = vmul.f32 %v6387_v46, %v6387_v46 }
 0x29e   : > { %v7859_v18 = vpop.f32.mrb[16].mxu1  ;;  %v6415_v30 = vadd.f32 %v6414_v63, %v6384_v9  ;;  %v6453_v43 = vmul.f32 %v6384_v9, %v6384_v9  ;;  %v6483_v61 = vadd.f32 %v6482_v48, %v6452_v10  ;;  %v8052_v40 = vpop.f32.mrb[18].mxu0  ;;  %v6454_v62 = vmul.f32 %v6385_v51, %v6385_v51 }
 0x29f   : > { %v3980_v47 = vpop.f32.mrb[17].mxu1  ;;  %v8097_v3 = vadd.f32 %v8051_v7, %v7859_v18  ;;  %v6120_v19 = vpop.f32.mrb[19].mxu0 }
 0x2a0   : > { %v7860_v8 = vpop.f32.mrb[18].mxu1  ;;  %v8098_v39 = vadd.f32 %v6117_v52, %v3980_v47  ;;  %v6416_v23 = vadd.f32 %v6415_v30, %v6385_v51  ;;  %v6484_v50 = vadd.f32 %v6483_v61, %v6453_v43 }
 0x2a1   : > { %v3983_v55 = vpop.f32.mrb[19].mxu1  ;;  %v8099_v15 = vadd.f32 %v8052_v40, %v7860_v8 }
 0x2a2   : > { %v8100_v24 = vadd.f32 %v6120_v19, %v3983_v55  ;;  %v6417_v32 = vadd.f32 %v6416_v23, %v6386_v44  ;;  %v6485_v26 = vadd.f32 %v6484_v50, %v6454_v62 }
 0x2a3   : > { %v6221_v5 = vpack.c.bf16 %v8099_v15, %v8097_v3 }
 0x2a4   : > { %v6220_v0 = vpack.c.bf16 %v8100_v24, %v8098_v39  ;;  %v6486_v1 = vadd.f32 %v6485_v26, %v6455_v4  ;;  %v6418_v2 = vadd.f32 %v6417_v32, %v6387_v46  ;;  %v8055_v35 = vpop.f32.mrb[20].mxu0 }
 0x2a5   : > { %7410 = vst [vmem:[%s10531_s9 + $0x48] sm:$0xff] %v6221_v5   ;;  %v6133_v38 = vpop.f32.mrb[21].mxu0  ;;  %v6390_v22 = vunpack.c.l.bf16 %v6221_v5  ;;  %v6391_v58 = vunpack.c.h.bf16 %v6221_v5 }
 0x2a6   : > { %v7863_v41 = vpop.f32.mrb[20].mxu1  ;;  %7409 = vst [vmem:[%s10531_s9 + $0x40] sm:$0xff] %v6220_v0   ;;  %v6388_v27 = vunpack.c.l.bf16 %v6220_v0  ;;  %v6389_v12 = vunpack.c.h.bf16 %v6220_v0  ;;  %v6487_v54 = vadd.f32 %v6486_v1, %v6456_v13  ;;  %v8056_v14 = vpop.f32.mrb[22].mxu0 }
 0x2a7   : > { %v3996_v59 = vpop.f32.mrb[21].mxu1  ;;  %v8101_v36 = vadd.f32 %v8055_v35, %v7863_v41  ;;  %v6136_v49 = vpop.f32.mrb[23].mxu0  ;;  %v6459_v53 = vmul.f32 %v6390_v22, %v6390_v22  ;;  %v6460_v56 = vmul.f32 %v6391_v58, %v6391_v58 }
 0x2a8   : > { %v7864_v31 = vpop.f32.mrb[22].mxu1  ;;  %v6419_v42 = vadd.f32 %v6418_v2, %v6388_v27  ;;  %v6457_v45 = vmul.f32 %v6388_v27, %v6388_v27  ;;  %v8102_v33 = vadd.f32 %v6133_v38, %v3996_v59  ;;  %v6458_v34 = vmul.f32 %v6389_v12, %v6389_v12 }
 0x2a9   : > { %v3999_v21 = vpop.f32.mrb[23].mxu1  ;;  %v8103_v20 = vadd.f32 %v8056_v14, %v7864_v31 }
 0x2aa   : > { %v6420_v11 = vadd.f32 %v6419_v42, %v6389_v12  ;;  %v6488_v6 = vadd.f32 %v6487_v54, %v6457_v45  ;;  %v8104_v17 = vadd.f32 %v6136_v49, %v3999_v21 }
 0x2ab   : > { %v6223_v25 = vpack.c.bf16 %v8103_v20, %v8101_v36 }
 0x2ac   : > { %v6421_v57 = vadd.f32 %v6420_v11, %v6390_v22  ;;  %v6489_v37 = vadd.f32 %v6488_v6, %v6458_v34  ;;  %v6222_v60 = vpack.c.bf16 %v8104_v17, %v8102_v33  ;;  %v8059_v9 = vpop.f32.mrb[24].mxu0 }
 0x2ad   : > { %7412 = vst [vmem:[%s10531_s9 + $0x58] sm:$0xff] %v6223_v25   ;;  %v6149_v47 = vpop.f32.mrb[25].mxu0  ;;  %v6394_v7 = vunpack.c.l.bf16 %v6223_v25  ;;  %v6395_v43 = vunpack.c.h.bf16 %v6223_v25 }
 0x2ae   : > { %v7867_v28 = vpop.f32.mrb[24].mxu1  ;;  %v6490_v16 = vadd.f32 %v6489_v37, %v6459_v53  ;;  %7411 = vst [vmem:[%s10531_s9 + $0x50] sm:$0xff] %v6222_v60   ;;  %v6392_v29 = vunpack.c.l.bf16 %v6222_v60  ;;  %v6393_v10 = vunpack.c.h.bf16 %v6222_v60  ;;  %v6422_v18 = vadd.f32 %v6421_v57, %v6391_v58  ;;  %v8060_v30 = vpop.f32.mrb[26].mxu0 }
 0x2af   : > { %v4012_v48 = vpop.f32.mrb[25].mxu1  ;;  %v8105_v51 = vadd.f32 %v8059_v9, %v7867_v28  ;;  %v6152_v40 = vpop.f32.mrb[27].mxu0  ;;  %v6463_v62 = vmul.f32 %v6394_v7, %v6394_v7  ;;  %v6464_v4 = vmul.f32 %v6395_v43, %v6395_v43 }
 0x2b0   : > { %v7868_v63 = vpop.f32.mrb[26].mxu1  ;;  %v6423_v3 = vadd.f32 %v6422_v18, %v6392_v29  ;;  %v6461_v8 = vmul.f32 %v6392_v29, %v6392_v29  ;;  %v6491_v52 = vadd.f32 %v6490_v16, %v6460_v56  ;;  %v8106_v61 = vadd.f32 %v6149_v47, %v4012_v48 }
 0x2b1   : > { %v4015_v44 = vpop.f32.mrb[27].mxu1  ;;  %v8107_v55 = vadd.f32 %v8060_v30, %v7868_v63  ;;  %v6462_v39 = vmul.f32 %v6393_v10, %v6393_v10 }
 0x2b2   : > { %v6424_v46 = vadd.f32 %v6423_v3, %v6393_v10  ;;  %v6492_v15 = vadd.f32 %v6491_v52, %v6461_v8  ;;  %v8108_v19 = vadd.f32 %v6152_v40, %v4015_v44 }
 0x2b3   : > { %v6225_v23 = vpack.c.bf16 %v8107_v55, %v8105_v51 }
 0x2b4   : > { %v6425_v50 = vadd.f32 %v6424_v46, %v6394_v7  ;;  %v6493_v24 = vadd.f32 %v6492_v15, %v6462_v39  ;;  %v6224_v5 = vpack.c.bf16 %v8108_v19, %v8106_v61  ;;  %v8063_v27 = vpop.f32.mrb[28].mxu0 }
 0x2b5   : > { %7414 = vst [vmem:[%s10531_s9 + $0x68] sm:$0xff] %v6225_v23   ;;  %v6165_v59 = vpop.f32.mrb[29].mxu0  ;;  %v6398_v35 = vunpack.c.l.bf16 %v6225_v23  ;;  %v6399_v45 = vunpack.c.h.bf16 %v6225_v23 }
 0x2b6   : > { %v7871_v32 = vpop.f32.mrb[28].mxu1  ;;  %v6494_v26 = vadd.f32 %v6493_v24, %v6463_v62  ;;  %7413 = vst [vmem:[%s10531_s9 + $0x60] sm:$0xff] %v6224_v5   ;;  %v6396_v0 = vunpack.c.l.bf16 %v6224_v5  ;;  %v6397_v13 = vunpack.c.h.bf16 %v6224_v5  ;;  %v6426_v41 = vadd.f32 %v6425_v50, %v6395_v43  ;;  %v8064_v42 = vpop.f32.mrb[30].mxu0 }
 0x2b7   : > { %v4028_v1 = vpop.f32.mrb[29].mxu1  ;;  %v8109_v12 = vadd.f32 %v8063_v27, %v7871_v32  ;;  %v6168_v14 = vpop.f32.mrb[31].mxu0  ;;  %v6467_v34 = vmul.f32 %v6398_v35, %v6398_v35  ;;  %v6468_v53 = vmul.f32 %v6399_v45, %v6399_v45 }
 0x2b8   : > { %v7872_v2 = vpop.f32.mrb[30].mxu1  ;;  %v6427_v36 = vadd.f32 %v6426_v41, %v6396_v0  ;;  %v6465_v31 = vmul.f32 %v6396_v0, %v6396_v0  ;;  %v6495_v38 = vadd.f32 %v6494_v26, %v6464_v4  ;;  %v8110_v54 = vadd.f32 %v6165_v59, %v4028_v1 }
 0x2b9   : > { %v4031_v22 = vpop.f32.mrb[31].mxu1  ;;  %v8111_v21 = vadd.f32 %v8064_v42, %v7872_v2  ;;  %v6466_v33 = vmul.f32 %v6397_v13, %v6397_v13 }
 0x2ba   : > { %v6428_v58 = vadd.f32 %v6427_v36, %v6397_v13  ;;  %v6496_v20 = vadd.f32 %v6495_v38, %v6465_v31  ;;  %v8112_v49 = vadd.f32 %v6168_v14, %v4031_v22 }
 0x2bb   : > { %v6227_v11 = vpack.c.bf16 %v8111_v21, %v8109_v12 }
 0x2bc   : > { %v6429_v6 = vadd.f32 %v6428_v58, %v6398_v35  ;;  %v6497_v17 = vadd.f32 %v6496_v20, %v6466_v33  ;;  %v6226_v25 = vpack.c.bf16 %v8112_v49, %v8110_v54 }
 0x2bd   : > { %7416 = vst [vmem:[%s10531_s9 + $0x78] sm:$0xff] %v6227_v11   ;;  %v6402_v28 = vunpack.c.l.bf16 %v6227_v11  ;;  %v6403_v18 = vunpack.c.h.bf16 %v6227_v11 }
 0x2be   : > { %v6498_v57 = vadd.f32 %v6497_v17, %v6467_v34  ;;  %7415 = vst [vmem:[%s10531_s9 + $0x70] sm:$0xff] %v6226_v25   ;;  %v6400_v37 = vunpack.c.l.bf16 %v6226_v25  ;;  %v6401_v60 = vunpack.c.h.bf16 %v6226_v25  ;;  %v6430_v56 = vadd.f32 %v6429_v6, %v6399_v45 }
 0x2bf   : > { %v6471_v63 = vmul.f32 %v6402_v28, %v6402_v28  ;;  %v6472_v3 = vmul.f32 %v6403_v18, %v6403_v18 }
 0x2c0   : > { %v6431_v16 = vadd.f32 %v6430_v56, %v6400_v37  ;;  %v6469_v29 = vmul.f32 %v6400_v37, %v6400_v37  ;;  %v6499_v10 = vadd.f32 %v6498_v57, %v6468_v53  ;;  %v6470_v9 = vmul.f32 %v6401_v60, %v6401_v60 }
 0x2c2   : > { %v6432_v48 = vadd.f32 %v6431_v16, %v6401_v60  ;;  %v6500_v51 = vadd.f32 %v6499_v10, %v6469_v29 }
 0x2c4   : > { %v6433_v47 = vadd.f32 %v6432_v48, %v6402_v28  ;;  %v6501_v7 = vadd.f32 %v6500_v51, %v6470_v9 }
 0x2c6   : > { %v6434_v8 = vadd.f32 %v6433_v47, %v6403_v18  ;;  %v6502_v52 = vadd.f32 %v6501_v7, %v6471_v63 }
 0x2c8   : > { %v6435_v44 = vrot.slane %v6434_v8, 4  ;;  %v6503_v30 = vadd.f32 %v6502_v52, %v6472_v3 }
 0x2ca   : > { %v6436_v43 = vadd.f32 %v6435_v44, %v6434_v8  ;;  %v6504_v61 = vrot.slane %v6503_v30, 4 }
 0x2cc   : > { %v6437_v55 = vrot.slane %v6436_v43, 2  ;;  %v6505_v40 = vadd.f32 %v6504_v61, %v6503_v30 }
 0x2ce   : > { %v6438_v46 = vadd.f32 %v6437_v55, %v6436_v43  ;;  %v6506_v39 = vrot.slane %v6505_v40, 2 }
 0x2d0   : > { %v6439_v15 = vrot.slane %v6438_v46, 1  ;;  %v6507_v19 = vadd.f32 %v6506_v39, %v6505_v40 }
 0x2d2   : > { %v6508_v23 = vrot.slane %v6507_v19, 1  ;;  %v6440_v62 = vadd.f32 %v6439_v15, %v6438_v46 }
 0x2d4   : > { %v6509_v50 = vadd.f32 %v6508_v23, %v6507_v19 }
 0x2d6   : > { %v6511_v24 = vsel %vm679_vm0, %v6440_v62, %v6509_v50 }
 0x2d7   : > { %6512 = vst [vmem:[%s465_s30] sm:$0x3] %v6511_v24 }
 0x2d8 PF: > { %s18_s2 = sadd.s32 1, %s8590_s2   ;;  %s10667_s24 = smov %s8586_s1 }
 0x2d9   : > { %p15_p5 = scmp.ge.s32.totalorder %s18_s2, 4   ;;  %s10668_s1 = smov %s10670_s25 }
 0x2db   :  { %17 = sbr.rel (!%p15_p5) target bundleno = 2 (0x2), region = 120 }

</bundles_post_ra>
